<compile_context>
chip_gen: v5e
topology: v5e:2x2
jax: 0.10.0
libtpu: 0.0.40
codegen_flags: <defaults>
</compile_context>

<pallas_src>
import jax
import jax.numpy as jnp
from jax.experimental import pallas as pl
from jax.experimental.pallas import tpu as pltpu

K_IN = 784           # input features (28*28)
H0, H1, H2 = 1024, 512, 256


def _leaky_relu(x, slope=0.2):
    # max(x, slope*x) == LeakyReLU(slope) for 0 < slope < 1.
    return jnp.maximum(x, slope * x)


def discriminator_kernel(x_ref,
                         w0_ref, b0_ref,
                         w1_ref, b1_ref,
                         w2_ref, b2_ref,
                         w3_ref, b3_ref,
                         o_ref):
    # hidden0: Linear(784->1024) + LeakyReLU(0.2) [+ Dropout = identity, eval]
    x = x_ref[...].astype(jnp.bfloat16)                  # f32 -> bf16 in-kernel
    h = jnp.dot(x, w0_ref[...], preferred_element_type=jnp.float32)
    h = _leaky_relu(h + b0_ref[...])

    # hidden1: Linear(1024->512) + LeakyReLU(0.2)
    h = jnp.dot(h.astype(jnp.bfloat16), w1_ref[...],
                preferred_element_type=jnp.float32)
    h = _leaky_relu(h + b1_ref[...])

    # hidden2: Linear(512->256) + LeakyReLU(0.2)
    h = jnp.dot(h.astype(jnp.bfloat16), w2_ref[...],
                preferred_element_type=jnp.float32)
    h = _leaky_relu(h + b2_ref[...])

    # out: Linear(256->1) + Sigmoid. Computed as (1,256) x (TB,256)^T on the
    # MXU so the result is already a lane-dense (1, TB) row -> dense store.
    logits = jnp.einsum('ok,bk->ob', w3_ref[...], h.astype(jnp.bfloat16),
                        preferred_element_type=jnp.float32)
    logits = logits + b3_ref[...]                        # b3 is (1, 1)
    probs = 1.0 / (1.0 + jnp.exp(-logits))               # exact sigmoid
    o_ref[...] = probs.reshape(o_ref.shape)              # (1, 1, TB)


def _choose_batch_tile(B):
    TB_MAX = 512
    if B >= 2 * TB_MAX:
        return TB_MAX                                    # >= 2 full 512 tiles
    if B >= 256:
        # Mid-size batch: split into (at least) 2 tiles so both v7x TCs work.
        return max(128, ((B + 1) // 2 + 7) // 8 * 8)
    return max(8, (B + 7) // 8 * 8)                      # small batch: 1 tile


def discriminator_forward(x, params):
    """x: (B, 784) float32. params from init_params()."""
    B = x.shape[0]
    (w0, b0), (w1, b1), (w2, b2), (w3, b3) = params
    weights_and_biases = (w0, b0, w1, b1, w2, b2, w3, b3)

    TB = _choose_batch_tile(B)
    n_tiles = pl.cdiv(B, TB)
    B_pad = n_tiles * TB

    # Only a (tiny) batch pad when B is not a tile multiple; no dtype change,
    # no feature padding -> no extra full-HBM pass in the wrapper.
    x_in = x if B_pad == B else jnp.pad(x, ((0, B_pad - B), (0, 0)))

    flops = 2 * B_pad * (K_IN * H0 + H0 * H1 + H1 * H2 + H2 * 1)
    bytes_accessed = (B_pad * K_IN * 4
                      + sum(int(a.size) * a.dtype.itemsize
                            for a in weights_and_biases)
                      + B_pad * 4)

    def resident(a, single_buffer):
        # Full array as a single block with a constant index_map -> DMA'd once
        # and kept VMEM-resident across all grid steps.
        nd = a.ndim
        idx_map = lambda i: (0,) * nd
        if single_buffer:
            return pl.BlockSpec(a.shape, idx_map, pipeline_mode=pl.Buffered(1))
        return pl.BlockSpec(a.shape, idx_map)

    def run(single_buffer):
        in_specs = [pl.BlockSpec((TB, K_IN), lambda i: (i, 0))]
        in_specs += [resident(a, single_buffer) for a in weights_and_biases]
        return pl.pallas_call(
            discriminator_kernel,
            out_shape=jax.ShapeDtypeStruct((n_tiles, 1, TB), jnp.float32),
            grid=(n_tiles,),
            in_specs=in_specs,
            out_specs=pl.BlockSpec((1, 1, TB), lambda i: (i, 0, 0)),
            compiler_params=pltpu.CompilerParams(
                dimension_semantics=("parallel",),
                vmem_limit_bytes=24 << 20,
            ),
            cost_estimate=pl.CostEstimate(
                flops=flops,
                transcendentals=B_pad,
                bytes_accessed=bytes_accessed,
            ),
        )(x_in, *weights_and_biases)

    try:
        out = run(single_buffer=True)
    except Exception:
        # Fallback if this JAX build rejects single-buffered resident blocks.
        out = run(single_buffer=False)

    return out.reshape(B_pad, 1)[:B]


def init_params(key):
    """Deterministic init mimicking nn.Linear default U(-1/sqrt(fan_in), +).

    Weights stored pre-transposed as (in, out) in bf16 (W3 stored as a (1, 256)
    row vector for the lane-dense final layer); biases kept f32 as (1, out).
    """
    sizes = [(K_IN, H0), (H0, H1), (H1, H2), (H2, 1)]
    params = []
    for li, (fan_in, fan_out) in enumerate(sizes):
        key, kw, kb = jax.random.split(key, 3)
        bound = 1.0 / jnp.sqrt(fan_in)
        W = jax.random.uniform(kw, (fan_in, fan_out), jnp.float32, -bound, bound)
        b = jax.random.uniform(kb, (1, fan_out), jnp.float32, -bound, bound)
        if li == 3:
            W = W.T                                      # (1, 256) row vector
        params.append((W.astype(jnp.bfloat16), b))
    return params


def reference_forward(x, params):
    """Pure-JAX reference mirroring the kernel's bf16-input / f32-acc math."""
    (w0, b0), (w1, b1), (w2, b2), (w3, b3) = params
    h = jnp.dot(x.astype(jnp.bfloat16), w0,
                preferred_element_type=jnp.float32) + b0
    h = jnp.maximum(h, 0.2 * h)
    h = jnp.dot(h.astype(jnp.bfloat16), w1,
                preferred_element_type=jnp.float32) + b1
    h = jnp.maximum(h, 0.2 * h)
    h = jnp.dot(h.astype(jnp.bfloat16), w2,
                preferred_element_type=jnp.float32) + b2
    h = jnp.maximum(h, 0.2 * h)
    logits = jnp.dot(h.astype(jnp.bfloat16), w3.T,
                     preferred_element_type=jnp.float32) + b3
    return jax.nn.sigmoid(logits)


if __name__ == "__main__":
    key = jax.random.PRNGKey(0)
    key, kx = jax.random.split(key)

    B = 2
    x = jax.random.normal(kx, (B, K_IN), dtype=jnp.float32)
    params = init_params(key)

    out = discriminator_forward(x, params)
    out = jax.block_until_ready(out)

    ref = reference_forward(x, params)
    assert out.shape == (B, 1), out.shape
    # bf16 matmul inputs -> loosened tolerance vs f32 reference accumulation.
    assert jnp.allclose(out, ref, atol=1e-2, rtol=1e-2), (out, ref)

    print("KERNEL_OK")
</pallas_src>

<mosaic_0001>
module attributes {stable_mosaic.version = 11 : i64} {
  func.func @discriminator_kernel(%arg0: i32, %arg1: memref<8x784xf32, #tpu.memory_space<vmem>>, %arg2: memref<784x1024xbf16, #tpu.memory_space<vmem>>, %arg3: memref<1x1024xf32, #tpu.memory_space<vmem>>, %arg4: memref<1024x512xbf16, #tpu.memory_space<vmem>>, %arg5: memref<1x512xf32, #tpu.memory_space<vmem>>, %arg6: memref<512x256xbf16, #tpu.memory_space<vmem>>, %arg7: memref<1x256xf32, #tpu.memory_space<vmem>>, %arg8: memref<1x256xbf16, #tpu.memory_space<vmem>>, %arg9: memref<1x1xf32, #tpu.memory_space<vmem>>, %arg10: memref<1x1x8xf32, #tpu.memory_space<vmem>>) attributes {dimension_semantics = [#tpu.dimension_semantics<parallel>], iteration_bounds = array<i64: 1>, scalar_prefetch = 0 : i64, scratch_operands = 0 : i64, tpu.core_type = #tpu.core_type<tc>, window_params = [{transform_indices = @transform_0, window_bounds = array<i64: 8, 784>}, {pipeline_mode = #tpu.pipeline_mode<synchronous>, transform_indices = @transform_1, window_bounds = array<i64: 784, 1024>}, {pipeline_mode = #tpu.pipeline_mode<synchronous>, transform_indices = @transform_2, window_bounds = array<i64: 1, 1024>}, {pipeline_mode = #tpu.pipeline_mode<synchronous>, transform_indices = @transform_3, window_bounds = array<i64: 1024, 512>}, {pipeline_mode = #tpu.pipeline_mode<synchronous>, transform_indices = @transform_4, window_bounds = array<i64: 1, 512>}, {pipeline_mode = #tpu.pipeline_mode<synchronous>, transform_indices = @transform_5, window_bounds = array<i64: 512, 256>}, {pipeline_mode = #tpu.pipeline_mode<synchronous>, transform_indices = @transform_6, window_bounds = array<i64: 1, 256>}, {pipeline_mode = #tpu.pipeline_mode<synchronous>, transform_indices = @transform_7, window_bounds = array<i64: 1, 256>}, {pipeline_mode = #tpu.pipeline_mode<synchronous>, transform_indices = @transform_8, window_bounds = array<i64: 1, 1>}, {transform_indices = @transform_9, window_bounds = array<i64: 1, 1, 8>}]} {
    %c0 = arith.constant 0 : index
    %c0_0 = arith.constant 0 : index
    %0 = vector.load %arg1[%c0, %c0_0] : memref<8x784xf32, #tpu.memory_space<vmem>>, vector<8x784xf32>
    %1 = arith.truncf %0 : vector<8x784xf32> to vector<8x784xbf16>
    %c0_1 = arith.constant 0 : index
    %c0_2 = arith.constant 0 : index
    %2 = vector.load %arg2[%c0_1, %c0_2] : memref<784x1024xbf16, #tpu.memory_space<vmem>>, vector<784x1024xbf16>
    %cst = arith.constant dense<0.000000e+00> : vector<8x1024xf32>
    %3 = tpu.matmul %1, %2, %cst {dimension_numbers = #tpu.dot_dimension_numbers<[1], [0], [0], [1], [0, 0, 1, 1], [], []>} : vector<8x784xbf16>, vector<784x1024xbf16>, vector<8x1024xf32> -> vector<8x1024xf32>
    %c0_3 = arith.constant 0 : index
    %c0_4 = arith.constant 0 : index
    %4 = vector.load %arg3[%c0_3, %c0_4] : memref<1x1024xf32, #tpu.memory_space<vmem>>, vector<1x1024xf32>
    %5 = vector.broadcast %4 : vector<1x1024xf32> to vector<8x1024xf32>
    %6 = arith.addf %3, %5 : vector<8x1024xf32>
    %cst_5 = arith.constant 2.000000e-01 : f32
    %7 = vector.broadcast %cst_5 : f32 to vector<8x1024xf32>
    %8 = arith.mulf %7, %6 : vector<8x1024xf32>
    %9 = arith.maximumf %6, %8 : vector<8x1024xf32>
    %10 = arith.truncf %9 : vector<8x1024xf32> to vector<8x1024xbf16>
    %c0_6 = arith.constant 0 : index
    %c0_7 = arith.constant 0 : index
    %11 = vector.load %arg4[%c0_6, %c0_7] : memref<1024x512xbf16, #tpu.memory_space<vmem>>, vector<1024x512xbf16>
    %cst_8 = arith.constant dense<0.000000e+00> : vector<8x512xf32>
    %12 = tpu.matmul %10, %11, %cst_8 {dimension_numbers = #tpu.dot_dimension_numbers<[1], [0], [0], [1], [0, 0, 1, 1], [], []>} : vector<8x1024xbf16>, vector<1024x512xbf16>, vector<8x512xf32> -> vector<8x512xf32>
    %c0_9 = arith.constant 0 : index
    %c0_10 = arith.constant 0 : index
    %13 = vector.load %arg5[%c0_9, %c0_10] : memref<1x512xf32, #tpu.memory_space<vmem>>, vector<1x512xf32>
    %14 = vector.broadcast %13 : vector<1x512xf32> to vector<8x512xf32>
    %15 = arith.addf %12, %14 : vector<8x512xf32>
    %cst_11 = arith.constant 2.000000e-01 : f32
    %16 = vector.broadcast %cst_11 : f32 to vector<8x512xf32>
    %17 = arith.mulf %16, %15 : vector<8x512xf32>
    %18 = arith.maximumf %15, %17 : vector<8x512xf32>
    %19 = arith.truncf %18 : vector<8x512xf32> to vector<8x512xbf16>
    %c0_12 = arith.constant 0 : index
    %c0_13 = arith.constant 0 : index
    %20 = vector.load %arg6[%c0_12, %c0_13] : memref<512x256xbf16, #tpu.memory_space<vmem>>, vector<512x256xbf16>
    %cst_14 = arith.constant dense<0.000000e+00> : vector<8x256xf32>
    %21 = tpu.matmul %19, %20, %cst_14 {dimension_numbers = #tpu.dot_dimension_numbers<[1], [0], [0], [1], [0, 0, 1, 1], [], []>} : vector<8x512xbf16>, vector<512x256xbf16>, vector<8x256xf32> -> vector<8x256xf32>
    %c0_15 = arith.constant 0 : index
    %c0_16 = arith.constant 0 : index
    %22 = vector.load %arg7[%c0_15, %c0_16] : memref<1x256xf32, #tpu.memory_space<vmem>>, vector<1x256xf32>
    %23 = vector.broadcast %22 : vector<1x256xf32> to vector<8x256xf32>
    %24 = arith.addf %21, %23 : vector<8x256xf32>
    %cst_17 = arith.constant 2.000000e-01 : f32
    %25 = vector.broadcast %cst_17 : f32 to vector<8x256xf32>
    %26 = arith.mulf %25, %24 : vector<8x256xf32>
    %27 = arith.maximumf %24, %26 : vector<8x256xf32>
    %c0_18 = arith.constant 0 : index
    %c0_19 = arith.constant 0 : index
    %28 = vector.load %arg8[%c0_18, %c0_19] : memref<1x256xbf16, #tpu.memory_space<vmem>>, vector<1x256xbf16>
    %29 = arith.truncf %27 : vector<8x256xf32> to vector<8x256xbf16>
    "tpu.trace_start"() <{level = 10 : i32, message = "ok,bk->ob"}> : () -> ()
    %cst_20 = arith.constant dense<0.000000e+00> : vector<1x8xf32>
    %30 = tpu.matmul %28, %29, %cst_20 {dimension_numbers = #tpu.dot_dimension_numbers<[1], [1], [0], [0], [0, 0, 1, 0], [], []>} : vector<1x256xbf16>, vector<8x256xbf16>, vector<1x8xf32> -> vector<1x8xf32>
    "tpu.trace_stop"() : () -> ()
    %c0_21 = arith.constant 0 : index
    %c0_22 = arith.constant 0 : index
    %31 = vector.load %arg9[%c0_21, %c0_22] : memref<1x1xf32, #tpu.memory_space<vmem>>, vector<1x1xf32>
    %32 = vector.broadcast %31 : vector<1x1xf32> to vector<1x8xf32>
    %33 = arith.addf %30, %32 : vector<1x8xf32>
    %cst_23 = arith.constant 0.000000e+00 : f32
    %34 = vector.broadcast %cst_23 : f32 to vector<1x8xf32>
    %35 = arith.subf %34, %33 : vector<1x8xf32>
    %36 = math.exp %35 : vector<1x8xf32>
    %cst_24 = arith.constant 1.000000e+00 : f32
    %37 = vector.broadcast %cst_24 : f32 to vector<1x8xf32>
    %38 = arith.addf %37, %36 : vector<1x8xf32>
    %cst_25 = arith.constant 1.000000e+00 : f32
    %39 = vector.broadcast %cst_25 : f32 to vector<1x8xf32>
    %40 = arith.divf %39, %38 : vector<1x8xf32>
    %41 = vector.shape_cast %40 : vector<1x8xf32> to vector<1x1x8xf32>
    %c0_26 = arith.constant 0 : index
    %c0_27 = arith.constant 0 : index
    %c0_28 = arith.constant 0 : index
    %42 = vector.load %arg10[%c0_26, %c0_27, %c0_28] : memref<1x1x8xf32, #tpu.memory_space<vmem>>, vector<1x1x8xf32>
    tpu.vector_store %arg10[%c0_26, %c0_27, %c0_28], %41 {strides = array<i32>} : memref<1x1x8xf32, #tpu.memory_space<vmem>>, vector<1x1x8xf32>,
    return
  }
  func.func @transform_0(%arg0: i32) -> (i32, i32) {
    %c0_i32 = arith.constant 0 : i32
    %c0_i32_0 = arith.constant 0 : i32
    return %arg0, %c0_i32 : i32, i32
  }
  func.func @transform_1(%arg0: i32) -> (i32, i32) {
    %c0_i32 = arith.constant 0 : i32
    %c0_i32_0 = arith.constant 0 : i32
    %c0_i32_1 = arith.constant 0 : i32
    return %c0_i32, %c0_i32_0 : i32, i32
  }
  func.func @transform_2(%arg0: i32) -> (i32, i32) {
    %c0_i32 = arith.constant 0 : i32
    %c0_i32_0 = arith.constant 0 : i32
    %c0_i32_1 = arith.constant 0 : i32
    return %c0_i32, %c0_i32_0 : i32, i32
  }
  func.func @transform_3(%arg0: i32) -> (i32, i32) {
    %c0_i32 = arith.constant 0 : i32
    %c0_i32_0 = arith.constant 0 : i32
    %c0_i32_1 = arith.constant 0 : i32
    return %c0_i32, %c0_i32_0 : i32, i32
  }
  func.func @transform_4(%arg0: i32) -> (i32, i32) {
    %c0_i32 = arith.constant 0 : i32
    %c0_i32_0 = arith.constant 0 : i32
    %c0_i32_1 = arith.constant 0 : i32
    return %c0_i32, %c0_i32_0 : i32, i32
  }
  func.func @transform_5(%arg0: i32) -> (i32, i32) {
    %c0_i32 = arith.constant 0 : i32
    %c0_i32_0 = arith.constant 0 : i32
    %c0_i32_1 = arith.constant 0 : i32
    return %c0_i32, %c0_i32_0 : i32, i32
  }
  func.func @transform_6(%arg0: i32) -> (i32, i32) {
    %c0_i32 = arith.constant 0 : i32
    %c0_i32_0 = arith.constant 0 : i32
    %c0_i32_1 = arith.constant 0 : i32
    return %c0_i32, %c0_i32_0 : i32, i32
  }
  func.func @transform_7(%arg0: i32) -> (i32, i32) {
    %c0_i32 = arith.constant 0 : i32
    %c0_i32_0 = arith.constant 0 : i32
    %c0_i32_1 = arith.constant 0 : i32
    return %c0_i32, %c0_i32_0 : i32, i32
  }
  func.func @transform_8(%arg0: i32) -> (i32, i32) {
    %c0_i32 = arith.constant 0 : i32
    %c0_i32_0 = arith.constant 0 : i32
    %c0_i32_1 = arith.constant 0 : i32
    return %c0_i32, %c0_i32_0 : i32, i32
  }
  func.func @transform_9(%arg0: i32) -> (i32, i32, i32) {
    %c0_i32 = arith.constant 0 : i32
    %c0_i32_0 = arith.constant 0 : i32
    %c0_i32_1 = arith.constant 0 : i32
    return %arg0, %c0_i32, %c0_i32_0 : i32, i32, i32
  }
}

module attributes {stable_mosaic.version = 11 : i64} {
  func.func @discriminator_kernel(%arg0: i32, %arg1: memref<8x784xf32, #tpu.memory_space<vmem>>, %arg2: memref<784x1024xbf16, #tpu.memory_space<vmem>>, %arg3: memref<1x1024xf32, #tpu.memory_space<vmem>>, %arg4: memref<1024x512xbf16, #tpu.memory_space<vmem>>, %arg5: memref<1x512xf32, #tpu.memory_space<vmem>>, %arg6: memref<512x256xbf16, #tpu.memory_space<vmem>>, %arg7: memref<1x256xf32, #tpu.memory_space<vmem>>, %arg8: memref<1x256xbf16, #tpu.memory_space<vmem>>, %arg9: memref<1x1xf32, #tpu.memory_space<vmem>>, %arg10: memref<1x1x8xf32, #tpu.memory_space<vmem>>) attributes {dimension_semantics = [#tpu.dimension_semantics<parallel>], iteration_bounds = array<i64: 1>, scalar_prefetch = 0 : i64, scratch_operands = 0 : i64, tpu.core_type = #tpu.core_type<tc>, window_params = [{transform_indices = @transform_0, window_bounds = array<i64: 8, 784>}, {pipeline_mode = #tpu.pipeline_mode<synchronous>, transform_indices = @transform_1, window_bounds = array<i64: 784, 1024>}, {pipeline_mode = #tpu.pipeline_mode<synchronous>, transform_indices = @transform_2, window_bounds = array<i64: 1, 1024>}, {pipeline_mode = #tpu.pipeline_mode<synchronous>, transform_indices = @transform_3, window_bounds = array<i64: 1024, 512>}, {pipeline_mode = #tpu.pipeline_mode<synchronous>, transform_indices = @transform_4, window_bounds = array<i64: 1, 512>}, {pipeline_mode = #tpu.pipeline_mode<synchronous>, transform_indices = @transform_5, window_bounds = array<i64: 512, 256>}, {pipeline_mode = #tpu.pipeline_mode<synchronous>, transform_indices = @transform_6, window_bounds = array<i64: 1, 256>}, {pipeline_mode = #tpu.pipeline_mode<synchronous>, transform_indices = @transform_7, window_bounds = array<i64: 1, 256>}, {pipeline_mode = #tpu.pipeline_mode<synchronous>, transform_indices = @transform_8, window_bounds = array<i64: 1, 1>}, {transform_indices = @transform_9, window_bounds = array<i64: 1, 1, 8>}]} {
    %c0 = arith.constant 0 : index
    %c0_0 = arith.constant 0 : index
    %0 = vector.load %arg1[%c0, %c0_0] : memref<8x784xf32, #tpu.memory_space<vmem>>, vector<8x784xf32>
    %1 = arith.truncf %0 : vector<8x784xf32> to vector<8x784xbf16>
    %c0_1 = arith.constant 0 : index
    %c0_2 = arith.constant 0 : index
    %2 = vector.load %arg2[%c0_1, %c0_2] : memref<784x1024xbf16, #tpu.memory_space<vmem>>, vector<784x1024xbf16>
    %cst = arith.constant dense<0.000000e+00> : vector<8x1024xf32>
    %3 = tpu.matmul %1, %2, %cst {dimension_numbers = #tpu.dot_dimension_numbers<[1], [0], [0], [1], [0, 0, 1, 1], [], []>} : vector<8x784xbf16>, vector<784x1024xbf16>, vector<8x1024xf32> -> vector<8x1024xf32>
    %c0_3 = arith.constant 0 : index
    %c0_4 = arith.constant 0 : index
    %4 = vector.load %arg3[%c0_3, %c0_4] : memref<1x1024xf32, #tpu.memory_space<vmem>>, vector<1x1024xf32>
    %5 = vector.broadcast %4 : vector<1x1024xf32> to vector<8x1024xf32>
    %6 = arith.addf %3, %5 : vector<8x1024xf32>
    %cst_5 = arith.constant 2.000000e-01 : f32
    %7 = vector.broadcast %cst_5 : f32 to vector<8x1024xf32>
    %8 = arith.mulf %7, %6 : vector<8x1024xf32>
    %9 = arith.maximumf %6, %8 : vector<8x1024xf32>
    %10 = arith.truncf %9 : vector<8x1024xf32> to vector<8x1024xbf16>
    %c0_6 = arith.constant 0 : index
    %c0_7 = arith.constant 0 : index
    %11 = vector.load %arg4[%c0_6, %c0_7] : memref<1024x512xbf16, #tpu.memory_space<vmem>>, vector<1024x512xbf16>
    %cst_8 = arith.constant dense<0.000000e+00> : vector<8x512xf32>
    %12 = tpu.matmul %10, %11, %cst_8 {dimension_numbers = #tpu.dot_dimension_numbers<[1], [0], [0], [1], [0, 0, 1, 1], [], []>} : vector<8x1024xbf16>, vector<1024x512xbf16>, vector<8x512xf32> -> vector<8x512xf32>
    %c0_9 = arith.constant 0 : index
    %c0_10 = arith.constant 0 : index
    %13 = vector.load %arg5[%c0_9, %c0_10] : memref<1x512xf32, #tpu.memory_space<vmem>>, vector<1x512xf32>
    %14 = vector.broadcast %13 : vector<1x512xf32> to vector<8x512xf32>
    %15 = arith.addf %12, %14 : vector<8x512xf32>
    %cst_11 = arith.constant 2.000000e-01 : f32
    %16 = vector.broadcast %cst_11 : f32 to vector<8x512xf32>
    %17 = arith.mulf %16, %15 : vector<8x512xf32>
    %18 = arith.maximumf %15, %17 : vector<8x512xf32>
    %19 = arith.truncf %18 : vector<8x512xf32> to vector<8x512xbf16>
    %c0_12 = arith.constant 0 : index
    %c0_13 = arith.constant 0 : index
    %20 = vector.load %arg6[%c0_12, %c0_13] : memref<512x256xbf16, #tpu.memory_space<vmem>>, vector<512x256xbf16>
    %cst_14 = arith.constant dense<0.000000e+00> : vector<8x256xf32>
    %21 = tpu.matmul %19, %20, %cst_14 {dimension_numbers = #tpu.dot_dimension_numbers<[1], [0], [0], [1], [0, 0, 1, 1], [], []>} : vector<8x512xbf16>, vector<512x256xbf16>, vector<8x256xf32> -> vector<8x256xf32>
    %c0_15 = arith.constant 0 : index
    %c0_16 = arith.constant 0 : index
    %22 = vector.load %arg7[%c0_15, %c0_16] : memref<1x256xf32, #tpu.memory_space<vmem>>, vector<1x256xf32>
    %23 = vector.broadcast %22 : vector<1x256xf32> to vector<8x256xf32>
    %24 = arith.addf %21, %23 : vector<8x256xf32>
    %cst_17 = arith.constant 2.000000e-01 : f32
    %25 = vector.broadcast %cst_17 : f32 to vector<8x256xf32>
    %26 = arith.mulf %25, %24 : vector<8x256xf32>
    %27 = arith.maximumf %24, %26 : vector<8x256xf32>
    %c0_18 = arith.constant 0 : index
    %c0_19 = arith.constant 0 : index
    %28 = vector.load %arg8[%c0_18, %c0_19] : memref<1x256xbf16, #tpu.memory_space<vmem>>, vector<1x256xbf16>
    %29 = arith.truncf %27 : vector<8x256xf32> to vector<8x256xbf16>
    "tpu.trace_start"() <{level = 10 : i32, message = "ok,bk->ob"}> : () -> ()
    %cst_20 = arith.constant dense<0.000000e+00> : vector<1x8xf32>
    %30 = tpu.matmul %28, %29, %cst_20 {dimension_numbers = #tpu.dot_dimension_numbers<[1], [1], [0], [0], [0, 0, 1, 0], [], []>} : vector<1x256xbf16>, vector<8x256xbf16>, vector<1x8xf32> -> vector<1x8xf32>
    "tpu.trace_stop"() : () -> ()
    %c0_21 = arith.constant 0 : index
    %c0_22 = arith.constant 0 : index
    %31 = vector.load %arg9[%c0_21, %c0_22] : memref<1x1xf32, #tpu.memory_space<vmem>>, vector<1x1xf32>
    %32 = vector.broadcast %31 : vector<1x1xf32> to vector<1x8xf32>
    %33 = arith.addf %30, %32 : vector<1x8xf32>
    %cst_23 = arith.constant 0.000000e+00 : f32
    %34 = vector.broadcast %cst_23 : f32 to vector<1x8xf32>
    %35 = arith.subf %34, %33 : vector<1x8xf32>
    %36 = math.exp %35 : vector<1x8xf32>
    %cst_24 = arith.constant 1.000000e+00 : f32
    %37 = vector.broadcast %cst_24 : f32 to vector<1x8xf32>
    %38 = arith.addf %37, %36 : vector<1x8xf32>
    %cst_25 = arith.constant 1.000000e+00 : f32
    %39 = vector.broadcast %cst_25 : f32 to vector<1x8xf32>
    %40 = arith.divf %39, %38 : vector<1x8xf32>
    %41 = vector.shape_cast %40 : vector<1x8xf32> to vector<1x1x8xf32>
    %c0_26 = arith.constant 0 : index
    %c0_27 = arith.constant 0 : index
    %c0_28 = arith.constant 0 : index
    %42 = vector.load %arg10[%c0_26, %c0_27, %c0_28] : memref<1x1x8xf32, #tpu.memory_space<vmem>>, vector<1x1x8xf32>
    tpu.vector_store %arg10[%c0_26, %c0_27, %c0_28], %41 {strides = array<i32>} : memref<1x1x8xf32, #tpu.memory_space<vmem>>, vector<1x1x8xf32>,
    return
  }
  func.func @transform_0(%arg0: i32) -> (i32, i32) {
    %c0_i32 = arith.constant 0 : i32
    %c0_i32_0 = arith.constant 0 : i32
    return %arg0, %c0_i32 : i32, i32
  }
  func.func @transform_1(%arg0: i32) -> (i32, i32) {
    %c0_i32 = arith.constant 0 : i32
    %c0_i32_0 = arith.constant 0 : i32
    %c0_i32_1 = arith.constant 0 : i32
    return %c0_i32, %c0_i32_0 : i32, i32
  }
  func.func @transform_2(%arg0: i32) -> (i32, i32) {
    %c0_i32 = arith.constant 0 : i32
    %c0_i32_0 = arith.constant 0 : i32
    %c0_i32_1 = arith.constant 0 : i32
    return %c0_i32, %c0_i32_0 : i32, i32
  }
  func.func @transform_3(%arg0: i32) -> (i32, i32) {
    %c0_i32 = arith.constant 0 : i32
    %c0_i32_0 = arith.constant 0 : i32
    %c0_i32_1 = arith.constant 0 : i32
    return %c0_i32, %c0_i32_0 : i32, i32
  }
  func.func @transform_4(%arg0: i32) -> (i32, i32) {
    %c0_i32 = arith.constant 0 : i32
    %c0_i32_0 = arith.constant 0 : i32
    %c0_i32_1 = arith.constant 0 : i32
    return %c0_i32, %c0_i32_0 : i32, i32
  }
  func.func @transform_5(%arg0: i32) -> (i32, i32) {
    %c0_i32 = arith.constant 0 : i32
    %c0_i32_0 = arith.constant 0 : i32
    %c0_i32_1 = arith.constant 0 : i32
    return %c0_i32, %c0_i32_0 : i32, i32
  }
  func.func @transform_6(%arg0: i32) -> (i32, i32) {
    %c0_i32 = arith.constant 0 : i32
    %c0_i32_0 = arith.constant 0 : i32
    %c0_i32_1 = arith.constant 0 : i32
    return %c0_i32, %c0_i32_0 : i32, i32
  }
  func.func @transform_7(%arg0: i32) -> (i32, i32) {
    %c0_i32 = arith.constant 0 : i32
    %c0_i32_0 = arith.constant 0 : i32
    %c0_i32_1 = arith.constant 0 : i32
    return %c0_i32, %c0_i32_0 : i32, i32
  }
  func.func @transform_8(%arg0: i32) -> (i32, i32) {
    %c0_i32 = arith.constant 0 : i32
    %c0_i32_0 = arith.constant 0 : i32
    %c0_i32_1 = arith.constant 0 : i32
    return %c0_i32, %c0_i32_0 : i32, i32
  }
  func.func @transform_9(%arg0: i32) -> (i32, i32, i32) {
    %c0_i32 = arith.constant 0 : i32
    %c0_i32_0 = arith.constant 0 : i32
    %c0_i32_1 = arith.constant 0 : i32
    return %arg0, %c0_i32, %c0_i32_0 : i32, i32, i32
  }
}

</mosaic_0001>

<bundles_post_ra>
// kernel: tpu_custom_call.1
= control target key start
LH: loop header
LB: loop body
LE: loop exit
PB: predicated region body
PF: predicated region fallthrough
CT: control target
= control target key end

     0   :  { %s10044_s0 = inlined_call_operand.hbm [shape: f32[8,784], index: 0, kind: input, shape index: {}]   ;;  %s10045_s1 = inlined_call_operand.hbm [shape: bf16[784,1024], index: 1, kind: input, shape index: {}]   ;;  %s10046_s2 = inlined_call_operand.hbm [shape: f32[1,1024], index: 2, kind: input, shape index: {}]   ;;  %s10047_s3 = inlined_call_operand.hbm [shape: bf16[1024,512], index: 3, kind: input, shape index: {}]   ;;  %s10048_s4 = inlined_call_operand.hbm [shape: f32[1,512], index: 4, kind: input, shape index: {}]   ;;  %s10049_s5 = inlined_call_operand.hbm [shape: bf16[512,256], index: 5, kind: input, shape index: {}]   ;;  %s10050_s6 = inlined_call_operand.hbm [shape: f32[1,256], index: 6, kind: input, shape index: {}]   ;;  %s10051_s7 = inlined_call_operand.hbm [shape: bf16[1,256], index: 7, kind: input, shape index: {}]   ;;  %s10052_s8 = inlined_call_operand.<no memory space> [shape: f32[1,1], index: 8, kind: input, shape index: {}]   ;;  %s10053_s9 = inlined_call_operand.hbm [shape: f32[1,1,8], index: 9, kind: output, shape index: {}]  }
   0x1   :  { %v14_v0 = vstv %s10052_s8 }
   0x2   :  { %15 = vst [vmem:[#allocation2] sm:$0x1] %v14_v0 }
   0x3   :  { %16 = vsyncpa [#allocation4], 0 }
   0x4   :  { %17 = vsyncpa [#allocation7], 0 }
   0x5   :  { %18 = vsyncpa [#allocation10], 0 }
   0x6   :  { %19 = vsyncpa [#allocation13], 0 }
   0x7   :  { %20 = vsyncpa [#allocation16], 0  ;;  %s37_s13 = sshll.u32 %s10045_s1, 4  ;;  %s38_s13 = int_to_ptr.hbm [resolvable:$true] %s37_s13 }
   0x8   :  { %21 = vsyncpa [#allocation5], 0  ;;  %s9667_s14 = smov [#allocation6]   ;;  %s61_s18 = sshll.u32 %s10047_s3, 4  ;;  %s62_s18 = int_to_ptr.hbm [resolvable:$true] %s61_s18 }
   0x9   :  { %s39_s15 = sshll.u32 %s9667_s14, 4  ;;  %s9668_s8 = smov 512   ;;  %s40_s15 = int_to_ptr.vmem [resolvable:$true] %s39_s15 }
   0xa   :  { %s9669_s19 = smov 32   ;;  %s9670_s20 = smov [#allocation9]  }
   0xb   :  { %45 = dma.hbm_to_vmem [thread:$0]  %s38_s13, 50176, %s40_s15, [#allocation7], %s9668_s8, %s9668_s8, %s9669_s19  }
   0xc   :  { %s63_s21 = sshll.u32 %s9670_s20, 4  ;;  %s9671_s22 = smov 256   ;;  %s64_s21 = int_to_ptr.vmem [resolvable:$true] %s63_s21 }
   0xd   :  { %s9672_s23 = smov 16   ;;  %s85_s25 = sshll.u32 %s10049_s5, 4  ;;  %s86_s25 = int_to_ptr.hbm [resolvable:$true] %s85_s25 }
   0xe   :  { %69 = dma.hbm_to_vmem [thread:$0]  %s62_s18, 32768, %s64_s21, [#allocation10], %s9671_s22, %s9671_s22, %s9672_s23  }
   0xf   :  { %s9673_s26 = smov [#allocation12]   ;;  %s27_s29 = sshll.u32 %s10044_s0, 4  ;;  %s28_s29 = int_to_ptr.hbm [resolvable:$true] %s27_s29 }
  0x10   :  { %s87_s27 = sshll.u32 %s9673_s26, 4  ;;  %s9674_s30 = smov 128   ;;  %s88_s27 = int_to_ptr.vmem [resolvable:$true] %s87_s27 }
  0x11   :  { %s9675_s10 = smov 8   ;;  %s9676_s11 = smov [#allocation3]  }
  0x12   :  { %93 = dma.hbm_to_vmem [thread:$0]  %s86_s25, 8192, %s88_s27, [#allocation13], %s9674_s30, %s9674_s30, %s9675_s10  }
  0x13   :  { %s29_s12 = sshll.u32 %s9676_s11, 4  ;;  %s51_s15 = sshll.u32 %s10046_s2, 4  ;;  %s30_s12 = int_to_ptr.vmem [resolvable:$true] %s29_s12  ;;  %s52_s15 = int_to_ptr.hbm [resolvable:$true] %s51_s15 }
  0x14   :  { %32 = dma.hbm_to_vmem [thread:$0]  %s28_s29, 896, %s30_s12, [#allocation4]  }
  0x15   :  { %s75_s17 = sshll.u32 %s10048_s4, 4  ;;  %s9677_s18 = smov [#allocation8]   ;;  %s76_s17 = int_to_ptr.hbm [resolvable:$true] %s75_s17 }
  0x16   :  { %s53_s8 = sshll.u32 %s9677_s18, 4  ;;  %s9678_s0 = smov [#allocation11]   ;;  %s54_s8 = int_to_ptr.vmem [resolvable:$true] %s53_s8 }
  0x17   :  { %56 = dma.hbm_to_vmem [thread:$0]  %s52_s15, 128, %s54_s8, [#allocation7]  }
  0x18   :  { %s77_s19 = sshll.u32 %s9678_s0, 4  ;;  %s99_s22 = sshll.u32 %s10050_s6, 4  ;;  %s78_s19 = int_to_ptr.vmem [resolvable:$true] %s77_s19  ;;  %s100_s22 = int_to_ptr.hbm [resolvable:$true] %s99_s22 }
  0x19   :  { %80 = dma.hbm_to_vmem [thread:$0]  %s76_s17, 64, %s78_s19, [#allocation10]  }
  0x1a   :  { %s110_s1 = sshll.u32 %s10051_s7, 4  ;;  %s9679_s24 = smov [#allocation14]   ;;  %s111_s1 = int_to_ptr.hbm [resolvable:$true] %s110_s1 }
  0x1b   :  { %s101_s4 = sshll.u32 %s9679_s24, 4  ;;  %s9680_s25 = smov [#allocation15]   ;;  %s102_s4 = int_to_ptr.vmem [resolvable:$true] %s101_s4 }
  0x1c   :  { %104 = dma.hbm_to_vmem [thread:$0]  %s100_s22, 32, %s102_s4, [#allocation13]  }
  0x1d   :  { %s112_s26 = sshll.u32 %s9680_s25, 4  ;;  %s113_s26 = int_to_ptr.vmem [resolvable:$true] %s112_s26 }
  0x1e   :  { %115 = dma.hbm_to_vmem [thread:$0]  %s111_s1, 32, %s113_s26, [#allocation16]  }
  0x1f   :  { %9655 = dma.done.wait [#allocation4], 896  }
  0x20   :  { %9656 = vsyncadd [#allocation4], 4294966400 }
  0x21   :  { %9657 = dma.done.wait [#allocation7], 50304  }
  0x22   :  { %9658 = vsyncadd [#allocation7], 4294916992 }
  0x23   :  { %9659 = dma.done.wait [#allocation10], 32832  }
  0x24   :  { %9660 = vsyncadd [#allocation10], 4294934464 }
  0x25   :  { %9661 = dma.done.wait [#allocation13], 8224  }
  0x26   :  { %9662 = vsyncadd [#allocation13], 4294959072 }
  0x27   :  { %9663 = dma.done.wait [#allocation16], 32  }
  0x28   :  { %9664 = vsyncadd [#allocation16], 4294967264  ;;  %v6073_v1 = vld [vmem:[#allocation6 + $0x1c0] sm:$0xf]  ;;  %vm2535_vm0 = vcmask 130048   ;;  %s9682_s6 = smov [#allocation17]  }
  0x29   :  { %v8763_v2 = vld [vmem:[#allocation6 + $0x1dc] sm:$0xf0]  ;;  %s5831_s7 = sshll.u32 %s9682_s6, 4  ;;  %s5833_s3 = sshll.u32 %s10053_s9, 4  ;;  %vm5824_vm4 = vcmask 57344   ;;  %s5832_s7 = int_to_ptr.vmem [resolvable:$true] %s5831_s7  ;;  %s5834_s3 = int_to_ptr.hbm [resolvable:$true] %s5833_s3 }
  0x2a   :  { %v6329_v3 = vld [vmem:[#allocation6 + $0x3c0] sm:$0xf]  ;;  %v6074_v4 = vor.u32 %v8763_v2, %v6073_v1 }
  0x2b   :  { %v8827_v5 = vld [vmem:[#allocation6 + $0x3dc] sm:$0xf0] }
  0x2c   :  { %v6585_v6 = vld [vmem:[#allocation6 + $0x5c0] sm:$0xf]  ;;  %v6330_v8 = vor.u32 %v8827_v5, %v6329_v3  ;;  %2539 = vmatpush.bf16.msra.mxu0 %v6074_v4 }
  0x2d   :  { %v8891_v7 = vld [vmem:[#allocation6 + $0x5dc] sm:$0xf0] }
  0x2e   :  { %v6586_v9 = vor.u32 %v8891_v7, %v6585_v6  ;;  %v6841_v10 = vld [vmem:[#allocation6 + $0x7c0] sm:$0xf]  ;;  %2552 = vmatpush.bf16.msra.mxu1 %v6330_v8 }
  0x2f   :  { %v8955_v11 = vld [vmem:[#allocation6 + $0x7dc] sm:$0xf0] }
  0x30   :  { %v6041_v12 = vld [vmem:[#allocation6 + $0x180] sm:$0xf]  ;;  %v6842_v13 = vor.u32 %v8955_v11, %v6841_v10  ;;  %2565 = vmatpush.bf16.msra.mxu2 %v6586_v9 }
  0x31   :  { %v8755_v14 = vld [vmem:[#allocation6 + $0x19c] sm:$0xf0] }
  0x32   :  { %v6297_v15 = vld [vmem:[#allocation6 + $0x380] sm:$0xf]  ;;  %v6042_v17 = vor.u32 %v8755_v14, %v6041_v12  ;;  %2578 = vmatpush.bf16.msra.mxu3 %v6842_v13 }
  0x33   :  { %v8819_v16 = vld [vmem:[#allocation6 + $0x39c] sm:$0xf0] }
  0x34   :  { %v6298_v18 = vor.u32 %v8819_v16, %v6297_v15  ;;  %v6553_v19 = vld [vmem:[#allocation6 + $0x580] sm:$0xf]  ;;  %2540 = vmatpush.bf16.msra.mxu0 %v6042_v17 }
  0x35   :  { %v8883_v20 = vld [vmem:[#allocation6 + $0x59c] sm:$0xf0] }
  0x36   :  { %v6809_v21 = vld [vmem:[#allocation6 + $0x780] sm:$0xf]  ;;  %v6554_v22 = vor.u32 %v8883_v20, %v6553_v19  ;;  %2553 = vmatpush.bf16.msra.mxu1 %v6298_v18 }
  0x37   :  { %v8947_v23 = vld [vmem:[#allocation6 + $0x79c] sm:$0xf0] }
  0x38   :  { %v6009_v24 = vld [vmem:[#allocation6 + $0x140] sm:$0xf]  ;;  %v6810_v26 = vor.u32 %v8947_v23, %v6809_v21  ;;  %2566 = vmatpush.bf16.msra.mxu2 %v6554_v22 }
  0x39   :  { %v8747_v25 = vld [vmem:[#allocation6 + $0x15c] sm:$0xf0] }
  0x3a   :  { %v6265_v27 = vld [vmem:[#allocation6 + $0x340] sm:$0xf]  ;;  %v6010_v30 = vor.u32 %v8747_v25, %v6009_v24  ;;  %2579 = vmatpush.bf16.msra.mxu3 %v6810_v26 }
  0x3b   :  { %v8811_v28 = vld [vmem:[#allocation6 + $0x35c] sm:$0xf0] }
  0x3c   :  { %v6521_v29 = vld [vmem:[#allocation6 + $0x540] sm:$0xf]  ;;  %v6266_v34 = vor.u32 %v8811_v28, %v6265_v27  ;;  %2541 = vmatpush.bf16.msra.mxu0 %v6010_v30 }
  0x3d   :  { %v8875_v31 = vld [vmem:[#allocation6 + $0x55c] sm:$0xf0] }
  0x3e   :  { %v6777_v32 = vld [vmem:[#allocation6 + $0x740] sm:$0xf]  ;;  %v6522_v35 = vor.u32 %v8875_v31, %v6521_v29  ;;  %2554 = vmatpush.bf16.msra.mxu1 %v6266_v34  ;;  %v8759_v34 = vld [vmem:[#allocation6 + $0x1c4] sm:$0xf] }
  0x3f   :  { %v8939_v33 = vld [vmem:[#allocation6 + $0x75c] sm:$0xf0] }
  0x40   :  { %v5977_v36 = vld [vmem:[#allocation6 + $0x100] sm:$0xf]  ;;  %v6778_v39 = vor.u32 %v8939_v33, %v6777_v32  ;;  %2567 = vmatpush.bf16.msra.mxu2 %v6522_v35  ;;  %v6075_v35 = vld [vmem:[#allocation6 + $0x1e0] sm:$0xf0] }
  0x41   :  { %v8739_v37 = vld [vmem:[#allocation6 + $0x11c] sm:$0xf0] }
  0x42   :  { %v6233_v38 = vld [vmem:[#allocation6 + $0x300] sm:$0xf]  ;;  %v5978_v45 = vor.u32 %v8739_v37, %v5977_v36  ;;  %2580 = vmatpush.bf16.msra.mxu3 %v6778_v39  ;;  %v153_v36 = vld [vmem:[#allocation3 + $0x10] sm:$0xff] }
  0x43   :  { %v8803_v40 = vld [vmem:[#allocation6 + $0x31c] sm:$0xf0] }
  0x44   :  { %v6489_v41 = vld [vmem:[#allocation6 + $0x500] sm:$0xf]  ;;  %v6234_v46 = vor.u32 %v8803_v40, %v6233_v38  ;;  %2542 = vmatpush.bf16.msra.mxu0 %v5978_v45  ;;  %v6331_v45 = vld [vmem:[#allocation6 + $0x3e0] sm:$0xf0] }
  0x45   :  { %v8867_v42 = vld [vmem:[#allocation6 + $0x51c] sm:$0xf0] }
  0x46   :  { %v6745_v43 = vld [vmem:[#allocation6 + $0x700] sm:$0xf]  ;;  %v6490_v47 = vor.u32 %v8867_v42, %v6489_v41  ;;  %2555 = vmatpush.bf16.msra.mxu1 %v6234_v46  ;;  %v151_v41 = vld [vmem:[#allocation3] sm:$0xff] }
  0x47   :  { %v8931_v44 = vld [vmem:[#allocation6 + $0x71c] sm:$0xf0] }
  0x48   :  { %v5945_v48 = vld [vmem:[#allocation6 + $0xc0] sm:$0xf]  ;;  %v6746_v51 = vor.u32 %v8931_v44, %v6745_v43  ;;  %2568 = vmatpush.bf16.msra.mxu2 %v6490_v47  ;;  %v8823_v44 = vld [vmem:[#allocation6 + $0x3c4] sm:$0xf] }
  0x49   :  { %v8731_v49 = vld [vmem:[#allocation6 + $0xdc] sm:$0xf0] }
  0x4a   :  { %v6201_v50 = vld [vmem:[#allocation6 + $0x2c0] sm:$0xf]  ;;  %v5946_v57 = vor.u32 %v8731_v49, %v5945_v48  ;;  %2581 = vmatpush.bf16.msra.mxu3 %v6746_v51  ;;  %v6078_v48 = vor.u32 %v8759_v34, %v6075_v35 }
  0x4b   :  { %v8795_v52 = vld [vmem:[#allocation6 + $0x2dc] sm:$0xf0] }
  0x4c   :  { %v6457_v53 = vld [vmem:[#allocation6 + $0x4c0] sm:$0xf]  ;;  %v6202_v58 = vor.u32 %v8795_v52, %v6201_v50  ;;  %2543 = vmatpush.bf16.msra.mxu0 %v5946_v57  ;;  %v9760_v52 = vpack.c.bf16 %v153_v36, %v153_v36  ;;  %v8791_v36 = vld [vmem:[#allocation6 + $0x2c4] sm:$0xf] }
  0x4d   :  { %v8859_v54 = vld [vmem:[#allocation6 + $0x4dc] sm:$0xf0] }
  0x4e   :  { %v6713_v55 = vld [vmem:[#allocation6 + $0x6c0] sm:$0xf]  ;;  %v6458_v59 = vor.u32 %v8859_v54, %v6457_v53  ;;  %2556 = vmatpush.bf16.msra.mxu1 %v6202_v58  ;;  %v8751_v54 = vld [vmem:[#allocation6 + $0x184] sm:$0xf] }
  0x4f   :  { %v8923_v56 = vld [vmem:[#allocation6 + $0x6dc] sm:$0xf0] }
  0x50   :  { %v5913_v60 = vld [vmem:[#allocation6 + $0x80] sm:$0xf]  ;;  %v6714_v63 = vor.u32 %v8923_v56, %v6713_v55  ;;  %2569 = vmatpush.bf16.msra.mxu2 %v6458_v59  ;;  %v6043_v55 = vld [vmem:[#allocation6 + $0x1a0] sm:$0xf0]  ;;  %v9762_v56 = vpack.c.bf16 %v151_v41, %v151_v41  ;;  %v152_v59 = vld [vmem:[#allocation3 + $0x8] sm:$0xff] }
  0x51   :  { %v8723_v61 = vld [vmem:[#allocation6 + $0x9c] sm:$0xf0] }
  0x52   :  { %v6169_v62 = vld [vmem:[#allocation6 + $0x280] sm:$0xf]  ;;  %v5914_v5 = vor.u32 %v8723_v61, %v5913_v60  ;;  %2582 = vmatpush.bf16.msra.mxu3 %v6714_v63  ;;  %v6334_v60 = vor.u32 %v8823_v44, %v6331_v45  ;;  %v6299_v63 = vld [vmem:[#allocation6 + $0x3a0] sm:$0xf0] }
  0x53   :  { %v8787_v0 = vld [vmem:[#allocation6 + $0x29c] sm:$0xf0]  ;;  %v8719_v44 = vld [vmem:[#allocation6 + $0x84] sm:$0xf] }
  0x54   :  { %v6425_v1 = vld [vmem:[#allocation6 + $0x480] sm:$0xf]  ;;  %v6170_v6 = vor.u32 %v8787_v0, %v6169_v62  ;;  %2544 = vmatpush.bf16.msra.mxu0 %v5914_v5  ;;  %v8815_v62 = vld [vmem:[#allocation6 + $0x384] sm:$0xf] }
  0x55   :  { %v8851_v2 = vld [vmem:[#allocation6 + $0x49c] sm:$0xf0]  ;;  %v5915_v45 = vld [vmem:[#allocation6 + $0xa0] sm:$0xf0] }
  0x56   :  { %v6681_v3 = vld [vmem:[#allocation6 + $0x680] sm:$0xf]  ;;  %v6426_v7 = vor.u32 %v8851_v2, %v6425_v1  ;;  %2557 = vmatpush.bf16.msra.mxu1 %v6170_v6  ;;  %v6046_v1 = vor.u32 %v8751_v54, %v6043_v55  ;;  %v8743_v6 = vld [vmem:[#allocation6 + $0x144] sm:$0xf] }
  0x57   :  { %v8915_v4 = vld [vmem:[#allocation6 + $0x69c] sm:$0xf0] }
  0x58   :  { %v5881_v8 = vld [vmem:[#allocation6 + $0x40] sm:$0xf]  ;;  %v6682_v11 = vor.u32 %v8915_v4, %v6681_v3  ;;  %2570 = vmatpush.bf16.msra.mxu2 %v6426_v7  ;;  %v6011_v7 = vld [vmem:[#allocation6 + $0x160] sm:$0xf0] }
  0x59   :  { %v8715_v9 = vld [vmem:[#allocation6 + $0x5c] sm:$0xf0] }
  0x5a   :  { %v6137_v10 = vld [vmem:[#allocation6 + $0x240] sm:$0xf]  ;;  %v5882_v17 = vor.u32 %v8715_v9, %v5881_v8  ;;  %2583 = vmatpush.bf16.msra.mxu3 %v6682_v11  ;;  %v9768_v8 = vpack.c.bf16 %v152_v59, %v152_v59  ;;  %v6302_v9 = vor.u32 %v8815_v62, %v6299_v63  ;;  %v8807_v11 = vld [vmem:[#allocation6 + $0x344] sm:$0xf] }
  0x5b   :  { %v8779_v12 = vld [vmem:[#allocation6 + $0x25c] sm:$0xf0] }
  0x5c   :  { %v6393_v13 = vld [vmem:[#allocation6 + $0x440] sm:$0xf]  ;;  %v6138_v21 = vor.u32 %v8779_v12, %v6137_v10  ;;  %2545 = vmatpush.bf16.msra.mxu0 %v5882_v17  ;;  %v6267_v12 = vld [vmem:[#allocation6 + $0x360] sm:$0xf0] }
  0x5d   :  { %v8843_v14 = vld [vmem:[#allocation6 + $0x45c] sm:$0xf0] }
  0x5e   :  { %v6649_v15 = vld [vmem:[#allocation6 + $0x640] sm:$0xf]  ;;  %v6394_v22 = vor.u32 %v8843_v14, %v6393_v13  ;;  %2558 = vmatpush.bf16.msra.mxu1 %v6138_v21  ;;  %v6014_v14 = vor.u32 %v8743_v6, %v6011_v7  ;;  %v6270_v21 = vor.u32 %v8807_v11, %v6267_v12  ;;  %v8887_v11 = vld [vmem:[#allocation6 + $0x5c4] sm:$0xf] }
  0x5f   :  { %v8907_v16 = vld [vmem:[#allocation6 + $0x65c] sm:$0xf0]  ;;  %v6587_v12 = vld [vmem:[#allocation6 + $0x5e0] sm:$0xf0] }
  0x60   :  { %v5849_v18 = vld [vmem:[#allocation6] sm:$0xf]  ;;  %v6650_v26 = vor.u32 %v8907_v16, %v6649_v15  ;;  %2571 = vmatpush.bf16.msra.mxu2 %v6394_v22 }
  0x61   :  { %v8707_v19 = vld [vmem:[#allocation6 + $0x1c] sm:$0xf0] }
  0x62   :  { %v6105_v20 = vld [vmem:[#allocation6 + $0x200] sm:$0xf]  ;;  %v5850_v33 = vor.u32 %v8707_v19, %v5849_v18  ;;  %2584 = vmatpush.bf16.msra.mxu3 %v6650_v26  ;;  %v8735_v19 = vld [vmem:[#allocation6 + $0x104] sm:$0xf] }
  0x63   :  { %v8771_v23 = vld [vmem:[#allocation6 + $0x21c] sm:$0xf0] }
  0x64   :  { %v6361_v24 = vld [vmem:[#allocation6 + $0x400] sm:$0xf]  ;;  %v6106_v37 = vor.u32 %v8771_v23, %v6105_v20  ;;  %2546 = vmatpush.bf16.msra.mxu0 %v5850_v33  ;;  %v5979_v20 = vld [vmem:[#allocation6 + $0x120] sm:$0xf0]  ;;  %v157_v33 = vld [vmem:[#allocation3 + $0x30] sm:$0xff] }
  0x65   :  { %v8835_v25 = vld [vmem:[#allocation6 + $0x41c] sm:$0xf0]  ;;  %v8799_v23 = vld [vmem:[#allocation6 + $0x304] sm:$0xf]  ;;  %v5982_v26 = vor.u32 %v8735_v19, %v5979_v20  ;;  %v155_v19 = vld [vmem:[#allocation3 + $0x20] sm:$0xff] }
  0x66   :  { %v6617_v27 = vld [vmem:[#allocation6 + $0x600] sm:$0xf]  ;;  %v6362_v38 = vor.u32 %v8835_v25, %v6361_v24  ;;  %2559 = vmatpush.bf16.msra.mxu1 %v6106_v37  ;;  %v6235_v24 = vld [vmem:[#allocation6 + $0x320] sm:$0xf0] }
  0x67   :  { %v8899_v28 = vld [vmem:[#allocation6 + $0x61c] sm:$0xf0]  ;;  %2547 = vmatmul.bf16.vlgmr.msra.gmra.mxu0 %v9762_v56  ;;  %v6238_v34 = vor.u32 %v8799_v23, %v6235_v24  ;;  %v6203_v37 = vld [vmem:[#allocation6 + $0x2e0] sm:$0xf0]  ;;  %v156_v24 = vld [vmem:[#allocation3 + $0x28] sm:$0xff] }
  0x68   :  { %v7097_v29 = vld [vmem:[#allocation6 + $0x9c0] sm:$0xf]  ;;  %v6618_v42 = vor.u32 %v8899_v28, %v6617_v27  ;;  %2572 = vmatpush.bf16.msra.mxu2 %v6362_v38  ;;  %v6107_v23 = vld [vmem:[#allocation6 + $0x220] sm:$0xf0] }
  0x69   :  { %v9019_v30 = vld [vmem:[#allocation6 + $0x9dc] sm:$0xf0]  ;;  %2560 = vmatmul.bf16.vlgmr.msra.gmra.mxu1 %v9768_v8 }
  0x6a   :  { %v7353_v31 = vld [vmem:[#allocation6 + $0xbc0] sm:$0xf]  ;;  %v7098_v43 = vor.u32 %v9019_v30, %v7097_v29  ;;  %2585 = vmatpush.bf16.msra.mxu3 %v6618_v42 }
  0x6b   :  { %v9083_v32 = vld [vmem:[#allocation6 + $0xbdc] sm:$0xf0]  ;;  %2573 = vmatmul.bf16.vlgmr.msra.gmra.mxu2 %v9760_v52 }
  0x6c   :  { %v7385_v39 = vld [vmem:[#allocation6 + $0xc00] sm:$0xf]  ;;  %v7354_v47 = vor.u32 %v9083_v32, %v7353_v31  ;;  %2591 = vmatpush.bf16.msrb.mxu0 %v7098_v43  ;;  %v8727_v31 = vld [vmem:[#allocation6 + $0xc4] sm:$0xf] }
  0x6d   :  { %v9091_v40 = vld [vmem:[#allocation6 + $0xc1c] sm:$0xf0]  ;;  %v5947_v32 = vld [vmem:[#allocation6 + $0xe0] sm:$0xf0] }
  0x6e   :  { %v154_v46 = vld [vmem:[#allocation3 + $0x18] sm:$0xff]  ;;  %v7386_v57 = vor.u32 %v9091_v40, %v7385_v39  ;;  %2604 = vmatpush.bf16.msrb.mxu1 %v7354_v47  ;;  %2630 = vmatpush.bf16.msrb.mxu3 %v6078_v48  ;;  %v5950_v39 = vor.u32 %v8727_v31, %v5947_v32  ;;  %v6206_v47 = vor.u32 %v8791_v36, %v6203_v37 }
  0x6f   :  { %v7065_v49 = vld [vmem:[#allocation6 + $0x980] sm:$0xf]  ;;  %v9764_v58 = vpack.c.bf16 %v154_v46, %v154_v46  ;;  %v9772_v46 = vpack.c.bf16 %v157_v33, %v157_v33  ;;  %v9776_v31 = vpack.c.bf16 %v155_v19, %v155_v19  ;;  %v6555_v32 = vld [vmem:[#allocation6 + $0x5a0] sm:$0xf0]  ;;  %v9778_v36 = vpack.c.bf16 %v156_v24, %v156_v24 }
  0x70   :  { %v9011_v50 = vld [vmem:[#allocation6 + $0x99c] sm:$0xf0]  ;;  %2624 = vmatpush.bf16.msrb.mxu2 %v7386_v57  ;;  %v8943_v33 = vld [vmem:[#allocation6 + $0x784] sm:$0xf] }
  0x71   :  { %v7321_v51 = vld [vmem:[#allocation6 + $0xb80] sm:$0xf]  ;;  %v7066_v61 = vor.u32 %v9011_v50, %v7065_v49  ;;  %2586 = vmatmul.bf16.vlgmr.msra.gmra.mxu3 %v9764_v58  ;;  %v8783_v49 = vld [vmem:[#allocation6 + $0x284] sm:$0xf] }
  0x72   :  { %v9075_v53 = vld [vmem:[#allocation6 + $0xb9c] sm:$0xf0]  ;;  %2631 = vmatpush.bf16.msrb.mxu3 %v6046_v1  ;;  %v6171_v50 = vld [vmem:[#allocation6 + $0x2a0] sm:$0xf0] }
  0x73   :  { %v7322_v0 = vor.u32 %v9075_v53, %v7321_v51  ;;  %v7033_v2 = vld [vmem:[#allocation6 + $0x940] sm:$0xf]  ;;  %2592 = vmatpush.bf16.msrb.mxu0 %v7066_v61  ;;  %v5918_v53 = vor.u32 %v8719_v44, %v5915_v45  ;;  %v5883_v61 = vld [vmem:[#allocation6 + $0x60] sm:$0xf0]  ;;  %v6174_v62 = vor.u32 %v8783_v49, %v6171_v50 }
  0x74   :  { %v9003_v3 = vld [vmem:[#allocation6 + $0x95c] sm:$0xf0]  ;;  %2643 = vmatpush.bf16.msra.mxu2 %v6334_v60  ;;  %v8711_v60 = vld [vmem:[#allocation6 + $0x44] sm:$0xf] }
  0x75   :  { %v7289_v4 = vld [vmem:[#allocation6 + $0xb40] sm:$0xf]  ;;  %v7034_v10 = vor.u32 %v9003_v3, %v7033_v2  ;;  %2605 = vmatpush.bf16.msrb.mxu1 %v7322_v0  ;;  %v8775_v0 = vld [vmem:[#allocation6 + $0x244] sm:$0xf] }
  0x76   :  { %v9067_v5 = vld [vmem:[#allocation6 + $0xb5c] sm:$0xf0]  ;;  %2632 = vmatpush.bf16.msrb.mxu3 %v6014_v14  ;;  %v6139_v1 = vld [vmem:[#allocation6 + $0x260] sm:$0xf0] }
  0x77   :  { %v7290_v13 = vor.u32 %v9067_v5, %v7289_v4  ;;  %v7001_v15 = vld [vmem:[#allocation6 + $0x900] sm:$0xf]  ;;  %2593 = vmatpush.bf16.msrb.mxu0 %v7034_v10  ;;  %v5886_v4 = vor.u32 %v8711_v60, %v5883_v61  ;;  %v5851_v10 = vld [vmem:[#allocation6 + $0x20] sm:$0xf0] }
  0x78   :  { %v8995_v16 = vld [vmem:[#allocation6 + $0x91c] sm:$0xf0]  ;;  %2644 = vmatpush.bf16.msra.mxu2 %v6302_v9  ;;  %v8703_v9 = vld [vmem:[#allocation6 + $0x4] sm:$0xf] }
  0x79   :  { %v7257_v17 = vld [vmem:[#allocation6 + $0xb00] sm:$0xf]  ;;  %v7002_v22 = vor.u32 %v8995_v16, %v7001_v15  ;;  %2606 = vmatpush.bf16.msrb.mxu1 %v7290_v13  ;;  %v8951_v13 = vld [vmem:[#allocation6 + $0x7c4] sm:$0xf]  ;;  %v6142_v15 = vor.u32 %v8775_v0, %v6139_v1 }
  0x7a   :  { %v9059_v18 = vld [vmem:[#allocation6 + $0xb1c] sm:$0xf0]  ;;  %2633 = vmatpush.bf16.msrb.mxu3 %v5982_v26  ;;  %v6843_v14 = vld [vmem:[#allocation6 + $0x7e0] sm:$0xf0] }
  0x7b   :  { %v7258_v25 = vor.u32 %v9059_v18, %v7257_v17  ;;  %v6969_v27 = vld [vmem:[#allocation6 + $0x8c0] sm:$0xf]  ;;  %2594 = vmatpush.bf16.msrb.mxu0 %v7002_v22  ;;  %7415 = vmatmul.msk.bf16.vlgmr.msrb.gmra.mxu2 %vm2535_vm0, %v9772_v46  ;;  %v9015_v17 = vld [vmem:[#allocation6 + $0x9c4] sm:$0xf]  ;;  %v6846_v26 = vor.u32 %v8951_v13, %v6843_v14 }
  0x7c   :  { %v8987_v28 = vld [vmem:[#allocation6 + $0x8dc] sm:$0xf0]  ;;  %2645 = vmatpush.bf16.msra.mxu2 %v6270_v21  ;;  %v7099_v18 = vld [vmem:[#allocation6 + $0x9e0] sm:$0xf0]  ;;  %v5854_v21 = vor.u32 %v8703_v9, %v5851_v10 }
  0x7d   :  { %v7225_v29 = vld [vmem:[#allocation6 + $0xac0] sm:$0xf]  ;;  %v6970_v35 = vor.u32 %v8987_v28, %v6969_v27  ;;  %2607 = vmatpush.bf16.msrb.mxu1 %v7258_v25  ;;  %v8767_v22 = vld [vmem:[#allocation6 + $0x204] sm:$0xf]  ;;  %v6590_v25 = vor.u32 %v8887_v11, %v6587_v12 }
  0x7e   :  { %v9051_v30 = vld [vmem:[#allocation6 + $0xadc] sm:$0xf0]  ;;  %2634 = vmatpush.bf16.msrb.mxu3 %v5950_v39  ;;  %v9079_v27 = vld [vmem:[#allocation6 + $0xbc4] sm:$0xf] }
  0x7f   :  { %v7226_v38 = vor.u32 %v9051_v30, %v7225_v29  ;;  %v6937_v40 = vld [vmem:[#allocation6 + $0x880] sm:$0xf]  ;;  %2595 = vmatpush.bf16.msrb.mxu0 %v6970_v35  ;;  %v7355_v28 = vld [vmem:[#allocation6 + $0xbe0] sm:$0xf0]  ;;  %v7102_v30 = vor.u32 %v9015_v17, %v7099_v18  ;;  %v6110_v35 = vor.u32 %v8767_v22, %v6107_v23 }
  0x80   :  { %v8979_v41 = vld [vmem:[#allocation6 + $0x89c] sm:$0xf0]  ;;  %2646 = vmatpush.bf16.msra.mxu2 %v6238_v34  ;;  %v8879_v29 = vld [vmem:[#allocation6 + $0x584] sm:$0xf]  ;;  %v7358_v39 = vor.u32 %v9079_v27, %v7355_v28 }
  0x81   :  { %v7193_v42 = vld [vmem:[#allocation6 + $0xa80] sm:$0xf]  ;;  %v6938_v48 = vor.u32 %v8979_v41, %v6937_v40  ;;  %2608 = vmatpush.bf16.msrb.mxu1 %v7226_v38  ;;  %v6811_v34 = vld [vmem:[#allocation6 + $0x7a0] sm:$0xf0]  ;;  %v6558_v40 = vor.u32 %v8879_v29, %v6555_v32 }
  0x82   :  { %v9043_v43 = vld [vmem:[#allocation6 + $0xa9c] sm:$0xf0]  ;;  %2635 = vmatpush.bf16.msrb.mxu3 %v5918_v53  ;;  %v9007_v37 = vld [vmem:[#allocation6 + $0x984] sm:$0xf]  ;;  %v6814_v41 = vor.u32 %v8943_v33, %v6811_v34 }
  0x83   :  { %v7194_v51 = vor.u32 %v9043_v43, %v7193_v42  ;;  %v6905_v54 = vld [vmem:[#allocation6 + $0x840] sm:$0xf]  ;;  %2596 = vmatpush.bf16.msrb.mxu0 %v6938_v48  ;;  %v7067_v38 = vld [vmem:[#allocation6 + $0x9a0] sm:$0xf0] }
  0x84   :  { %v8971_v55 = vld [vmem:[#allocation6 + $0x85c] sm:$0xf0]  ;;  %2647 = vmatpush.bf16.msra.mxu2 %v6206_v47  ;;  %v9071_v42 = vld [vmem:[#allocation6 + $0xb84] sm:$0xf]  ;;  %v7070_v45 = vor.u32 %v9007_v37, %v7067_v38 }
  0x85   :  { %v7161_v57 = vld [vmem:[#allocation6 + $0xa40] sm:$0xf]  ;;  %v6906_v63 = vor.u32 %v8971_v55, %v6905_v54  ;;  %2609 = vmatpush.bf16.msrb.mxu1 %v7194_v51  ;;  %v7323_v43 = vld [vmem:[#allocation6 + $0xba0] sm:$0xf0] }
  0x86   :  { %v9035_v59 = vld [vmem:[#allocation6 + $0xa5c] sm:$0xf0]  ;;  %2636 = vmatpush.bf16.msrb.mxu3 %v5886_v4  ;;  %v8871_v44 = vld [vmem:[#allocation6 + $0x544] sm:$0xf]  ;;  %v7326_v53 = vor.u32 %v9071_v42, %v7323_v43 }
  0x87   :  { %v6873_v2 = vld [vmem:[#allocation6 + $0x800] sm:$0xf]  ;;  %v7162_v3 = vor.u32 %v9035_v59, %v7161_v57  ;;  %2597 = vmatpush.bf16.msrb.mxu0 %v6906_v63  ;;  %v6523_v47 = vld [vmem:[#allocation6 + $0x560] sm:$0xf0] }
  0x88   :  { %v8963_v5 = vld [vmem:[#allocation6 + $0x81c] sm:$0xf0]  ;;  %2648 = vmatpush.bf16.msra.mxu2 %v6174_v62  ;;  %v8935_v48 = vld [vmem:[#allocation6 + $0x744] sm:$0xf]  ;;  %v6526_v54 = vor.u32 %v8871_v44, %v6523_v47 }
  0x89   :  { %v7129_v6 = vld [vmem:[#allocation6 + $0xa00] sm:$0xf]  ;;  %v6874_v16 = vor.u32 %v8963_v5, %v6873_v2  ;;  %2610 = vmatpush.bf16.msrb.mxu1 %v7162_v3  ;;  %v6779_v49 = vld [vmem:[#allocation6 + $0x760] sm:$0xf0] }
  0x8a   :  { %v9027_v7 = vld [vmem:[#allocation6 + $0xa1c] sm:$0xf0]  ;;  %2637 = vmatpush.bf16.msrb.mxu3 %v5854_v21  ;;  %v8999_v50 = vld [vmem:[#allocation6 + $0x944] sm:$0xf]  ;;  %v6782_v55 = vor.u32 %v8935_v48, %v6779_v49 }
  0x8b   :  { %v7130_v20 = vor.u32 %v9027_v7, %v7129_v6  ;;  %2598 = vmatpush.bf16.msrb.mxu0 %v6874_v16  ;;  %v7035_v51 = vld [vmem:[#allocation6 + $0x960] sm:$0xf0] }
  0x8c   :  { %2649 = vmatpush.bf16.msra.mxu2 %v6142_v15  ;;  %v9063_v57 = vld [vmem:[#allocation6 + $0xb44] sm:$0xf]  ;;  %v7038_v61 = vor.u32 %v8999_v50, %v7035_v51 }
  0x8d   :  { %2611 = vmatpush.bf16.msrb.mxu1 %v7130_v20  ;;  %2638 = vmatmul.bf16.vlgmr.msrb.gmra.mxu3 %v9762_v56  ;;  %v7291_v59 = vld [vmem:[#allocation6 + $0xb60] sm:$0xf0] }
  0x8e   :  { %2682 = vmatpush.bf16.msra.mxu3 %v7102_v30  ;;  %2599 = vmatmul.bf16.vlgmr.msrb.gmra.mxu0 %v9776_v31  ;;  %v8863_v60 = vld [vmem:[#allocation6 + $0x504] sm:$0xf]  ;;  %v7294_v3 = vor.u32 %v9063_v57, %v7291_v59  ;;  %v6081_v57 = vld [vmem:[#allocation6 + $0x1c8] sm:$0xf] }
  0x8f   :  { %2656 = vmatpush.bf16.msra.mxu0 %v6590_v25  ;;  %v6491_v62 = vld [vmem:[#allocation6 + $0x520] sm:$0xf0]  ;;  %v8764_v59 = vld [vmem:[#allocation6 + $0x1e4] sm:$0xf0] }
  0x90   :  { %2650 = vmatpush.bf16.msra.mxu2 %v6110_v35  ;;  %2612 = vmatmul.bf16.vlgmr.msrb.gmra.mxu1 %v9778_v36  ;;  %v8927_v63 = vld [vmem:[#allocation6 + $0x704] sm:$0xf]  ;;  %v6494_v4 = vor.u32 %v8863_v60, %v6491_v62  ;;  %v6337_v60 = vld [vmem:[#allocation6 + $0x3c8] sm:$0xf] }
  0x91   :  { %2669 = vmatpush.bf16.msra.mxu1 %v6846_v26  ;;  %v6747_v0 = vld [vmem:[#allocation6 + $0x720] sm:$0xf0]  ;;  %v8828_v62 = vld [vmem:[#allocation6 + $0x3e4] sm:$0xf0] }
  0x92   :  { %2683 = vmatpush.bf16.msra.mxu3 %v7070_v45  ;;  %v8991_v1 = vld [vmem:[#allocation6 + $0x904] sm:$0xf]  ;;  %v6750_v5 = vor.u32 %v8927_v63, %v6747_v0 }
  0x93   :  { %2657 = vmatpush.bf16.msra.mxu0 %v6558_v40  ;;  %2651 = vmatmul.bf16.vlgmr.msra.gmra.mxu2 %v9768_v8  ;;  %v7003_v2 = vld [vmem:[#allocation6 + $0x920] sm:$0xf0] }
  0x94   :  { %2695 = vmatpush.bf16.msrb.mxu2 %v7358_v39  ;;  %v9055_v6 = vld [vmem:[#allocation6 + $0xb04] sm:$0xf]  ;;  %v7006_v10 = vor.u32 %v8991_v1, %v7003_v2 }
  0x95   :  { %2670 = vmatpush.bf16.msra.mxu1 %v6814_v41  ;;  %v7259_v7 = vld [vmem:[#allocation6 + $0xb20] sm:$0xf0] }
  0x96   :  { %v8855_v9 = vld [vmem:[#allocation6 + $0x4c4] sm:$0xf]  ;;  %2684 = vmatpush.bf16.msra.mxu3 %v7038_v61  ;;  %v7262_v16 = vor.u32 %v9055_v6, %v7259_v7  ;;  %v6082_v7 = vor.u32 %v8764_v59, %v6081_v57  ;;  %v8732_v57 = vld [vmem:[#allocation6 + $0xe4] sm:$0xf0] }
  0x97   :  { %2658 = vmatpush.bf16.msra.mxu0 %v6526_v54  ;;  %v6459_v11 = vld [vmem:[#allocation6 + $0x4e0] sm:$0xf0]  ;;  %v6209_v59 = vld [vmem:[#allocation6 + $0x2c8] sm:$0xf] }
  0x98   :  { %2696 = vmatpush.bf16.msrb.mxu2 %v7326_v53  ;;  %v8919_v12 = vld [vmem:[#allocation6 + $0x6c4] sm:$0xf]  ;;  %v6462_v17 = vor.u32 %v8855_v9, %v6459_v11  ;;  %v8892_v9 = vld [vmem:[#allocation6 + $0x5e4] sm:$0xf0] }
  0x99   :  { %2671 = vmatpush.bf16.msra.mxu1 %v6782_v55  ;;  %v6715_v13 = vld [vmem:[#allocation6 + $0x6e0] sm:$0xf0]  ;;  %v8956_v11 = vld [vmem:[#allocation6 + $0x7e4] sm:$0xf0] }
  0x9a   :  { %v8983_v14 = vld [vmem:[#allocation6 + $0x8c4] sm:$0xf]  ;;  %v6718_v18 = vor.u32 %v8919_v12, %v6715_v13  ;;  %2685 = vmatpush.bf16.msra.mxu3 %v7006_v10  ;;  %v6849_v10 = vld [vmem:[#allocation6 + $0x7c8] sm:$0xf]  ;;  %v6338_v12 = vor.u32 %v8828_v62, %v6337_v60 }
  0x9b   :  { %v6971_v15 = vld [vmem:[#allocation6 + $0x8e0] sm:$0xf0]  ;;  %2659 = vmatpush.bf16.msra.mxu0 %v6494_v4  ;;  %v8796_v60 = vld [vmem:[#allocation6 + $0x2e4] sm:$0xf0] }
  0x9c   :  { %2697 = vmatpush.bf16.msrb.mxu2 %v7294_v3  ;;  %v9047_v19 = vld [vmem:[#allocation6 + $0xac4] sm:$0xf]  ;;  %v6974_v22 = vor.u32 %v8983_v14, %v6971_v15  ;;  %v6049_v14 = vld [vmem:[#allocation6 + $0x188] sm:$0xf] }
  0x9d   :  { %2672 = vmatpush.bf16.msra.mxu1 %v6750_v5  ;;  %v7227_v20 = vld [vmem:[#allocation6 + $0xae0] sm:$0xf0]  ;;  %v6593_v5 = vld [vmem:[#allocation6 + $0x5c8] sm:$0xf] }
  0x9e   :  { %v8847_v21 = vld [vmem:[#allocation6 + $0x484] sm:$0xf]  ;;  %v7230_v28 = vor.u32 %v9047_v19, %v7227_v20  ;;  %2686 = vmatpush.bf16.msra.mxu3 %v6974_v22  ;;  %v8756_v15 = vld [vmem:[#allocation6 + $0x1a4] sm:$0xf0]  ;;  %v6594_v19 = vor.u32 %v8892_v9, %v6593_v5  ;;  %v6850_v20 = vor.u32 %v8956_v11, %v6849_v10 }
  0x9f   :  { %v6427_v23 = vld [vmem:[#allocation6 + $0x4a0] sm:$0xf0]  ;;  %2660 = vmatpush.bf16.msra.mxu0 %v6462_v17  ;;  %v6305_v17 = vld [vmem:[#allocation6 + $0x388] sm:$0xf]  ;;  %v6050_v22 = vor.u32 %v8756_v15, %v6049_v14 }
  0xa0   :  { %v8911_v24 = vld [vmem:[#allocation6 + $0x684] sm:$0xf]  ;;  %2698 = vmatpush.bf16.msrb.mxu2 %v7262_v16  ;;  %v6430_v29 = vor.u32 %v8847_v21, %v6427_v23  ;;  %v6561_v21 = vld [vmem:[#allocation6 + $0x588] sm:$0xf] }
  0xa1   :  { %v6683_v25 = vld [vmem:[#allocation6 + $0x6a0] sm:$0xf0]  ;;  %2673 = vmatpush.bf16.msra.mxu1 %v6718_v18  ;;  %v8820_v18 = vld [vmem:[#allocation6 + $0x3a4] sm:$0xf0] }
  0xa2   :  { %v8975_v26 = vld [vmem:[#allocation6 + $0x884] sm:$0xf]  ;;  %v6686_v30 = vor.u32 %v8911_v24, %v6683_v25  ;;  %v8884_v23 = vld [vmem:[#allocation6 + $0x5a4] sm:$0xf0] }
  0xa3   :  { %v6939_v27 = vld [vmem:[#allocation6 + $0x8a0] sm:$0xf0]  ;;  %2661 = vmatpush.bf16.msra.mxu0 %v6430_v29  ;;  %v6817_v24 = vld [vmem:[#allocation6 + $0x788] sm:$0xf] }
  0xa4   :  { %v9039_v32 = vld [vmem:[#allocation6 + $0xa84] sm:$0xf]  ;;  %v6942_v35 = vor.u32 %v8975_v26, %v6939_v27  ;;  %2699 = vmatpush.bf16.msrb.mxu2 %v7230_v28  ;;  %v8948_v25 = vld [vmem:[#allocation6 + $0x7a4] sm:$0xf0]  ;;  %v6306_v26 = vor.u32 %v8820_v18, %v6305_v17 }
  0xa5   :  { %v7195_v33 = vld [vmem:[#allocation6 + $0xaa0] sm:$0xf0]  ;;  %2674 = vmatpush.bf16.msra.mxu1 %v6686_v30  ;;  %v6017_v27 = vld [vmem:[#allocation6 + $0x148] sm:$0xf] }
  0xa6   :  { %v8839_v34 = vld [vmem:[#allocation6 + $0x444] sm:$0xf]  ;;  %v7198_v42 = vor.u32 %v9039_v32, %v7195_v33  ;;  %2687 = vmatpush.bf16.msra.mxu3 %v6942_v35  ;;  %v8748_v28 = vld [vmem:[#allocation6 + $0x164] sm:$0xf0]  ;;  %v6562_v32 = vor.u32 %v8884_v23, %v6561_v21  ;;  %v6818_v33 = vor.u32 %v8948_v25, %v6817_v24 }
  0xa7   :  { %v6395_v37 = vld [vmem:[#allocation6 + $0x460] sm:$0xf0]  ;;  %v6273_v29 = vld [vmem:[#allocation6 + $0x348] sm:$0xf]  ;;  %v6018_v35 = vor.u32 %v8748_v28, %v6017_v27 }
  0xa8   :  { %v8903_v38 = vld [vmem:[#allocation6 + $0x644] sm:$0xf]  ;;  %v6398_v45 = vor.u32 %v8839_v34, %v6395_v37  ;;  %2700 = vmatpush.bf16.msrb.mxu2 %v7198_v42  ;;  %v8812_v30 = vld [vmem:[#allocation6 + $0x364] sm:$0xf0] }
  0xa9   :  { %v6651_v39 = vld [vmem:[#allocation6 + $0x660] sm:$0xf0]  ;;  %v6529_v34 = vld [vmem:[#allocation6 + $0x548] sm:$0xf] }
  0xaa   :  { %v8967_v40 = vld [vmem:[#allocation6 + $0x844] sm:$0xf]  ;;  %v6654_v47 = vor.u32 %v8903_v38, %v6651_v39  ;;  %2662 = vmatpush.bf16.msra.mxu0 %v6398_v45  ;;  %v8876_v37 = vld [vmem:[#allocation6 + $0x564] sm:$0xf0] }
  0xab   :  { %v6907_v41 = vld [vmem:[#allocation6 + $0x860] sm:$0xf0]  ;;  %v6785_v38 = vld [vmem:[#allocation6 + $0x748] sm:$0xf]  ;;  %v6530_v45 = vor.u32 %v8876_v37, %v6529_v34 }
  0xac   :  { %v9031_v43 = vld [vmem:[#allocation6 + $0xa44] sm:$0xf]  ;;  %v6910_v51 = vor.u32 %v8967_v40, %v6907_v41  ;;  %2675 = vmatpush.bf16.msra.mxu1 %v6654_v47  ;;  %v8940_v39 = vld [vmem:[#allocation6 + $0x764] sm:$0xf0]  ;;  %v6274_v40 = vor.u32 %v8812_v30, %v6273_v29 }
  0xad   :  { %v7163_v44 = vld [vmem:[#allocation6 + $0xa60] sm:$0xf0]  ;;  %v5985_v41 = vld [vmem:[#allocation6 + $0x108] sm:$0xf]  ;;  %v6786_v47 = vor.u32 %v8940_v39, %v6785_v38 }
  0xae   :  { %v8831_v48 = vld [vmem:[#allocation6 + $0x404] sm:$0xf]  ;;  %v7166_v61 = vor.u32 %v9031_v43, %v7163_v44  ;;  %2688 = vmatpush.bf16.msra.mxu3 %v6910_v51  ;;  %v8740_v42 = vld [vmem:[#allocation6 + $0x124] sm:$0xf0] }
  0xaf   :  { %v6363_v49 = vld [vmem:[#allocation6 + $0x420] sm:$0xf0]  ;;  %v6241_v43 = vld [vmem:[#allocation6 + $0x308] sm:$0xf] }
  0xb0   :  { %v8895_v50 = vld [vmem:[#allocation6 + $0x604] sm:$0xf]  ;;  %v6366_v1 = vor.u32 %v8831_v48, %v6363_v49  ;;  %2701 = vmatpush.bf16.msrb.mxu2 %v7166_v61  ;;  %v8804_v44 = vld [vmem:[#allocation6 + $0x324] sm:$0xf0]  ;;  %v5986_v49 = vor.u32 %v8740_v42, %v5985_v41 }
  0xb1   :  { %v6619_v53 = vld [vmem:[#allocation6 + $0x620] sm:$0xf0]  ;;  %v6497_v48 = vld [vmem:[#allocation6 + $0x508] sm:$0xf] }
  0xb2   :  { %v8959_v54 = vld [vmem:[#allocation6 + $0x804] sm:$0xf]  ;;  %v6622_v2 = vor.u32 %v8895_v50, %v6619_v53  ;;  %2663 = vmatpush.bf16.msra.mxu0 %v6366_v1  ;;  %v8868_v50 = vld [vmem:[#allocation6 + $0x524] sm:$0xf0] }
  0xb3   :  { %v6875_v55 = vld [vmem:[#allocation6 + $0x820] sm:$0xf0]  ;;  %v6753_v51 = vld [vmem:[#allocation6 + $0x708] sm:$0xf]  ;;  %v6498_v61 = vor.u32 %v8868_v50, %v6497_v48  ;;  %v8760_v48 = vld [vmem:[#allocation6 + $0x1cc] sm:$0xf] }
  0xb4   :  { %v9087_v63 = vld [vmem:[#allocation6 + $0xc04] sm:$0xf]  ;;  %v6878_v6 = vor.u32 %v8959_v54, %v6875_v55  ;;  %2676 = vmatpush.bf16.msra.mxu1 %v6622_v2  ;;  %v8932_v53 = vld [vmem:[#allocation6 + $0x724] sm:$0xf0]  ;;  %v6242_v54 = vor.u32 %v8804_v44, %v6241_v43 }
  0xb5   :  { %v7387_v0 = vld [vmem:[#allocation6 + $0xc20] sm:$0xf0]  ;;  %2664 = vmatmul.bf16.vlgmr.msra.gmra.mxu0 %v9760_v52  ;;  %v5953_v55 = vld [vmem:[#allocation6 + $0xc8] sm:$0xf]  ;;  %v6754_v62 = vor.u32 %v8932_v53, %v6753_v51  ;;  %v6083_v51 = vld [vmem:[#allocation6 + $0x1e8] sm:$0xf0] }
  0xb6   :  { %v9023_v3 = vld [vmem:[#allocation6 + $0xa04] sm:$0xf]  ;;  %v7390_v13 = vor.u32 %v9087_v63, %v7387_v0  ;;  %2689 = vmatpush.bf16.msra.mxu3 %v6878_v6  ;;  %v6465_v63 = vld [vmem:[#allocation6 + $0x4c8] sm:$0xf]  ;;  %v5954_v0 = vor.u32 %v8732_v57, %v5953_v55 }
  0xb7   :  { %v7131_v4 = vld [vmem:[#allocation6 + $0xa20] sm:$0xf0]  ;;  %2677 = vmatmul.bf16.vlgmr.msra.gmra.mxu1 %v9764_v58  ;;  %v8860_v1 = vld [vmem:[#allocation6 + $0x4e4] sm:$0xf0] }
  0xb8   :  { %v7134_v16 = vor.u32 %v9023_v3, %v7131_v4  ;;  %2721 = vmatpush.bf16.msrb.mxu1 %v6082_v7  ;;  %2715 = vmatpush.bf16.msrb.mxu0 %v7390_v13  ;;  %v6721_v2 = vld [vmem:[#allocation6 + $0x6c8] sm:$0xf]  ;;  %v6210_v4 = vor.u32 %v8796_v60, %v6209_v59  ;;  %v6466_v10 = vor.u32 %v8860_v1, %v6465_v63 }
  0xb9   :  { %2690 = vmatmul.bf16.vlgmr.msra.gmra.mxu3 %v9776_v31  ;;  %v8924_v3 = vld [vmem:[#allocation6 + $0x6e4] sm:$0xf0] }
  0xba   :  { %2734 = vmatpush.bf16.msrb.mxu3 %v6338_v12  ;;  %2702 = vmatpush.bf16.msrb.mxu2 %v7134_v16  ;;  %v5921_v5 = vld [vmem:[#allocation6 + $0x88] sm:$0xf]  ;;  %v6722_v11 = vor.u32 %v8924_v3, %v6721_v2  ;;  %v8824_v2 = vld [vmem:[#allocation6 + $0x3cc] sm:$0xf] }
  0xbb   :  { %v8724_v6 = vld [vmem:[#allocation6 + $0xa4] sm:$0xf0]  ;;  %v6339_v3 = vld [vmem:[#allocation6 + $0x3e8] sm:$0xf0] }
  0xbc   :  { %2747 = vmatpush.bf16.msra.mxu0 %v6594_v19  ;;  %2722 = vmatpush.bf16.msrb.mxu1 %v6050_v22  ;;  %v6177_v7 = vld [vmem:[#allocation6 + $0x288] sm:$0xf]  ;;  %v5922_v13 = vor.u32 %v8724_v6, %v5921_v5  ;;  %v8752_v5 = vld [vmem:[#allocation6 + $0x18c] sm:$0xf] }
  0xbd   :  { %2703 = vmatmul.bf16.vlgmr.msrb.gmra.mxu2 %v9778_v36  ;;  %v8788_v9 = vld [vmem:[#allocation6 + $0x2a4] sm:$0xf0]  ;;  %v6051_v6 = vld [vmem:[#allocation6 + $0x1a8] sm:$0xf0] }
  0xbe   :  { %2760 = vmatpush.bf16.msra.mxu2 %v6850_v20  ;;  %2735 = vmatpush.bf16.msrb.mxu3 %v6306_v26  ;;  %v6433_v12 = vld [vmem:[#allocation6 + $0x488] sm:$0xf]  ;;  %v6178_v17 = vor.u32 %v8788_v9, %v6177_v7 }
  0xbf   :  { %v8852_v14 = vld [vmem:[#allocation6 + $0x4a4] sm:$0xf0] }
  0xc0   :  { %2748 = vmatpush.bf16.msra.mxu0 %v6562_v32  ;;  %2723 = vmatpush.bf16.msrb.mxu1 %v6018_v35  ;;  %v6689_v15 = vld [vmem:[#allocation6 + $0x688] sm:$0xf]  ;;  %v6434_v22 = vor.u32 %v8852_v14, %v6433_v12  ;;  %v6054_v14 = vor.u32 %v8752_v5, %v6051_v6  ;;  %v8784_v5 = vld [vmem:[#allocation6 + $0x28c] sm:$0xf] }
  0xc1   :  { %v8916_v16 = vld [vmem:[#allocation6 + $0x6a4] sm:$0xf0]  ;;  %v6179_v6 = vld [vmem:[#allocation6 + $0x2a8] sm:$0xf0] }
  0xc2   :  { %2761 = vmatpush.bf16.msra.mxu2 %v6818_v33  ;;  %2736 = vmatpush.bf16.msrb.mxu3 %v6274_v40  ;;  %v5889_v18 = vld [vmem:[#allocation6 + $0x48] sm:$0xf]  ;;  %v6690_v23 = vor.u32 %v8916_v16, %v6689_v15  ;;  %v8816_v15 = vld [vmem:[#allocation6 + $0x38c] sm:$0xf] }
  0xc3   :  { %v8716_v19 = vld [vmem:[#allocation6 + $0x64] sm:$0xf0]  ;;  %v6307_v16 = vld [vmem:[#allocation6 + $0x3a8] sm:$0xf0] }
  0xc4   :  { %2749 = vmatpush.bf16.msra.mxu0 %v6530_v45  ;;  %2724 = vmatpush.bf16.msrb.mxu1 %v5986_v49  ;;  %v6145_v20 = vld [vmem:[#allocation6 + $0x248] sm:$0xf]  ;;  %v5890_v26 = vor.u32 %v8716_v19, %v5889_v18  ;;  %v8744_v18 = vld [vmem:[#allocation6 + $0x14c] sm:$0xf] }
  0xc5   :  { %7416 = vmatmul.msk.bf16.vlgmr.msrb.gmra.mxu0 %vm2535_vm0, %v9772_v46  ;;  %v8780_v21 = vld [vmem:[#allocation6 + $0x264] sm:$0xf0]  ;;  %v6019_v19 = vld [vmem:[#allocation6 + $0x168] sm:$0xf0] }
  0xc6   :  { %2762 = vmatpush.bf16.msra.mxu2 %v6786_v47  ;;  %2737 = vmatpush.bf16.msrb.mxu3 %v6242_v54  ;;  %v6401_v24 = vld [vmem:[#allocation6 + $0x448] sm:$0xf]  ;;  %v6146_v30 = vor.u32 %v8780_v21, %v6145_v20 }
  0xc7   :  { %v8844_v25 = vld [vmem:[#allocation6 + $0x464] sm:$0xf0] }
  0xc8   :  { %2750 = vmatpush.bf16.msra.mxu0 %v6498_v61  ;;  %2725 = vmatpush.bf16.msrb.mxu1 %v5954_v0  ;;  %v6657_v27 = vld [vmem:[#allocation6 + $0x648] sm:$0xf]  ;;  %v6402_v39 = vor.u32 %v8844_v25, %v6401_v24  ;;  %v6086_v0 = vor.u32 %v8760_v48, %v6083_v51 }
  0xc9   :  { %v8908_v28 = vld [vmem:[#allocation6 + $0x664] sm:$0xf0] }
  0xca   :  { %2763 = vmatpush.bf16.msra.mxu2 %v6754_v62  ;;  %2738 = vmatpush.bf16.msrb.mxu3 %v6210_v4  ;;  %v5857_v29 = vld [vmem:[#allocation6 + $0x8] sm:$0xf]  ;;  %v6658_v40 = vor.u32 %v8908_v28, %v6657_v27  ;;  %v8808_v27 = vld [vmem:[#allocation6 + $0x34c] sm:$0xf] }
  0xcb   :  { %v8708_v32 = vld [vmem:[#allocation6 + $0x24] sm:$0xf0]  ;;  %v6275_v28 = vld [vmem:[#allocation6 + $0x368] sm:$0xf0] }
  0xcc   :  { %2751 = vmatpush.bf16.msra.mxu0 %v6466_v10  ;;  %2726 = vmatpush.bf16.msrb.mxu1 %v5922_v13  ;;  %v6113_v33 = vld [vmem:[#allocation6 + $0x208] sm:$0xf]  ;;  %v5858_v44 = vor.u32 %v8708_v32, %v5857_v29  ;;  %v5987_v32 = vld [vmem:[#allocation6 + $0x128] sm:$0xf0] }
  0xcd   :  { %v8772_v34 = vld [vmem:[#allocation6 + $0x224] sm:$0xf0] }
  0xce   :  { %2764 = vmatpush.bf16.msra.mxu2 %v6722_v11  ;;  %2739 = vmatpush.bf16.msrb.mxu3 %v6178_v17  ;;  %v7105_v35 = vld [vmem:[#allocation6 + $0x9c8] sm:$0xf]  ;;  %v6114_v49 = vor.u32 %v8772_v34, %v6113_v33  ;;  %v6342_v11 = vor.u32 %v8824_v2, %v6339_v3 }
  0xcf   :  { %v9020_v37 = vld [vmem:[#allocation6 + $0x9e4] sm:$0xf0] }
  0xd0   :  { %v7361_v38 = vld [vmem:[#allocation6 + $0xbc8] sm:$0xf]  ;;  %2752 = vmatpush.bf16.msra.mxu0 %v6434_v22  ;;  %2727 = vmatpush.bf16.msrb.mxu1 %v5890_v26  ;;  %v7106_v50 = vor.u32 %v9020_v37, %v7105_v35  ;;  %v6022_v26 = vor.u32 %v8744_v18, %v6019_v19  ;;  %v6278_v37 = vor.u32 %v8808_v27, %v6275_v28  ;;  %v6595_v18 = vld [vmem:[#allocation6 + $0x5e8] sm:$0xf0] }
  0xd1   :  { %v9084_v41 = vld [vmem:[#allocation6 + $0xbe4] sm:$0xf0]  ;;  %v8952_v19 = vld [vmem:[#allocation6 + $0x7cc] sm:$0xf] }
  0xd2   :  { %2765 = vmatpush.bf16.msra.mxu2 %v6690_v23  ;;  %v6369_v42 = vld [vmem:[#allocation6 + $0x408] sm:$0xf]  ;;  %2740 = vmatpush.bf16.msrb.mxu3 %v6146_v30  ;;  %v7362_v55 = vor.u32 %v9084_v41, %v7361_v38  ;;  %v6310_v23 = vor.u32 %v8816_v15, %v6307_v16  ;;  %v8736_v30 = vld [vmem:[#allocation6 + $0x10c] sm:$0xf]  ;;  %v6182_v16 = vor.u32 %v8784_v5, %v6179_v6 }
  0xd3   :  { %v8836_v43 = vld [vmem:[#allocation6 + $0x424] sm:$0xf0]  ;;  %v8800_v41 = vld [vmem:[#allocation6 + $0x30c] sm:$0xf] }
  0xd4   :  { %v6625_v45 = vld [vmem:[#allocation6 + $0x608] sm:$0xf]  ;;  %2753 = vmatpush.bf16.msra.mxu0 %v6402_v39  ;;  %v6370_v60 = vor.u32 %v8836_v43, %v6369_v42  ;;  %2728 = vmatpush.bf16.msrb.mxu1 %v5858_v44  ;;  %v6243_v42 = vld [vmem:[#allocation6 + $0x328] sm:$0xf0] }
  0xd5   :  { %v8900_v47 = vld [vmem:[#allocation6 + $0x624] sm:$0xf0]  ;;  %v8728_v44 = vld [vmem:[#allocation6 + $0xcc] sm:$0xf] }
  0xd6   :  { %v7393_v53 = vld [vmem:[#allocation6 + $0xc08] sm:$0xf]  ;;  %2766 = vmatpush.bf16.msra.mxu2 %v6658_v40  ;;  %v6626_v61 = vor.u32 %v8900_v47, %v6625_v45  ;;  %2741 = vmatpush.bf16.msrb.mxu3 %v6114_v49  ;;  %v5990_v40 = vor.u32 %v8736_v30, %v5987_v32  ;;  %v5955_v45 = vld [vmem:[#allocation6 + $0xe8] sm:$0xf0] }
  0xd7   :  { %v9092_v54 = vld [vmem:[#allocation6 + $0xc24] sm:$0xf0]  ;;  %2729 = vmatmul.bf16.vlgmr.msrb.gmra.mxu1 %v9762_v56  ;;  %v7107_v30 = vld [vmem:[#allocation6 + $0x9e8] sm:$0xf0] }
  0xd8   :  { %v7073_v57 = vld [vmem:[#allocation6 + $0x988] sm:$0xf]  ;;  %v7394_v1 = vor.u32 %v9092_v54, %v7393_v53  ;;  %2773 = vmatpush.bf16.msra.mxu1 %v7106_v50  ;;  %2754 = vmatpush.bf16.msra.mxu0 %v6370_v60  ;;  %v6246_v50 = vor.u32 %v8800_v41, %v6243_v42  ;;  %v5958_v54 = vor.u32 %v8728_v44, %v5955_v45  ;;  %v8720_v60 = vld [vmem:[#allocation6 + $0x8c] sm:$0xf] }
  0xd9   :  { %v9012_v59 = vld [vmem:[#allocation6 + $0x9a4] sm:$0xf0]  ;;  %2742 = vmatmul.bf16.vlgmr.msrb.gmra.mxu3 %v9768_v8  ;;  %v6115_v41 = vld [vmem:[#allocation6 + $0x228] sm:$0xf0] }
  0xda   :  { %v7329_v62 = vld [vmem:[#allocation6 + $0xb88] sm:$0xf]  ;;  %v7074_v4 = vor.u32 %v9012_v59, %v7073_v57  ;;  %2786 = vmatpush.bf16.msra.mxu3 %v7362_v55  ;;  %2767 = vmatpush.bf16.msra.mxu2 %v6626_v61  ;;  %v8792_v55 = vld [vmem:[#allocation6 + $0x2cc] sm:$0xf] }
  0xdb   :  { %v9076_v63 = vld [vmem:[#allocation6 + $0xba4] sm:$0xf0]  ;;  %2755 = vmatmul.bf16.vlgmr.msra.gmra.mxu0 %v9760_v52  ;;  %v6211_v57 = vld [vmem:[#allocation6 + $0x2e8] sm:$0xf0] }
  0xdc   :  { %v7330_v7 = vor.u32 %v9076_v63, %v7329_v62  ;;  %v7041_v9 = vld [vmem:[#allocation6 + $0x948] sm:$0xf]  ;;  %2806 = vmatpush.bf16.msrb.mxu0 %v7394_v1  ;;  %2774 = vmatpush.bf16.msra.mxu1 %v7074_v4  ;;  %v5923_v61 = vld [vmem:[#allocation6 + $0xa8] sm:$0xf0]  ;;  %v6214_v1 = vor.u32 %v8792_v55, %v6211_v57 }
  0xdd   :  { %v9004_v10 = vld [vmem:[#allocation6 + $0x964] sm:$0xf0]  ;;  %2768 = vmatmul.bf16.vlgmr.msra.gmra.mxu2 %v9764_v58  ;;  %v5926_v4 = vor.u32 %v8720_v60, %v5923_v61  ;;  %v7363_v44 = vld [vmem:[#allocation6 + $0xbe8] sm:$0xf0] }
  0xde   :  { %v7297_v12 = vld [vmem:[#allocation6 + $0xb48] sm:$0xf]  ;;  %2812 = vmatpush.bf16.msrb.mxu2 %v6086_v0  ;;  %v7042_v17 = vor.u32 %v9004_v10, %v7041_v9  ;;  %2787 = vmatpush.bf16.msra.mxu3 %v7330_v7  ;;  %v8712_v9 = vld [vmem:[#allocation6 + $0x4c] sm:$0xf] }
  0xdf   :  { %v9068_v13 = vld [vmem:[#allocation6 + $0xb64] sm:$0xf0]  ;;  %v5891_v10 = vld [vmem:[#allocation6 + $0x68] sm:$0xf0] }
  0xe0   :  { %v7298_v20 = vor.u32 %v9068_v13, %v7297_v12  ;;  %v7009_v21 = vld [vmem:[#allocation6 + $0x908] sm:$0xf]  ;;  %2825 = vmatpush.bf16.msra.mxu0 %v6342_v11  ;;  %2775 = vmatpush.bf16.msra.mxu1 %v7042_v17  ;;  %v8888_v17 = vld [vmem:[#allocation6 + $0x5cc] sm:$0xf] }
  0xe1   :  { %v8996_v22 = vld [vmem:[#allocation6 + $0x924] sm:$0xf0]  ;;  %v6598_v28 = vor.u32 %v8888_v17, %v6595_v18  ;;  %v8936_v55 = vld [vmem:[#allocation6 + $0x74c] sm:$0xf] }
  0xe2   :  { %v7265_v24 = vld [vmem:[#allocation6 + $0xb08] sm:$0xf]  ;;  %2813 = vmatpush.bf16.msrb.mxu2 %v6054_v14  ;;  %v7010_v29 = vor.u32 %v8996_v22, %v7009_v21  ;;  %2788 = vmatpush.bf16.msra.mxu3 %v7298_v20  ;;  %v5894_v20 = vor.u32 %v8712_v9, %v5891_v10  ;;  %v6851_v21 = vld [vmem:[#allocation6 + $0x7e8] sm:$0xf0] }
  0xe3   :  { %v9060_v25 = vld [vmem:[#allocation6 + $0xb24] sm:$0xf0]  ;;  %v8776_v22 = vld [vmem:[#allocation6 + $0x24c] sm:$0xf]  ;;  %v6854_v32 = vor.u32 %v8952_v19, %v6851_v21 }
  0xe4   :  { %v7266_v33 = vor.u32 %v9060_v25, %v7265_v24  ;;  %v6977_v34 = vld [vmem:[#allocation6 + $0x8c8] sm:$0xf]  ;;  %2826 = vmatpush.bf16.msra.mxu0 %v6310_v23  ;;  %2776 = vmatpush.bf16.msra.mxu1 %v7010_v29  ;;  %v6147_v23 = vld [vmem:[#allocation6 + $0x268] sm:$0xf0] }
  0xe5   :  { %v8988_v35 = vld [vmem:[#allocation6 + $0x8e4] sm:$0xf0]  ;;  %v8704_v25 = vld [vmem:[#allocation6 + $0xc] sm:$0xf] }
  0xe6   :  { %v7233_v38 = vld [vmem:[#allocation6 + $0xac8] sm:$0xf]  ;;  %2814 = vmatpush.bf16.msrb.mxu2 %v6022_v26  ;;  %v6978_v43 = vor.u32 %v8988_v35, %v6977_v34  ;;  %2789 = vmatpush.bf16.msra.mxu3 %v7266_v33  ;;  %v5859_v26 = vld [vmem:[#allocation6 + $0x28] sm:$0xf0]  ;;  %v6150_v33 = vor.u32 %v8776_v22, %v6147_v23  ;;  %v2548_v22 = vpop.f32.mrf.mxu0 }
  0xe7   :  { %v9052_v39 = vld [vmem:[#allocation6 + $0xae4] sm:$0xf0]  ;;  %v9016_v29 = vld [vmem:[#allocation6 + $0x9cc] sm:$0xf] }
  0xe8   :  { %v7234_v47 = vor.u32 %v9052_v39, %v7233_v38  ;;  %v6945_v48 = vld [vmem:[#allocation6 + $0x888] sm:$0xf]  ;;  %2827 = vmatpush.bf16.msra.mxu0 %v6278_v37  ;;  %2777 = vmatpush.bf16.msra.mxu1 %v6978_v43  ;;  %v8880_v34 = vld [vmem:[#allocation6 + $0x58c] sm:$0xf]  ;;  %v5862_v38 = vor.u32 %v8704_v25, %v5859_v26  ;;  %v7110_v42 = vor.u32 %v9016_v29, %v7107_v30 }
  0xe9   :  { %v8980_v49 = vld [vmem:[#allocation6 + $0x8a4] sm:$0xf0]  ;;  %v6563_v35 = vld [vmem:[#allocation6 + $0x5a8] sm:$0xf0] }
  0xea   :  { %v7201_v51 = vld [vmem:[#allocation6 + $0xa88] sm:$0xf]  ;;  %2815 = vmatpush.bf16.msrb.mxu2 %v5990_v40  ;;  %v6946_v59 = vor.u32 %v8980_v49, %v6945_v48  ;;  %2790 = vmatpush.bf16.msra.mxu3 %v7234_v47  ;;  %v8944_v37 = vld [vmem:[#allocation6 + $0x78c] sm:$0xf]  ;;  %v6566_v45 = vor.u32 %v8880_v34, %v6563_v35  ;;  %v2561_v35 = vpop.f32.mrf.mxu1 }
  0xeb   :  { %v9044_v53 = vld [vmem:[#allocation6 + $0xaa4] sm:$0xf0]  ;;  %7417 = vmatmul.msk.bf16.vlgmr.msrb.gmra.mxu0 %vm2535_vm0, %v9772_v46  ;;  %v6819_v39 = vld [vmem:[#allocation6 + $0x7a8] sm:$0xf0] }
  0xec   :  { %v7202_v62 = vor.u32 %v9044_v53, %v7201_v51  ;;  %v6913_v63 = vld [vmem:[#allocation6 + $0x848] sm:$0xf]  ;;  %2828 = vmatpush.bf16.msra.mxu0 %v6246_v50  ;;  %2778 = vmatpush.bf16.msra.mxu1 %v6946_v59  ;;  %v8768_v40 = vld [vmem:[#allocation6 + $0x20c] sm:$0xf]  ;;  %v6822_v49 = vor.u32 %v8944_v37, %v6819_v39 }
  0xed   :  { %v8972_v0 = vld [vmem:[#allocation6 + $0x864] sm:$0xf0]  ;;  %v9080_v43 = vld [vmem:[#allocation6 + $0xbcc] sm:$0xf]  ;;  %v6118_v50 = vor.u32 %v8768_v40, %v6115_v41 }
  0xee   :  { %v7169_v2 = vld [vmem:[#allocation6 + $0xa48] sm:$0xf]  ;;  %2816 = vmatpush.bf16.msrb.mxu2 %v5958_v54  ;;  %v6914_v7 = vor.u32 %v8972_v0, %v6913_v63  ;;  %2791 = vmatpush.bf16.msra.mxu3 %v7202_v62  ;;  %v9008_v47 = vld [vmem:[#allocation6 + $0x98c] sm:$0xf]  ;;  %v7366_v54 = vor.u32 %v9080_v43, %v7363_v44  ;;  %v2574_v43 = vpop.f32.mrf.mxu2 }
  0xef   :  { %v9036_v3 = vld [vmem:[#allocation6 + $0xa64] sm:$0xf0]  ;;  %v7075_v48 = vld [vmem:[#allocation6 + $0x9a8] sm:$0xf0] }
  0xf0   :  { %v6881_v11 = vld [vmem:[#allocation6 + $0x808] sm:$0xf]  ;;  %v7170_v12 = vor.u32 %v9036_v3, %v7169_v2  ;;  %2829 = vmatpush.bf16.msra.mxu0 %v6214_v1  ;;  %2779 = vmatpush.bf16.msra.mxu1 %v6914_v7  ;;  %v8872_v51 = vld [vmem:[#allocation6 + $0x54c] sm:$0xf]  ;;  %v7078_v59 = vor.u32 %v9008_v47, %v7075_v48  ;;  %v9798_v1 = vld [vmem:[#allocation8] sm:$0xff] }
  0xf1   :  { %v8964_v13 = vld [vmem:[#allocation6 + $0x824] sm:$0xf0]  ;;  %v6531_v53 = vld [vmem:[#allocation6 + $0x568] sm:$0xf0] }
  0xf2   :  { %v7137_v14 = vld [vmem:[#allocation6 + $0xa08] sm:$0xf]  ;;  %2817 = vmatpush.bf16.msrb.mxu2 %v5926_v4  ;;  %v6882_v24 = vor.u32 %v8964_v13, %v6881_v11  ;;  %2792 = vmatpush.bf16.msra.mxu3 %v7170_v12  ;;  %v6787_v57 = vld [vmem:[#allocation6 + $0x768] sm:$0xf0]  ;;  %v6534_v62 = vor.u32 %v8872_v51, %v6531_v53  ;;  %v559_v12 = vperm.slane %v9798_v1, 0 }
  0xf3   :  { %v9028_v15 = vld [vmem:[#allocation6 + $0xa24] sm:$0xf0]  ;;  %v9072_v60 = vld [vmem:[#allocation6 + $0xb8c] sm:$0xf]  ;;  %v6790_v2 = vor.u32 %v8936_v55, %v6787_v57 }
  0xf4   :  { %v7138_v27 = vor.u32 %v9028_v15, %v7137_v14  ;;  %2830 = vmatpush.bf16.msra.mxu0 %v6182_v16  ;;  %2780 = vmatpush.bf16.msra.mxu1 %v6882_v24  ;;  %v7331_v61 = vld [vmem:[#allocation6 + $0xba8] sm:$0xf0]  ;;  %v2549_v24 = vadd.f32 %v2548_v22, %v559_v12 }
  0xf5   :  { %v9000_v63 = vld [vmem:[#allocation6 + $0x94c] sm:$0xf]  ;;  %v7334_v5 = vor.u32 %v9072_v60, %v7331_v61 }
  0xf6   :  { %2818 = vmatpush.bf16.msrb.mxu2 %v5894_v20  ;;  %2793 = vmatpush.bf16.msra.mxu3 %v7138_v27  ;;  %v7043_v0 = vld [vmem:[#allocation6 + $0x968] sm:$0xf0]  ;;  %v2562_v39 = vadd.f32 %v2561_v35, %v2549_v24  ;;  %v8757_v35 = vld [vmem:[#allocation6 + $0x1ac] sm:$0xf0] }
  0xf7   :  { %2781 = vmatmul.bf16.vlgmr.msra.gmra.mxu1 %v9776_v31  ;;  %v8864_v3 = vld [vmem:[#allocation6 + $0x50c] sm:$0xf]  ;;  %v7046_v9 = vor.u32 %v9000_v63, %v7043_v0 }
  0xf8   :  { %2838 = vmatpush.bf16.msrb.mxu1 %v6598_v28  ;;  %2831 = vmatpush.bf16.msra.mxu0 %v6150_v33  ;;  %v6499_v4 = vld [vmem:[#allocation6 + $0x528] sm:$0xf0] }
  0xf9   :  { %2794 = vmatmul.bf16.vlgmr.msra.gmra.mxu3 %v9778_v36  ;;  %v8928_v6 = vld [vmem:[#allocation6 + $0x70c] sm:$0xf]  ;;  %v6502_v13 = vor.u32 %v8864_v3, %v6499_v4 }
  0xfa   :  { %2851 = vmatpush.bf16.msrb.mxu3 %v6854_v32  ;;  %2819 = vmatpush.bf16.msrb.mxu2 %v5862_v38  ;;  %v6755_v7 = vld [vmem:[#allocation6 + $0x728] sm:$0xf0] }
  0xfb   :  { %v9064_v10 = vld [vmem:[#allocation6 + $0xb4c] sm:$0xf]  ;;  %v6758_v16 = vor.u32 %v8928_v6, %v6755_v7 }
  0xfc   :  { %2839 = vmatpush.bf16.msrb.mxu1 %v6566_v45  ;;  %2832 = vmatpush.bf16.msra.mxu0 %v6118_v50  ;;  %v7299_v11 = vld [vmem:[#allocation6 + $0xb68] sm:$0xf0]  ;;  %v2587_v50 = vpop.f32.mrf.mxu3 }
  0xfd   :  { %2820 = vmatmul.bf16.vlgmr.msrb.gmra.mxu2 %v9762_v56  ;;  %v8992_v14 = vld [vmem:[#allocation6 + $0x90c] sm:$0xf]  ;;  %v7302_v19 = vor.u32 %v9064_v10, %v7299_v11  ;;  %v6089_v11 = vld [vmem:[#allocation6 + $0x1d0] sm:$0xf] }
  0xfe   :  { %2864 = vmatpush.bf16.msra.mxu2 %v7110_v42  ;;  %2852 = vmatpush.bf16.msrb.mxu3 %v6822_v49  ;;  %v7011_v15 = vld [vmem:[#allocation6 + $0x928] sm:$0xf0]  ;;  %v2575_v49 = vadd.f32 %v2574_v43, %v2562_v39  ;;  %v6313_v43 = vld [vmem:[#allocation6 + $0x390] sm:$0xf] }
  0xff   :  { %2833 = vmatmul.bf16.vlgmr.msra.gmra.mxu0 %v9768_v8  ;;  %v8856_v17 = vld [vmem:[#allocation6 + $0x4cc] sm:$0xf]  ;;  %v7014_v23 = vor.u32 %v8992_v14, %v7011_v15  ;;  %v2563_v14 = vpop.f32.mrf.mxu1 }
 0x100   :  { %2877 = vmatpush.bf16.msrb.mxu0 %v7366_v54  ;;  %2840 = vmatpush.bf16.msrb.mxu1 %v6534_v62  ;;  %v6467_v18 = vld [vmem:[#allocation6 + $0x4e8] sm:$0xf0]  ;;  %v9803_v60 = vadd.f32 %v2587_v50, %v2575_v49  ;;  %v6025_v50 = vld [vmem:[#allocation6 + $0x150] sm:$0xf] }
 0x101   :  { %v8920_v20 = vld [vmem:[#allocation6 + $0x6cc] sm:$0xf]  ;;  %v6470_v27 = vor.u32 %v8856_v17, %v6467_v18 }
 0x102   :  { %2865 = vmatpush.bf16.msra.mxu2 %v7078_v59  ;;  %2853 = vmatpush.bf16.msrb.mxu3 %v6790_v2  ;;  %v6723_v21 = vld [vmem:[#allocation6 + $0x6e8] sm:$0xf0]  ;;  %v2550_v59 = vpop.f32.mrf.mxu0 }
 0x103   :  { %v9056_v25 = vld [vmem:[#allocation6 + $0xb0c] sm:$0xf]  ;;  %v6726_v30 = vor.u32 %v8920_v20, %v6723_v21 }
 0x104   :  { %2878 = vmatpush.bf16.msrb.mxu0 %v7334_v5  ;;  %v7267_v26 = vld [vmem:[#allocation6 + $0xb28] sm:$0xf0]  ;;  %2841 = vmatpush.bf16.msrb.mxu1 %v6502_v13 }
 0x105   :  { %v8984_v28 = vld [vmem:[#allocation6 + $0x8cc] sm:$0xf]  ;;  %v7270_v34 = vor.u32 %v9056_v25, %v7267_v26  ;;  %v6345_v25 = vld [vmem:[#allocation6 + $0x3d0] sm:$0xf] }
 0x106   :  { %2866 = vmatpush.bf16.msra.mxu2 %v7046_v9  ;;  %v6979_v29 = vld [vmem:[#allocation6 + $0x8e8] sm:$0xf0]  ;;  %2854 = vmatpush.bf16.msrb.mxu3 %v6758_v16  ;;  %v8765_v16 = vld [vmem:[#allocation6 + $0x1ec] sm:$0xf0] }
 0x107   :  { %v8848_v32 = vld [vmem:[#allocation6 + $0x48c] sm:$0xf]  ;;  %v6982_v40 = vor.u32 %v8984_v28, %v6979_v29  ;;  %v8829_v26 = vld [vmem:[#allocation6 + $0x3ec] sm:$0xf0]  ;;  %v6090_v28 = vor.u32 %v8765_v16, %v6089_v11 }
 0x108   :  { %v6435_v33 = vld [vmem:[#allocation6 + $0x4a8] sm:$0xf0]  ;;  %2879 = vmatpush.bf16.msrb.mxu0 %v7302_v19  ;;  %2842 = vmatpush.bf16.msrb.mxu1 %v6470_v27  ;;  %v2576_v19 = vpop.f32.mrf.mxu2  ;;  %v2589_v27 = vpop.f32.mrf.mxu3  ;;  %v8941_v11 = vld [vmem:[#allocation6 + $0x76c] sm:$0xf0] }
 0x109   :  { %v8912_v37 = vld [vmem:[#allocation6 + $0x68c] sm:$0xf]  ;;  %v6438_v44 = vor.u32 %v8848_v32, %v6435_v33  ;;  %v8893_v32 = vld [vmem:[#allocation6 + $0x5ec] sm:$0xf0] }
 0x10a   :  { %v6691_v38 = vld [vmem:[#allocation6 + $0x6a8] sm:$0xf0]  ;;  %2867 = vmatpush.bf16.msra.mxu2 %v7014_v23  ;;  %2855 = vmatpush.bf16.msrb.mxu3 %v6726_v30  ;;  %v6601_v30 = vld [vmem:[#allocation6 + $0x5d0] sm:$0xf] }
 0x10b   :  { %v9048_v41 = vld [vmem:[#allocation6 + $0xacc] sm:$0xf]  ;;  %v6694_v48 = vor.u32 %v8912_v37, %v6691_v38  ;;  %v6346_v37 = vor.u32 %v8829_v26, %v6345_v25  ;;  %v8869_v16 = vld [vmem:[#allocation6 + $0x52c] sm:$0xf0] }
 0x10c   :  { %v7235_v42 = vld [vmem:[#allocation6 + $0xae8] sm:$0xf0]  ;;  %2880 = vmatpush.bf16.msrb.mxu0 %v7270_v34  ;;  %2843 = vmatpush.bf16.msrb.mxu1 %v6438_v44  ;;  %v6057_v34 = vld [vmem:[#allocation6 + $0x190] sm:$0xf] }
 0x10d   :  { %v8976_v45 = vld [vmem:[#allocation6 + $0x88c] sm:$0xf]  ;;  %v7238_v54 = vor.u32 %v9048_v41, %v7235_v42  ;;  %v6602_v41 = vor.u32 %v8893_v32, %v6601_v30  ;;  %v8957_v42 = vld [vmem:[#allocation6 + $0x7ec] sm:$0xf0] }
 0x10e   :  { %v6947_v47 = vld [vmem:[#allocation6 + $0x8a8] sm:$0xf0]  ;;  %2868 = vmatpush.bf16.msra.mxu2 %v6982_v40  ;;  %2856 = vmatpush.bf16.msrb.mxu3 %v6694_v48  ;;  %v6857_v40 = vld [vmem:[#allocation6 + $0x7d0] sm:$0xf] }
 0x10f   :  { %v8840_v51 = vld [vmem:[#allocation6 + $0x44c] sm:$0xf]  ;;  %v6950_v61 = vor.u32 %v8976_v45, %v6947_v47  ;;  %v8821_v44 = vld [vmem:[#allocation6 + $0x3ac] sm:$0xf0]  ;;  %v6058_v45 = vor.u32 %v8757_v35, %v6057_v34 }
 0x110   :  { %v6403_v53 = vld [vmem:[#allocation6 + $0x468] sm:$0xf0]  ;;  %2881 = vmatpush.bf16.msrb.mxu0 %v7238_v54  ;;  %v6569_v47 = vld [vmem:[#allocation6 + $0x590] sm:$0xf]  ;;  %v6314_v54 = vor.u32 %v8821_v44, %v6313_v43 }
 0x111   :  { %v8904_v55 = vld [vmem:[#allocation6 + $0x64c] sm:$0xf]  ;;  %v6406_v0 = vor.u32 %v8840_v51, %v6403_v53  ;;  %v8885_v48 = vld [vmem:[#allocation6 + $0x5ac] sm:$0xf0]  ;;  %v6858_v53 = vor.u32 %v8957_v42, %v6857_v40 }
 0x112   :  { %v6659_v57 = vld [vmem:[#allocation6 + $0x668] sm:$0xf0]  ;;  %2869 = vmatpush.bf16.msra.mxu2 %v6950_v61  ;;  %v8749_v51 = vld [vmem:[#allocation6 + $0x16c] sm:$0xf0]  ;;  %v6570_v59 = vor.u32 %v8885_v48, %v6569_v47 }
 0x113   :  { %v9040_v62 = vld [vmem:[#allocation6 + $0xa8c] sm:$0xf]  ;;  %v6662_v5 = vor.u32 %v8904_v55, %v6659_v57  ;;  %2844 = vmatpush.bf16.msrb.mxu1 %v6406_v0  ;;  %v6825_v55 = vld [vmem:[#allocation6 + $0x790] sm:$0xf]  ;;  %v2626_v57 = vpop.f32.mrf.mxu2  ;;  %v6026_v0 = vor.u32 %v8749_v51, %v6025_v50 }
 0x114   :  { %v7203_v63 = vld [vmem:[#allocation6 + $0xaa8] sm:$0xf0]  ;;  %v8949_v61 = vld [vmem:[#allocation6 + $0x7ac] sm:$0xf0] }
 0x115   :  { %v8968_v2 = vld [vmem:[#allocation6 + $0x84c] sm:$0xf]  ;;  %v7206_v10 = vor.u32 %v9040_v62, %v7203_v63  ;;  %2857 = vmatpush.bf16.msrb.mxu3 %v6662_v5  ;;  %v6281_v62 = vld [vmem:[#allocation6 + $0x350] sm:$0xf] }
 0x116   :  { %v6915_v3 = vld [vmem:[#allocation6 + $0x868] sm:$0xf0]  ;;  %v8813_v63 = vld [vmem:[#allocation6 + $0x36c] sm:$0xf0] }
 0x117   :  { %v8832_v4 = vld [vmem:[#allocation6 + $0x40c] sm:$0xf]  ;;  %v6918_v15 = vor.u32 %v8968_v2, %v6915_v3  ;;  %2882 = vmatpush.bf16.msrb.mxu0 %v7206_v10  ;;  %v6537_v2 = vld [vmem:[#allocation6 + $0x550] sm:$0xf] }
 0x118   :  { %v6371_v6 = vld [vmem:[#allocation6 + $0x428] sm:$0xf0]  ;;  %v8877_v3 = vld [vmem:[#allocation6 + $0x56c] sm:$0xf0] }
 0x119   :  { %v8896_v7 = vld [vmem:[#allocation6 + $0x60c] sm:$0xf]  ;;  %v6374_v20 = vor.u32 %v8832_v4, %v6371_v6  ;;  %2870 = vmatpush.bf16.msra.mxu2 %v6918_v15  ;;  %v5993_v4 = vld [vmem:[#allocation6 + $0x110] sm:$0xf]  ;;  %v6826_v6 = vor.u32 %v8949_v61, %v6825_v55  ;;  %v6538_v10 = vor.u32 %v8877_v3, %v6537_v2 }
 0x11a   :  { %v6627_v9 = vld [vmem:[#allocation6 + $0x628] sm:$0xf0]  ;;  %v8741_v5 = vld [vmem:[#allocation6 + $0x12c] sm:$0xf0] }
 0x11b   :  { %v9088_v12 = vld [vmem:[#allocation6 + $0xc0c] sm:$0xf]  ;;  %v6630_v23 = vor.u32 %v8896_v7, %v6627_v9  ;;  %2845 = vmatpush.bf16.msrb.mxu1 %v6374_v20  ;;  %v6282_v7 = vor.u32 %v8813_v63, %v6281_v62  ;;  %v6793_v9 = vld [vmem:[#allocation6 + $0x750] sm:$0xf]  ;;  %v5994_v14 = vor.u32 %v8741_v5, %v5993_v4  ;;  %v2628_v25 = vpop.f32.mrf.mxu2 }
 0x11c   :  { %v7395_v13 = vld [vmem:[#allocation6 + $0xc28] sm:$0xf0]  ;;  %v6505_v15 = vld [vmem:[#allocation6 + $0x510] sm:$0xf] }
 0x11d   :  { %v9032_v17 = vld [vmem:[#allocation6 + $0xa4c] sm:$0xf]  ;;  %v7398_v24 = vor.u32 %v9088_v12, %v7395_v13  ;;  %2858 = vmatpush.bf16.msrb.mxu3 %v6630_v23  ;;  %v6249_v12 = vld [vmem:[#allocation6 + $0x310] sm:$0xf]  ;;  %v6506_v26 = vor.u32 %v8869_v16, %v6505_v15 }
 0x11e   :  { %v7171_v18 = vld [vmem:[#allocation6 + $0xa68] sm:$0xf0]  ;;  %2846 = vmatmul.bf16.vlgmr.msrb.gmra.mxu1 %v9760_v52  ;;  %v8805_v13 = vld [vmem:[#allocation6 + $0x32c] sm:$0xf0] }
 0x11f   :  { %v8960_v21 = vld [vmem:[#allocation6 + $0x80c] sm:$0xf]  ;;  %v7174_v29 = vor.u32 %v9032_v17, %v7171_v18  ;;  %2897 = vmatpush.bf16.msra.mxu1 %v7398_v24  ;;  %v2600_v17 = vpop.f32.mrf.mxu0  ;;  %v5961_v18 = vld [vmem:[#allocation6 + $0xd0] sm:$0xf]  ;;  %v6250_v23 = vor.u32 %v8805_v13, %v6249_v12 }
 0x120   :  { %v6883_v22 = vld [vmem:[#allocation6 + $0x828] sm:$0xf0]  ;;  %2859 = vmatmul.bf16.vlgmr.msrb.gmra.mxu3 %v9764_v58  ;;  %v8733_v19 = vld [vmem:[#allocation6 + $0xec] sm:$0xf0]  ;;  %v2601_v20 = vadd.f32 %v2600_v17, %v9803_v60 }
 0x121   :  { %v6886_v33 = vor.u32 %v8960_v21, %v6883_v22  ;;  %v9024_v38 = vld [vmem:[#allocation6 + $0xa0c] sm:$0xf]  ;;  %2903 = vmatpush.bf16.msra.mxu3 %v6090_v28  ;;  %2883 = vmatpush.bf16.msrb.mxu0 %v7174_v29  ;;  %v2613_v21 = vpop.f32.mrf.mxu1  ;;  %v6794_v22 = vor.u32 %v8941_v11, %v6793_v9  ;;  %v6761_v24 = vld [vmem:[#allocation6 + $0x710] sm:$0xf]  ;;  %v5962_v32 = vor.u32 %v8733_v19, %v5961_v18 }
 0x122   :  { %v7139_v39 = vld [vmem:[#allocation6 + $0xa28] sm:$0xf0]  ;;  %v8933_v27 = vld [vmem:[#allocation6 + $0x72c] sm:$0xf0]  ;;  %v2614_v30 = vadd.f32 %v2613_v21, %v2601_v20 }
 0x123   :  { %2871 = vmatpush.bf16.msra.mxu2 %v6886_v33  ;;  %v7142_v49 = vor.u32 %v9024_v38, %v7139_v39  ;;  %2916 = vmatpush.bf16.msrb.mxu1 %v6346_v37  ;;  %v6217_v28 = vld [vmem:[#allocation6 + $0x2d0] sm:$0xf]  ;;  %v6762_v60 = vor.u32 %v8933_v27, %v6761_v24  ;;  %v2652_v4 = vpop.f32.mrf.mxu2 }
 0x124   :  { %v8797_v29 = vld [vmem:[#allocation6 + $0x2ec] sm:$0xf0]  ;;  %v9810_v38 = vadd.f32 %v2626_v57, %v2614_v30 }
 0x125   :  { %2904 = vmatpush.bf16.msra.mxu3 %v6058_v45  ;;  %2884 = vmatpush.bf16.msrb.mxu0 %v7142_v49  ;;  %v6473_v33 = vld [vmem:[#allocation6 + $0x4d0] sm:$0xf]  ;;  %v6218_v39 = vor.u32 %v8797_v29, %v6217_v28 }
 0x126   :  { %2872 = vmatmul.bf16.vlgmr.msra.gmra.mxu2 %v9776_v31  ;;  %v8861_v34 = vld [vmem:[#allocation6 + $0x4ec] sm:$0xf0] }
 0x127   :  { %2929 = vmatpush.bf16.msrb.mxu2 %v6602_v41  ;;  %2917 = vmatpush.bf16.msrb.mxu1 %v6314_v54  ;;  %v5929_v35 = vld [vmem:[#allocation6 + $0x90] sm:$0xf]  ;;  %v560_v41 = vperm.slane %v9798_v1, 1  ;;  %v6474_v42 = vor.u32 %v8861_v34, %v6473_v33  ;;  %v2639_v54 = vpop.f32.mrf.mxu3 }
 0x128   :  { %2885 = vmatmul.bf16.vlgmr.msrb.gmra.mxu0 %v9778_v36  ;;  %v8725_v37 = vld [vmem:[#allocation6 + $0xac] sm:$0xf0] }
 0x129   :  { %2942 = vmatpush.bf16.msra.mxu0 %v6858_v53  ;;  %2905 = vmatpush.bf16.msra.mxu3 %v6026_v0  ;;  %v6729_v40 = vld [vmem:[#allocation6 + $0x6d0] sm:$0xf]  ;;  %v5930_v47 = vor.u32 %v8725_v37, %v5929_v35  ;;  %v2602_v53 = vpop.f32.mrf.mxu0  ;;  %v2640_v61 = vadd.f32 %v2639_v54, %v560_v41  ;;  %v2615_v62 = vpop.f32.mrf.mxu1 }
 0x12a   :  { %v8925_v43 = vld [vmem:[#allocation6 + $0x6ec] sm:$0xf0]  ;;  %v8817_v62 = vld [vmem:[#allocation6 + $0x394] sm:$0xf] }
 0x12b   :  { %2930 = vmatpush.bf16.msrb.mxu2 %v6570_v59  ;;  %2918 = vmatpush.bf16.msrb.mxu1 %v6282_v7  ;;  %v6185_v44 = vld [vmem:[#allocation6 + $0x290] sm:$0xf]  ;;  %v6730_v55 = vor.u32 %v8925_v43, %v6729_v40  ;;  %v9815_v9 = vadd.f32 %v2652_v4, %v2640_v61  ;;  %v8761_v40 = vld [vmem:[#allocation6 + $0x1d4] sm:$0xf]  ;;  %v2654_v41 = vpop.f32.mrf.mxu2 }
 0x12c   :  { %v8789_v45 = vld [vmem:[#allocation6 + $0x2ac] sm:$0xf0]  ;;  %v6091_v43 = vld [vmem:[#allocation6 + $0x1f0] sm:$0xf0] }
 0x12d   :  { %2943 = vmatpush.bf16.msra.mxu0 %v6826_v6  ;;  %2906 = vmatpush.bf16.msra.mxu3 %v5994_v14  ;;  %v6441_v48 = vld [vmem:[#allocation6 + $0x490] sm:$0xf]  ;;  %v6186_v57 = vor.u32 %v8789_v45, %v6185_v44  ;;  %v8825_v44 = vld [vmem:[#allocation6 + $0x3d4] sm:$0xf]  ;;  %v6094_v54 = vor.u32 %v8761_v40, %v6091_v43 }
 0x12e   :  { %v8853_v49 = vld [vmem:[#allocation6 + $0x4ac] sm:$0xf0]  ;;  %7418 = vmatmul.msk.bf16.vlgmr.msra.gmra.mxu1 %vm2535_vm0, %v9772_v46  ;;  %v6347_v45 = vld [vmem:[#allocation6 + $0x3f0] sm:$0xf0] }
 0x12f   :  { %2931 = vmatpush.bf16.msrb.mxu2 %v6538_v10  ;;  %2919 = vmatpush.bf16.msrb.mxu1 %v6250_v23  ;;  %v5897_v50 = vld [vmem:[#allocation6 + $0x50] sm:$0xf]  ;;  %v6442_v63 = vor.u32 %v8853_v49, %v6441_v48  ;;  %v2641_v29 = vpop.f32.mrf.mxu3  ;;  %v6059_v61 = vld [vmem:[#allocation6 + $0x1b0] sm:$0xf0] }
 0x130   :  { %v8717_v51 = vld [vmem:[#allocation6 + $0x6c] sm:$0xf0]  ;;  %v5963_v41 = vld [vmem:[#allocation6 + $0xf0] sm:$0xf0] }
 0x131   :  { %2944 = vmatpush.bf16.msra.mxu0 %v6794_v22  ;;  %2907 = vmatpush.bf16.msra.mxu3 %v5962_v32  ;;  %v6697_v59 = vld [vmem:[#allocation6 + $0x690] sm:$0xf]  ;;  %v5898_v5 = vor.u32 %v8717_v51, %v5897_v50  ;;  %v6219_v43 = vld [vmem:[#allocation6 + $0x2f0] sm:$0xf0] }
 0x132   :  { %v8917_v0 = vld [vmem:[#allocation6 + $0x6ac] sm:$0xf0] }
 0x133   :  { %2932 = vmatpush.bf16.msrb.mxu2 %v6506_v26  ;;  %2920 = vmatpush.bf16.msrb.mxu1 %v6218_v39  ;;  %v6153_v2 = vld [vmem:[#allocation6 + $0x250] sm:$0xf]  ;;  %v6698_v13 = vor.u32 %v8917_v0, %v6697_v59 }
 0x134   :  { %v8781_v3 = vld [vmem:[#allocation6 + $0x26c] sm:$0xf0] }
 0x135   :  { %2945 = vmatpush.bf16.msra.mxu0 %v6762_v60  ;;  %2908 = vmatpush.bf16.msra.mxu3 %v5930_v47  ;;  %v6409_v6 = vld [vmem:[#allocation6 + $0x450] sm:$0xf]  ;;  %v6154_v14 = vor.u32 %v8781_v3, %v6153_v2 }
 0x136   :  { %v8845_v7 = vld [vmem:[#allocation6 + $0x46c] sm:$0xf0] }
 0x137   :  { %2933 = vmatpush.bf16.msrb.mxu2 %v6474_v42  ;;  %v5865_v10 = vld [vmem:[#allocation6 + $0x10] sm:$0xf]  ;;  %2921 = vmatpush.bf16.msrb.mxu1 %v6186_v57  ;;  %v6410_v18 = vor.u32 %v8845_v7, %v6409_v6  ;;  %v8753_v57 = vld [vmem:[#allocation6 + $0x194] sm:$0xf] }
 0x138   :  { %v8709_v11 = vld [vmem:[#allocation6 + $0x2c] sm:$0xf0]  ;;  %v6062_v6 = vor.u32 %v8753_v57, %v6059_v61 }
 0x139   :  { %v7113_v12 = vld [vmem:[#allocation6 + $0x9d0] sm:$0xf]  ;;  %2946 = vmatpush.bf16.msra.mxu0 %v6730_v55  ;;  %2909 = vmatpush.bf16.msra.mxu3 %v5898_v5  ;;  %v5866_v22 = vor.u32 %v8709_v11, %v5865_v10  ;;  %v6350_v55 = vor.u32 %v8825_v44, %v6347_v45  ;;  %v8745_v10 = vld [vmem:[#allocation6 + $0x154] sm:$0xf] }
 0x13a   :  { %v9021_v15 = vld [vmem:[#allocation6 + $0x9ec] sm:$0xf0] }
 0x13b   :  { %v6665_v16 = vld [vmem:[#allocation6 + $0x650] sm:$0xf]  ;;  %2934 = vmatpush.bf16.msrb.mxu2 %v6442_v63  ;;  %v7114_v26 = vor.u32 %v9021_v15, %v7113_v12  ;;  %2922 = vmatpush.bf16.msrb.mxu1 %v6154_v14  ;;  %v6315_v63 = vld [vmem:[#allocation6 + $0x3b0] sm:$0xf0] }
 0x13c   :  { %v8909_v17 = vld [vmem:[#allocation6 + $0x66c] sm:$0xf0]  ;;  %v6318_v7 = vor.u32 %v8817_v62, %v6315_v63  ;;  %v6027_v12 = vld [vmem:[#allocation6 + $0x170] sm:$0xf0] }
 0x13d   :  { %v6121_v19 = vld [vmem:[#allocation6 + $0x210] sm:$0xf]  ;;  %2947 = vmatpush.bf16.msra.mxu0 %v6698_v13  ;;  %v6666_v30 = vor.u32 %v8909_v17, %v6665_v16  ;;  %2910 = vmatpush.bf16.msra.mxu3 %v5866_v22  ;;  %v8809_v13 = vld [vmem:[#allocation6 + $0x354] sm:$0xf] }
 0x13e   :  { %v8773_v20 = vld [vmem:[#allocation6 + $0x22c] sm:$0xf0]  ;;  %v6283_v14 = vld [vmem:[#allocation6 + $0x370] sm:$0xf0] }
 0x13f   :  { %v6377_v21 = vld [vmem:[#allocation6 + $0x410] sm:$0xf]  ;;  %v6122_v32 = vor.u32 %v8773_v20, %v6121_v19  ;;  %2935 = vmatpush.bf16.msrb.mxu2 %v6410_v18  ;;  %v2665_v20 = vpop.f32.mrf.mxu0  ;;  %v6286_v22 = vor.u32 %v8809_v13, %v6283_v14  ;;  %v5931_v62 = vld [vmem:[#allocation6 + $0xb0] sm:$0xf0] }
 0x140   :  { %v8837_v23 = vld [vmem:[#allocation6 + $0x42c] sm:$0xf0]  ;;  %2911 = vmatmul.bf16.vlgmr.msra.gmra.mxu3 %v9762_v56  ;;  %v2704_v61 = vpop.f32.mrf.mxu2  ;;  %v8785_v63 = vld [vmem:[#allocation6 + $0x294] sm:$0xf] }
 0x141   :  { %v7369_v24 = vld [vmem:[#allocation6 + $0xbd0] sm:$0xf]  ;;  %v6378_v35 = vor.u32 %v8837_v23, %v6377_v21  ;;  %2955 = vmatpush.bf16.msrb.mxu3 %v7114_v26  ;;  %2948 = vmatpush.bf16.msra.mxu0 %v6666_v30  ;;  %v6030_v21 = vor.u32 %v8745_v10, %v6027_v12  ;;  %v8737_v23 = vld [vmem:[#allocation6 + $0x114] sm:$0xf] }
 0x142   :  { %v9085_v25 = vld [vmem:[#allocation6 + $0xbec] sm:$0xf0]  ;;  %2923 = vmatpush.bf16.msrb.mxu1 %v6122_v32  ;;  %v5995_v26 = vld [vmem:[#allocation6 + $0x130] sm:$0xf0] }
 0x143   :  { %v7401_v27 = vld [vmem:[#allocation6 + $0xc10] sm:$0xf]  ;;  %v7370_v37 = vor.u32 %v9085_v25, %v7369_v24  ;;  %2936 = vmatpush.bf16.msrb.mxu2 %v6378_v35  ;;  %v2666_v24 = vadd.f32 %v2665_v20, %v9815_v9  ;;  %v5998_v35 = vor.u32 %v8737_v23, %v5995_v26  ;;  %v8889_v12 = vld [vmem:[#allocation6 + $0x5d4] sm:$0xf] }
 0x144   :  { %v9093_v28 = vld [vmem:[#allocation6 + $0xc2c] sm:$0xf0]  ;;  %v6603_v13 = vld [vmem:[#allocation6 + $0x5f0] sm:$0xf0] }
 0x145   :  { %v7081_v33 = vld [vmem:[#allocation6 + $0x990] sm:$0xf]  ;;  %v7402_v42 = vor.u32 %v9093_v28, %v7401_v27  ;;  %2924 = vmatmul.bf16.vlgmr.msrb.gmra.mxu1 %v9768_v8  ;;  %v8801_v27 = vld [vmem:[#allocation6 + $0x314] sm:$0xf]  ;;  %v6606_v23 = vor.u32 %v8889_v12, %v6603_v13 }
 0x146   :  { %v9013_v34 = vld [vmem:[#allocation6 + $0x9ac] sm:$0xf0]  ;;  %2968 = vmatpush.bf16.msra.mxu1 %v7370_v37  ;;  %2937 = vmatmul.bf16.vlgmr.msrb.gmra.mxu2 %v9760_v52  ;;  %v6251_v28 = vld [vmem:[#allocation6 + $0x330] sm:$0xf0] }
 0x147   :  { %v6633_v60 = vld [vmem:[#allocation6 + $0x610] sm:$0xf]  ;;  %v7082_v47 = vor.u32 %v9013_v34, %v7081_v33  ;;  %2988 = vmatpush.bf16.msra.mxu2 %v7402_v42  ;;  %v6254_v37 = vor.u32 %v8801_v27, %v6251_v28  ;;  %v8793_v42 = vld [vmem:[#allocation6 + $0x2d4] sm:$0xf] }
 0x148   :  { %v8901_v39 = vld [vmem:[#allocation6 + $0x62c] sm:$0xf0]  ;;  %v8713_v14 = vld [vmem:[#allocation6 + $0x54] sm:$0xf] }
 0x149   :  { %v7337_v48 = vld [vmem:[#allocation6 + $0xb90] sm:$0xf]  ;;  %v6634_v50 = vor.u32 %v8901_v39, %v6633_v60  ;;  %2956 = vmatpush.bf16.msrb.mxu3 %v7082_v47  ;;  %v2678_v60 = vpop.f32.mrf.mxu1  ;;  %v8729_v39 = vld [vmem:[#allocation6 + $0xd4] sm:$0xf] }
 0x14a   :  { %v9077_v49 = vld [vmem:[#allocation6 + $0xbac] sm:$0xf0]  ;;  %v2679_v9 = vadd.f32 %v2678_v60, %v2666_v24  ;;  %v8953_v24 = vld [vmem:[#allocation6 + $0x7d4] sm:$0xf] }
 0x14b   :  { %v7049_v51 = vld [vmem:[#allocation6 + $0x950] sm:$0xf]  ;;  %v7338_v59 = vor.u32 %v9077_v49, %v7337_v48  ;;  %2949 = vmatpush.bf16.msra.mxu0 %v6634_v50  ;;  %3007 = vmatpush.bf16.msrb.mxu2 %v6350_v55  ;;  %v2667_v50 = vpop.f32.mrf.mxu0  ;;  %v8721_v55 = vld [vmem:[#allocation6 + $0x94] sm:$0xf] }
 0x14c   :  { %v9005_v53 = vld [vmem:[#allocation6 + $0x96c] sm:$0xf0]  ;;  %v5934_v10 = vor.u32 %v8721_v55, %v5931_v62  ;;  %v8881_v26 = vld [vmem:[#allocation6 + $0x594] sm:$0xf] }
 0x14d   :  { %v7050_v0 = vor.u32 %v9005_v53, %v7049_v51  ;;  %v7305_v2 = vld [vmem:[#allocation6 + $0xb50] sm:$0xf]  ;;  %2969 = vmatpush.bf16.msra.mxu1 %v7338_v59  ;;  %v5966_v51 = vor.u32 %v8729_v39, %v5963_v41  ;;  %v6222_v53 = vor.u32 %v8793_v42, %v6219_v43  ;;  %v8769_v60 = vld [vmem:[#allocation6 + $0x214] sm:$0xf] }
 0x14e   :  { %v9069_v3 = vld [vmem:[#allocation6 + $0xb6c] sm:$0xf0]  ;;  %2950 = vmatmul.bf16.vlgmr.msra.gmra.mxu0 %v9764_v58  ;;  %v6123_v39 = vld [vmem:[#allocation6 + $0x230] sm:$0xf0] }
 0x14f   :  { %v7017_v4 = vld [vmem:[#allocation6 + $0x910] sm:$0xf]  ;;  %2994 = vmatpush.bf16.msrb.mxu0 %v6094_v54  ;;  %v7306_v11 = vor.u32 %v9069_v3, %v7305_v2  ;;  %2957 = vmatpush.bf16.msrb.mxu3 %v7050_v0  ;;  %v2691_v54 = vpop.f32.mrf.mxu3  ;;  %v6187_v0 = vld [vmem:[#allocation6 + $0x2b0] sm:$0xf0]  ;;  %v6126_v50 = vor.u32 %v8769_v60, %v6123_v39 }
 0x150   :  { %v8997_v5 = vld [vmem:[#allocation6 + $0x92c] sm:$0xf0]  ;;  %3008 = vmatpush.bf16.msrb.mxu2 %v6318_v7  ;;  %v2692_v57 = vadd.f32 %v2691_v54, %v2679_v9  ;;  %v2706_v9 = vpop.f32.mrf.mxu2  ;;  %v7115_v42 = vld [vmem:[#allocation6 + $0x9f0] sm:$0xf0] }
 0x151   :  { %v7018_v15 = vor.u32 %v8997_v5, %v7017_v4  ;;  %v7273_v16 = vld [vmem:[#allocation6 + $0xb10] sm:$0xf]  ;;  %2970 = vmatpush.bf16.msra.mxu1 %v7306_v11  ;;  %v6190_v11 = vor.u32 %v8785_v63, %v6187_v0  ;;  %v9081_v43 = vld [vmem:[#allocation6 + $0xbd4] sm:$0xf] }
 0x152   :  { %v9061_v17 = vld [vmem:[#allocation6 + $0xb2c] sm:$0xf0]  ;;  %v2705_v5 = vadd.f32 %v2704_v61, %v2692_v57  ;;  %v9009_v57 = vld [vmem:[#allocation6 + $0x994] sm:$0xf] }
 0x153   :  { %v6985_v18 = vld [vmem:[#allocation6 + $0x8d0] sm:$0xf]  ;;  %2995 = vmatpush.bf16.msrb.mxu0 %v6062_v6  ;;  %v7274_v25 = vor.u32 %v9061_v17, %v7273_v16  ;;  %2958 = vmatpush.bf16.msrb.mxu3 %v7018_v15  ;;  %v2680_v15 = vpop.f32.mrf.mxu1  ;;  %v5899_v17 = vld [vmem:[#allocation6 + $0x70] sm:$0xf0]  ;;  %v2717_v27 = vpop.f32.mrf.mxu0 }
 0x154   :  { %v8989_v19 = vld [vmem:[#allocation6 + $0x8ec] sm:$0xf0]  ;;  %3009 = vmatpush.bf16.msrb.mxu2 %v6286_v22  ;;  %v5902_v28 = vor.u32 %v8713_v14, %v5899_v17  ;;  %v7083_v61 = vld [vmem:[#allocation6 + $0x9b0] sm:$0xf0] }
 0x155   :  { %v6986_v29 = vor.u32 %v8989_v19, %v6985_v18  ;;  %v7241_v30 = vld [vmem:[#allocation6 + $0xad0] sm:$0xf]  ;;  %2971 = vmatpush.bf16.msra.mxu1 %v7274_v25  ;;  %v8777_v18 = vld [vmem:[#allocation6 + $0x254] sm:$0xf] }
 0x156   :  { %v9053_v32 = vld [vmem:[#allocation6 + $0xaec] sm:$0xf0]  ;;  %7419 = vmatmul.msk.bf16.vlgmr.msra.gmra.mxu2 %vm2535_vm0, %v9772_v46  ;;  %v6155_v19 = vld [vmem:[#allocation6 + $0x270] sm:$0xf0] }
 0x157   :  { %v6953_v33 = vld [vmem:[#allocation6 + $0x890] sm:$0xf]  ;;  %2996 = vmatpush.bf16.msrb.mxu0 %v6030_v21  ;;  %v7242_v40 = vor.u32 %v9053_v32, %v7241_v30  ;;  %2959 = vmatpush.bf16.msrb.mxu3 %v6986_v29  ;;  %v6859_v25 = vld [vmem:[#allocation6 + $0x7f0] sm:$0xf0]  ;;  %v6158_v29 = vor.u32 %v8777_v18, %v6155_v19 }
 0x158   :  { %v8981_v34 = vld [vmem:[#allocation6 + $0x8ac] sm:$0xf0]  ;;  %3010 = vmatpush.bf16.msrb.mxu2 %v6254_v37  ;;  %v6571_v30 = vld [vmem:[#allocation6 + $0x5b0] sm:$0xf0]  ;;  %v6862_v41 = vor.u32 %v8953_v24, %v6859_v25 }
 0x159   :  { %v6954_v44 = vor.u32 %v8981_v34, %v6953_v33  ;;  %v7209_v45 = vld [vmem:[#allocation6 + $0xa90] sm:$0xf]  ;;  %2972 = vmatpush.bf16.msra.mxu1 %v7242_v40  ;;  %v8705_v32 = vld [vmem:[#allocation6 + $0x14] sm:$0xf]  ;;  %v2693_v34 = vpop.f32.mrf.mxu3 }
 0x15a   :  { %v9045_v47 = vld [vmem:[#allocation6 + $0xaac] sm:$0xf0]  ;;  %v5867_v33 = vld [vmem:[#allocation6 + $0x30] sm:$0xf0] }
 0x15b   :  { %v6921_v48 = vld [vmem:[#allocation6 + $0x850] sm:$0xf]  ;;  %2997 = vmatpush.bf16.msrb.mxu0 %v5998_v35  ;;  %v7210_v59 = vor.u32 %v9045_v47, %v7209_v45  ;;  %2960 = vmatpush.bf16.msrb.mxu3 %v6954_v44  ;;  %v9824_v35 = vadd.f32 %v2717_v27, %v2705_v5  ;;  %v9017_v40 = vld [vmem:[#allocation6 + $0x9d4] sm:$0xf]  ;;  %v6574_v45 = vor.u32 %v8881_v26, %v6571_v30 }
 0x15c   :  { %v8973_v49 = vld [vmem:[#allocation6 + $0x86c] sm:$0xf0]  ;;  %3011 = vmatpush.bf16.msrb.mxu2 %v6222_v53  ;;  %v7371_v44 = vld [vmem:[#allocation6 + $0xbf0] sm:$0xf0]  ;;  %v7118_v54 = vor.u32 %v9017_v40, %v7115_v42  ;;  %v2730_v40 = vpop.f32.mrf.mxu1 }
 0x15d   :  { %v6922_v2 = vor.u32 %v8973_v49, %v6921_v48  ;;  %v7177_v3 = vld [vmem:[#allocation6 + $0xa50] sm:$0xf]  ;;  %2973 = vmatpush.bf16.msra.mxu1 %v7210_v59  ;;  %v8945_v47 = vld [vmem:[#allocation6 + $0x794] sm:$0xf]  ;;  %v5870_v49 = vor.u32 %v8705_v32, %v5867_v33  ;;  %v7374_v55 = vor.u32 %v9081_v43, %v7371_v44 }
 0x15e   :  { %v9037_v4 = vld [vmem:[#allocation6 + $0xa6c] sm:$0xf0]  ;;  %v6827_v48 = vld [vmem:[#allocation6 + $0x7b0] sm:$0xf0] }
 0x15f   :  { %v6889_v6 = vld [vmem:[#allocation6 + $0x810] sm:$0xf]  ;;  %2998 = vmatpush.bf16.msrb.mxu0 %v5966_v51  ;;  %v7178_v16 = vor.u32 %v9037_v4, %v7177_v3  ;;  %2961 = vmatpush.bf16.msrb.mxu3 %v6922_v2  ;;  %v8873_v51 = vld [vmem:[#allocation6 + $0x554] sm:$0xf]  ;;  %v6830_v59 = vor.u32 %v8945_v47, %v6827_v48  ;;  %v2719_v4 = vpop.f32.mrf.mxu0 }
 0x160   :  { %v8965_v7 = vld [vmem:[#allocation6 + $0x82c] sm:$0xf0]  ;;  %3012 = vmatpush.bf16.msrb.mxu2 %v6190_v11  ;;  %v6539_v53 = vld [vmem:[#allocation6 + $0x570] sm:$0xf0] }
 0x161   :  { %v6890_v20 = vor.u32 %v8965_v7, %v6889_v6  ;;  %v7145_v21 = vld [vmem:[#allocation6 + $0xa10] sm:$0xf]  ;;  %2974 = vmatpush.bf16.msra.mxu1 %v7178_v16  ;;  %v9073_v62 = vld [vmem:[#allocation6 + $0xb94] sm:$0xf]  ;;  %v6542_v0 = vor.u32 %v8873_v51, %v6539_v53  ;;  %v7086_v7 = vor.u32 %v9009_v57, %v7083_v61  ;;  %v2743_v51 = vpop.f32.mrf.mxu3 }
 0x162   :  { %v9029_v22 = vld [vmem:[#allocation6 + $0xa2c] sm:$0xf0]  ;;  %v7339_v63 = vld [vmem:[#allocation6 + $0xbb0] sm:$0xf0] }
 0x163   :  { %2999 = vmatpush.bf16.msrb.mxu0 %v5934_v10  ;;  %v7146_v37 = vor.u32 %v9029_v22, %v7145_v21  ;;  %2962 = vmatpush.bf16.msrb.mxu3 %v6890_v20  ;;  %v8937_v2 = vld [vmem:[#allocation6 + $0x754] sm:$0xf]  ;;  %v7342_v10 = vor.u32 %v9073_v62, %v7339_v63 }
 0x164   :  { %3013 = vmatpush.bf16.msrb.mxu2 %v6158_v29  ;;  %v6795_v3 = vld [vmem:[#allocation6 + $0x770] sm:$0xf0] }
 0x165   :  { %2975 = vmatpush.bf16.msra.mxu1 %v7146_v37  ;;  %v8865_v5 = vld [vmem:[#allocation6 + $0x514] sm:$0xf]  ;;  %v6798_v12 = vor.u32 %v8937_v2, %v6795_v3 }
 0x166   :  { %2963 = vmatmul.bf16.vlgmr.msrb.gmra.mxu3 %v9776_v31  ;;  %v6507_v6 = vld [vmem:[#allocation6 + $0x530] sm:$0xf0] }
 0x167   :  { %3020 = vmatpush.bf16.msra.mxu3 %v6606_v23  ;;  %3000 = vmatpush.bf16.msrb.mxu0 %v5902_v28  ;;  %v9001_v11 = vld [vmem:[#allocation6 + $0x954] sm:$0xf]  ;;  %v6510_v16 = vor.u32 %v8865_v5, %v6507_v6  ;;  %v561_v28 = vperm.slane %v9798_v1, 2  ;;  %v2756_v33 = vpop.f32.mrf.mxu0 }
 0x168   :  { %3014 = vmatpush.bf16.msrb.mxu2 %v6126_v50  ;;  %v7051_v13 = vld [vmem:[#allocation6 + $0x970] sm:$0xf0]  ;;  %2976 = vmatmul.bf16.vlgmr.msra.gmra.mxu1 %v9778_v36 }
 0x169   :  { %3033 = vmatpush.bf16.msrb.mxu1 %v6862_v41  ;;  %v9065_v14 = vld [vmem:[#allocation6 + $0xb54] sm:$0xf]  ;;  %v7054_v21 = vor.u32 %v9001_v11, %v7051_v13  ;;  %v2731_v41 = vadd.f32 %v2730_v40, %v561_v28  ;;  %v6353_v28 = vld [vmem:[#allocation6 + $0x3d8] sm:$0xf] }
 0x16a   :  { %v7307_v15 = vld [vmem:[#allocation6 + $0xb70] sm:$0xf0] }
 0x16b   :  { %3021 = vmatpush.bf16.msra.mxu3 %v6574_v45  ;;  %3001 = vmatpush.bf16.msrb.mxu0 %v5870_v49  ;;  %v8929_v17 = vld [vmem:[#allocation6 + $0x714] sm:$0xf]  ;;  %v7310_v22 = vor.u32 %v9065_v14, %v7307_v15  ;;  %v2744_v57 = vadd.f32 %v2743_v51, %v2731_v41  ;;  %v8894_v41 = vld [vmem:[#allocation6 + $0x5f4] sm:$0xf0] }
 0x16c   :  { %3059 = vmatpush.bf16.msra.mxu2 %v7374_v55  ;;  %v6763_v18 = vld [vmem:[#allocation6 + $0x730] sm:$0xf0] }
 0x16d   :  { %3034 = vmatpush.bf16.msrb.mxu1 %v6830_v59  ;;  %v8857_v19 = vld [vmem:[#allocation6 + $0x4d4] sm:$0xf]  ;;  %3015 = vmatmul.bf16.vlgmr.msrb.gmra.mxu2 %v9768_v8  ;;  %v6766_v25 = vor.u32 %v8929_v17, %v6763_v18  ;;  %v2757_v5 = vadd.f32 %v2756_v33, %v2744_v57 }
 0x16e   :  { %v6475_v20 = vld [vmem:[#allocation6 + $0x4f0] sm:$0xf0]  ;;  %3002 = vmatmul.bf16.vlgmr.msrb.gmra.mxu0 %v9762_v56 }
 0x16f   :  { %3046 = vmatpush.bf16.msra.mxu0 %v7118_v54  ;;  %3022 = vmatpush.bf16.msra.mxu3 %v6542_v0  ;;  %v8993_v23 = vld [vmem:[#allocation6 + $0x914] sm:$0xf]  ;;  %v6478_v29 = vor.u32 %v8857_v19, %v6475_v20  ;;  %v2758_v4 = vpop.f32.mrf.mxu0 }
 0x170   :  { %3060 = vmatpush.bf16.msra.mxu2 %v7342_v10  ;;  %v7019_v24 = vld [vmem:[#allocation6 + $0x930] sm:$0xf0]  ;;  %v2769_v10 = vpop.f32.mrf.mxu2  ;;  %v8750_v4 = vld [vmem:[#allocation6 + $0x174] sm:$0xf0] }
 0x171   :  { %3035 = vmatpush.bf16.msrb.mxu1 %v6798_v12  ;;  %v9057_v26 = vld [vmem:[#allocation6 + $0xb14] sm:$0xf]  ;;  %v7022_v60 = vor.u32 %v8993_v23, %v7019_v24  ;;  %v9831_v17 = vadd.f32 %v2769_v10, %v2757_v5  ;;  %v6289_v5 = vld [vmem:[#allocation6 + $0x358] sm:$0xf] }
 0x172   :  { %v7275_v27 = vld [vmem:[#allocation6 + $0xb30] sm:$0xf0] }
 0x173   :  { %3047 = vmatpush.bf16.msra.mxu0 %v7086_v7  ;;  %3023 = vmatpush.bf16.msra.mxu3 %v6510_v16  ;;  %v8921_v30 = vld [vmem:[#allocation6 + $0x6d4] sm:$0xf]  ;;  %v7278_v39 = vor.u32 %v9057_v26, %v7275_v27  ;;  %v2732_v16 = vpop.f32.mrf.mxu1  ;;  %v8766_v27 = vld [vmem:[#allocation6 + $0x1f4] sm:$0xf0] }
 0x174   :  { %v6731_v32 = vld [vmem:[#allocation6 + $0x6f0] sm:$0xf0]  ;;  %3061 = vmatpush.bf16.msra.mxu2 %v7310_v22  ;;  %v8942_v16 = vld [vmem:[#allocation6 + $0x774] sm:$0xf0] }
 0x175   :  { %v8849_v34 = vld [vmem:[#allocation6 + $0x494] sm:$0xf]  ;;  %3036 = vmatpush.bf16.msrb.mxu1 %v6766_v25  ;;  %v6734_v42 = vor.u32 %v8921_v30, %v6731_v32  ;;  %v6097_v25 = vld [vmem:[#allocation6 + $0x1d8] sm:$0xf] }
 0x176   :  { %v6443_v37 = vld [vmem:[#allocation6 + $0x4b0] sm:$0xf0] }
 0x177   :  { %3048 = vmatpush.bf16.msra.mxu0 %v7054_v21  ;;  %v8985_v9 = vld [vmem:[#allocation6 + $0x8d4] sm:$0xf]  ;;  %3024 = vmatpush.bf16.msra.mxu3 %v6478_v29  ;;  %v6446_v1 = vor.u32 %v8849_v34, %v6443_v37  ;;  %v8830_v29 = vld [vmem:[#allocation6 + $0x3f4] sm:$0xf0] }
 0x178   :  { %v6987_v43 = vld [vmem:[#allocation6 + $0x8f0] sm:$0xf0]  ;;  %3062 = vmatpush.bf16.msra.mxu2 %v7278_v39 }
 0x179   :  { %v9049_v44 = vld [vmem:[#allocation6 + $0xad4] sm:$0xf]  ;;  %v6990_v53 = vor.u32 %v8985_v9, %v6987_v43  ;;  %3037 = vmatpush.bf16.msrb.mxu1 %v6734_v42  ;;  %v6609_v9 = vld [vmem:[#allocation6 + $0x5d8] sm:$0xf]  ;;  %v6098_v42 = vor.u32 %v8766_v27, %v6097_v25  ;;  %v6354_v43 = vor.u32 %v8830_v29, %v6353_v28 }
 0x17a   :  { %v7243_v45 = vld [vmem:[#allocation6 + $0xaf0] sm:$0xf0]  ;;  %v6513_v29 = vld [vmem:[#allocation6 + $0x518] sm:$0xf] }
 0x17b   :  { %v8913_v47 = vld [vmem:[#allocation6 + $0x694] sm:$0xf]  ;;  %3049 = vmatpush.bf16.msra.mxu0 %v7022_v60  ;;  %v7246_v54 = vor.u32 %v9049_v44, %v7243_v45  ;;  %3025 = vmatpush.bf16.msra.mxu3 %v6446_v1  ;;  %v2745_v60 = vpop.f32.mrf.mxu3  ;;  %v6865_v44 = vld [vmem:[#allocation6 + $0x7d8] sm:$0xf] }
 0x17c   :  { %v6699_v48 = vld [vmem:[#allocation6 + $0x6b0] sm:$0xf0]  ;;  %v8958_v45 = vld [vmem:[#allocation6 + $0x7f4] sm:$0xf0] }
 0x17d   :  { %v8841_v49 = vld [vmem:[#allocation6 + $0x454] sm:$0xf]  ;;  %v6702_v59 = vor.u32 %v8913_v47, %v6699_v48  ;;  %3063 = vmatpush.bf16.msra.mxu2 %v7246_v54  ;;  %v6065_v1 = vld [vmem:[#allocation6 + $0x198] sm:$0xf]  ;;  %v2771_v54 = vpop.f32.mrf.mxu2  ;;  %v6866_v57 = vor.u32 %v8958_v45, %v6865_v44 }
 0x17e   :  { %v6411_v50 = vld [vmem:[#allocation6 + $0x470] sm:$0xf0]  ;;  %v8758_v47 = vld [vmem:[#allocation6 + $0x1b4] sm:$0xf0]  ;;  %v9840_v54 = vld [vmem:[#allocation8] sm:$0xff] }
 0x17f   :  { %v8977_v55 = vld [vmem:[#allocation6 + $0x894] sm:$0xf]  ;;  %v6414_v0 = vor.u32 %v8841_v49, %v6411_v50  ;;  %3050 = vmatpush.bf16.msra.mxu0 %v6990_v53  ;;  %3038 = vmatpush.bf16.msrb.mxu1 %v6702_v59  ;;  %v6321_v48 = vld [vmem:[#allocation6 + $0x398] sm:$0xf]  ;;  %v9833_v50 = vpop.f32.mrf.mxu0 }
 0x180   :  { %v6955_v61 = vld [vmem:[#allocation6 + $0x8b0] sm:$0xf0]  ;;  %v8822_v49 = vld [vmem:[#allocation6 + $0x3b4] sm:$0xf0] }
 0x181   :  { %v9041_v62 = vld [vmem:[#allocation6 + $0xa94] sm:$0xf]  ;;  %v6958_v11 = vor.u32 %v8977_v55, %v6955_v61  ;;  %3026 = vmatpush.bf16.msra.mxu3 %v6414_v0  ;;  %v6610_v55 = vor.u32 %v8894_v41, %v6609_v9  ;;  %v6577_v59 = vld [vmem:[#allocation6 + $0x598] sm:$0xf] }
 0x182   :  { %v7211_v63 = vld [vmem:[#allocation6 + $0xab0] sm:$0xf0]  ;;  %v8886_v61 = vld [vmem:[#allocation6 + $0x5b4] sm:$0xf0] }
 0x183   :  { %v8905_v2 = vld [vmem:[#allocation6 + $0x654] sm:$0xf]  ;;  %v7214_v12 = vor.u32 %v9041_v62, %v7211_v63  ;;  %3051 = vmatpush.bf16.msra.mxu0 %v6958_v11  ;;  %v6066_v62 = vor.u32 %v8758_v47, %v6065_v1  ;;  %v6322_v63 = vor.u32 %v8822_v49, %v6321_v48  ;;  %v6833_v0 = vld [vmem:[#allocation6 + $0x798] sm:$0xf]  ;;  %v2795_v49 = vpop.f32.mrf.mxu3 }
 0x184   :  { %v6667_v3 = vld [vmem:[#allocation6 + $0x670] sm:$0xf0]  ;;  %v6545_v11 = vld [vmem:[#allocation6 + $0x558] sm:$0xf] }
 0x185   :  { %v8833_v6 = vld [vmem:[#allocation6 + $0x414] sm:$0xf]  ;;  %v6670_v18 = vor.u32 %v8905_v2, %v6667_v3  ;;  %3064 = vmatpush.bf16.msra.mxu2 %v7214_v12  ;;  %v8950_v2 = vld [vmem:[#allocation6 + $0x7b4] sm:$0xf0] }
 0x186   :  { %v6379_v7 = vld [vmem:[#allocation6 + $0x430] sm:$0xf0]  ;;  %v6033_v3 = vld [vmem:[#allocation6 + $0x158] sm:$0xf]  ;;  %v6834_v10 = vor.u32 %v8950_v2, %v6833_v0 }
 0x187   :  { %v8969_v13 = vld [vmem:[#allocation6 + $0x854] sm:$0xf]  ;;  %v6382_v22 = vor.u32 %v8833_v6, %v6379_v7  ;;  %3039 = vmatpush.bf16.msrb.mxu1 %v6670_v18  ;;  %v8814_v6 = vld [vmem:[#allocation6 + $0x374] sm:$0xf0]  ;;  %v6578_v7 = vor.u32 %v8886_v61, %v6577_v59 }
 0x188   :  { %v9089_v14 = vld [vmem:[#allocation6 + $0xc14] sm:$0xf]  ;;  %v8878_v12 = vld [vmem:[#allocation6 + $0x574] sm:$0xf0] }
 0x189   :  { %v7403_v15 = vld [vmem:[#allocation6 + $0xc30] sm:$0xf0]  ;;  %3027 = vmatpush.bf16.msra.mxu3 %v6382_v22  ;;  %v6001_v18 = vld [vmem:[#allocation6 + $0x118] sm:$0xf]  ;;  %v2810_v22 = vpop.f32.mrf.mxu0 }
 0x18a   :  { %v6923_v19 = vld [vmem:[#allocation6 + $0x870] sm:$0xf0]  ;;  %v7406_v26 = vor.u32 %v9089_v14, %v7403_v15  ;;  %v6290_v14 = vor.u32 %v8814_v6, %v6289_v5  ;;  %v6801_v15 = vld [vmem:[#allocation6 + $0x758] sm:$0xf] }
 0x18b   :  { %v9033_v20 = vld [vmem:[#allocation6 + $0xa54] sm:$0xf]  ;;  %v6926_v30 = vor.u32 %v8969_v13, %v6923_v19  ;;  %v6034_v13 = vor.u32 %v8750_v4, %v6033_v3  ;;  %v8742_v19 = vld [vmem:[#allocation6 + $0x134] sm:$0xf0]  ;;  %v6802_v25 = vor.u32 %v8942_v16, %v6801_v15 }
 0x18c   :  { %v7179_v21 = vld [vmem:[#allocation6 + $0xa70] sm:$0xf0]  ;;  %3028 = vmatmul.bf16.vlgmr.msra.gmra.mxu3 %v9760_v52  ;;  %v6002_v27 = vor.u32 %v8742_v19, %v6001_v18  ;;  %v6225_v60 = vld [vmem:[#allocation6 + $0x2d8] sm:$0xf] }
 0x18d   :  { %v8897_v23 = vld [vmem:[#allocation6 + $0x614] sm:$0xf]  ;;  %v7182_v32 = vor.u32 %v9033_v20, %v7179_v21  ;;  %3079 = vmatpush.bf16.msrb.mxu3 %v7406_v26  ;;  %3052 = vmatpush.bf16.msra.mxu0 %v6926_v30  ;;  %v6257_v20 = vld [vmem:[#allocation6 + $0x318] sm:$0xf] }
 0x18e   :  { %v6635_v24 = vld [vmem:[#allocation6 + $0x630] sm:$0xf0]  ;;  %v8806_v21 = vld [vmem:[#allocation6 + $0x334] sm:$0xf0] }
 0x18f   :  { %v8961_v33 = vld [vmem:[#allocation6 + $0x814] sm:$0xf]  ;;  %v6638_v39 = vor.u32 %v8897_v23, %v6635_v24  ;;  %3065 = vmatpush.bf16.msra.mxu2 %v7182_v32  ;;  %v2782_v23 = vpop.f32.mrf.mxu1  ;;  %v6546_v24 = vor.u32 %v8878_v12, %v6545_v11  ;;  %v6258_v28 = vor.u32 %v8806_v21, %v6257_v20  ;;  %v8870_v30 = vld [vmem:[#allocation6 + $0x534] sm:$0xf0]  ;;  %v2821_v11 = vpop.f32.mrf.mxu2 }
 0x190   :  { %v6891_v34 = vld [vmem:[#allocation6 + $0x830] sm:$0xf0]  ;;  %v2783_v26 = vadd.f32 %v2782_v23, %v9831_v17  ;;  %v6769_v32 = vld [vmem:[#allocation6 + $0x718] sm:$0xf] }
 0x191   :  { %v9025_v37 = vld [vmem:[#allocation6 + $0xa14] sm:$0xf]  ;;  %v6894_v51 = vor.u32 %v8961_v33, %v6891_v34  ;;  %3040 = vmatpush.bf16.msrb.mxu1 %v6638_v39  ;;  %3098 = vmatpush.bf16.msra.mxu3 %v6354_v43  ;;  %v8934_v33 = vld [vmem:[#allocation6 + $0x734] sm:$0xf0]  ;;  %v2834_v48 = vpop.f32.mrf.mxu0 }
 0x192   :  { %v7147_v40 = vld [vmem:[#allocation6 + $0xa30] sm:$0xf0]  ;;  %v5969_v34 = vld [vmem:[#allocation6 + $0xd8] sm:$0xf]  ;;  %v6770_v9 = vor.u32 %v8934_v33, %v6769_v32  ;;  %v2797_v32 = vpop.f32.mrf.mxu3 }
 0x193   :  { %v7150_v53 = vor.u32 %v9025_v37, %v7147_v40  ;;  %3053 = vmatpush.bf16.msra.mxu0 %v6894_v51  ;;  %v8734_v37 = vld [vmem:[#allocation6 + $0xf4] sm:$0xf0]  ;;  %v6514_v40 = vor.u32 %v8870_v30, %v6513_v29 }
 0x194   :  { %3041 = vmatmul.bf16.vlgmr.msrb.gmra.mxu1 %v9764_v58  ;;  %v8798_v39 = vld [vmem:[#allocation6 + $0x2f4] sm:$0xf0]  ;;  %v5970_v41 = vor.u32 %v8734_v37, %v5969_v34 }
 0x195   :  { %3085 = vmatpush.bf16.msra.mxu1 %v6098_v42  ;;  %3066 = vmatpush.bf16.msra.mxu2 %v7150_v53  ;;  %v6481_v17 = vld [vmem:[#allocation6 + $0x4d8] sm:$0xf]  ;;  %v6226_v44 = vor.u32 %v8798_v39, %v6225_v60 }
 0x196   :  { %3099 = vmatpush.bf16.msra.mxu3 %v6322_v63  ;;  %3054 = vmatmul.bf16.vlgmr.msra.gmra.mxu0 %v9776_v31  ;;  %v8862_v42 = vld [vmem:[#allocation6 + $0x4f4] sm:$0xf0] }
 0x197   :  { %3111 = vmatpush.bf16.msrb.mxu0 %v6610_v55  ;;  %v6737_v43 = vld [vmem:[#allocation6 + $0x6d8] sm:$0xf]  ;;  %v562_v55 = vperm.slane %v9840_v54, 3  ;;  %v6482_v59 = vor.u32 %v8862_v42, %v6481_v17  ;;  %v2784_v61 = vpop.f32.mrf.mxu1 }
 0x198   :  { %3067 = vmatmul.bf16.vlgmr.msra.gmra.mxu2 %v9778_v36  ;;  %v8926_v45 = vld [vmem:[#allocation6 + $0x6f4] sm:$0xf0] }
 0x199   :  { %3124 = vmatpush.bf16.msrb.mxu2 %v6866_v57  ;;  %3086 = vmatpush.bf16.msra.mxu1 %v6066_v62  ;;  %v5937_v1 = vld [vmem:[#allocation6 + $0x98] sm:$0xf]  ;;  %v2796_v57 = vadd.f32 %v2795_v49, %v2783_v26  ;;  %v6738_v62 = vor.u32 %v8926_v45, %v6737_v43  ;;  %v6099_v49 = vld [vmem:[#allocation6 + $0x1f8] sm:$0xf0] }
 0x19a   :  { %3100 = vmatpush.bf16.msra.mxu3 %v6290_v14  ;;  %v8726_v47 = vld [vmem:[#allocation6 + $0xb4] sm:$0xf0]  ;;  %v2822_v14 = vadd.f32 %v2821_v11, %v562_v55 }
 0x19b   :  { %3112 = vmatpush.bf16.msrb.mxu0 %v6578_v7  ;;  %v6193_v51 = vld [vmem:[#allocation6 + $0x298] sm:$0xf]  ;;  %v5938_v63 = vor.u32 %v8726_v47, %v5937_v1  ;;  %v9846_v4 = vadd.f32 %v9833_v50, %v2796_v57  ;;  %v2823_v47 = vpop.f32.mrf.mxu2 }
 0x19c   :  { %v8790_v53 = vld [vmem:[#allocation6 + $0x2b4] sm:$0xf0]  ;;  %7420 = vmatmul.msk.bf16.vlgmr.msrb.gmra.mxu3 %vm2535_vm0, %v9772_v46  ;;  %v9848_v22 = vadd.f32 %v2834_v48, %v2822_v14 }
 0x19d   :  { %3125 = vmatpush.bf16.msrb.mxu2 %v6834_v10  ;;  %3087 = vmatpush.bf16.msra.mxu1 %v6034_v13  ;;  %v6449_v0 = vld [vmem:[#allocation6 + $0x498] sm:$0xf]  ;;  %v6194_v5 = vor.u32 %v8790_v53, %v6193_v51 }
 0x19e   :  { %3101 = vmatpush.bf16.msra.mxu3 %v6258_v28  ;;  %v8854_v2 = vld [vmem:[#allocation6 + $0x4b4] sm:$0xf0] }
 0x19f   :  { %3113 = vmatpush.bf16.msrb.mxu0 %v6546_v24  ;;  %v6705_v3 = vld [vmem:[#allocation6 + $0x698] sm:$0xf]  ;;  %v6450_v15 = vor.u32 %v8854_v2, %v6449_v0  ;;  %v6355_v0 = vld [vmem:[#allocation6 + $0x3f8] sm:$0xf0] }
 0x1a0   :  { %v8918_v6 = vld [vmem:[#allocation6 + $0x6b4] sm:$0xf0] }
 0x1a1   :  { %3126 = vmatpush.bf16.msrb.mxu2 %v6802_v25  ;;  %3088 = vmatpush.bf16.msra.mxu1 %v6002_v27  ;;  %v5905_v7 = vld [vmem:[#allocation6 + $0x58] sm:$0xf]  ;;  %v6706_v18 = vor.u32 %v8918_v6, %v6705_v3  ;;  %v2836_v27 = vpop.f32.mrf.mxu0 }
 0x1a2   :  { %3102 = vmatpush.bf16.msra.mxu3 %v6226_v44  ;;  %v8718_v10 = vld [vmem:[#allocation6 + $0x74] sm:$0xf0]  ;;  %v8762_v44 = vld [vmem:[#allocation6 + $0x1dc] sm:$0xf] }
 0x1a3   :  { %3114 = vmatpush.bf16.msrb.mxu0 %v6514_v40  ;;  %v6161_v12 = vld [vmem:[#allocation6 + $0x258] sm:$0xf]  ;;  %v5906_v19 = vor.u32 %v8718_v10, %v5905_v7  ;;  %v6102_v2 = vor.u32 %v8762_v44, %v6099_v49  ;;  %v6067_v7 = vld [vmem:[#allocation6 + $0x1b8] sm:$0xf0] }
 0x1a4   :  { %v8782_v13 = vld [vmem:[#allocation6 + $0x274] sm:$0xf0]  ;;  %v6259_v44 = vld [vmem:[#allocation6 + $0x338] sm:$0xf0] }
 0x1a5   :  { %3127 = vmatpush.bf16.msrb.mxu2 %v6770_v9  ;;  %3089 = vmatpush.bf16.msra.mxu1 %v5970_v41  ;;  %v6417_v16 = vld [vmem:[#allocation6 + $0x458] sm:$0xf]  ;;  %v6162_v23 = vor.u32 %v8782_v13, %v6161_v12 }
 0x1a6   :  { %v8846_v20 = vld [vmem:[#allocation6 + $0x474] sm:$0xf0]  ;;  %3103 = vmatpush.bf16.msra.mxu3 %v6194_v5  ;;  %v8754_v5 = vld [vmem:[#allocation6 + $0x19c] sm:$0xf] }
 0x1a7   :  { %3115 = vmatpush.bf16.msrb.mxu0 %v6482_v59  ;;  %v6673_v21 = vld [vmem:[#allocation6 + $0x658] sm:$0xf]  ;;  %v6418_v33 = vor.u32 %v8846_v20, %v6417_v16  ;;  %v6323_v16 = vld [vmem:[#allocation6 + $0x3b8] sm:$0xf0] }
 0x1a8   :  { %v8910_v50 = vld [vmem:[#allocation6 + $0x674] sm:$0xf0]  ;;  %v8746_v20 = vld [vmem:[#allocation6 + $0x15c] sm:$0xf] }
 0x1a9   :  { %3128 = vmatpush.bf16.msrb.mxu2 %v6738_v62  ;;  %3090 = vmatpush.bf16.msra.mxu1 %v5938_v63  ;;  %v5873_v24 = vld [vmem:[#allocation6 + $0x18] sm:$0xf]  ;;  %v6674_v39 = vor.u32 %v8910_v50, %v6673_v21  ;;  %v8826_v63 = vld [vmem:[#allocation6 + $0x3dc] sm:$0xf] }
 0x1aa   :  { %v8710_v25 = vld [vmem:[#allocation6 + $0x34] sm:$0xf0]  ;;  %3104 = vmatpush.bf16.msra.mxu3 %v6162_v23  ;;  %v6358_v12 = vor.u32 %v8826_v63, %v6355_v0  ;;  %v6035_v50 = vld [vmem:[#allocation6 + $0x178] sm:$0xf0] }
 0x1ab   :  { %v6129_v26 = vld [vmem:[#allocation6 + $0x218] sm:$0xf]  ;;  %3116 = vmatpush.bf16.msrb.mxu0 %v6450_v15  ;;  %v5874_v40 = vor.u32 %v8710_v25, %v5873_v24  ;;  %v8818_v15 = vld [vmem:[#allocation6 + $0x39c] sm:$0xf] }
 0x1ac   :  { %v8774_v28 = vld [vmem:[#allocation6 + $0x234] sm:$0xf0]  ;;  %v6326_v25 = vor.u32 %v8818_v15, %v6323_v16  ;;  %v8794_v0 = vld [vmem:[#allocation6 + $0x2dc] sm:$0xf] }
 0x1ad   :  { %v7121_v29 = vld [vmem:[#allocation6 + $0x9d8] sm:$0xf]  ;;  %3129 = vmatpush.bf16.msrb.mxu2 %v6706_v18  ;;  %3091 = vmatpush.bf16.msra.mxu1 %v5906_v19  ;;  %v6130_v42 = vor.u32 %v8774_v28, %v6129_v26  ;;  %v6070_v18 = vor.u32 %v8754_v5, %v6067_v7  ;;  %v2847_v28 = vpop.f32.mrf.mxu1  ;;  %v8722_v7 = vld [vmem:[#allocation6 + $0x9c] sm:$0xf] }
 0x1ae   :  { %v9022_v30 = vld [vmem:[#allocation6 + $0x9f4] sm:$0xf0]  ;;  %v2848_v32 = vadd.f32 %v2847_v28, %v9848_v22  ;;  %v8730_v22 = vld [vmem:[#allocation6 + $0xdc] sm:$0xf] }
 0x1af   :  { %v7377_v34 = vld [vmem:[#allocation6 + $0xbd8] sm:$0xf]  ;;  %v7122_v43 = vor.u32 %v9022_v30, %v7121_v29  ;;  %3117 = vmatpush.bf16.msrb.mxu0 %v6418_v33  ;;  %3105 = vmatpush.bf16.msra.mxu3 %v6130_v42  ;;  %v8810_v29 = vld [vmem:[#allocation6 + $0x35c] sm:$0xf]  ;;  %v6038_v33 = vor.u32 %v8746_v20, %v6035_v50 }
 0x1b0   :  { %v9086_v37 = vld [vmem:[#allocation6 + $0xbf4] sm:$0xf0]  ;;  %v6291_v30 = vld [vmem:[#allocation6 + $0x378] sm:$0xf0] }
 0x1b1   :  { %v6385_v60 = vld [vmem:[#allocation6 + $0x418] sm:$0xf]  ;;  %v7378_v48 = vor.u32 %v9086_v37, %v7377_v34  ;;  %3130 = vmatpush.bf16.msrb.mxu2 %v6674_v39  ;;  %3092 = vmatpush.bf16.msra.mxu1 %v5874_v40  ;;  %v8738_v37 = vld [vmem:[#allocation6 + $0x11c] sm:$0xf] }
 0x1b2   :  { %v8838_v9 = vld [vmem:[#allocation6 + $0x434] sm:$0xf0]  ;;  %3106 = vmatmul.bf16.vlgmr.msra.gmra.mxu3 %v9768_v8  ;;  %v6003_v39 = vld [vmem:[#allocation6 + $0x138] sm:$0xf0] }
 0x1b3   :  { %v6641_v41 = vld [vmem:[#allocation6 + $0x618] sm:$0xf]  ;;  %v6386_v55 = vor.u32 %v8838_v9, %v6385_v60  ;;  %3150 = vmatpush.bf16.msrb.mxu3 %v7378_v48  ;;  %v5971_v48 = vld [vmem:[#allocation6 + $0xf8] sm:$0xf0] }
 0x1b4   :  { %v8902_v17 = vld [vmem:[#allocation6 + $0x634] sm:$0xf0]  ;;  %3093 = vmatmul.bf16.vlgmr.msra.gmra.mxu1 %v9762_v56  ;;  %v5974_v5 = vor.u32 %v8730_v22, %v5971_v48  ;;  %v8786_v20 = vld [vmem:[#allocation6 + $0x29c] sm:$0xf] }
 0x1b5   :  { %v7409_v45 = vld [vmem:[#allocation6 + $0xc18] sm:$0xf]  ;;  %v6642_v61 = vor.u32 %v8902_v17, %v6641_v41  ;;  %3137 = vmatpush.bf16.msrb.mxu1 %v7122_v43  ;;  %3118 = vmatpush.bf16.msrb.mxu0 %v6386_v55  ;;  %v6294_v41 = vor.u32 %v8810_v29, %v6291_v30  ;;  %v8802_v43 = vld [vmem:[#allocation6 + $0x31c] sm:$0xf]  ;;  %v2849_v63 = vpop.f32.mrf.mxu1 }
 0x1b6   :  { %v9094_v1 = vld [vmem:[#allocation6 + $0xc34] sm:$0xf0]  ;;  %v6262_v55 = vor.u32 %v8802_v43, %v6259_v44  ;;  %v8706_v44 = vld [vmem:[#allocation6 + $0x1c] sm:$0xf] }
 0x1b7   :  { %v7089_v51 = vld [vmem:[#allocation6 + $0x998] sm:$0xf]  ;;  %v7410_v62 = vor.u32 %v9094_v1, %v7409_v45  ;;  %3131 = vmatpush.bf16.msrb.mxu2 %v6642_v61  ;;  %v6006_v45 = vor.u32 %v8738_v37, %v6003_v39  ;;  %v8954_v37 = vld [vmem:[#allocation6 + $0x7dc] sm:$0xf] }
 0x1b8   :  { %v9014_v53 = vld [vmem:[#allocation6 + $0x9b4] sm:$0xf0]  ;;  %3119 = vmatmul.bf16.vlgmr.msrb.gmra.mxu0 %v9760_v52  ;;  %v9018_v48 = vld [vmem:[#allocation6 + $0x9dc] sm:$0xf] }
 0x1b9   :  { %v7345_v57 = vld [vmem:[#allocation6 + $0xb98] sm:$0xf]  ;;  %v7090_v3 = vor.u32 %v9014_v53, %v7089_v51  ;;  %3170 = vmatpush.bf16.msra.mxu0 %v7410_v62  ;;  %v2860_v53 = vpop.f32.mrf.mxu3  ;;  %v6131_v63 = vld [vmem:[#allocation6 + $0x238] sm:$0xf0] }
 0x1ba   :  { %v9078_v59 = vld [vmem:[#allocation6 + $0xbb4] sm:$0xf0]  ;;  %3132 = vmatmul.bf16.vlgmr.msrb.gmra.mxu2 %v9764_v58  ;;  %v2861_v62 = vadd.f32 %v2860_v53, %v2848_v32 }
 0x1bb   :  { %v7346_v6 = vor.u32 %v9078_v59, %v7345_v57  ;;  %v7057_v10 = vld [vmem:[#allocation6 + $0x958] sm:$0xf]  ;;  %3176 = vmatpush.bf16.msra.mxu2 %v6102_v2  ;;  %3138 = vmatpush.bf16.msrb.mxu1 %v7090_v3  ;;  %v2886_v57 = vpop.f32.mrf.mxu0  ;;  %v6227_v2 = vld [vmem:[#allocation6 + $0x2f8] sm:$0xf0]  ;;  %v2873_v3 = vpop.f32.mrf.mxu2 }
 0x1bc   :  { %v9006_v11 = vld [vmem:[#allocation6 + $0x974] sm:$0xf0]  ;;  %v6230_v15 = vor.u32 %v8794_v0, %v6227_v2  ;;  %v9082_v2 = vld [vmem:[#allocation6 + $0xbdc] sm:$0xf] }
 0x1bd   :  { %v7313_v13 = vld [vmem:[#allocation6 + $0xb58] sm:$0xf]  ;;  %v7058_v19 = vor.u32 %v9006_v11, %v7057_v10  ;;  %3151 = vmatpush.bf16.msrb.mxu3 %v7346_v6  ;;  %3189 = vmatpush.bf16.msrb.mxu0 %v6358_v12  ;;  %v2874_v10 = vadd.f32 %v2873_v3, %v2861_v62  ;;  %v5939_v12 = vld [vmem:[#allocation6 + $0xb8] sm:$0xf0] }
 0x1be   :  { %v9070_v14 = vld [vmem:[#allocation6 + $0xb74] sm:$0xf0]  ;;  %v5942_v50 = vor.u32 %v8722_v7, %v5939_v12  ;;  %v8770_v62 = vld [vmem:[#allocation6 + $0x21c] sm:$0xf] }
 0x1bf   :  { %v7314_v21 = vor.u32 %v9070_v14, %v7313_v13  ;;  %v7025_v23 = vld [vmem:[#allocation6 + $0x918] sm:$0xf]  ;;  %3177 = vmatpush.bf16.msra.mxu2 %v6070_v18  ;;  %3139 = vmatpush.bf16.msrb.mxu1 %v7058_v19  ;;  %v9855_v19 = vadd.f32 %v2886_v57, %v2874_v10  ;;  %v6579_v57 = vld [vmem:[#allocation6 + $0x5b8] sm:$0xf0] }
 0x1c0   :  { %v8998_v24 = vld [vmem:[#allocation6 + $0x934] sm:$0xf0]  ;;  %v7379_v3 = vld [vmem:[#allocation6 + $0xbf8] sm:$0xf0] }
 0x1c1   :  { %v7281_v26 = vld [vmem:[#allocation6 + $0xb18] sm:$0xf]  ;;  %v7026_v34 = vor.u32 %v8998_v24, %v7025_v23  ;;  %3152 = vmatpush.bf16.msrb.mxu3 %v7314_v21  ;;  %3190 = vmatpush.bf16.msrb.mxu0 %v6326_v25  ;;  %v6195_v21 = vld [vmem:[#allocation6 + $0x2b8] sm:$0xf0] }
 0x1c2   :  { %v9062_v27 = vld [vmem:[#allocation6 + $0xb34] sm:$0xf0]  ;;  %v8714_v24 = vld [vmem:[#allocation6 + $0x5c] sm:$0xf]  ;;  %v6198_v32 = vor.u32 %v8786_v20, %v6195_v21 }
 0x1c3   :  { %v7282_v60 = vor.u32 %v9062_v27, %v7281_v26  ;;  %v6993_v40 = vld [vmem:[#allocation6 + $0x8d8] sm:$0xf]  ;;  %3178 = vmatpush.bf16.msra.mxu2 %v6038_v33  ;;  %3140 = vmatpush.bf16.msrb.mxu1 %v7026_v34  ;;  %v5907_v25 = vld [vmem:[#allocation6 + $0x78] sm:$0xf0]  ;;  %v2888_v39 = vpop.f32.mrf.mxu0 }
 0x1c4   :  { %v8990_v9 = vld [vmem:[#allocation6 + $0x8f4] sm:$0xf0]  ;;  %v8890_v33 = vld [vmem:[#allocation6 + $0x5dc] sm:$0xf] }
 0x1c5   :  { %v7249_v17 = vld [vmem:[#allocation6 + $0xad8] sm:$0xf]  ;;  %v6994_v1 = vor.u32 %v8990_v9, %v6993_v40  ;;  %3153 = vmatpush.bf16.msrb.mxu3 %v7282_v60  ;;  %3191 = vmatpush.bf16.msrb.mxu0 %v6294_v41  ;;  %v6611_v34 = vld [vmem:[#allocation6 + $0x5f8] sm:$0xf0]  ;;  %v2862_v60 = vpop.f32.mrf.mxu3  ;;  %v9859_v40 = vpop.f32.mrf.mxu1 }
 0x1c6   :  { %v9054_v42 = vld [vmem:[#allocation6 + $0xaf4] sm:$0xf0]  ;;  %v6867_v9 = vld [vmem:[#allocation6 + $0x7f8] sm:$0xf0]  ;;  %v6614_v22 = vor.u32 %v8890_v33, %v6611_v34 }
 0x1c7   :  { %v7250_v47 = vor.u32 %v9054_v42, %v7249_v17  ;;  %v6961_v49 = vld [vmem:[#allocation6 + $0x898] sm:$0xf]  ;;  %3179 = vmatpush.bf16.msra.mxu2 %v6006_v45  ;;  %3141 = vmatpush.bf16.msrb.mxu1 %v6994_v1  ;;  %v8778_v41 = vld [vmem:[#allocation6 + $0x25c] sm:$0xf]  ;;  %v5910_v42 = vor.u32 %v8714_v24, %v5907_v25  ;;  %v2875_v45 = vpop.f32.mrf.mxu2 }
 0x1c8   :  { %v8982_v51 = vld [vmem:[#allocation6 + $0x8b4] sm:$0xf0]  ;;  %7421 = vmatmul.msk.bf16.vlgmr.msra.gmra.mxu0 %vm2535_vm0, %v9772_v46  ;;  %v6163_v17 = vld [vmem:[#allocation6 + $0x278] sm:$0xf0] }
 0x1c9   :  { %v7217_v59 = vld [vmem:[#allocation6 + $0xa98] sm:$0xf]  ;;  %v6962_v6 = vor.u32 %v8982_v51, %v6961_v49  ;;  %3154 = vmatpush.bf16.msrb.mxu3 %v7250_v47  ;;  %3192 = vmatpush.bf16.msrb.mxu0 %v6262_v55  ;;  %v5875_v47 = vld [vmem:[#allocation6 + $0x38] sm:$0xf0]  ;;  %v6870_v51 = vor.u32 %v8954_v37, %v6867_v9  ;;  %v6166_v53 = vor.u32 %v8778_v41, %v6163_v17 }
 0x1ca   :  { %v9046_v61 = vld [vmem:[#allocation6 + $0xab4] sm:$0xf0]  ;;  %v7123_v49 = vld [vmem:[#allocation6 + $0x9f8] sm:$0xf0]  ;;  %v5878_v0 = vor.u32 %v8706_v44, %v5875_v47 }
 0x1cb   :  { %v7218_v11 = vor.u32 %v9046_v61, %v7217_v59  ;;  %v6929_v13 = vld [vmem:[#allocation6 + $0x858] sm:$0xf]  ;;  %3180 = vmatpush.bf16.msra.mxu2 %v5974_v5  ;;  %3142 = vmatpush.bf16.msrb.mxu1 %v6962_v6  ;;  %v8882_v55 = vld [vmem:[#allocation6 + $0x59c] sm:$0xf]  ;;  %v7126_v5 = vor.u32 %v9018_v48, %v7123_v49 }
 0x1cc   :  { %v8974_v14 = vld [vmem:[#allocation6 + $0x874] sm:$0xf0]  ;;  %v8946_v59 = vld [vmem:[#allocation6 + $0x79c] sm:$0xf]  ;;  %v6582_v6 = vor.u32 %v8882_v55, %v6579_v57 }
 0x1cd   :  { %v7185_v16 = vld [vmem:[#allocation6 + $0xa58] sm:$0xf]  ;;  %v6930_v23 = vor.u32 %v8974_v14, %v6929_v13  ;;  %3155 = vmatpush.bf16.msrb.mxu3 %v7218_v11  ;;  %3193 = vmatpush.bf16.msrb.mxu0 %v6230_v15  ;;  %v6835_v61 = vld [vmem:[#allocation6 + $0x7b8] sm:$0xf0]  ;;  %v6134_v11 = vor.u32 %v8770_v62, %v6131_v63  ;;  %v7382_v15 = vor.u32 %v9082_v2, %v7379_v3  ;;  %v2901_v20 = vpop.f32.mrf.mxu1  ;;  %v9867_v63 = vpop.f32.mrf.mxu0 }
 0x1ce   :  { %v9038_v18 = vld [vmem:[#allocation6 + $0xa74] sm:$0xf0]  ;;  %v9010_v7 = vld [vmem:[#allocation6 + $0x99c] sm:$0xf]  ;;  %v6838_v10 = vor.u32 %v8946_v59, %v6835_v61 }
 0x1cf   :  { %v6897_v26 = vld [vmem:[#allocation6 + $0x818] sm:$0xf]  ;;  %v7186_v27 = vor.u32 %v9038_v18, %v7185_v16  ;;  %3181 = vmatpush.bf16.msra.mxu2 %v5942_v50  ;;  %3143 = vmatpush.bf16.msrb.mxu1 %v6930_v23  ;;  %v7091_v12 = vld [vmem:[#allocation6 + $0x9b8] sm:$0xf0] }
 0x1d0   :  { %v8966_v28 = vld [vmem:[#allocation6 + $0x834] sm:$0xf0]  ;;  %v8874_v13 = vld [vmem:[#allocation6 + $0x55c] sm:$0xf]  ;;  %v7094_v23 = vor.u32 %v9010_v7, %v7091_v12 }
 0x1d1   :  { %v7153_v29 = vld [vmem:[#allocation6 + $0xa18] sm:$0xf]  ;;  %v6898_v43 = vor.u32 %v8966_v28, %v6897_v26  ;;  %3156 = vmatpush.bf16.msrb.mxu3 %v7186_v27  ;;  %3194 = vmatpush.bf16.msrb.mxu0 %v6198_v32  ;;  %v6547_v14 = vld [vmem:[#allocation6 + $0x578] sm:$0xf0] }
 0x1d2   :  { %v9030_v30 = vld [vmem:[#allocation6 + $0xa34] sm:$0xf0]  ;;  %v8938_v16 = vld [vmem:[#allocation6 + $0x75c] sm:$0xf]  ;;  %v6550_v24 = vor.u32 %v8874_v13, %v6547_v14 }
 0x1d3   :  { %v7154_v1 = vor.u32 %v9030_v30, %v7153_v29  ;;  %3182 = vmatpush.bf16.msra.mxu2 %v5910_v42  ;;  %3144 = vmatpush.bf16.msrb.mxu1 %v6898_v43  ;;  %v6803_v18 = vld [vmem:[#allocation6 + $0x778] sm:$0xf0] }
 0x1d4   :  { %v9074_v21 = vld [vmem:[#allocation6 + $0xb9c] sm:$0xf]  ;;  %v6806_v26 = vor.u32 %v8938_v16, %v6803_v18 }
 0x1d5   :  { %3157 = vmatpush.bf16.msrb.mxu3 %v7154_v1  ;;  %3195 = vmatpush.bf16.msrb.mxu0 %v6166_v53  ;;  %v7347_v50 = vld [vmem:[#allocation6 + $0xbb8] sm:$0xf0] }
 0x1d6   :  { %3145 = vmatmul.bf16.vlgmr.msrb.gmra.mxu1 %v9776_v31  ;;  %v9002_v25 = vld [vmem:[#allocation6 + $0x95c] sm:$0xf]  ;;  %v7350_v30 = vor.u32 %v9074_v21, %v7347_v50 }
 0x1d7   :  { %3202 = vmatpush.bf16.msra.mxu1 %v6614_v22  ;;  %3183 = vmatpush.bf16.msra.mxu2 %v5878_v0  ;;  %v7059_v27 = vld [vmem:[#allocation6 + $0x978] sm:$0xf0]  ;;  %v9865_v22 = vpop.f32.mrf.mxu1  ;;  %v9869_v0 = vpop.f32.mrf.mxu3 }
 0x1d8   :  { %3158 = vmatmul.bf16.vlgmr.msrb.gmra.mxu3 %v9778_v36  ;;  %v8866_v28 = vld [vmem:[#allocation6 + $0x51c] sm:$0xf]  ;;  %v7062_v60 = vor.u32 %v9002_v25, %v7059_v27 }
 0x1d9   :  { %3215 = vmatpush.bf16.msra.mxu3 %v6870_v51  ;;  %3196 = vmatpush.bf16.msrb.mxu0 %v6134_v11  ;;  %v6515_v29 = vld [vmem:[#allocation6 + $0x538] sm:$0xf0] }
 0x1da   :  { %v8930_v32 = vld [vmem:[#allocation6 + $0x71c] sm:$0xf]  ;;  %3184 = vmatmul.bf16.vlgmr.msra.gmra.mxu2 %v9762_v56  ;;  %v6518_v39 = vor.u32 %v8866_v28, %v6515_v29 }
 0x1db   :  { %3228 = vmatpush.bf16.msrb.mxu2 %v7126_v5  ;;  %3203 = vmatpush.bf16.msra.mxu1 %v6582_v6  ;;  %v6771_v33 = vld [vmem:[#allocation6 + $0x738] sm:$0xf0] }
 0x1dc   :  { %v9066_v34 = vld [vmem:[#allocation6 + $0xb5c] sm:$0xf]  ;;  %v6774_v41 = vor.u32 %v8930_v32, %v6771_v33  ;;  %3197 = vmatmul.bf16.vlgmr.msrb.gmra.mxu0 %v9768_v8 }
 0x1dd   :  { %3216 = vmatpush.bf16.msra.mxu3 %v6838_v10  ;;  %3241 = vmatpush.bf16.msra.mxu0 %v7382_v15  ;;  %v7315_v37 = vld [vmem:[#allocation6 + $0xb78] sm:$0xf0]  ;;  %v9871_v10 = vpop.f32.mrf.mxu2 }
 0x1de   :  { %v8994_v9 = vld [vmem:[#allocation6 + $0x91c] sm:$0xf]  ;;  %v7318_v44 = vor.u32 %v9066_v34, %v7315_v37  ;;  %v7537_v34 = vld [vmem:[#allocation9 + $0xe0] sm:$0xf] }
 0x1df   :  { %3229 = vmatpush.bf16.msrb.mxu2 %v7094_v23  ;;  %3204 = vmatpush.bf16.msra.mxu1 %v6550_v24  ;;  %v7027_v17 = vld [vmem:[#allocation6 + $0x938] sm:$0xf0]  ;;  %v2927_v20 = vpop.f32.mrf.mxu1 }
 0x1e0   :  { %v8858_v42 = vld [vmem:[#allocation6 + $0x4dc] sm:$0xf]  ;;  %v7030_v48 = vor.u32 %v8994_v9, %v7027_v17  ;;  %v9125_v9 = vld [vmem:[#allocation9 + $0xec] sm:$0xf0] }
 0x1e1   :  { %3217 = vmatpush.bf16.msra.mxu3 %v6806_v26  ;;  %v6483_v43 = vld [vmem:[#allocation6 + $0x4f8] sm:$0xf0]  ;;  %3242 = vmatpush.bf16.msra.mxu0 %v7350_v30 }
 0x1e2   :  { %v8922_v45 = vld [vmem:[#allocation6 + $0x6dc] sm:$0xf]  ;;  %v6486_v49 = vor.u32 %v8858_v42, %v6483_v43  ;;  %v2914_v42 = vpop.f32.mrf.mxu3 }
 0x1e3   :  { %v6739_v1 = vld [vmem:[#allocation6 + $0x6f8] sm:$0xf0]  ;;  %3230 = vmatpush.bf16.msrb.mxu2 %v7062_v60  ;;  %3205 = vmatpush.bf16.msra.mxu1 %v6518_v39  ;;  %v2953_v39 = vpop.f32.mrf.mxu0  ;;  %v9145_v42 = vld [vmem:[#allocation9 + $0x18c] sm:$0xf0] }
 0x1e4   :  { %v9058_v56 = vld [vmem:[#allocation6 + $0xb1c] sm:$0xf]  ;;  %v6742_v53 = vor.u32 %v8922_v45, %v6739_v1 }
 0x1e5   :  { %v7283_v47 = vld [vmem:[#allocation6 + $0xb38] sm:$0xf0]  ;;  %3218 = vmatpush.bf16.msra.mxu3 %v6774_v41  ;;  %3243 = vmatpush.bf16.msra.mxu0 %v7318_v44  ;;  %v2940_v1 = vpop.f32.mrf.mxu2 }
 0x1e6   :  { %v8986_v51 = vld [vmem:[#allocation6 + $0x8dc] sm:$0xf]  ;;  %v7286_v8 = vor.u32 %v9058_v56, %v7283_v47  ;;  %v9109_v1 = vld [vmem:[#allocation9 + $0x6c] sm:$0xf0] }
 0x1e7   :  { %v6995_v55 = vld [vmem:[#allocation6 + $0x8f8] sm:$0xf0]  ;;  %3231 = vmatpush.bf16.msrb.mxu2 %v7030_v48  ;;  %3206 = vmatpush.bf16.msra.mxu1 %v6486_v49  ;;  %v7665_v49 = vld [vmem:[#allocation9 + $0x1e0] sm:$0xf] }
 0x1e8   :  { %v8850_v57 = vld [vmem:[#allocation6 + $0x49c] sm:$0xf]  ;;  %v6998_v5 = vor.u32 %v8986_v51, %v6995_v55  ;;  %v9157_v51 = vld [vmem:[#allocation9 + $0x1ec] sm:$0xf0] }
 0x1e9   :  { %v6451_v59 = vld [vmem:[#allocation6 + $0x4b8] sm:$0xf0]  ;;  %3219 = vmatpush.bf16.msra.mxu3 %v6742_v53  ;;  %3244 = vmatpush.bf16.msra.mxu0 %v7286_v8  ;;  %v7538_v53 = vor.u32 %v9125_v9, %v7537_v34  ;;  %v7521_v8 = vld [vmem:[#allocation9 + $0xc0] sm:$0xf]  ;;  %v9113_v34 = vld [vmem:[#allocation9 + $0x8c] sm:$0xf0] }
 0x1ea   :  { %v8914_v61 = vld [vmem:[#allocation6 + $0x69c] sm:$0xf]  ;;  %v6454_v6 = vor.u32 %v8850_v57, %v6451_v59  ;;  %v7793_v57 = vld [vmem:[#allocation9 + $0x2e0] sm:$0xf]  ;;  %v9189_v59 = vld [vmem:[#allocation9 + $0x2ec] sm:$0xf0] }
 0x1eb   :  { %v6707_v62 = vld [vmem:[#allocation6 + $0x6b8] sm:$0xf0]  ;;  %3232 = vmatpush.bf16.msrb.mxu2 %v6998_v5  ;;  %v7921_v5 = vld [vmem:[#allocation9 + $0x3e0] sm:$0xf] }
 0x1ec   :  { %v9050_v2 = vld [vmem:[#allocation6 + $0xadc] sm:$0xf]  ;;  %v6710_v11 = vor.u32 %v8914_v61, %v6707_v62  ;;  %3207 = vmatpush.bf16.msra.mxu1 %v6454_v6  ;;  %v9121_v61 = vld [vmem:[#allocation9 + $0xcc] sm:$0xf0] }
 0x1ed   :  { %v7251_v3 = vld [vmem:[#allocation6 + $0xaf8] sm:$0xf0]  ;;  %v9221_v6 = vld [vmem:[#allocation9 + $0x3ec] sm:$0xf0] }
 0x1ee   :  { %v8978_v7 = vld [vmem:[#allocation6 + $0x89c] sm:$0xf]  ;;  %v7254_v15 = vor.u32 %v9050_v2, %v7251_v3  ;;  %3220 = vmatpush.bf16.msra.mxu3 %v6710_v11  ;;  %v7794_v11 = vor.u32 %v9189_v59, %v7793_v57  ;;  %v7922_v20 = vor.u32 %v9221_v6, %v7921_v5  ;;  %v7729_v57 = vld [vmem:[#allocation9 + $0x260] sm:$0xf]  ;;  %v9173_v59 = vld [vmem:[#allocation9 + $0x26c] sm:$0xf0] }
 0x1ef   :  { %v6963_v12 = vld [vmem:[#allocation6 + $0x8b8] sm:$0xf0]  ;;  %v7857_v5 = vld [vmem:[#allocation9 + $0x360] sm:$0xf]  ;;  %v9205_v6 = vld [vmem:[#allocation9 + $0x36c] sm:$0xf0] }
 0x1f0   :  { %v8842_v13 = vld [vmem:[#allocation6 + $0x45c] sm:$0xf]  ;;  %v6966_v23 = vor.u32 %v8978_v7, %v6963_v12  ;;  %3245 = vmatpush.bf16.msra.mxu0 %v7254_v15  ;;  %v7666_v7 = vor.u32 %v9157_v51, %v7665_v49  ;;  %v7649_v12 = vld [vmem:[#allocation9 + $0x1c0] sm:$0xf]  ;;  %v9153_v15 = vld [vmem:[#allocation9 + $0x1cc] sm:$0xf0] }
 0x1f1   :  { %v6419_v14 = vld [vmem:[#allocation6 + $0x478] sm:$0xf0]  ;;  %v7601_v51 = vld [vmem:[#allocation9 + $0x160] sm:$0xf] }
 0x1f2   :  { %v8906_v16 = vld [vmem:[#allocation6 + $0x65c] sm:$0xf]  ;;  %v6422_v24 = vor.u32 %v8842_v13, %v6419_v14  ;;  %3233 = vmatpush.bf16.msrb.mxu2 %v6966_v23  ;;  %v7522_v13 = vor.u32 %v9121_v61, %v7521_v8  ;;  %v7905_v23 = vld [vmem:[#allocation9 + $0x3c0] sm:$0xf]  ;;  %v9879_v8 = vpop.f32.mrf.mxu3  ;;  %v9881_v61 = vpop.f32.mrf.mxu1 }
 0x1f3   :  { %v6675_v18 = vld [vmem:[#allocation6 + $0x678] sm:$0xf0] }
 0x1f4   :  { %v9042_v21 = vld [vmem:[#allocation6 + $0xa9c] sm:$0xf]  ;;  %v6678_v28 = vor.u32 %v8906_v16, %v6675_v18  ;;  %3208 = vmatpush.bf16.msra.mxu1 %v6422_v24  ;;  %v7777_v16 = vld [vmem:[#allocation9 + $0x2c0] sm:$0xf]  ;;  %v9185_v18 = vld [vmem:[#allocation9 + $0x2cc] sm:$0xf0] }
 0x1f5   :  { %v7219_v50 = vld [vmem:[#allocation6 + $0xab8] sm:$0xf0]  ;;  %v9217_v24 = vld [vmem:[#allocation9 + $0x3cc] sm:$0xf0] }
 0x1f6   :  { %v8970_v25 = vld [vmem:[#allocation6 + $0x85c] sm:$0xf]  ;;  %v7222_v33 = vor.u32 %v9042_v21, %v7219_v50  ;;  %3221 = vmatpush.bf16.msra.mxu3 %v6678_v28  ;;  %v7505_v21 = vld [vmem:[#allocation9 + $0xa0] sm:$0xf]  ;;  %v9117_v50 = vld [vmem:[#allocation9 + $0xac] sm:$0xf0]  ;;  %v9875_v28 = vpop.f32.mrf.mxu2 }
 0x1f7   :  { %v6931_v26 = vld [vmem:[#allocation6 + $0x878] sm:$0xf0] }
 0x1f8   :  { %v8834_v27 = vld [vmem:[#allocation6 + $0x41c] sm:$0xf]  ;;  %v6934_v43 = vor.u32 %v8970_v25, %v6931_v26  ;;  %3246 = vmatpush.bf16.msra.mxu0 %v7222_v33  ;;  %v7650_v25 = vor.u32 %v9153_v15, %v7649_v12  ;;  %v7778_v26 = vor.u32 %v9185_v18, %v7777_v16  ;;  %v7489_v33 = vld [vmem:[#allocation9 + $0x80] sm:$0xf]  ;;  %v9137_v16 = vld [vmem:[#allocation9 + $0x14c] sm:$0xf0] }
 0x1f9   :  { %v6387_v29 = vld [vmem:[#allocation6 + $0x438] sm:$0xf0]  ;;  %v7713_v18 = vld [vmem:[#allocation9 + $0x240] sm:$0xf] }
 0x1fa   :  { %v8898_v30 = vld [vmem:[#allocation6 + $0x61c] sm:$0xf]  ;;  %v6390_v44 = vor.u32 %v8834_v27, %v6387_v29  ;;  %3234 = vmatpush.bf16.msrb.mxu2 %v6934_v43  ;;  %v7633_v27 = vld [vmem:[#allocation9 + $0x1a0] sm:$0xf]  ;;  %v7506_v29 = vor.u32 %v9117_v50, %v7505_v21  ;;  %v3268_v21 = vmul.f32 0.2, %v9824_v35  ;;  %v7858_v50 = vor.u32 %v9205_v6, %v7857_v5 }
 0x1fb   :  { %v6643_v32 = vld [vmem:[#allocation6 + $0x638] sm:$0xf0]  ;;  %v7745_v43 = vld [vmem:[#allocation9 + $0x280] sm:$0xf]  ;;  %v9193_v5 = vld [vmem:[#allocation9 + $0x30c] sm:$0xf0] }
 0x1fc   :  { %v9090_v37 = vld [vmem:[#allocation6 + $0xc1c] sm:$0xf]  ;;  %v6646_v56 = vor.u32 %v8898_v30, %v6643_v32  ;;  %3209 = vmatpush.bf16.msra.mxu1 %v6390_v44  ;;  %v9149_v30 = vld [vmem:[#allocation9 + $0x1ac] sm:$0xf0] }
 0x1fd   :  { %v7411_v60 = vld [vmem:[#allocation6 + $0xc38] sm:$0xf0]  ;;  %v9181_v32 = vld [vmem:[#allocation9 + $0x2ac] sm:$0xf0]  ;;  %v7634_v39 = vor.u32 %v9149_v30, %v7633_v27  ;;  %v563_v30 = vperm.slane %v9840_v54, 4 }
 0x1fe   :  { %v9034_v41 = vld [vmem:[#allocation6 + $0xa5c] sm:$0xf]  ;;  %v7414_v48 = vor.u32 %v9090_v37, %v7411_v60  ;;  %3222 = vmatpush.bf16.msra.mxu3 %v6646_v56  ;;  %v7889_v37 = vld [vmem:[#allocation9 + $0x3a0] sm:$0xf]  ;;  %v9213_v60 = vld [vmem:[#allocation9 + $0x3ac] sm:$0xf0] }
 0x1ff   :  { %v7187_v17 = vld [vmem:[#allocation6 + $0xa78] sm:$0xf0]  ;;  %3210 = vmatmul.bf16.vlgmr.msra.gmra.mxu1 %v9760_v52  ;;  %v7761_v52 = vld [vmem:[#allocation9 + $0x2a0] sm:$0xf]  ;;  %v9177_v44 = vld [vmem:[#allocation9 + $0x28c] sm:$0xf0] }
 0x200   :  { %v8962_v45 = vld [vmem:[#allocation6 + $0x81c] sm:$0xf]  ;;  %v7190_v55 = vor.u32 %v9034_v41, %v7187_v17  ;;  %3261 = vmatpush.bf16.msrb.mxu1 %v7414_v48  ;;  %v7762_v9 = vor.u32 %v9181_v32, %v7761_v52  ;;  %v7617_v41 = vld [vmem:[#allocation9 + $0x180] sm:$0xf]  ;;  %v7490_v17 = vor.u32 %v9113_v34, %v7489_v33  ;;  %v7746_v49 = vor.u32 %v9177_v44, %v7745_v43  ;;  %v9201_v27 = vld [vmem:[#allocation9 + $0x34c] sm:$0xf0] }
 0x201   :  { %v6899_v47 = vld [vmem:[#allocation6 + $0x838] sm:$0xf0]  ;;  %3223 = vmatmul.bf16.vlgmr.msra.gmra.mxu3 %v9764_v58  ;;  %v7906_v58 = vor.u32 %v9217_v24, %v7905_v23  ;;  %v7873_v56 = vld [vmem:[#allocation9 + $0x380] sm:$0xf]  ;;  %v7618_v48 = vor.u32 %v9145_v42, %v7617_v41  ;;  %v9101_v24 = vld [vmem:[#allocation9 + $0x2c] sm:$0xf0] }
 0x202   :  { %v9026_v62 = vld [vmem:[#allocation6 + $0xa1c] sm:$0xf]  ;;  %v6902_v3 = vor.u32 %v8962_v45, %v6899_v47  ;;  %4837 = vmatpush.bf16.msrb.mxu3 %v7538_v53  ;;  %3247 = vmatpush.bf16.msra.mxu0 %v7190_v55  ;;  %v7473_v45 = vld [vmem:[#allocation9 + $0x60] sm:$0xf]  ;;  %v9209_v47 = vld [vmem:[#allocation9 + $0x38c] sm:$0xf0]  ;;  %v2992_v53 = vpop.f32.mrf.mxu2 }
 0x203   :  { %v7155_v2 = vld [vmem:[#allocation6 + $0xa38] sm:$0xf0]  ;;  %v7474_v55 = vor.u32 %v9109_v1, %v7473_v45  ;;  %v7441_v23 = vld [vmem:[#allocation9 + $0x20] sm:$0xf]  ;;  %v9133_v33 = vld [vmem:[#allocation9 + $0x12c] sm:$0xf0]  ;;  %v2913_v45 = vadd.f32 %v9869_v0, %v563_v30 }
 0x204   :  { %v7158_v14 = vor.u32 %v9026_v62, %v7155_v2  ;;  %3235 = vmatpush.bf16.msrb.mxu2 %v6902_v3  ;;  %4850 = vmatpush.bf16.msra.mxu1 %v7666_v7  ;;  %v7874_v62 = vor.u32 %v9209_v47, %v7873_v56  ;;  %v7457_v2 = vld [vmem:[#allocation9 + $0x40] sm:$0xf]  ;;  %v9105_v3 = vld [vmem:[#allocation9 + $0x4c] sm:$0xf0]  ;;  %v9883_v7 = vpop.f32.mrf.mxu0 }
 0x205   :  { %v7458_v15 = vor.u32 %v9105_v3, %v7457_v2  ;;  %v7697_v34 = vld [vmem:[#allocation9 + $0x220] sm:$0xf]  ;;  %v9097_v41 = vld [vmem:[#allocation9 + $0xc] sm:$0xf0]  ;;  %v2926_v6 = vadd.f32 %v9865_v22, %v2913_v45 }
 0x206   :  { %4838 = vmatpush.bf16.msrb.mxu3 %v7522_v13  ;;  %3248 = vmatpush.bf16.msra.mxu0 %v7158_v14  ;;  %v7730_v13 = vor.u32 %v9173_v59, %v7729_v57  ;;  %v7585_v14 = vld [vmem:[#allocation9 + $0x140] sm:$0xf]  ;;  %v9253_v54 = vld [vmem:[#allocation9 + $0x4ec] sm:$0xf0] }
 0x207   :  { %3236 = vmatmul.bf16.vlgmr.msrb.gmra.mxu2 %v9776_v31  ;;  %v7890_v31 = vor.u32 %v9213_v60, %v7889_v37  ;;  %v7586_v52 = vor.u32 %v9137_v16, %v7585_v14  ;;  %v9165_v37 = vld [vmem:[#allocation9 + $0x22c] sm:$0xf0]  ;;  %v7825_v42 = vld [vmem:[#allocation9 + $0x320] sm:$0xf]  ;;  %v3276_v14 = vmax.f32 %v9824_v35, %v3268_v21 }
 0x208   :  { %4863 = vmatpush.bf16.msra.mxu2 %v7794_v11  ;;  %4851 = vmatpush.bf16.msra.mxu1 %v7650_v25  ;;  %v3267_v11 = vmul.f32 0.2, %v9810_v38  ;;  %v3269_v25 = vmul.f32 0.2, %v9846_v4  ;;  %v9197_v43 = vld [vmem:[#allocation9 + $0x32c] sm:$0xf0]  ;;  %v7698_v56 = vor.u32 %v9165_v37, %v7697_v34 }
 0x209   :  { %3249 = vmatmul.bf16.vlgmr.msra.gmra.mxu0 %v9778_v36  ;;  %v9141_v36 = vld [vmem:[#allocation9 + $0x16c] sm:$0xf0]  ;;  %v7553_v47 = vld [vmem:[#allocation9 + $0x100] sm:$0xf]  ;;  %v7826_v57 = vor.u32 %v9197_v43, %v7825_v42 }
 0x20a   :  { %4876 = vmatpush.bf16.msrb.mxu0 %v7922_v20  ;;  %4839 = vmatpush.bf16.msrb.mxu3 %v7506_v29  ;;  %v7602_v12 = vor.u32 %v9141_v36, %v7601_v51  ;;  %v9169_v20 = vld [vmem:[#allocation9 + $0x24c] sm:$0xf0]  ;;  %v9892_v29 = vadd.f32 %v9859_v40, %v9855_v19  ;;  %v9895_v60 = vpop.f32.mrf.mxu2  ;;  %v8049_v19 = vld [vmem:[#allocation9 + $0x4e0] sm:$0xf]  ;;  %v2966_v40 = vpop.f32.mrf.mxu3 }
 0x20b   :  { %v7714_v32 = vor.u32 %v9169_v20, %v7713_v18  ;;  %v9129_v51 = vld [vmem:[#allocation9 + $0x10c] sm:$0xf0]  ;;  %v7681_v53 = vld [vmem:[#allocation9 + $0x200] sm:$0xf]  ;;  %v8050_v36 = vor.u32 %v9253_v54, %v8049_v19  ;;  %v3277_v20 = vmax.f32 %v9846_v4, %v3269_v25 }
 0x20c   :  { %4864 = vmatpush.bf16.msra.mxu2 %v7778_v26  ;;  %4852 = vmatpush.bf16.msra.mxu1 %v7634_v39  ;;  %v7841_v26 = vld [vmem:[#allocation9 + $0x340] sm:$0xf]  ;;  %v3005_v44 = vpop.f32.mrf.mxu0  ;;  %v9249_v3 = vld [vmem:[#allocation9 + $0x4cc] sm:$0xf0] }
 0x20d   :  { %v7842_v39 = vor.u32 %v9201_v27, %v7841_v26  ;;  %v8177_v59 = vld [vmem:[#allocation9 + $0x5e0] sm:$0xf]  ;;  %v9245_v30 = vld [vmem:[#allocation9 + $0x4ac] sm:$0xf0]  ;;  %v9910_v25 = vpack.c.bf16 %v3277_v20, %v3277_v20 }
 0x20e   :  { %4877 = vmatpush.bf16.msrb.mxu0 %v7906_v58  ;;  %4840 = vmatpush.bf16.msrb.mxu3 %v7490_v17  ;;  %v7569_v58 = vld [vmem:[#allocation9 + $0x120] sm:$0xf]  ;;  %v2979_v17 = vpop.f32.mrf.mxu1  ;;  %v9313_v21 = vld [vmem:[#allocation9 + $0x6cc] sm:$0xf0] }
 0x20f   :  { %7422 = vmatmul.msk.bf16.vlgmr.msrb.gmra.mxu1 %vm2535_vm0, %v9772_v46  ;;  %v7442_v46 = vor.u32 %v9101_v24, %v7441_v23  ;;  %v7570_v1 = vor.u32 %v9133_v33, %v7569_v58  ;;  %v8033_v2 = vld [vmem:[#allocation9 + $0x4c0] sm:$0xf]  ;;  %v9281_v24 = vld [vmem:[#allocation9 + $0x5cc] sm:$0xf0]  ;;  %v9908_v58 = vpack.c.bf16 %v3276_v14, %v3276_v14 }
 0x210   :  { %4865 = vmatpush.bf16.msra.mxu2 %v7762_v9  ;;  %4853 = vmatpush.bf16.msra.mxu1 %v7618_v48  ;;  %v7425_v9 = vld [vmem:[#allocation9] sm:$0xf]  ;;  %v3275_v48 = vmax.f32 %v9810_v38, %v3267_v11  ;;  %v9317_v11 = vld [vmem:[#allocation9 + $0x6ec] sm:$0xf0] }
 0x211   :  { %v7809_v0 = vld [vmem:[#allocation9 + $0x300] sm:$0xf]  ;;  %v9277_v34 = vld [vmem:[#allocation9 + $0x5ac] sm:$0xf0] }
 0x212   :  { %4878 = vmatpush.bf16.msrb.mxu0 %v7890_v31  ;;  %4841 = vmatpush.bf16.msrb.mxu3 %v7474_v55  ;;  %v3270_v31 = vmul.f32 0.2, %v9892_v29  ;;  %v9161_v55 = vld [vmem:[#allocation9 + $0x20c] sm:$0xf0]  ;;  %v8305_v38 = vld [vmem:[#allocation9 + $0x6e0] sm:$0xf]  ;;  %v3018_v18 = vpop.f32.mrf.mxu2  ;;  %v7810_v23 = vor.u32 %v9193_v5, %v7809_v0 }
 0x213   :  { %v8161_v22 = vld [vmem:[#allocation9 + $0x5c0] sm:$0xf]  ;;  %v9309_v17 = vld [vmem:[#allocation9 + $0x6ac] sm:$0xf0] }
 0x214   :  { %4866 = vmatpush.bf16.msra.mxu2 %v7746_v49  ;;  %4854 = vmatpush.bf16.msra.mxu1 %v7602_v12  ;;  %v7426_v49 = vor.u32 %v9097_v41, %v7425_v9  ;;  %v7554_v12 = vor.u32 %v9129_v51, %v7553_v47  ;;  %v3278_v26 = vmax.f32 %v9892_v29, %v3270_v31  ;;  %v8017_v27 = vld [vmem:[#allocation9 + $0x4a0] sm:$0xf]  ;;  %v9912_v29 = vld [vmem:[#allocation8] sm:$0xff]  ;;  %v9241_v9 = vld [vmem:[#allocation9 + $0x48c] sm:$0xf0] }
 0x215   :  { %v8289_v35 = vld [vmem:[#allocation9 + $0x6c0] sm:$0xf]  ;;  %v8162_v4 = vor.u32 %v9281_v24, %v8161_v22  ;;  %v8018_v33 = vor.u32 %v9245_v30, %v8017_v27  ;;  %v9273_v45 = vld [vmem:[#allocation9 + $0x58c] sm:$0xf0] }
 0x216   :  { %4879 = vmatpush.bf16.msrb.mxu0 %v7874_v62  ;;  %4842 = vmatpush.bf16.msrb.mxu3 %v7458_v15  ;;  %v9285_v62 = vld [vmem:[#allocation9 + $0x5ec] sm:$0xf0]  ;;  %v7682_v15 = vor.u32 %v9161_v55, %v7681_v53  ;;  %v9915_v37 = vpack.c.bf16 %v3278_v26, %v3278_v26  ;;  %v8290_v41 = vor.u32 %v9313_v21, %v8289_v35  ;;  %v8273_v40 = vld [vmem:[#allocation9 + $0x6a0] sm:$0xf]  ;;  %v9123_v35 = vld [vmem:[#allocation9 + $0xe4] sm:$0xf] }
 0x217   :  { %v8178_v16 = vor.u32 %v9285_v62, %v8177_v59  ;;  %v8129_v31 = vld [vmem:[#allocation9 + $0x580] sm:$0xf]  ;;  %v9233_v59 = vld [vmem:[#allocation9 + $0x44c] sm:$0xf0]  ;;  %v3042_v62 = vpop.f32.mrf.mxu1 }
 0x218   :  { %4867 = vmatpush.bf16.msra.mxu2 %v7730_v13  ;;  %4855 = vmatpush.bf16.msra.mxu1 %v7586_v52  ;;  %v9901_v13 = vpack.c.bf16 %v3275_v48, %v3275_v48  ;;  %v8306_v52 = vor.u32 %v9317_v11, %v8305_v38  ;;  %v8257_v47 = vld [vmem:[#allocation9 + $0x680] sm:$0xf]  ;;  %v9305_v48 = vld [vmem:[#allocation9 + $0x68c] sm:$0xf0] }
 0x219   :  { %v8113_v55 = vld [vmem:[#allocation9 + $0x560] sm:$0xf]  ;;  %v9301_v5 = vld [vmem:[#allocation9 + $0x66c] sm:$0xf0] }
 0x21a   :  { %4880 = vmatpush.bf16.msrb.mxu0 %v7858_v50  ;;  %4843 = vmatpush.bf16.msrb.mxu3 %v7442_v46  ;;  %v8034_v50 = vor.u32 %v9249_v3, %v8033_v2  ;;  %v564_v46 = vperm.slane %v9912_v29, 5  ;;  %v8258_v2 = vor.u32 %v9305_v48, %v8257_v47  ;;  %v3055_v3 = vpop.f32.mrf.mxu0  ;;  %v8241_v0 = vld [vmem:[#allocation9 + $0x660] sm:$0xf]  ;;  %v9265_v11 = vld [vmem:[#allocation9 + $0x54c] sm:$0xf0] }
 0x21b   :  { %v8097_v38 = vld [vmem:[#allocation9 + $0x540] sm:$0xf]  ;;  %v9297_v20 = vld [vmem:[#allocation9 + $0x64c] sm:$0xf0]  ;;  %v9187_v48 = vld [vmem:[#allocation9 + $0x2e4] sm:$0xf] }
 0x21c   :  { %4868 = vmatpush.bf16.msra.mxu2 %v7714_v32  ;;  %4856 = vmatpush.bf16.msra.mxu1 %v7570_v1  ;;  %v2939_v32 = vadd.f32 %v9871_v10, %v2926_v6  ;;  %v8145_v10 = vld [vmem:[#allocation9 + $0x5a0] sm:$0xf]  ;;  %v3004_v43 = vadd.f32 %v9883_v7, %v564_v46  ;;  %v9269_v7 = vld [vmem:[#allocation9 + $0x56c] sm:$0xf0]  ;;  %v7539_v46 = vld [vmem:[#allocation9 + $0xf0] sm:$0xf0] }
 0x21d   :  { %v8146_v54 = vor.u32 %v9277_v34, %v8145_v10  ;;  %v7985_v1 = vld [vmem:[#allocation9 + $0x460] sm:$0xf]  ;;  %v8114_v6 = vor.u32 %v9269_v7, %v8113_v55  ;;  %v9293_v34 = vld [vmem:[#allocation9 + $0x62c] sm:$0xf0] }
 0x21e   :  { %4881 = vmatpush.bf16.msrb.mxu0 %v7842_v39  ;;  %4844 = vmatpush.bf16.msrb.mxu3 %v7426_v49  ;;  %v8001_v39 = vld [vmem:[#allocation9 + $0x480] sm:$0xf]  ;;  %v2952_v19 = vadd.f32 %v9867_v63, %v2939_v32  ;;  %v8274_v63 = vor.u32 %v9309_v17, %v8273_v40  ;;  %v8130_v49 = vor.u32 %v9273_v45, %v8129_v31  ;;  %v9225_v32 = vld [vmem:[#allocation9 + $0x40c] sm:$0xf0]  ;;  %v7523_v45 = vld [vmem:[#allocation9 + $0xd0] sm:$0xf0] }
 0x21f   :  { %v8002_v44 = vor.u32 %v9241_v9, %v8001_v39  ;;  %v3017_v53 = vadd.f32 %v9895_v60, %v3004_v43  ;;  %v7953_v14 = vld [vmem:[#allocation9 + $0x420] sm:$0xf]  ;;  %v3044_v21 = vpop.f32.mrf.mxu1  ;;  %v9257_v40 = vld [vmem:[#allocation9 + $0x50c] sm:$0xf0]  ;;  %v7667_v43 = vld [vmem:[#allocation9 + $0x1f0] sm:$0xf0] }
 0x220   :  { %4869 = vmatpush.bf16.msra.mxu2 %v7698_v56  ;;  %4857 = vmatpush.bf16.msra.mxu1 %v7554_v12  ;;  %v2965_v42 = vadd.f32 %v9879_v8, %v2952_v19  ;;  %v9237_v56 = vld [vmem:[#allocation9 + $0x46c] sm:$0xf0]  ;;  %v8225_v18 = vld [vmem:[#allocation9 + $0x640] sm:$0xf]  ;;  %v9143_v21 = vld [vmem:[#allocation9 + $0x184] sm:$0xf] }
 0x221   :  { %4845 = vmatmul.bf16.vlgmr.msrb.gmra.mxu3 %v9901_v13  ;;  %v7986_v8 = vor.u32 %v9237_v56, %v7985_v1  ;;  %v8081_v27 = vld [vmem:[#allocation9 + $0x520] sm:$0xf]  ;;  %v9289_v56 = vld [vmem:[#allocation9 + $0x60c] sm:$0xf0] }
 0x222   :  { %4889 = vmatpush.bf16.msra.mxu3 %v8050_v36  ;;  %4882 = vmatpush.bf16.msrb.mxu0 %v7826_v57  ;;  %v2978_v51 = vadd.f32 %v9881_v61, %v2965_v42  ;;  %v3029_v36 = vpop.f32.mrf.mxu3  ;;  %v7969_v57 = vld [vmem:[#allocation9 + $0x440] sm:$0xf]  ;;  %v9155_v42 = vld [vmem:[#allocation9 + $0x1e4] sm:$0xf] }
 0x223   :  { %4858 = vmatmul.bf16.vlgmr.msra.gmra.mxu1 %v9908_v58  ;;  %v3030_v61 = vadd.f32 %v3029_v36, %v3017_v53  ;;  %v7970_v60 = vor.u32 %v9233_v59, %v7969_v57  ;;  %v8209_v10 = vld [vmem:[#allocation9 + $0x620] sm:$0xf]  ;;  %v7670_v53 = vor.u32 %v9155_v42, %v7667_v43  ;;  %v9151_v36 = vld [vmem:[#allocation9 + $0x1c4] sm:$0xf]  ;;  %v7651_v57 = vld [vmem:[#allocation9 + $0x1d0] sm:$0xf0] }
 0x224   :  { %4870 = vmatpush.bf16.msra.mxu2 %v7682_v15  ;;  %4902 = vmatpush.bf16.msrb.mxu1 %v8178_v16  ;;  %v2991_v12 = vadd.f32 %v9875_v28, %v2978_v51  ;;  %v9229_v15 = vld [vmem:[#allocation9 + $0x42c] sm:$0xf0]  ;;  %v8242_v16 = vor.u32 %v9301_v5, %v8241_v0  ;;  %v8065_v19 = vld [vmem:[#allocation9 + $0x500] sm:$0xf]  ;;  %v8210_v31 = vor.u32 %v9293_v34, %v8209_v10  ;;  %v9183_v5 = vld [vmem:[#allocation9 + $0x2c4] sm:$0xf] }
 0x225   :  { %v3043_v24 = vadd.f32 %v3042_v62, %v3030_v61  ;;  %v7954_v26 = vor.u32 %v9229_v15, %v7953_v14  ;;  %v9261_v28 = vld [vmem:[#allocation9 + $0x52c] sm:$0xf0]  ;;  %v8193_v1 = vld [vmem:[#allocation9 + $0x600] sm:$0xf]  ;;  %v9147_v15 = vld [vmem:[#allocation9 + $0x1a4] sm:$0xf] }
 0x226   :  { %4890 = vmatpush.bf16.msra.mxu3 %v8034_v50  ;;  %4883 = vmatpush.bf16.msrb.mxu0 %v7810_v23  ;;  %v8098_v50 = vor.u32 %v9265_v11, %v8097_v38  ;;  %v3068_v23 = vpop.f32.mrf.mxu2  ;;  %v3271_v22 = vmul.f32 0.2, %v2991_v12  ;;  %v8082_v39 = vor.u32 %v9261_v28, %v8081_v27  ;;  %v8194_v59 = vor.u32 %v9289_v56, %v8193_v1  ;;  %v9349_v61 = vld [vmem:[#allocation9 + $0x7ec] sm:$0xf0]  ;;  %v8401_v34 = vld [vmem:[#allocation9 + $0x7a0] sm:$0xf] }
 0x227   :  { %4871 = vmatmul.bf16.vlgmr.msra.gmra.mxu2 %v9910_v25  ;;  %v3056_v9 = vadd.f32 %v3055_v3, %v3043_v24  ;;  %v7507_v3 = vld [vmem:[#allocation9 + $0xb0] sm:$0xf0]  ;;  %v7654_v38 = vor.u32 %v9151_v36, %v7651_v57  ;;  %v9345_v27 = vld [vmem:[#allocation9 + $0x7cc] sm:$0xf0]  ;;  %v9139_v42 = vld [vmem:[#allocation9 + $0x164] sm:$0xf] }
 0x228   :  { %4915 = vmatpush.bf16.msrb.mxu2 %v8306_v52  ;;  %4903 = vmatpush.bf16.msrb.mxu1 %v8162_v4  ;;  %v7937_v52 = vld [vmem:[#allocation9 + $0x400] sm:$0xf]  ;;  %v8226_v4 = vor.u32 %v9297_v20, %v8225_v18  ;;  %v3279_v17 = vmax.f32 %v2991_v12, %v3271_v22  ;;  %v9111_v20 = vld [vmem:[#allocation9 + $0x84] sm:$0xf]  ;;  %v7763_v24 = vld [vmem:[#allocation9 + $0x2b0] sm:$0xf0] }
 0x229   :  { %4884 = vmatmul.bf16.vlgmr.msrb.gmra.mxu0 %v9915_v37  ;;  %v3069_v51 = vadd.f32 %v3068_v23, %v3056_v9  ;;  %v8433_v12 = vld [vmem:[#allocation9 + $0x7e0] sm:$0xf]  ;;  %v9179_v22 = vld [vmem:[#allocation9 + $0x2a4] sm:$0xf]  ;;  %v7603_v43 = vld [vmem:[#allocation9 + $0x170] sm:$0xf0] }
 0x22a   :  { %4891 = vmatpush.bf16.msra.mxu3 %v8018_v33  ;;  %v3031_v30 = vpop.f32.mrf.mxu3  ;;  %v3057_v33 = vpop.f32.mrf.mxu0  ;;  %v8434_v11 = vor.u32 %v9349_v61, %v8433_v12  ;;  %v7766_v10 = vor.u32 %v9179_v22, %v7763_v24  ;;  %v9171_v56 = vld [vmem:[#allocation9 + $0x264] sm:$0xf]  ;;  %v7443_v57 = vld [vmem:[#allocation9 + $0x30] sm:$0xf0] }
 0x22b   :  { %v7475_v33 = vld [vmem:[#allocation9 + $0x70] sm:$0xf0]  ;;  %v9099_v36 = vld [vmem:[#allocation9 + $0x24] sm:$0xf] }
 0x22c   :  { %4916 = vmatpush.bf16.msrb.mxu2 %v8290_v41  ;;  %4904 = vmatpush.bf16.msrb.mxu1 %v8146_v54  ;;  %v7938_v41 = vor.u32 %v9225_v32, %v7937_v52  ;;  %v7542_v54 = vor.u32 %v9123_v35, %v7539_v46  ;;  %v9107_v46 = vld [vmem:[#allocation9 + $0x64] sm:$0xf]  ;;  %v7699_v24 = vld [vmem:[#allocation9 + $0x230] sm:$0xf0] }
 0x22d   :  { %4928 = vmatpush.bf16.msra.mxu0 %v8434_v11  ;;  %v9131_v12 = vld [vmem:[#allocation9 + $0x124] sm:$0xf]  ;;  %v7571_v11 = vld [vmem:[#allocation9 + $0x130] sm:$0xf0] }
 0x22e   :  { %4892 = vmatpush.bf16.msra.mxu3 %v8002_v44  ;;  %v9119_v44 = vld [vmem:[#allocation9 + $0xc4] sm:$0xf]  ;;  %v3070_v47 = vpop.f32.mrf.mxu2 }
 0x22f   :  { %v7526_v7 = vor.u32 %v9119_v44, %v7523_v45  ;;  %v7459_v45 = vld [vmem:[#allocation9 + $0x50] sm:$0xf0]  ;;  %v8385_v47 = vld [vmem:[#allocation9 + $0x780] sm:$0xf]  ;;  %v9163_v22 = vld [vmem:[#allocation9 + $0x224] sm:$0xf] }
 0x230   :  { %4917 = vmatpush.bf16.msrb.mxu2 %v8274_v63  ;;  %4905 = vmatpush.bf16.msrb.mxu1 %v8130_v49  ;;  %v8066_v63 = vor.u32 %v9257_v40, %v8065_v19  ;;  %v7795_v49 = vld [vmem:[#allocation9 + $0x2f0] sm:$0xf0] }
 0x231   :  { %v7798_v0 = vor.u32 %v9187_v48, %v7795_v49  ;;  %v9932_v9 = vpop.f32.mrf.mxu1  ;;  %v7747_v19 = vld [vmem:[#allocation9 + $0x290] sm:$0xf0]  ;;  %v9337_v48 = vld [vmem:[#allocation9 + $0x78c] sm:$0xf0]  ;;  %v7606_v49 = vor.u32 %v9139_v42, %v7603_v43 }
 0x232   :  { %4893 = vmatpush.bf16.msra.mxu3 %v7986_v8  ;;  %v9926_v8 = vpack.c.bf16 %v3279_v17, %v3279_v17  ;;  %v3081_v55 = vpop.f32.mrf.mxu3 }
 0x233   :  { %v3082_v62 = vadd.f32 %v3081_v55, %v3069_v51  ;;  %v8386_v51 = vor.u32 %v9337_v48, %v8385_v47  ;;  %v9135_v55 = vld [vmem:[#allocation9 + $0x144] sm:$0xf] }
 0x234   :  { %4918 = vmatpush.bf16.msrb.mxu2 %v8258_v2  ;;  %4906 = vmatpush.bf16.msrb.mxu1 %v8114_v6  ;;  %v9115_v2 = vld [vmem:[#allocation9 + $0xa4] sm:$0xf]  ;;  %v7779_v6 = vld [vmem:[#allocation9 + $0x2d0] sm:$0xf0] }
 0x235   :  { %v7510_v14 = vor.u32 %v9115_v2, %v7507_v3  ;;  %v7782_v23 = vor.u32 %v9183_v5, %v7779_v6  ;;  %v9934_v44 = vpop.f32.mrf.mxu0  ;;  %v7715_v3 = vld [vmem:[#allocation9 + $0x250] sm:$0xf0]  ;;  %v9333_v5 = vld [vmem:[#allocation9 + $0x76c] sm:$0xf0]  ;;  %v9243_v47 = vld [vmem:[#allocation9 + $0x4a4] sm:$0xf] }
 0x236   :  { %4894 = vmatpush.bf16.msra.mxu3 %v7970_v60  ;;  %v3272_v60 = vmul.f32 0.2, %v3082_v62 }
 0x238   :  { %4919 = vmatpush.bf16.msrb.mxu2 %v8242_v16  ;;  %4907 = vmatpush.bf16.msrb.mxu1 %v8098_v50  ;;  %v7635_v16 = vld [vmem:[#allocation9 + $0x1b0] sm:$0xf0]  ;;  %v3280_v18 = vmax.f32 %v3082_v62, %v3272_v60  ;;  %v9167_v62 = vld [vmem:[#allocation9 + $0x244] sm:$0xf] }
 0x239   :  { %v7491_v50 = vld [vmem:[#allocation9 + $0x90] sm:$0xf0]  ;;  %v7638_v30 = vor.u32 %v9147_v15, %v7635_v16  ;;  %v3096_v2 = vpop.f32.mrf.mxu1 }
 0x23a   :  { %4895 = vmatpush.bf16.msra.mxu3 %v7954_v26  ;;  %v8417_v26 = vld [vmem:[#allocation9 + $0x7c0] sm:$0xf]  ;;  %v9929_v28 = vpack.c.bf16 %v3280_v18, %v3280_v18  ;;  %v7494_v32 = vor.u32 %v9111_v20, %v7491_v50  ;;  %v3083_v35 = vpop.f32.mrf.mxu3  ;;  %v7427_v15 = vld [vmem:[#allocation9 + $0x10] sm:$0xf0]  ;;  %v9251_v20 = vld [vmem:[#allocation9 + $0x4e4] sm:$0xf] }
 0x23b   :  { %v8418_v52 = vor.u32 %v9345_v27, %v8417_v26  ;;  %v8051_v50 = vld [vmem:[#allocation9 + $0x4f0] sm:$0xf0]  ;;  %v8353_v26 = vld [vmem:[#allocation9 + $0x740] sm:$0xf]  ;;  %v9329_v27 = vld [vmem:[#allocation9 + $0x74c] sm:$0xf0] }
 0x23c   :  { %4920 = vmatpush.bf16.msrb.mxu2 %v8226_v4  ;;  %4908 = vmatpush.bf16.msrb.mxu1 %v8082_v39  ;;  %v7619_v4 = vld [vmem:[#allocation9 + $0x190] sm:$0xf0]  ;;  %v9341_v39 = vld [vmem:[#allocation9 + $0x7ac] sm:$0xf0] }
 0x23d   :  { %4929 = vmatpush.bf16.msra.mxu0 %v8418_v52  ;;  %v8402_v40 = vor.u32 %v9341_v39, %v8401_v34  ;;  %v7622_v17 = vor.u32 %v9143_v21, %v7619_v4  ;;  %v3122_v16 = vpop.f32.mrf.mxu0  ;;  %v9938_v18 = vpop.f32.mrf.mxu2  ;;  %v9127_v52 = vld [vmem:[#allocation9 + $0x104] sm:$0xf]  ;;  %v7555_v21 = vld [vmem:[#allocation9 + $0x110] sm:$0xf0]  ;;  %v7702_v39 = vor.u32 %v9163_v22, %v7699_v24 }
 0x23e   :  { %4896 = vmatpush.bf16.msra.mxu3 %v7938_v41  ;;  %v9175_v41 = vld [vmem:[#allocation9 + $0x284] sm:$0xf]  ;;  %v8035_v34 = vld [vmem:[#allocation9 + $0x4d0] sm:$0xf0]  ;;  %v7558_v42 = vor.u32 %v9127_v52, %v7555_v21 }
 0x23f   :  { %v7750_v1 = vor.u32 %v9175_v41, %v7747_v19  ;;  %v9283_v4 = vld [vmem:[#allocation9 + $0x5e4] sm:$0xf]  ;;  %v7683_v19 = vld [vmem:[#allocation9 + $0x210] sm:$0xf0] }
 0x240   :  { %4921 = vmatpush.bf16.msrb.mxu2 %v8210_v31  ;;  %4909 = vmatpush.bf16.msrb.mxu1 %v8066_v63  ;;  %v9103_v31 = vld [vmem:[#allocation9 + $0x44] sm:$0xf]  ;;  %v7731_v63 = vld [vmem:[#allocation9 + $0x270] sm:$0xf0] }
 0x241   :  { %4897 = vmatmul.bf16.vlgmr.msra.gmra.mxu3 %v9926_v8  ;;  %4930 = vmatpush.bf16.msra.mxu0 %v8402_v40  ;;  %v9159_v41 = vld [vmem:[#allocation9 + $0x204] sm:$0xf]  ;;  %v8337_v40 = vld [vmem:[#allocation9 + $0x720] sm:$0xf]  ;;  %v7987_v24 = vld [vmem:[#allocation9 + $0x470] sm:$0xf0] }
 0x242   :  { %4941 = vmatpush.bf16.msrb.mxu3 %v7542_v54  ;;  %v7478_v54 = vor.u32 %v9107_v46, %v7475_v33  ;;  %v9936_v60 = vpop.f32.mrf.mxu3  ;;  %v8179_v46 = vld [vmem:[#allocation9 + $0x5f0] sm:$0xf0]  ;;  %v8054_v33 = vor.u32 %v9251_v20, %v8051_v50  ;;  %v9271_v20 = vld [vmem:[#allocation9 + $0x584] sm:$0xf] }
 0x243   :  { %4910 = vmatmul.bf16.vlgmr.msrb.gmra.mxu1 %v9929_v28  ;;  %v8131_v50 = vld [vmem:[#allocation9 + $0x590] sm:$0xf0]  ;;  %v9235_v22 = vld [vmem:[#allocation9 + $0x464] sm:$0xf] }
 0x244   :  { %4954 = vmatpush.bf16.msra.mxu1 %v7670_v53  ;;  %4922 = vmatpush.bf16.msrb.mxu2 %v8194_v59  ;;  %v7462_v53 = vor.u32 %v9103_v31, %v7459_v45  ;;  %v7734_v59 = vor.u32 %v9171_v56, %v7731_v63  ;;  %v8182_v31 = vor.u32 %v9283_v4, %v8179_v46  ;;  %v9279_v56 = vld [vmem:[#allocation9 + $0x5c4] sm:$0xf]  ;;  %v8163_v63 = vld [vmem:[#allocation9 + $0x5d0] sm:$0xf0] }
 0x245   :  { %4931 = vmatpush.bf16.msra.mxu0 %v8386_v51  ;;  %v9941_v48 = vpop.f32.mrf.mxu0  ;;  %v7686_v51 = vor.u32 %v9159_v41, %v7683_v19  ;;  %v8166_v2 = vor.u32 %v9279_v56, %v8163_v63  ;;  %v7891_v52 = vld [vmem:[#allocation9 + $0x3b0] sm:$0xf0]  ;;  %v9267_v21 = vld [vmem:[#allocation9 + $0x564] sm:$0xf] }
 0x246   :  { %4942 = vmatpush.bf16.msrb.mxu3 %v7526_v7  ;;  %v7587_v7 = vld [vmem:[#allocation9 + $0x150] sm:$0xf0]  ;;  %v9231_v46 = vld [vmem:[#allocation9 + $0x444] sm:$0xf] }
 0x247   :  { %v7590_v6 = vor.u32 %v9135_v55, %v7587_v7  ;;  %v8321_v55 = vld [vmem:[#allocation9 + $0x700] sm:$0xf]  ;;  %v9321_v7 = vld [vmem:[#allocation9 + $0x70c] sm:$0xf0]  ;;  %v8115_v4 = vld [vmem:[#allocation9 + $0x570] sm:$0xf0] }
 0x248   :  { %4967 = vmatpush.bf16.msra.mxu2 %v7798_v0  ;;  %4955 = vmatpush.bf16.msra.mxu1 %v7654_v38  ;;  %v8369_v0 = vld [vmem:[#allocation9 + $0x760] sm:$0xf]  ;;  %v7446_v38 = vor.u32 %v9099_v36, %v7443_v57  ;;  %v8322_v57 = vor.u32 %v9321_v7, %v8321_v55  ;;  %v7859_v63 = vld [vmem:[#allocation9 + $0x370] sm:$0xf0] }
 0x249   :  { %v8370_v61 = vor.u32 %v9333_v5, %v8369_v0  ;;  %v9275_v5 = vld [vmem:[#allocation9 + $0x5a4] sm:$0xf] }
 0x24a   :  { %4943 = vmatpush.bf16.msrb.mxu3 %v7510_v14  ;;  %v9095_v14 = vld [vmem:[#allocation9 + $0x4] sm:$0xf]  ;;  %v3109_v45 = vpop.f32.mrf.mxu3 }
 0x24b   :  { %4932 = vmatpush.bf16.msra.mxu0 %v8370_v61  ;;  %v7430_v35 = vor.u32 %v9095_v14, %v7427_v15  ;;  %v8003_v61 = vld [vmem:[#allocation9 + $0x490] sm:$0xf0] }
 0x24c   :  { %4968 = vmatpush.bf16.msra.mxu2 %v7782_v23  ;;  %4956 = vmatpush.bf16.msra.mxu1 %v7638_v30  ;;  %v7718_v23 = vor.u32 %v9167_v62, %v7715_v3  ;;  %v7574_v30 = vor.u32 %v9131_v12, %v7571_v11  ;;  %v7923_v62 = vld [vmem:[#allocation9 + $0x3f0] sm:$0xf0]  ;;  %v9239_v12 = vld [vmem:[#allocation9 + $0x484] sm:$0xf] }
 0x24d   :  { %v7907_v11 = vld [vmem:[#allocation9 + $0x3d0] sm:$0xf0]  ;;  %v8006_v16 = vor.u32 %v9239_v12, %v8003_v61 }
 0x24e   :  { %4944 = vmatpush.bf16.msrb.mxu3 %v7494_v32  ;;  %v8354_v32 = vor.u32 %v9329_v27, %v8353_v26  ;;  %v7843_v12 = vld [vmem:[#allocation9 + $0x350] sm:$0xf0] }
 0x250   :  { %4969 = vmatpush.bf16.msra.mxu2 %v7766_v10  ;;  %4957 = vmatpush.bf16.msra.mxu1 %v7622_v17  ;;  %v9247_v10 = vld [vmem:[#allocation9 + $0x4c4] sm:$0xf]  ;;  %v9325_v17 = vld [vmem:[#allocation9 + $0x72c] sm:$0xf0] }
 0x251   :  { %4933 = vmatpush.bf16.msra.mxu0 %v8354_v32  ;;  %v8338_v43 = vor.u32 %v9325_v17, %v8337_v40  ;;  %v9263_v17 = vld [vmem:[#allocation9 + $0x544] sm:$0xf] }
 0x252   :  { %4945 = vmatpush.bf16.msrb.mxu3 %v7478_v54  ;;  %v565_v54 = vperm.slane %v9912_v29, 6 }
 0x253   :  { %v3146_v27 = vpop.f32.mrf.mxu1 }
 0x254   :  { %4970 = vmatpush.bf16.msra.mxu2 %v7750_v1  ;;  %4958 = vmatpush.bf16.msra.mxu1 %v7606_v49  ;;  %v8038_v1 = vor.u32 %v9247_v10, %v8035_v34  ;;  %v3135_v49 = vpop.f32.mrf.mxu2  ;;  %v3095_v36 = vadd.f32 %v9932_v9, %v565_v54  ;;  %v9207_v34 = vld [vmem:[#allocation9 + $0x384] sm:$0xf]  ;;  %v8099_v54 = vld [vmem:[#allocation9 + $0x550] sm:$0xf0] }
 0x255   :  { %4934 = vmatpush.bf16.msra.mxu0 %v8338_v43  ;;  %v9227_v43 = vld [vmem:[#allocation9 + $0x424] sm:$0xf] }
 0x256   :  { %4946 = vmatpush.bf16.msrb.mxu3 %v7462_v53  ;;  %v8019_v53 = vld [vmem:[#allocation9 + $0x4b0] sm:$0xf0]  ;;  %v3108_v9 = vadd.f32 %v9936_v60, %v3095_v36  ;;  %v8134_v60 = vor.u32 %v9271_v20, %v8131_v50  ;;  %v9259_v49 = vld [vmem:[#allocation9 + $0x524] sm:$0xf] }
 0x257   :  { %v8022_v0 = vor.u32 %v9243_v47, %v8019_v53  ;;  %v8102_v47 = vor.u32 %v9263_v17, %v8099_v54  ;;  %v9191_v17 = vld [vmem:[#allocation9 + $0x304] sm:$0xf]  ;;  %v7811_v54 = vld [vmem:[#allocation9 + $0x310] sm:$0xf0] }
 0x258   :  { %4971 = vmatpush.bf16.msra.mxu2 %v7734_v59  ;;  %4959 = vmatpush.bf16.msra.mxu1 %v7590_v6  ;;  %v9219_v59 = vld [vmem:[#allocation9 + $0x3e4] sm:$0xf]  ;;  %v8147_v6 = vld [vmem:[#allocation9 + $0x5b0] sm:$0xf0]  ;;  %v3121_v26 = vadd.f32 %v9934_v44, %v3108_v9  ;;  %v8118_v44 = vor.u32 %v9267_v21, %v8115_v4 }
 0x259   :  { %v7926_v3 = vor.u32 %v9219_v59, %v7923_v62  ;;  %4935 = vmatpush.bf16.msra.mxu0 %v8322_v57  ;;  %v8150_v14 = vor.u32 %v9275_v5, %v8147_v6  ;;  %v9223_v57 = vld [vmem:[#allocation9 + $0x404] sm:$0xf]  ;;  %v7939_v59 = vld [vmem:[#allocation9 + $0x410] sm:$0xf0] }
 0x25a   :  { %4947 = vmatpush.bf16.msrb.mxu3 %v7446_v38  ;;  %v9215_v38 = vld [vmem:[#allocation9 + $0x3c4] sm:$0xf]  ;;  %v3134_v10 = vadd.f32 %v9938_v18, %v3121_v26 }
 0x25b   :  { %v7910_v15 = vor.u32 %v9215_v38, %v7907_v11  ;;  %v3148_v56 = vpop.f32.mrf.mxu1  ;;  %v9203_v18 = vld [vmem:[#allocation9 + $0x364] sm:$0xf] }
 0x25c   :  { %4972 = vmatpush.bf16.msra.mxu2 %v7718_v23  ;;  %4960 = vmatpush.bf16.msra.mxu1 %v7574_v30  ;;  %v3174_v23 = vpop.f32.mrf.mxu0  ;;  %v9211_v30 = vld [vmem:[#allocation9 + $0x3a4] sm:$0xf]  ;;  %v3147_v19 = vadd.f32 %v3146_v27, %v3134_v10  ;;  %v7862_v53 = vor.u32 %v9203_v18, %v7859_v63  ;;  %v8275_v10 = vld [vmem:[#allocation9 + $0x6b0] sm:$0xf0]  ;;  %v7641_v63 = vld [vmem:[#allocation9 + $0x1a8] sm:$0xf] }
 0x25d   :  { %4980 = vmatpush.bf16.msrb.mxu0 %v7926_v3  ;;  %v7894_v32 = vor.u32 %v9211_v30, %v7891_v52  ;;  %v9952_v36 = vpop.f32.mrf.mxu2  ;;  %v9315_v62 = vld [vmem:[#allocation9 + $0x6e4] sm:$0xf]  ;;  %v7545_v3 = vld [vmem:[#allocation9 + $0xe8] sm:$0xf]  ;;  %v9122_v52 = vld [vmem:[#allocation9 + $0xd4] sm:$0xf0] }
 0x25e   :  { %4948 = vmatpush.bf16.msrb.mxu3 %v7430_v35  ;;  %v7990_v35 = vor.u32 %v9235_v22, %v7987_v24  ;;  %v9199_v6 = vld [vmem:[#allocation9 + $0x344] sm:$0xf]  ;;  %v7673_v23 = vld [vmem:[#allocation9 + $0x1e8] sm:$0xf]  ;;  %v9158_v22 = vld [vmem:[#allocation9 + $0x1f4] sm:$0xf0] }
 0x25f   :  { %v9255_v9 = vld [vmem:[#allocation9 + $0x504] sm:$0xf]  ;;  %v7846_v38 = vor.u32 %v9199_v6, %v7843_v12  ;;  %v7529_v24 = vld [vmem:[#allocation9 + $0xc8] sm:$0xf]  ;;  %v7674_v4 = vor.u32 %v9158_v22, %v7673_v23 }
 0x260   :  { %4973 = vmatpush.bf16.msra.mxu2 %v7702_v39  ;;  %4961 = vmatpush.bf16.msra.mxu1 %v7558_v42  ;;  %v7875_v39 = vld [vmem:[#allocation9 + $0x390] sm:$0xf0]  ;;  %v3159_v42 = vpop.f32.mrf.mxu3  ;;  %v9303_v18 = vld [vmem:[#allocation9 + $0x684] sm:$0xf] }
 0x261   :  { %4949 = vmatmul.bf16.vlgmr.msrb.gmra.mxu3 %v9901_v13  ;;  %4981 = vmatpush.bf16.msrb.mxu0 %v7910_v15  ;;  %v7878_v41 = vor.u32 %v9207_v34, %v7875_v39  ;;  %v9311_v15 = vld [vmem:[#allocation9 + $0x6c4] sm:$0xf]  ;;  %v7530_v39 = vor.u32 %v9122_v52, %v7529_v24  ;;  %v7593_v24 = vld [vmem:[#allocation9 + $0x148] sm:$0xf] }
 0x262   :  { %4993 = vmatpush.bf16.msra.mxu3 %v8054_v33  ;;  %v7971_v33 = vld [vmem:[#allocation9 + $0x450] sm:$0xf0] }
 0x263   :  { %4962 = vmatmul.bf16.vlgmr.msra.gmra.mxu1 %v9908_v58  ;;  %v7974_v40 = vor.u32 %v9231_v46, %v7971_v33  ;;  %v9307_v33 = vld [vmem:[#allocation9 + $0x6a4] sm:$0xf] }
 0x264   :  { %5006 = vmatpush.bf16.msrb.mxu1 %v8182_v31  ;;  %4974 = vmatpush.bf16.msra.mxu2 %v7686_v51  ;;  %v7955_v31 = vld [vmem:[#allocation9 + $0x430] sm:$0xf0]  ;;  %v9949_v45 = vpop.f32.mrf.mxu0 }
 0x265   :  { %4982 = vmatpush.bf16.msrb.mxu0 %v7894_v32  ;;  %v8083_v51 = vld [vmem:[#allocation9 + $0x530] sm:$0xf0]  ;;  %v7958_v7 = vor.u32 %v9227_v43, %v7955_v31  ;;  %v3187_v46 = vpop.f32.mrf.mxu2  ;;  %v566_v43 = vperm.slane %v9912_v29, 7 }
 0x266   :  { %4994 = vmatpush.bf16.msra.mxu3 %v8038_v1  ;;  %v3160_v1 = vadd.f32 %v3159_v42, %v3147_v19  ;;  %v8086_v61 = vor.u32 %v9259_v49, %v8083_v51  ;;  %v7827_v32 = vld [vmem:[#allocation9 + $0x330] sm:$0xf0]  ;;  %v7513_v19 = vld [vmem:[#allocation9 + $0xa8] sm:$0xf]  ;;  %v7814_v42 = vor.u32 %v9191_v17, %v7811_v54  ;;  %v9098_v54 = vld [vmem:[#allocation9 + $0x14] sm:$0xf0] }
 0x267   :  { %v8259_v49 = vld [vmem:[#allocation9 + $0x690] sm:$0xf0]  ;;  %v7497_v51 = vld [vmem:[#allocation9 + $0x88] sm:$0xf] }
 0x268   :  { %5007 = vmatpush.bf16.msrb.mxu1 %v8166_v2  ;;  %v3173_v55 = vadd.f32 %v9941_v48, %v3160_v1  ;;  %v8307_v2 = vld [vmem:[#allocation9 + $0x6f0] sm:$0xf0]  ;;  %v7942_v48 = vor.u32 %v9223_v57, %v7939_v59  ;;  %v3161_v26 = vpop.f32.mrf.mxu3  ;;  %v8278_v1 = vor.u32 %v9307_v33, %v8275_v10  ;;  %v8262_v29 = vor.u32 %v9303_v18, %v8259_v49  ;;  %v9299_v59 = vld [vmem:[#allocation9 + $0x664] sm:$0xf]  ;;  %v7433_v17 = vld [vmem:[#allocation9 + $0x8] sm:$0xf] }
 0x269   :  { %4983 = vmatpush.bf16.msrb.mxu0 %v7878_v41  ;;  %v8310_v20 = vor.u32 %v9315_v62, %v8307_v2  ;;  %v9154_v41 = vld [vmem:[#allocation9 + $0x1d4] sm:$0xf0]  ;;  %v7625_v62 = vld [vmem:[#allocation9 + $0x188] sm:$0xf]  ;;  %v9287_v33 = vld [vmem:[#allocation9 + $0x604] sm:$0xf] }
 0x26a   :  { %4995 = vmatpush.bf16.msra.mxu3 %v8022_v0  ;;  %v9126_v0 = vld [vmem:[#allocation9 + $0xf4] sm:$0xf0]  ;;  %v3273_v5 = vmul.f32 0.2, %v3173_v55 }
 0x26b   :  { %v7546_v50 = vor.u32 %v9126_v0, %v7545_v3  ;;  %v9146_v2 = vld [vmem:[#allocation9 + $0x194] sm:$0xf0]  ;;  %v8243_v3 = vld [vmem:[#allocation9 + $0x670] sm:$0xf0]  ;;  %v7481_v0 = vld [vmem:[#allocation9 + $0x68] sm:$0xf] }
 0x26c   :  { %5008 = vmatpush.bf16.msrb.mxu1 %v8150_v14  ;;  %v3281_v11 = vmax.f32 %v3173_v55, %v3273_v5  ;;  %v8067_v14 = vld [vmem:[#allocation9 + $0x510] sm:$0xf0]  ;;  %v3200_v27 = vpop.f32.mrf.mxu0  ;;  %v9110_v5 = vld [vmem:[#allocation9 + $0x74] sm:$0xf0]  ;;  %v7626_v12 = vor.u32 %v9146_v2, %v7625_v62  ;;  %v8185_v2 = vld [vmem:[#allocation9 + $0x5e8] sm:$0xf] }
 0x26d   :  { %4984 = vmatpush.bf16.msrb.mxu0 %v7862_v53  ;;  %v9114_v53 = vld [vmem:[#allocation9 + $0x94] sm:$0xf0] }
 0x26e   :  { %4996 = vmatpush.bf16.msra.mxu3 %v8006_v16  ;;  %v8291_v16 = vld [vmem:[#allocation9 + $0x6d0] sm:$0xf0]  ;;  %v9954_v30 = vpack.c.bf16 %v3281_v11, %v3281_v11  ;;  %v7498_v57 = vor.u32 %v9114_v53, %v7497_v51  ;;  %v7609_v11 = vld [vmem:[#allocation9 + $0x168] sm:$0xf]  ;;  %v9138_v26 = vld [vmem:[#allocation9 + $0x154] sm:$0xf0] }
 0x26f   :  { %v8294_v34 = vor.u32 %v9311_v15, %v8291_v16  ;;  %v7465_v15 = vld [vmem:[#allocation9 + $0x48] sm:$0xf]  ;;  %v9106_v16 = vld [vmem:[#allocation9 + $0x54] sm:$0xf0]  ;;  %v7594_v46 = vor.u32 %v9138_v26, %v7593_v24 }
 0x270   :  { %5009 = vmatpush.bf16.msrb.mxu1 %v8134_v60  ;;  %v9195_v60 = vld [vmem:[#allocation9 + $0x324] sm:$0xf]  ;;  %4923 = vmatmul.bf16.vlgmr.msrb.gmra.mxu2 %v9954_v30  ;;  %v7466_v22 = vor.u32 %v9106_v16, %v7465_v15  ;;  %v9186_v62 = vld [vmem:[#allocation9 + $0x2d4] sm:$0xf0] }
 0x271   :  { %4985 = vmatpush.bf16.msrb.mxu0 %v7846_v38  ;;  %v7830_v21 = vor.u32 %v9195_v60, %v7827_v32  ;;  %5019 = vmatpush.bf16.msrb.mxu2 %v8310_v20  ;;  %v7482_v38 = vor.u32 %v9110_v5, %v7481_v0  ;;  %v8211_v60 = vld [vmem:[#allocation9 + $0x630] sm:$0xf0]  ;;  %v7449_v32 = vld [vmem:[#allocation9 + $0x28] sm:$0xf]  ;;  %v9182_v16 = vld [vmem:[#allocation9 + $0x2b4] sm:$0xf0] }
 0x272   :  { %4997 = vmatpush.bf16.msra.mxu3 %v7990_v35  ;;  %v8070_v35 = vor.u32 %v9255_v9, %v8067_v14  ;;  %v8246_v9 = vor.u32 %v9299_v59, %v8243_v3  ;;  %v8227_v14 = vld [vmem:[#allocation9 + $0x650] sm:$0xf0]  ;;  %v9286_v3 = vld [vmem:[#allocation9 + $0x5f4] sm:$0xf0]  ;;  %v8041_v5 = vld [vmem:[#allocation9 + $0x4c8] sm:$0xf] }
 0x274   :  { %5010 = vmatpush.bf16.msrb.mxu1 %v8118_v44  ;;  %v7657_v44 = vld [vmem:[#allocation9 + $0x1c8] sm:$0xf] }
 0x275   :  { %4986 = vmatpush.bf16.msrb.mxu0 %v7830_v21  ;;  %v7658_v31 = vor.u32 %v9154_v41, %v7657_v44  ;;  %5020 = vmatpush.bf16.msrb.mxu2 %v8294_v34  ;;  %v8195_v44 = vld [vmem:[#allocation9 + $0x610] sm:$0xf0]  ;;  %v7577_v41 = vld [vmem:[#allocation9 + $0x128] sm:$0xf] }
 0x276   :  { %4998 = vmatpush.bf16.msra.mxu3 %v7974_v40  ;;  %v9118_v40 = vld [vmem:[#allocation9 + $0xb4] sm:$0xf0]  ;;  %v8198_v18 = vor.u32 %v9287_v33, %v8195_v44  ;;  %v8153_v33 = vld [vmem:[#allocation9 + $0x5a8] sm:$0xf] }
 0x277   :  { %v7514_v56 = vor.u32 %v9118_v40, %v7513_v19  ;;  %v9134_v19 = vld [vmem:[#allocation9 + $0x134] sm:$0xf0] }
 0x278   :  { %5011 = vmatpush.bf16.msrb.mxu1 %v8102_v47  ;;  %v9150_v47 = vld [vmem:[#allocation9 + $0x1b4] sm:$0xf0] }
 0x279   :  { %4987 = vmatpush.bf16.msrb.mxu0 %v7814_v42  ;;  %v7642_v55 = vor.u32 %v9150_v47, %v7641_v63  ;;  %5021 = vmatpush.bf16.msrb.mxu2 %v8278_v1  ;;  %v7801_v42 = vld [vmem:[#allocation9 + $0x2e8] sm:$0xf]  ;;  %v9254_v1 = vld [vmem:[#allocation9 + $0x4f4] sm:$0xf0]  ;;  %v7434_v63 = vor.u32 %v9098_v54, %v7433_v17  ;;  %v8403_v17 = vld [vmem:[#allocation9 + $0x7b0] sm:$0xf0] }
 0x27a   :  { %4999 = vmatpush.bf16.msra.mxu3 %v7958_v7  ;;  %v3186_v7 = vadd.f32 %v9952_v36, %v566_v43  ;;  %v9295_v36 = vld [vmem:[#allocation9 + $0x644] sm:$0xf]  ;;  %v9190_v43 = vld [vmem:[#allocation9 + $0x2f4] sm:$0xf0]  ;;  %v7737_v54 = vld [vmem:[#allocation9 + $0x268] sm:$0xf] }
 0x27b   :  { %v8230_v23 = vor.u32 %v9295_v36, %v8227_v14  ;;  %v7802_v53 = vor.u32 %v9190_v43, %v7801_v42  ;;  %v7769_v14 = vld [vmem:[#allocation9 + $0x2a8] sm:$0xf]  ;;  %v9174_v43 = vld [vmem:[#allocation9 + $0x274] sm:$0xf0] }
 0x27c   :  { %5012 = vmatpush.bf16.msrb.mxu1 %v8086_v61  ;;  %v3211_v6 = vpop.f32.mrf.mxu1  ;;  %v3199_v61 = vadd.f32 %v9949_v45, %v3186_v7  ;;  %v9291_v45 = vld [vmem:[#allocation9 + $0x624] sm:$0xf]  ;;  %v7561_v7 = vld [vmem:[#allocation9 + $0x108] sm:$0xf] }
 0x27d   :  { %5022 = vmatpush.bf16.msrb.mxu2 %v8262_v29  ;;  %v8214_v34 = vor.u32 %v9291_v45, %v8211_v60  ;;  %v9130_v29 = vld [vmem:[#allocation9 + $0x114] sm:$0xf0]  ;;  %v9343_v60 = vld [vmem:[#allocation9 + $0x7c4] sm:$0xf] }
 0x27e   :  { %5000 = vmatpush.bf16.msra.mxu3 %v7942_v48  ;;  %v9142_v48 = vld [vmem:[#allocation9 + $0x174] sm:$0xf0] }
 0x27f   :  { %v7610_v20 = vor.u32 %v9142_v48, %v7609_v11  ;;  %v8186_v11 = vor.u32 %v9286_v3, %v8185_v2  ;;  %v8435_v48 = vld [vmem:[#allocation9 + $0x7f0] sm:$0xf0]  ;;  %v9246_v45 = vld [vmem:[#allocation9 + $0x4b4] sm:$0xf0] }
 0x280   :  { %5013 = vmatpush.bf16.msrb.mxu1 %v8070_v35  ;;  %4975 = vmatmul.bf16.vlgmr.msra.gmra.mxu2 %v9910_v25  ;;  %v9102_v35 = vld [vmem:[#allocation9 + $0x34] sm:$0xf0] }
 0x281   :  { %5001 = vmatmul.bf16.vlgmr.msra.gmra.mxu3 %v9926_v8  ;;  %5023 = vmatpush.bf16.msrb.mxu2 %v8246_v9  ;;  %v9347_v9 = vld [vmem:[#allocation9 + $0x7e4] sm:$0xf] }
 0x282   :  { %5045 = vmatpush.bf16.msrb.mxu3 %v7546_v50  ;;  %v3212_v50 = vadd.f32 %v3211_v6, %v3199_v61  ;;  %v9250_v6 = vld [vmem:[#allocation9 + $0x4d4] sm:$0xf0]  ;;  %v7562_v61 = vor.u32 %v9130_v29, %v7561_v7  ;;  %v8438_v24 = vor.u32 %v9347_v9, %v8435_v48  ;;  %v7721_v7 = vld [vmem:[#allocation9 + $0x248] sm:$0xf] }
 0x283   :  { %5014 = vmatmul.bf16.vlgmr.msrb.gmra.mxu1 %v9929_v28  ;;  %v8042_v15 = vor.u32 %v9250_v6, %v8041_v5  ;;  %v9234_v5 = vld [vmem:[#allocation9 + $0x454] sm:$0xf0] }
 0x284   :  { %5058 = vmatpush.bf16.msra.mxu1 %v7674_v4  ;;  %v3224_v27 = vpop.f32.mrf.mxu3  ;;  %v3213_v4 = vpop.f32.mrf.mxu1 }
 0x285   :  { %v3225_v21 = vadd.f32 %v3224_v27, %v3212_v50  ;;  %5024 = vmatpush.bf16.msrb.mxu2 %v8230_v23  ;;  %v9282_v50 = vld [vmem:[#allocation9 + $0x5d4] sm:$0xf0]  ;;  %v7770_v27 = vor.u32 %v9182_v16, %v7769_v14  ;;  %v8105_v16 = vld [vmem:[#allocation9 + $0x548] sm:$0xf] }
 0x286   :  { %5046 = vmatpush.bf16.msrb.mxu3 %v7530_v39  ;;  %v3250_v52 = vpop.f32.mrf.mxu0  ;;  %v7450_v39 = vor.u32 %v9102_v35, %v7449_v32  ;;  %v8419_v32 = vld [vmem:[#allocation9 + $0x7d0] sm:$0xf0]  ;;  %v7753_v35 = vld [vmem:[#allocation9 + $0x288] sm:$0xf] }
 0x287   :  { %v8422_v44 = vor.u32 %v9343_v60, %v8419_v32  ;;  %v8355_v32 = vld [vmem:[#allocation9 + $0x750] sm:$0xf0] }
 0x288   :  { %5059 = vmatpush.bf16.msra.mxu1 %v7658_v31  ;;  %v8057_v31 = vld [vmem:[#allocation9 + $0x4e8] sm:$0xf] }
 0x289   :  { %5025 = vmatpush.bf16.msrb.mxu2 %v8214_v34  ;;  %v8009_v34 = vld [vmem:[#allocation9 + $0x488] sm:$0xf] }
 0x28a   :  { %5047 = vmatpush.bf16.msrb.mxu3 %v7514_v56  ;;  %v3237_v10 = vpop.f32.mrf.mxu2  ;;  %v7578_v56 = vor.u32 %v9134_v19, %v7577_v41 }
 0x28b   :  { %v3238_v40 = vadd.f32 %v3237_v10, %v3225_v21  ;;  %v9278_v10 = vld [vmem:[#allocation9 + $0x5b4] sm:$0xf0] }
 0x28c   :  { %5060 = vmatpush.bf16.msra.mxu1 %v7642_v55  ;;  %v3226_v47 = vpop.f32.mrf.mxu3  ;;  %v8058_v55 = vor.u32 %v9254_v1, %v8057_v31  ;;  %v3263_v59 = vpop.f32.mrf.mxu1  ;;  %v8154_v19 = vor.u32 %v9278_v10, %v8153_v33  ;;  %v8137_v31 = vld [vmem:[#allocation9 + $0x588] sm:$0xf]  ;;  %v9274_v1 = vld [vmem:[#allocation9 + $0x594] sm:$0xf0] }
 0x28d   :  { %v3251_v51 = vadd.f32 %v3250_v52, %v3238_v40  ;;  %5026 = vmatpush.bf16.msrb.mxu2 %v8198_v18  ;;  %v9339_v40 = vld [vmem:[#allocation9 + $0x7a4] sm:$0xf]  ;;  %v9238_v18 = vld [vmem:[#allocation9 + $0x474] sm:$0xf0]  ;;  %v9969_v47 = vld [vmem:[#allocation11] sm:$0xf] }
 0x28e   :  { %5048 = vmatpush.bf16.msrb.mxu3 %v7498_v57  ;;  %v3252_v49 = vpop.f32.mrf.mxu0  ;;  %v7785_v57 = vld [vmem:[#allocation9 + $0x2c8] sm:$0xf]  ;;  %v3549_v3 = vperm.slane %v9969_v47, 0  ;;  %v9262_v10 = vld [vmem:[#allocation9 + $0x534] sm:$0xf0] }
 0x28f   :  { %v3264_v0 = vadd.f32 %v3263_v59, %v3251_v51  ;;  %v7786_v36 = vor.u32 %v9186_v62, %v7785_v57  ;;  %v7738_v49 = vor.u32 %v9174_v43, %v7737_v54  ;;  %v8138_v51 = vor.u32 %v9274_v1, %v8137_v31  ;;  %v9170_v57 = vld [vmem:[#allocation9 + $0x254] sm:$0xf0]  ;;  %v8121_v59 = vld [vmem:[#allocation9 + $0x568] sm:$0xf]  ;;  %v9124_v54 = vld [vmem:[#allocation9 + $0xec] sm:$0xf] }
 0x290   :  { %5061 = vmatpush.bf16.msra.mxu1 %v7626_v12  ;;  %5027 = vmatmul.bf16.vlgmr.msrb.gmra.mxu2 %v9954_v30  ;;  %v9270_v62 = vld [vmem:[#allocation9 + $0x574] sm:$0xf0]  ;;  %v8089_v33 = vld [vmem:[#allocation9 + $0x528] sm:$0xf] }
 0x291   :  { %5071 = vmatpush.bf16.msra.mxu2 %v7802_v53  ;;  %v9335_v53 = vld [vmem:[#allocation9 + $0x784] sm:$0xf]  ;;  %v8122_v9 = vor.u32 %v9270_v62, %v8121_v59  ;;  %v8090_v1 = vor.u32 %v9262_v10, %v8089_v33  ;;  %v9314_v59 = vld [vmem:[#allocation9 + $0x6d4] sm:$0xf0]  ;;  %v9156_v62 = vld [vmem:[#allocation9 + $0x1ec] sm:$0xf] }
 0x292   :  { %5049 = vmatpush.bf16.msrb.mxu3 %v7482_v38  ;;  %v3239_v12 = vpop.f32.mrf.mxu2  ;;  %v3274_v38 = vmul.f32 0.2, %v3264_v0  ;;  %v7643_v33 = vld [vmem:[#allocation9 + $0x1b8] sm:$0xf0]  ;;  %v9112_v10 = vld [vmem:[#allocation9 + $0x8c] sm:$0xf] }
 0x294   :  { %5062 = vmatpush.bf16.msra.mxu1 %v7610_v20  ;;  %v8169_v20 = vld [vmem:[#allocation9 + $0x5c8] sm:$0xf]  ;;  %v3282_v23 = vmax.f32 %v3264_v0, %v3274_v38  ;;  %v3265_v21 = vpop.f32.mrf.mxu1  ;;  %v9331_v38 = vld [vmem:[#allocation9 + $0x764] sm:$0xf] }
 0x295   :  { %5072 = vmatpush.bf16.msra.mxu2 %v7786_v36  ;;  %v8170_v52 = vor.u32 %v9282_v50, %v8169_v20  ;;  %v7977_v0 = vld [vmem:[#allocation9 + $0x448] sm:$0xf]  ;;  %v8371_v36 = vld [vmem:[#allocation9 + $0x770] sm:$0xf0]  ;;  %v9266_v20 = vld [vmem:[#allocation9 + $0x554] sm:$0xf0] }
 0x296   :  { %5050 = vmatpush.bf16.msrb.mxu3 %v7466_v22  ;;  %v8025_v22 = vld [vmem:[#allocation9 + $0x4a8] sm:$0xf]  ;;  %v9965_v26 = vpack.c.bf16 %v3282_v23, %v3282_v23  ;;  %v7978_v14 = vor.u32 %v9234_v5, %v7977_v0  ;;  %v8106_v60 = vor.u32 %v9266_v20, %v8105_v16  ;;  %v9162_v21 = vld [vmem:[#allocation9 + $0x214] sm:$0xf0]  ;;  %v9120_v0 = vld [vmem:[#allocation9 + $0xcc] sm:$0xf] }
 0x297   :  { %v8026_v4 = vor.u32 %v9246_v45, %v8025_v22  ;;  %v7961_v23 = vld [vmem:[#allocation9 + $0x428] sm:$0xf]  ;;  %v9230_v22 = vld [vmem:[#allocation9 + $0x434] sm:$0xf0]  ;;  %v8374_v45 = vor.u32 %v9331_v38, %v8371_v36  ;;  %v7531_v5 = vld [vmem:[#allocation9 + $0xd8] sm:$0xf0] }
 0x298   :  { %5063 = vmatpush.bf16.msra.mxu1 %v7594_v46  ;;  %v9178_v46 = vld [vmem:[#allocation9 + $0x294] sm:$0xf0]  ;;  %4936 = vmatmul.bf16.vlgmr.msra.gmra.mxu0 %v9965_v26  ;;  %v9152_v20 = vld [vmem:[#allocation9 + $0x1cc] sm:$0xf] }
 0x299   :  { %5032 = vmatpush.bf16.msra.mxu0 %v8438_v24  ;;  %5073 = vmatpush.bf16.msra.mxu2 %v7770_v27  ;;  %v7754_v41 = vor.u32 %v9178_v46, %v7753_v35  ;;  %v9327_v24 = vld [vmem:[#allocation9 + $0x744] sm:$0xf]  ;;  %v7689_v35 = vld [vmem:[#allocation9 + $0x208] sm:$0xf]  ;;  %v7962_v46 = vor.u32 %v9230_v22, %v7961_v23  ;;  %v9310_v16 = vld [vmem:[#allocation9 + $0x6b4] sm:$0xf0] }
 0x29a   :  { %5051 = vmatpush.bf16.msrb.mxu3 %v7450_v39  ;;  %v9242_v39 = vld [vmem:[#allocation9 + $0x494] sm:$0xf0]  ;;  %v7690_v31 = vor.u32 %v9162_v21, %v7689_v35  ;;  %v9116_v22 = vld [vmem:[#allocation9 + $0xac] sm:$0xf]  ;;  %v8265_v35 = vld [vmem:[#allocation9 + $0x688] sm:$0xf] }
 0x29b   :  { %v8010_v42 = vor.u32 %v9242_v39, %v8009_v34  ;;  %v7945_v34 = vld [vmem:[#allocation9 + $0x408] sm:$0xf] }
 0x29c   :  { %5064 = vmatpush.bf16.msra.mxu1 %v7578_v56  ;;  %v7993_v56 = vld [vmem:[#allocation9 + $0x468] sm:$0xf] }
 0x29d   :  { %5033 = vmatpush.bf16.msra.mxu0 %v8422_v44  ;;  %5074 = vmatpush.bf16.msra.mxu2 %v7754_v41  ;;  %v7994_v29 = vor.u32 %v9238_v18, %v7993_v56  ;;  %v9226_v41 = vld [vmem:[#allocation9 + $0x414] sm:$0xf0]  ;;  %v9323_v56 = vld [vmem:[#allocation9 + $0x724] sm:$0xf]  ;;  %v8339_v18 = vld [vmem:[#allocation9 + $0x730] sm:$0xf0] }
 0x29e   :  { %5052 = vmatpush.bf16.msrb.mxu3 %v7434_v63  ;;  %v8406_v63 = vor.u32 %v9339_v40, %v8403_v17  ;;  %v9318_v40 = vld [vmem:[#allocation9 + $0x6f4] sm:$0xf0]  ;;  %v8358_v17 = vor.u32 %v9327_v24, %v8355_v32 }
 0x29f   :  { %v9218_v32 = vld [vmem:[#allocation9 + $0x3d4] sm:$0xf0] }
 0x2a0   :  { %5065 = vmatpush.bf16.msra.mxu1 %v7562_v61  ;;  %v4859_v2 = vpop.f32.mrf.mxu1  ;;  %v7722_v61 = vor.u32 %v9170_v57, %v7721_v7  ;;  %v9258_v7 = vld [vmem:[#allocation9 + $0x514] sm:$0xf0] }
 0x2a1   :  { %5053 = vmatmul.bf16.vlgmr.msrb.gmra.mxu3 %v9901_v13  ;;  %5034 = vmatpush.bf16.msra.mxu0 %v8406_v63 }
 0x2a2   :  { %5097 = vmatpush.bf16.msra.mxu3 %v8058_v55  ;;  %v8387_v55 = vld [vmem:[#allocation9 + $0x790] sm:$0xf0]  ;;  %5075 = vmatpush.bf16.msra.mxu2 %v7738_v49 }
 0x2a3   :  { %5066 = vmatmul.bf16.vlgmr.msra.gmra.mxu1 %v9908_v58  ;;  %v8390_v6 = vor.u32 %v9335_v53, %v8387_v55  ;;  %v8073_v55 = vld [vmem:[#allocation9 + $0x508] sm:$0xf] }
 0x2a4   :  { %5110 = vmatpush.bf16.msrb.mxu1 %v8186_v11  ;;  %v7705_v11 = vld [vmem:[#allocation9 + $0x228] sm:$0xf]  ;;  %v4846_v48 = vpop.f32.mrf.mxu3 }
 0x2a5   :  { %v4847_v50 = vadd.f32 %v4846_v48, %v3549_v3  ;;  %5035 = vmatpush.bf16.msra.mxu0 %v8390_v6  ;;  %v8342_v3 = vor.u32 %v9323_v56, %v8339_v18  ;;  %v8074_v6 = vor.u32 %v9258_v7, %v8073_v55  ;;  %v9222_v48 = vld [vmem:[#allocation9 + $0x3f4] sm:$0xf0]  ;;  %v7483_v56 = vld [vmem:[#allocation9 + $0x78] sm:$0xf0]  ;;  %v8233_v7 = vld [vmem:[#allocation9 + $0x648] sm:$0xf] }
 0x2a6   :  { %5098 = vmatpush.bf16.msra.mxu3 %v8042_v15  ;;  %v4885_v12 = vpop.f32.mrf.mxu0  ;;  %v9166_v15 = vld [vmem:[#allocation9 + $0x234] sm:$0xf0]  ;;  %5076 = vmatpush.bf16.msra.mxu2 %v7722_v61  ;;  %v8323_v61 = vld [vmem:[#allocation9 + $0x710] sm:$0xf0] }
 0x2a7   :  { %v4860_v27 = vadd.f32 %v4859_v2, %v4847_v50  ;;  %v7675_v2 = vld [vmem:[#allocation9 + $0x1f8] sm:$0xf0]  ;;  %v9210_v55 = vld [vmem:[#allocation9 + $0x394] sm:$0xf0] }
 0x2a8   :  { %5111 = vmatpush.bf16.msrb.mxu1 %v8170_v52  ;;  %v7706_v52 = vor.u32 %v9166_v15, %v7705_v11  ;;  %v4861_v44 = vpop.f32.mrf.mxu1  ;;  %4988 = vmatmul.bf16.vlgmr.msrb.gmra.mxu0 %v9915_v37  ;;  %v7678_v36 = vor.u32 %v9156_v62, %v7675_v2  ;;  %v7929_v11 = vld [vmem:[#allocation9 + $0x3e8] sm:$0xf]  ;;  %v7534_v15 = vor.u32 %v9120_v0, %v7531_v5  ;;  %v7659_v50 = vld [vmem:[#allocation9 + $0x1d8] sm:$0xf0]  ;;  %v9104_v2 = vld [vmem:[#allocation9 + $0x4c] sm:$0xf] }
 0x2a9   :  { %5036 = vmatpush.bf16.msra.mxu0 %v8374_v45  ;;  %v7515_v45 = vld [vmem:[#allocation9 + $0xb8] sm:$0xf0]  ;;  %v7930_v24 = vor.u32 %v9222_v48, %v7929_v11  ;;  %v9294_v11 = vld [vmem:[#allocation9 + $0x634] sm:$0xf0]  ;;  %v9136_v48 = vld [vmem:[#allocation9 + $0x14c] sm:$0xf] }
 0x2aa   :  { %5099 = vmatpush.bf16.msra.mxu3 %v8026_v4  ;;  %v4872_v4 = vpop.f32.mrf.mxu2  ;;  %5077 = vmatpush.bf16.msra.mxu2 %v7706_v52  ;;  %v7662_v52 = vor.u32 %v9152_v20, %v7659_v50  ;;  %v7518_v21 = vor.u32 %v9116_v22, %v7515_v45  ;;  %v7611_v62 = vld [vmem:[#allocation9 + $0x178] sm:$0xf0]  ;;  %v9100_v20 = vld [vmem:[#allocation9 + $0x2c] sm:$0xf]  ;;  %v7849_v22 = vld [vmem:[#allocation9 + $0x348] sm:$0xf] }
 0x2ab   :  { %v4873_v39 = vadd.f32 %v4872_v4, %v4860_v27  ;;  %v9306_v4 = vld [vmem:[#allocation9 + $0x694] sm:$0xf0]  ;;  %v7451_v50 = vld [vmem:[#allocation9 + $0x38] sm:$0xf0] }
 0x2ac   :  { %5112 = vmatpush.bf16.msrb.mxu1 %v8154_v19  ;;  %v8313_v19 = vld [vmem:[#allocation9 + $0x6e8] sm:$0xf]  ;;  %v4848_v49 = vpop.f32.mrf.mxu3  ;;  %v8266_v44 = vor.u32 %v9306_v4, %v8265_v35  ;;  %v7454_v35 = vor.u32 %v9100_v20, %v7451_v50  ;;  %v7579_v4 = vld [vmem:[#allocation9 + $0x138] sm:$0xf0] }
 0x2ad   :  { %v9973_v63 = vadd.f32 %v4885_v12, %v4873_v39  ;;  %v8314_v53 = vor.u32 %v9318_v40, %v8313_v19  ;;  %5037 = vmatpush.bf16.msra.mxu0 %v8358_v17  ;;  %v9319_v12 = vld [vmem:[#allocation9 + $0x704] sm:$0xf]  ;;  %v7897_v19 = vld [vmem:[#allocation9 + $0x3a8] sm:$0xf]  ;;  %v9214_v40 = vld [vmem:[#allocation9 + $0x3b4] sm:$0xf0] }
 0x2ae   :  { %5100 = vmatpush.bf16.msra.mxu3 %v8010_v42  ;;  %v7547_v42 = vld [vmem:[#allocation9 + $0xf8] sm:$0xf0]  ;;  %v4887_v43 = vpop.f32.mrf.mxu0  ;;  %5078 = vmatpush.bf16.msra.mxu2 %v7690_v31  ;;  %v8326_v23 = vor.u32 %v9319_v12, %v8323_v61  ;;  %v8249_v17 = vld [vmem:[#allocation9 + $0x668] sm:$0xf]  ;;  %v7898_v18 = vor.u32 %v9214_v40, %v7897_v19  ;;  %v9206_v61 = vld [vmem:[#allocation9 + $0x374] sm:$0xf0] }
 0x2af   :  { %v7550_v57 = vor.u32 %v9124_v54, %v7547_v42  ;;  %v9302_v42 = vld [vmem:[#allocation9 + $0x674] sm:$0xf0]  ;;  %v9144_v43 = vld [vmem:[#allocation9 + $0x18c] sm:$0xf]  ;;  %v7627_v31 = vld [vmem:[#allocation9 + $0x198] sm:$0xf0] }
 0x2b0   :  { %5113 = vmatpush.bf16.msrb.mxu1 %v8138_v51  ;;  %v7946_v51 = vor.u32 %v9226_v41, %v7945_v34  ;;  %v7499_v34 = vld [vmem:[#allocation9 + $0x98] sm:$0xf0]  ;;  %v8250_v49 = vor.u32 %v9302_v42, %v8249_v17  ;;  %v7865_v12 = vld [vmem:[#allocation9 + $0x368] sm:$0xf]  ;;  %v9198_v17 = vld [vmem:[#allocation9 + $0x334] sm:$0xf0] }
 0x2b1   :  { %5079 = vmatmul.bf16.vlgmr.msra.gmra.mxu2 %v9910_v25  ;;  %5038 = vmatpush.bf16.msra.mxu0 %v8342_v3  ;;  %v7502_v54 = vor.u32 %v9112_v10, %v7499_v34  ;;  %v7467_v3 = vld [vmem:[#allocation9 + $0x58] sm:$0xf0]  ;;  %v7833_v40 = vld [vmem:[#allocation9 + $0x328] sm:$0xf] }
 0x2b2   :  { %5101 = vmatpush.bf16.msra.mxu3 %v7994_v29  ;;  %v8297_v29 = vld [vmem:[#allocation9 + $0x6c8] sm:$0xf]  ;;  %5123 = vmatpush.bf16.msrb.mxu2 %v8314_v53  ;;  %v7803_v10 = vld [vmem:[#allocation9 + $0x2f8] sm:$0xf0] }
 0x2b3   :  { %v8298_v38 = vor.u32 %v9314_v59, %v8297_v29  ;;  %v7881_v53 = vld [vmem:[#allocation9 + $0x388] sm:$0xf]  ;;  %v9140_v59 = vld [vmem:[#allocation9 + $0x16c] sm:$0xf] }
 0x2b4   :  { %5114 = vmatpush.bf16.msrb.mxu1 %v8122_v9  ;;  %v4874_v9 = vpop.f32.mrf.mxu2  ;;  %v7882_v0 = vor.u32 %v9210_v55, %v7881_v53  ;;  %v9284_v53 = vld [vmem:[#allocation9 + $0x5ec] sm:$0xf]  ;;  %v8187_v55 = vld [vmem:[#allocation9 + $0x5f8] sm:$0xf0]  ;;  %v8425_v50 = vld [vmem:[#allocation9 + $0x7c8] sm:$0xf] }
 0x2b5   :  { %5039 = vmatpush.bf16.msra.mxu0 %v8326_v23  ;;  %v8217_v9 = vld [vmem:[#allocation9 + $0x628] sm:$0xf]  ;;  %v7866_v23 = vor.u32 %v9206_v61, %v7865_v12  ;;  %v9180_v12 = vld [vmem:[#allocation9 + $0x2ac] sm:$0xf] }
 0x2b6   :  { %5102 = vmatpush.bf16.msra.mxu3 %v7978_v14  ;;  %v8281_v14 = vld [vmem:[#allocation9 + $0x6a8] sm:$0xf]  ;;  %5124 = vmatpush.bf16.msrb.mxu2 %v8298_v38 }
 0x2b7   :  { %v8282_v27 = vor.u32 %v9310_v16, %v8281_v14  ;;  %v7595_v14 = vld [vmem:[#allocation9 + $0x158] sm:$0xf0] }
 0x2b8   :  { %5115 = vmatpush.bf16.msrb.mxu1 %v8106_v60  ;;  %v7913_v60 = vld [vmem:[#allocation9 + $0x3c8] sm:$0xf]  ;;  %5040 = vmatmul.bf16.vlgmr.msra.gmra.mxu0 %v9965_v26 }
 0x2b9   :  { %5084 = vmatpush.bf16.msrb.mxu0 %v7930_v24  ;;  %v7914_v39 = vor.u32 %v9218_v32, %v7913_v60  ;;  %v8218_v24 = vor.u32 %v9294_v11, %v8217_v9  ;;  %v8201_v60 = vld [vmem:[#allocation9 + $0x608] sm:$0xf]  ;;  %v9290_v32 = vld [vmem:[#allocation9 + $0x614] sm:$0xf0]  ;;  %v7771_v9 = vld [vmem:[#allocation9 + $0x2b8] sm:$0xf0] }
 0x2ba   :  { %5103 = vmatpush.bf16.msra.mxu3 %v7962_v46  ;;  %v9148_v46 = vld [vmem:[#allocation9 + $0x1ac] sm:$0xf]  ;;  %5125 = vmatpush.bf16.msrb.mxu2 %v8282_v27  ;;  %v7598_v27 = vor.u32 %v9136_v48, %v7595_v14  ;;  %v8027_v14 = vld [vmem:[#allocation9 + $0x4b8] sm:$0xf0] }
 0x2bb   :  { %v7646_v41 = vor.u32 %v9148_v46, %v7643_v33  ;;  %v7435_v46 = vld [vmem:[#allocation9 + $0x18] sm:$0xf0]  ;;  %v9188_v33 = vld [vmem:[#allocation9 + $0x2ec] sm:$0xf] }
 0x2bc   :  { %5116 = vmatpush.bf16.msrb.mxu1 %v8090_v1  ;;  %v9108_v1 = vld [vmem:[#allocation9 + $0x6c] sm:$0xf] }
 0x2bd   :  { %5085 = vmatpush.bf16.msrb.mxu0 %v7914_v39  ;;  %v7486_v29 = vor.u32 %v9108_v1, %v7483_v56  ;;  %v9252_v39 = vld [vmem:[#allocation9 + $0x4ec] sm:$0xf]  ;;  %v7563_v1 = vld [vmem:[#allocation9 + $0x118] sm:$0xf0] }
 0x2be   :  { %5104 = vmatpush.bf16.msra.mxu3 %v7946_v51  ;;  %5126 = vmatpush.bf16.msrb.mxu2 %v8266_v44  ;;  %v7630_v51 = vor.u32 %v9144_v43, %v7627_v31  ;;  %v8059_v44 = vld [vmem:[#allocation9 + $0x4f8] sm:$0xf0]  ;;  %v7806_v43 = vor.u32 %v9188_v33, %v7803_v10  ;;  %v9128_v31 = vld [vmem:[#allocation9 + $0x10c] sm:$0xf] }
 0x2bf   :  { %v9184_v56 = vld [vmem:[#allocation9 + $0x2cc] sm:$0xf] }
 0x2c0   :  { %5117 = vmatpush.bf16.msrb.mxu1 %v8074_v6  ;;  %v7614_v6 = vor.u32 %v9140_v59, %v7611_v62  ;;  %v4911_v16 = vpop.f32.mrf.mxu1  ;;  %v7566_v59 = vor.u32 %v9128_v31, %v7563_v1  ;;  %v7817_v62 = vld [vmem:[#allocation9 + $0x308] sm:$0xf]  ;;  %v9244_v48 = vld [vmem:[#allocation9 + $0x4ac] sm:$0xf]  ;;  %v7723_v1 = vld [vmem:[#allocation9 + $0x258] sm:$0xf0] }
 0x2c1   :  { %5105 = vmatmul.bf16.vlgmr.msra.gmra.mxu3 %v9926_v8  ;;  %5086 = vmatpush.bf16.msrb.mxu0 %v7898_v18  ;;  %v9172_v33 = vld [vmem:[#allocation9 + $0x26c] sm:$0xf] }
 0x2c2   :  { %5149 = vmatpush.bf16.msrb.mxu3 %v7550_v57  ;;  %v9298_v57 = vld [vmem:[#allocation9 + $0x654] sm:$0xf0]  ;;  %5127 = vmatpush.bf16.msrb.mxu2 %v8250_v49  ;;  %v8062_v49 = vor.u32 %v9252_v39, %v8059_v44  ;;  %v9272_v39 = vld [vmem:[#allocation9 + $0x58c] sm:$0xf]  ;;  %v8139_v44 = vld [vmem:[#allocation9 + $0x598] sm:$0xf0] }
 0x2c3   :  { %5118 = vmatmul.bf16.vlgmr.msrb.gmra.mxu1 %v9929_v28  ;;  %v8234_v5 = vor.u32 %v9298_v57, %v8233_v7  ;;  %v7834_v7 = vor.u32 %v9198_v17, %v7833_v40  ;;  %v8043_v57 = vld [vmem:[#allocation9 + $0x4d8] sm:$0xf0]  ;;  %v8142_v17 = vor.u32 %v9272_v39, %v8139_v44  ;;  %v9256_v44 = vld [vmem:[#allocation9 + $0x50c] sm:$0xf] }
 0x2c4   :  { %5162 = vmatpush.bf16.msra.mxu1 %v7678_v36  ;;  %v4898_v38 = vpop.f32.mrf.mxu3  ;;  %v7470_v36 = vor.u32 %v9104_v2, %v7467_v3  ;;  %v9194_v2 = vld [vmem:[#allocation9 + $0x314] sm:$0xf0] }
 0x2c5   :  { %5087 = vmatpush.bf16.msrb.mxu0 %v7882_v0  ;;  %v8190_v0 = vor.u32 %v9284_v53, %v8187_v55  ;;  %v7818_v11 = vor.u32 %v9194_v2, %v7817_v62  ;;  %v9232_v53 = vld [vmem:[#allocation9 + $0x44c] sm:$0xf]  ;;  %v7979_v55 = vld [vmem:[#allocation9 + $0x458] sm:$0xf0]  ;;  %v9334_v62 = vld [vmem:[#allocation9 + $0x774] sm:$0xf0] }
 0x2c6   :  { %5150 = vmatpush.bf16.msrb.mxu3 %v7534_v15  ;;  %v4899_v15 = vadd.f32 %v4898_v38, %v9973_v63  ;;  %5128 = vmatpush.bf16.msrb.mxu2 %v8234_v5  ;;  %v9096_v63 = vld [vmem:[#allocation9 + $0xc] sm:$0xf]  ;;  %v8441_v5 = vld [vmem:[#allocation9 + $0x7e8] sm:$0xf] }
 0x2c7   :  { %v7438_v42 = vor.u32 %v9096_v63, %v7435_v46  ;;  %v9280_v38 = vld [vmem:[#allocation9 + $0x5cc] sm:$0xf]  ;;  %v8409_v63 = vld [vmem:[#allocation9 + $0x7a8] sm:$0xf]  ;;  %v9342_v46 = vld [vmem:[#allocation9 + $0x7b4] sm:$0xf0] }
 0x2c8   :  { %5163 = vmatpush.bf16.msra.mxu1 %v7662_v52  ;;  %v9980_v45 = vadd.f32 %v4911_v16, %v4899_v15  ;;  %v9202_v52 = vld [vmem:[#allocation9 + $0x354] sm:$0xf0]  ;;  %v4913_v18 = vpop.f32.mrf.mxu1  ;;  %v7774_v16 = vor.u32 %v9180_v12, %v7771_v9  ;;  %v9164_v2 = vld [vmem:[#allocation9 + $0x22c] sm:$0xf]  ;;  %v8107_v12 = vld [vmem:[#allocation9 + $0x558] sm:$0xf0] }
 0x2c9   :  { %5088 = vmatpush.bf16.msrb.mxu0 %v7866_v23  ;;  %v7850_v34 = vor.u32 %v9202_v52, %v7849_v22  ;;  %v9346_v23 = vld [vmem:[#allocation9 + $0x7d4] sm:$0xf0]  ;;  %v9176_v22 = vld [vmem:[#allocation9 + $0x28c] sm:$0xf]  ;;  %v8123_v18 = vld [vmem:[#allocation9 + $0x578] sm:$0xf0] }
 0x2ca   :  { %5151 = vmatpush.bf16.msrb.mxu3 %v7518_v21  ;;  %v9132_v21 = vld [vmem:[#allocation9 + $0x12c] sm:$0xf]  ;;  %5129 = vmatpush.bf16.msrb.mxu2 %v8218_v24  ;;  %v8030_v24 = vor.u32 %v9244_v48, %v8027_v14  ;;  %v9330_v14 = vld [vmem:[#allocation9 + $0x754] sm:$0xf0] }
 0x2cb   :  { %v7582_v19 = vor.u32 %v9132_v21, %v7579_v4  ;;  %v9276_v52 = vld [vmem:[#allocation9 + $0x5ac] sm:$0xf] }
 0x2cc   :  { %5164 = vmatpush.bf16.msra.mxu1 %v7646_v41  ;;  %v8202_v41 = vor.u32 %v9290_v32, %v8201_v60  ;;  %v8155_v60 = vld [vmem:[#allocation9 + $0x5b8] sm:$0xf0]  ;;  %v9240_v32 = vld [vmem:[#allocation9 + $0x48c] sm:$0xf] }
 0x2cd   :  { %5089 = vmatpush.bf16.msrb.mxu0 %v7850_v34  ;;  %v8158_v4 = vor.u32 %v9276_v52, %v8155_v60  ;;  %v7739_v34 = vld [vmem:[#allocation9 + $0x278] sm:$0xf0]  ;;  %v9228_v9 = vld [vmem:[#allocation9 + $0x42c] sm:$0xf] }
 0x2ce   :  { %5152 = vmatpush.bf16.msrb.mxu3 %v7502_v54  ;;  %v4900_v54 = vpop.f32.mrf.mxu3  ;;  %5130 = vmatpush.bf16.msrb.mxu2 %v8202_v41  ;;  %v7995_v41 = vld [vmem:[#allocation9 + $0x478] sm:$0xf0]  ;;  %v7742_v40 = vor.u32 %v9172_v33, %v7739_v34  ;;  %v9316_v60 = vld [vmem:[#allocation9 + $0x6ec] sm:$0xf]  ;;  %v9326_v33 = vld [vmem:[#allocation9 + $0x734] sm:$0xf0] }
 0x2cf   :  { %v8393_v54 = vld [vmem:[#allocation9 + $0x788] sm:$0xf]  ;;  %v7947_v52 = vld [vmem:[#allocation9 + $0x418] sm:$0xf0] }
 0x2d0   :  { %5165 = vmatpush.bf16.msra.mxu1 %v7630_v51  ;;  %v7787_v51 = vld [vmem:[#allocation9 + $0x2d8] sm:$0xf0] }
 0x2d1   :  { %v7790_v3 = vor.u32 %v9184_v56, %v7787_v51  ;;  %5131 = vmatmul.bf16.vlgmr.msrb.gmra.mxu2 %v9954_v30  ;;  %5090 = vmatpush.bf16.msrb.mxu0 %v7834_v7  ;;  %v9268_v56 = vld [vmem:[#allocation9 + $0x56c] sm:$0xf]  ;;  %v3550_v51 = vperm.slane %v9969_v47, 1  ;;  %v7963_v47 = vld [vmem:[#allocation9 + $0x438] sm:$0xf0] }
 0x2d2   :  { %5153 = vmatpush.bf16.msrb.mxu3 %v7486_v29  ;;  %v9248_v29 = vld [vmem:[#allocation9 + $0x4cc] sm:$0xf]  ;;  %5175 = vmatpush.bf16.msra.mxu2 %v7806_v43 }
 0x2d3   :  { %v8046_v61 = vor.u32 %v9248_v29, %v8043_v57  ;;  %v9168_v43 = vld [vmem:[#allocation9 + $0x24c] sm:$0xf]  ;;  %v8126_v57 = vor.u32 %v9268_v56, %v8123_v18 }
 0x2d4   :  { %5166 = vmatpush.bf16.msra.mxu1 %v7614_v6  ;;  %v9350_v6 = vld [vmem:[#allocation9 + $0x7f4] sm:$0xf0]  ;;  %v7726_v29 = vor.u32 %v9168_v43, %v7723_v1  ;;  %v9220_v18 = vld [vmem:[#allocation9 + $0x3ec] sm:$0xf] }
 0x2d5   :  { %v8442_v15 = vor.u32 %v9350_v6, %v8441_v5  ;;  %5091 = vmatpush.bf16.msrb.mxu0 %v7818_v11  ;;  %v7707_v5 = vld [vmem:[#allocation9 + $0x238] sm:$0xf0]  ;;  %v9264_v6 = vld [vmem:[#allocation9 + $0x54c] sm:$0xf]  ;;  %v9322_v1 = vld [vmem:[#allocation9 + $0x714] sm:$0xf0] }
 0x2d6   :  { %5154 = vmatpush.bf16.msrb.mxu3 %v7470_v36  ;;  %v8171_v36 = vld [vmem:[#allocation9 + $0x5d8] sm:$0xf0]  ;;  %5176 = vmatpush.bf16.msra.mxu2 %v7790_v3  ;;  %v7710_v11 = vor.u32 %v9164_v2, %v7707_v5  ;;  %v8110_v48 = vor.u32 %v9264_v6, %v8107_v12  ;;  %v9216_v2 = vld [vmem:[#allocation9 + $0x3cc] sm:$0xf] }
 0x2d7   :  { %v8174_v20 = vor.u32 %v9280_v38, %v8171_v36  ;;  %v8361_v36 = vld [vmem:[#allocation9 + $0x748] sm:$0xf]  ;;  %v8267_v5 = vld [vmem:[#allocation9 + $0x698] sm:$0xf0]  ;;  %v9360_v12 = vld [vmem:[#allocation12 + $0x44] sm:$0xf0] }
 0x2d8   :  { %5167 = vmatpush.bf16.msra.mxu1 %v7598_v27  ;;  %v7755_v27 = vld [vmem:[#allocation9 + $0x298] sm:$0xf0]  ;;  %5092 = vmatmul.bf16.vlgmr.msrb.gmra.mxu0 %v9915_v37 }
 0x2d9   :  { %5136 = vmatpush.bf16.msra.mxu0 %v8442_v15  ;;  %v7758_v21 = vor.u32 %v9176_v22, %v7755_v27  ;;  %v9160_v15 = vld [vmem:[#allocation9 + $0x20c] sm:$0xf]  ;;  %v8091_v22 = vld [vmem:[#allocation9 + $0x538] sm:$0xf0] }
 0x2da   :  { %5155 = vmatpush.bf16.msrb.mxu3 %v7454_v35  ;;  %v8011_v35 = vld [vmem:[#allocation9 + $0x498] sm:$0xf0]  ;;  %5177 = vmatpush.bf16.msra.mxu2 %v7774_v16 }
 0x2db   :  { %v8014_v10 = vor.u32 %v9240_v32, %v8011_v35  ;;  %v7691_v16 = vld [vmem:[#allocation9 + $0x218] sm:$0xf0]  ;;  %v8362_v35 = vor.u32 %v9330_v14, %v8361_v36 }
 0x2dc   :  { %5168 = vmatpush.bf16.msra.mxu1 %v7582_v19  ;;  %v8410_v19 = vor.u32 %v9342_v46, %v8409_v63  ;;  %v8315_v32 = vld [vmem:[#allocation9 + $0x6f8] sm:$0xf0]  ;;  %v8345_v46 = vld [vmem:[#allocation9 + $0x728] sm:$0xf] }
 0x2dd   :  { %v8318_v39 = vor.u32 %v9316_v60, %v8315_v32  ;;  %v9382_v36 = vld [vmem:[#allocation12 + $0xf4] sm:$0xf0]  ;;  %v9296_v60 = vld [vmem:[#allocation9 + $0x64c] sm:$0xf] }
 0x2de   :  { %5156 = vmatpush.bf16.msrb.mxu3 %v7438_v42  ;;  %5178 = vmatpush.bf16.msra.mxu2 %v7758_v21  ;;  %v9338_v42 = vld [vmem:[#allocation9 + $0x794] sm:$0xf0]  ;;  %v9366_v21 = vld [vmem:[#allocation12 + $0x74] sm:$0xf0] }
 0x2df   :  { %v8394_v7 = vor.u32 %v9338_v42, %v8393_v54  ;;  %v8497_v54 = vld [vmem:[#allocation12 + $0x60] sm:$0xf]  ;;  %v9364_v42 = vld [vmem:[#allocation12 + $0x64] sm:$0xf0]  ;;  %v8235_v32 = vld [vmem:[#allocation9 + $0x658] sm:$0xf0] }
 0x2e0   :  { %5169 = vmatpush.bf16.msra.mxu1 %v7566_v59  ;;  %v8377_v59 = vld [vmem:[#allocation9 + $0x768] sm:$0xf] }
 0x2e1   :  { %5157 = vmatmul.bf16.vlgmr.msrb.gmra.mxu3 %v9901_v13  ;;  %v8426_v13 = vor.u32 %v9346_v23, %v8425_v50  ;;  %v8378_v38 = vor.u32 %v9334_v62, %v8377_v59  ;;  %v7966_v50 = vor.u32 %v9228_v9, %v7963_v47  ;;  %v9260_v23 = vld [vmem:[#allocation9 + $0x52c] sm:$0xf]  ;;  %v7899_v47 = vld [vmem:[#allocation9 + $0x3b8] sm:$0xf0] }
 0x2e2   :  { %5201 = vmatpush.bf16.msra.mxu3 %v8062_v49  ;;  %v4963_v49 = vpop.f32.mrf.mxu1  ;;  %5179 = vmatpush.bf16.msra.mxu2 %v7742_v40  ;;  %v8094_v63 = vor.u32 %v9260_v23, %v8091_v22  ;;  %v9212_v9 = vld [vmem:[#allocation9 + $0x3ac] sm:$0xf] }
 0x2e3   :  { %5170 = vmatmul.bf16.vlgmr.msra.gmra.mxu1 %v9908_v58  ;;  %v9236_v58 = vld [vmem:[#allocation9 + $0x46c] sm:$0xf]  ;;  %5137 = vmatpush.bf16.msra.mxu0 %v8426_v13  ;;  %v8505_v13 = vld [vmem:[#allocation12 + $0x70] sm:$0xf] }
 0x2e4   :  { %5214 = vmatpush.bf16.msrb.mxu1 %v8190_v0  ;;  %v7998_v31 = vor.u32 %v9236_v58, %v7995_v41  ;;  %v4950_v3 = vpop.f32.mrf.mxu3  ;;  %v7982_v0 = vor.u32 %v9232_v53, %v7979_v55  ;;  %v8075_v58 = vld [vmem:[#allocation9 + $0x518] sm:$0xf0]  ;;  %v9312_v41 = vld [vmem:[#allocation9 + $0x6cc] sm:$0xf]  ;;  %v8506_v40 = vor.u32 %v9366_v21, %v8505_v13  ;;  %v8498_v55 = vor.u32 %v9364_v42, %v8497_v54  ;;  %v8457_v42 = vld [vmem:[#allocation12 + $0x10] sm:$0xf] }
 0x2e5   :  { %v8078_v43 = vor.u32 %v9256_v44, %v8075_v58  ;;  %v8283_v53 = vld [vmem:[#allocation9 + $0x6b8] sm:$0xf0]  ;;  %v9208_v23 = vld [vmem:[#allocation9 + $0x38c] sm:$0xf]  ;;  %v8553_v44 = vld [vmem:[#allocation12 + $0xd0] sm:$0xf] }
 0x2e6   :  { %5202 = vmatpush.bf16.msra.mxu3 %v8046_v61  ;;  %v4951_v61 = vadd.f32 %v4950_v3, %v3550_v51  ;;  %5180 = vmatpush.bf16.msra.mxu2 %v7726_v29  ;;  %v9308_v51 = vld [vmem:[#allocation9 + $0x6ac] sm:$0xf]  ;;  %v8489_v29 = vld [vmem:[#allocation12 + $0x50] sm:$0xf]  ;;  %v7915_v3 = vld [vmem:[#allocation9 + $0x3d8] sm:$0xf0] }
 0x2e7   :  { %5138 = vmatpush.bf16.msra.mxu0 %v8410_v19  ;;  %v8299_v19 = vld [vmem:[#allocation9 + $0x6d8] sm:$0xf0]  ;;  %v8286_v62 = vor.u32 %v9308_v51, %v8283_v53  ;;  %v9376_v51 = vld [vmem:[#allocation12 + $0xc4] sm:$0xf0] }
 0x2e8   :  { %5215 = vmatpush.bf16.msrb.mxu1 %v8174_v20  ;;  %v9987_v20 = vadd.f32 %v4963_v49, %v4951_v61  ;;  %v8302_v56 = vor.u32 %v9312_v41, %v8299_v19  ;;  %v7931_v49 = vld [vmem:[#allocation9 + $0x3f8] sm:$0xf0]  ;;  %v7918_v61 = vor.u32 %v9216_v2, %v7915_v3  ;;  %v9292_v19 = vld [vmem:[#allocation9 + $0x62c] sm:$0xf] }
 0x2e9   :  { %v7934_v59 = vor.u32 %v9220_v18, %v7931_v49  ;;  %v9378_v58 = vld [vmem:[#allocation12 + $0xd4] sm:$0xf0]  ;;  %v8545_v49 = vld [vmem:[#allocation12 + $0xc0] sm:$0xf]  ;;  %v9288_v53 = vld [vmem:[#allocation9 + $0x60c] sm:$0xf] }
 0x2ea   :  { %5203 = vmatpush.bf16.msra.mxu3 %v8030_v24  ;;  %v9224_v24 = vld [vmem:[#allocation9 + $0x40c] sm:$0xf]  ;;  %v4965_v27 = vpop.f32.mrf.mxu1  ;;  %5181 = vmatpush.bf16.msra.mxu2 %v7710_v11  ;;  %v8554_v54 = vor.u32 %v9378_v58, %v8553_v44  ;;  %v7851_v18 = vld [vmem:[#allocation9 + $0x358] sm:$0xf0]  ;;  %v9359_v44 = vld [vmem:[#allocation12 + $0x44] sm:$0xf] }
 0x2eb   :  { %5139 = vmatpush.bf16.msra.mxu0 %v8394_v7  ;;  %v7950_v34 = vor.u32 %v9224_v24, %v7947_v52  ;;  %v9300_v11 = vld [vmem:[#allocation9 + $0x66c] sm:$0xf]  ;;  %v7883_v24 = vld [vmem:[#allocation9 + $0x398] sm:$0xf0]  ;;  %v8561_v27 = vld [vmem:[#allocation12 + $0xe0] sm:$0xf] }
 0x2ec   :  { %5216 = vmatpush.bf16.msrb.mxu1 %v8158_v4  ;;  %v7694_v4 = vor.u32 %v9160_v15, %v7691_v16  ;;  %v8473_v16 = vld [vmem:[#allocation12 + $0x30] sm:$0xf]  ;;  %v9380_v52 = vld [vmem:[#allocation12 + $0xe4] sm:$0xf0]  ;;  %v8483_v58 = vld [vmem:[#allocation12 + $0x48] sm:$0xf0] }
 0x2ed   :  { %v8562_v13 = vor.u32 %v9380_v52, %v8561_v27  ;;  %v9352_v2 = vld [vmem:[#allocation12 + $0x4] sm:$0xf0] }
 0x2ee   :  { %5204 = vmatpush.bf16.msra.mxu3 %v8014_v10  ;;  %v4952_v10 = vpop.f32.mrf.mxu3  ;;  %5182 = vmatpush.bf16.msra.mxu2 %v7694_v4 }
 0x2ef   :  { %5140 = vmatpush.bf16.msra.mxu0 %v8378_v38  ;;  %v8569_v38 = vld [vmem:[#allocation12 + $0xf0] sm:$0xf]  ;;  %v9204_v10 = vld [vmem:[#allocation9 + $0x36c] sm:$0xf] }
 0x2f0   :  { %5217 = vmatpush.bf16.msrb.mxu1 %v8142_v17  ;;  %v8346_v17 = vor.u32 %v9326_v33, %v8345_v46  ;;  %v8570_v15 = vor.u32 %v9382_v36, %v8569_v38  ;;  %v9356_v46 = vld [vmem:[#allocation12 + $0x24] sm:$0xf0]  ;;  %v7886_v33 = vor.u32 %v9208_v23, %v7883_v24 }
 0x2f1   :  { %5183 = vmatmul.bf16.vlgmr.msra.gmra.mxu2 %v9910_v25  ;;  %v8481_v25 = vld [vmem:[#allocation12 + $0x40] sm:$0xf]  ;;  %v9348_v23 = vld [vmem:[#allocation9 + $0x7ec] sm:$0xf] }
 0x2f2   :  { %5205 = vmatpush.bf16.msra.mxu3 %v7998_v31  ;;  %v8329_v31 = vld [vmem:[#allocation9 + $0x708] sm:$0xf]  ;;  %5227 = vmatpush.bf16.msrb.mxu2 %v8318_v39  ;;  %v8482_v14 = vor.u32 %v9360_v12, %v8481_v25  ;;  %v7867_v39 = vld [vmem:[#allocation9 + $0x378] sm:$0xf0] }
 0x2f3   :  { %5141 = vmatpush.bf16.msra.mxu0 %v8362_v35  ;;  %v8330_v7 = vor.u32 %v9322_v1, %v8329_v31  ;;  %v9993_v21 = vpop.f32.mrf.mxu2  ;;  %v7870_v31 = vor.u32 %v9204_v10, %v7867_v39  ;;  %v9200_v1 = vld [vmem:[#allocation9 + $0x34c] sm:$0xf]  ;;  %v7835_v12 = vld [vmem:[#allocation9 + $0x338] sm:$0xf0] }
 0x2f4   :  { %5218 = vmatpush.bf16.msrb.mxu1 %v8126_v57  ;;  %v9362_v57 = vld [vmem:[#allocation12 + $0x54] sm:$0xf0]  ;;  %v7854_v3 = vor.u32 %v9200_v1, %v7851_v18 }
 0x2f5   :  { %v8490_v6 = vor.u32 %v9362_v57, %v8489_v29  ;;  %v8546_v29 = vor.u32 %v9376_v51, %v8545_v49  ;;  %v8427_v10 = vld [vmem:[#allocation9 + $0x7d8] sm:$0xf0]  ;;  %v9357_v49 = vld [vmem:[#allocation12 + $0x34] sm:$0xf]  ;;  %v8475_v51 = vld [vmem:[#allocation12 + $0x38] sm:$0xf0] }
 0x2f6   :  { %5206 = vmatpush.bf16.msra.mxu3 %v7982_v0  ;;  %5228 = vmatpush.bf16.msrb.mxu2 %v8302_v56  ;;  %v9304_v0 = vld [vmem:[#allocation9 + $0x68c] sm:$0xf] }
 0x2f7   :  { %5142 = vmatpush.bf16.msra.mxu0 %v8346_v17 }
 0x2f8   :  { %5219 = vmatpush.bf16.msrb.mxu1 %v8110_v48  ;;  %v8251_v48 = vld [vmem:[#allocation9 + $0x678] sm:$0xf0] }
 0x2f9   :  { %v8254_v22 = vor.u32 %v9300_v11, %v8251_v48  ;;  %v9192_v48 = vld [vmem:[#allocation9 + $0x30c] sm:$0xf] }
 0x2fa   :  { %5207 = vmatpush.bf16.msra.mxu3 %v7966_v50  ;;  %5229 = vmatpush.bf16.msrb.mxu2 %v8286_v62  ;;  %v7902_v50 = vor.u32 %v9212_v9, %v7899_v47  ;;  %v8449_v62 = vld [vmem:[#allocation12] sm:$0xf]  ;;  %v9374_v9 = vld [vmem:[#allocation12 + $0xb4] sm:$0xf0] }
 0x2fb   :  { %5143 = vmatpush.bf16.msra.mxu0 %v8330_v7  ;;  %v4926_v57 = vpop.f32.mrf.mxu2  ;;  %v8450_v47 = vor.u32 %v9352_v2, %v8449_v62  ;;  %v4925_v2 = vadd.f32 %v9993_v21, %v9980_v45 }
 0x2fc   :  { %5220 = vmatpush.bf16.msrb.mxu1 %v8094_v63  ;;  %v8465_v63 = vld [vmem:[#allocation12 + $0x20] sm:$0xf]  ;;  %v8563_v57 = vld [vmem:[#allocation12 + $0xe8] sm:$0xf0] }
 0x2fd   :  { %v8466_v17 = vor.u32 %v9356_v46, %v8465_v63  ;;  %v8521_v63 = vld [vmem:[#allocation12 + $0x90] sm:$0xf]  ;;  %v9370_v46 = vld [vmem:[#allocation12 + $0x94] sm:$0xf0] }
 0x2fe   :  { %5208 = vmatpush.bf16.msra.mxu3 %v7950_v34  ;;  %5144 = vmatmul.bf16.vlgmr.msra.gmra.mxu0 %v9965_v26  ;;  %v8238_v34 = vor.u32 %v9296_v60, %v8235_v32  ;;  %v9361_v32 = vld [vmem:[#allocation12 + $0x54] sm:$0xf] }
 0x2ff   :  { %5188 = vmatpush.bf16.msrb.mxu0 %v7934_v59 }
 0x300   :  { %5221 = vmatpush.bf16.msrb.mxu1 %v8078_v43  ;;  %v9995_v4 = vpop.f32.mrf.mxu1  ;;  %v9354_v43 = vld [vmem:[#allocation12 + $0x14] sm:$0xf0] }
 0x301   :  { %5209 = vmatmul.bf16.vlgmr.msra.gmra.mxu3 %v9926_v8  ;;  %v8270_v8 = vor.u32 %v9304_v0, %v8267_v5  ;;  %v8458_v7 = vor.u32 %v9354_v43, %v8457_v42  ;;  %v9196_v0 = vld [vmem:[#allocation9 + $0x32c] sm:$0xf]  ;;  %v9365_v5 = vld [vmem:[#allocation12 + $0x74] sm:$0xf] }
 0x302   :  { %5655 = vmatpush.bf16.msrb.mxu3 %v8506_v40  ;;  %v8219_v40 = vld [vmem:[#allocation9 + $0x638] sm:$0xf0]  ;;  %v7838_v11 = vor.u32 %v9196_v0, %v7835_v12  ;;  %v9381_v43 = vld [vmem:[#allocation12 + $0xf4] sm:$0xf]  ;;  %v9355_v0 = vld [vmem:[#allocation12 + $0x24] sm:$0xf] }
 0x303   :  { %5222 = vmatmul.bf16.vlgmr.msrb.gmra.mxu1 %v9929_v28  ;;  %v9358_v28 = vld [vmem:[#allocation12 + $0x34] sm:$0xf0]  ;;  %5189 = vmatpush.bf16.msrb.mxu0 %v7918_v61  ;;  %v8222_v56 = vor.u32 %v9292_v19, %v8219_v40  ;;  %v8537_v61 = vld [vmem:[#allocation12 + $0xb0] sm:$0xf]  ;;  %v9999_v27 = vpop.f32.mrf.mxu2  ;;  %v9340_v40 = vld [vmem:[#allocation9 + $0x7ac] sm:$0xf] }
 0x304   :  { %5668 = vmatpush.bf16.msra.mxu1 %v8570_v15  ;;  %5230 = vmatpush.bf16.msrb.mxu2 %v8270_v8  ;;  %v8474_v35 = vor.u32 %v9358_v28, %v8473_v16  ;;  %v9997_v41 = vpop.f32.mrf.mxu3  ;;  %v8538_v38 = vor.u32 %v9374_v9, %v8537_v61  ;;  %v8499_v15 = vld [vmem:[#allocation12 + $0x68] sm:$0xf0]  ;;  %v7819_v16 = vld [vmem:[#allocation9 + $0x318] sm:$0xf0]  ;;  %v8529_v28 = vld [vmem:[#allocation12 + $0xa0] sm:$0xf] }
 0x305   :  { %v7822_v60 = vor.u32 %v9192_v48, %v7819_v16  ;;  %v9332_v61 = vld [vmem:[#allocation9 + $0x76c] sm:$0xf]  ;;  %v8459_v16 = vld [vmem:[#allocation12 + $0x18] sm:$0xf0] }
 0x306   :  { %5656 = vmatpush.bf16.msrb.mxu3 %v8498_v55  ;;  %v8203_v55 = vld [vmem:[#allocation9 + $0x618] sm:$0xf0] }
 0x307   :  { %5190 = vmatpush.bf16.msrb.mxu0 %v7902_v50  ;;  %v8206_v25 = vor.u32 %v9288_v53, %v8203_v55  ;;  %v9372_v50 = vld [vmem:[#allocation12 + $0xa4] sm:$0xf0] }
 0x308   :  { %5669 = vmatpush.bf16.msra.mxu1 %v8562_v13  ;;  %5231 = vmatpush.bf16.msrb.mxu2 %v8254_v22  ;;  %v5017_v59 = vpop.f32.mrf.mxu1  ;;  %v8443_v22 = vld [vmem:[#allocation9 + $0x7f8] sm:$0xf0]  ;;  %v8530_v24 = vor.u32 %v9372_v50, %v8529_v28  ;;  %v9336_v55 = vld [vmem:[#allocation9 + $0x78c] sm:$0xf] }
 0x309   :  { %v8446_v13 = vor.u32 %v9348_v23, %v8443_v22  ;;  %v8478_v59 = vor.u32 %v9357_v49, %v8475_v51  ;;  %v9328_v50 = vld [vmem:[#allocation9 + $0x74c] sm:$0xf]  ;;  %v8363_v22 = vld [vmem:[#allocation9 + $0x758] sm:$0xf0] }
 0x30a   :  { %5657 = vmatpush.bf16.msrb.mxu3 %v8490_v6  ;;  %v8507_v6 = vld [vmem:[#allocation12 + $0x78] sm:$0xf0]  ;;  %v9320_v49 = vld [vmem:[#allocation9 + $0x70c] sm:$0xf]  ;;  %v8331_v51 = vld [vmem:[#allocation9 + $0x718] sm:$0xf0] }
 0x30b   :  { %5191 = vmatpush.bf16.msrb.mxu0 %v7886_v33  ;;  %v8510_v36 = vor.u32 %v9365_v5, %v8507_v6  ;;  %v9344_v33 = vld [vmem:[#allocation9 + $0x7cc] sm:$0xf]  ;;  %v4978_v1 = vpop.f32.mrf.mxu2  ;;  %v8467_v5 = vld [vmem:[#allocation12 + $0x28] sm:$0xf0] }
 0x30c   :  { %5670 = vmatpush.bf16.msra.mxu1 %v8554_v54  ;;  %5232 = vmatpush.bf16.msrb.mxu2 %v8238_v34  ;;  %v5004_v8 = vpop.f32.mrf.mxu3  ;;  %v8522_v34 = vor.u32 %v9370_v46, %v8521_v63  ;;  %v8430_v19 = vor.u32 %v9344_v33, %v8427_v10  ;;  %v8411_v54 = vld [vmem:[#allocation9 + $0x7b8] sm:$0xf0]  ;;  %v8470_v45 = vor.u32 %v9355_v0, %v8467_v5  ;;  %v9351_v63 = vld [vmem:[#allocation12 + $0x4] sm:$0xf]  ;;  %v8451_v46 = vld [vmem:[#allocation12 + $0x8] sm:$0xf0] }
 0x30d   :  { %v8414_v53 = vor.u32 %v9340_v40, %v8411_v54  ;;  %v8379_v8 = vld [vmem:[#allocation9 + $0x778] sm:$0xf0] }
 0x30e   :  { %5658 = vmatpush.bf16.msrb.mxu3 %v8482_v14  ;;  %v9363_v14 = vld [vmem:[#allocation12 + $0x64] sm:$0xf]  ;;  %v8382_v28 = vor.u32 %v9332_v61, %v8379_v8  ;;  %v9398_v1 = vld [vmem:[#allocation12 + $0x174] sm:$0xf0]  ;;  %v9396_v61 = vld [vmem:[#allocation12 + $0x164] sm:$0xf0] }
 0x30f   :  { %5192 = vmatpush.bf16.msrb.mxu0 %v7870_v31  ;;  %v8502_v52 = vor.u32 %v9363_v14, %v8499_v15  ;;  %v8571_v31 = vld [vmem:[#allocation12 + $0xf8] sm:$0xf0]  ;;  %v9353_v15 = vld [vmem:[#allocation12 + $0x14] sm:$0xf]  ;;  %v8617_v8 = vld [vmem:[#allocation12 + $0x150] sm:$0xf] }
 0x310   :  { %5671 = vmatpush.bf16.msra.mxu1 %v8546_v29  ;;  %5233 = vmatpush.bf16.msrb.mxu2 %v8222_v56  ;;  %v8486_v56 = vor.u32 %v9359_v44, %v8483_v58  ;;  %v8574_v18 = vor.u32 %v9381_v43, %v8571_v31  ;;  %v9379_v29 = vld [vmem:[#allocation12 + $0xe4] sm:$0xf]  ;;  %v8347_v44 = vld [vmem:[#allocation9 + $0x738] sm:$0xf0]  ;;  %v9373_v58 = vld [vmem:[#allocation12 + $0xb4] sm:$0xf] }
 0x311   :  { %v8566_v62 = vor.u32 %v9379_v29, %v8563_v57  ;;  %v8531_v43 = vld [vmem:[#allocation12 + $0xa8] sm:$0xf0]  ;;  %v8633_v31 = vld [vmem:[#allocation12 + $0x170] sm:$0xf]  ;;  %v8334_v57 = vor.u32 %v9320_v49, %v8331_v51 }
 0x312   :  { %5659 = vmatpush.bf16.msrb.mxu3 %v8474_v35  ;;  %v8491_v35 = vld [vmem:[#allocation12 + $0x58] sm:$0xf0] }
 0x313   :  { %5193 = vmatpush.bf16.msrb.mxu0 %v7854_v3  ;;  %v8494_v39 = vor.u32 %v9361_v32, %v8491_v35  ;;  %v8462_v32 = vor.u32 %v9353_v15, %v8459_v16 }
 0x314   :  { %5672 = vmatpush.bf16.msra.mxu1 %v8538_v38  ;;  %5234 = vmatpush.bf16.msrb.mxu2 %v8206_v25  ;;  %v8555_v38 = vld [vmem:[#allocation12 + $0xd8] sm:$0xf0] }
 0x315   :  { %v4937_v25 = vpop.f32.mrf.mxu0 }
 0x316   :  { %5660 = vmatpush.bf16.msrb.mxu3 %v8466_v17  ;;  %v9368_v17 = vld [vmem:[#allocation12 + $0x84] sm:$0xf0]  ;;  %v4938_v9 = vadd.f32 %v4937_v25, %v4925_v2  ;;  %v9367_v2 = vld [vmem:[#allocation12 + $0x84] sm:$0xf] }
 0x317   :  { %5235 = vmatmul.bf16.vlgmr.msrb.gmra.mxu2 %v9954_v30  ;;  %5194 = vmatpush.bf16.msrb.mxu0 %v7838_v11  ;;  %v8513_v30 = vld [vmem:[#allocation12 + $0x80] sm:$0xf] }
 0x318   :  { %5673 = vmatpush.bf16.msra.mxu1 %v8530_v24  ;;  %v8514_v42 = vor.u32 %v9368_v17, %v8513_v30  ;;  %v5253_v48 = vmul.f32 0.2, %v4938_v9  ;;  %v8454_v17 = vor.u32 %v9351_v63, %v8451_v46  ;;  %v8585_v46 = vld [vmem:[#allocation12 + $0x110] sm:$0xf] }
 0x31a   :  { %5661 = vmatpush.bf16.msrb.mxu3 %v8458_v7  ;;  %v8395_v7 = vld [vmem:[#allocation9 + $0x798] sm:$0xf0]  ;;  %v5257_v23 = vmax.f32 %v4938_v9, %v5253_v48  ;;  %v8609_v48 = vld [vmem:[#allocation12 + $0x140] sm:$0xf] }
 0x31b   :  { %5195 = vmatpush.bf16.msrb.mxu0 %v7822_v60  ;;  %v8398_v12 = vor.u32 %v9336_v55, %v8395_v7  ;;  %v8547_v60 = vld [vmem:[#allocation12 + $0xc8] sm:$0xf0]  ;;  %v9369_v55 = vld [vmem:[#allocation12 + $0x94] sm:$0xf]  ;;  %v8523_v7 = vld [vmem:[#allocation12 + $0x98] sm:$0xf0] }
 0x31c   :  { %5674 = vmatpush.bf16.msra.mxu1 %v8522_v34  ;;  %v8366_v34 = vor.u32 %v9328_v50, %v8363_v22  ;;  %v8601_v50 = vld [vmem:[#allocation12 + $0x130] sm:$0xf]  ;;  %v8593_v22 = vld [vmem:[#allocation12 + $0x120] sm:$0xf] }
 0x31d   :  { %v4939_v10 = vpop.f32.mrf.mxu0 }
 0x31e   :  { %5662 = vmatpush.bf16.msrb.mxu3 %v8450_v47  ;;  %5196 = vmatmul.bf16.vlgmr.msrb.gmra.mxu0 %v9915_v37  ;;  %v10005_v37 = vld [vmem:[#allocation11] sm:$0xf]  ;;  %v9377_v47 = vld [vmem:[#allocation12 + $0xd4] sm:$0xf] }
 0x31f   :  { %5240 = vmatpush.bf16.msra.mxu0 %v8446_v13  ;;  %v3551_v3 = vperm.slane %v10005_v37, 2  ;;  %v8558_v21 = vor.u32 %v9377_v47, %v8555_v38  ;;  %v5261_v13 = vpack.c.bf16 %v5257_v23, %v5257_v23  ;;  %v9394_v47 = vld [vmem:[#allocation12 + $0x154] sm:$0xf0] }
 0x320   :  { %5675 = vmatpush.bf16.msra.mxu1 %v8514_v42  ;;  %v5067_v6 = vpop.f32.mrf.mxu1  ;;  %v9371_v42 = vld [vmem:[#allocation12 + $0xa4] sm:$0xf]  ;;  %v8618_v38 = vor.u32 %v9394_v47, %v8617_v8  ;;  %v9390_v23 = vld [vmem:[#allocation12 + $0x134] sm:$0xf0]  ;;  %v8587_v8 = vld [vmem:[#allocation12 + $0x118] sm:$0xf0] }
 0x321   :  { %5663 = vmatmul.bf16.vlgmr.msrb.gmra.mxu3 %v5261_v13 }
 0x322   :  { %5707 = vmatpush.bf16.msra.mxu3 %v8510_v36  ;;  %v10008_v36 = vpop.f32.mrf.mxu2 }
 0x323   :  { %5241 = vmatpush.bf16.msra.mxu0 %v8430_v19  ;;  %v8539_v19 = vld [vmem:[#allocation12 + $0xb8] sm:$0xf0] }
 0x324   :  { %5720 = vmatpush.bf16.msrb.mxu1 %v8574_v18  ;;  %v5054_v11 = vpop.f32.mrf.mxu3  ;;  %v8542_v54 = vor.u32 %v9373_v58, %v8539_v19  ;;  %v8634_v18 = vor.u32 %v9398_v1, %v8633_v31  ;;  %v8635_v58 = vld [vmem:[#allocation12 + $0x178] sm:$0xf0]  ;;  %v9393_v31 = vld [vmem:[#allocation12 + $0x154] sm:$0xf] }
 0x325   :  { %v5055_v14 = vadd.f32 %v5054_v11, %v3551_v3  ;;  %v4989_v29 = vpop.f32.mrf.mxu0  ;;  %v8515_v3 = vld [vmem:[#allocation12 + $0x88] sm:$0xf0]  ;;  %v8619_v1 = vld [vmem:[#allocation12 + $0x158] sm:$0xf0] }
 0x326   :  { %5708 = vmatpush.bf16.msra.mxu3 %v8502_v52  ;;  %v9375_v52 = vld [vmem:[#allocation12 + $0xc4] sm:$0xf]  ;;  %5681 = vmatpush.bf16.msra.mxu2 %v8634_v18  ;;  %v8518_v5 = vor.u32 %v9367_v2, %v8515_v3  ;;  %v8603_v2 = vld [vmem:[#allocation12 + $0x138] sm:$0xf0] }
 0x327   :  { %5242 = vmatpush.bf16.msra.mxu0 %v8414_v53  ;;  %v10010_v24 = vadd.f32 %v5067_v6, %v5055_v14  ;;  %v8550_v35 = vor.u32 %v9375_v52, %v8547_v60  ;;  %v8534_v53 = vor.u32 %v9371_v42, %v8531_v43  ;;  %v9392_v14 = vld [vmem:[#allocation12 + $0x144] sm:$0xf0]  ;;  %v8602_v52 = vor.u32 %v9390_v23, %v8601_v50 }
 0x328   :  { %5721 = vmatpush.bf16.msrb.mxu1 %v8566_v62  ;;  %v5069_v33 = vpop.f32.mrf.mxu1  ;;  %v8526_v62 = vor.u32 %v9369_v55, %v8523_v7  ;;  %v8610_v15 = vor.u32 %v9392_v14, %v8609_v48  ;;  %v9388_v60 = vld [vmem:[#allocation12 + $0x124] sm:$0xf0]  ;;  %v3552_v43 = vperm.slane %v10005_v37, 3  ;;  %v9391_v55 = vld [vmem:[#allocation12 + $0x144] sm:$0xf] }
 0x329   :  { %v8594_v63 = vor.u32 %v9388_v60, %v8593_v22  ;;  %v9386_v33 = vld [vmem:[#allocation12 + $0x114] sm:$0xf0]  ;;  %v8611_v7 = vld [vmem:[#allocation12 + $0x148] sm:$0xf0]  ;;  %v8681_v22 = vld [vmem:[#allocation12 + $0x1d0] sm:$0xf] }
 0x32a   :  { %5709 = vmatpush.bf16.msra.mxu3 %v8494_v39  ;;  %v9324_v39 = vld [vmem:[#allocation9 + $0x72c] sm:$0xf]  ;;  %v5030_v40 = vpop.f32.mrf.mxu2  ;;  %v8586_v10 = vor.u32 %v9386_v33, %v8585_v46  ;;  %v8595_v37 = vld [vmem:[#allocation12 + $0x128] sm:$0xf0] }
 0x32b   :  { %5243 = vmatpush.bf16.msra.mxu0 %v8398_v12  ;;  %v8625_v12 = vld [vmem:[#allocation12 + $0x160] sm:$0xf] }
 0x32c   :  { %5722 = vmatpush.bf16.msrb.mxu1 %v8558_v21  ;;  %v5056_v30 = vpop.f32.mrf.mxu3  ;;  %v8626_v9 = vor.u32 %v9396_v61, %v8625_v12  ;;  %v8697_v61 = vld [vmem:[#allocation12 + $0x1f0] sm:$0xf] }
 0x32d   :  { %v4991_v25 = vpop.f32.mrf.mxu0  ;;  %v9395_v30 = vld [vmem:[#allocation12 + $0x164] sm:$0xf] }
 0x32e   :  { %5710 = vmatpush.bf16.msra.mxu3 %v8486_v56  ;;  %v8350_v56 = vor.u32 %v9324_v39, %v8347_v44  ;;  %5682 = vmatpush.bf16.msra.mxu2 %v8626_v9  ;;  %v9384_v39 = vld [vmem:[#allocation12 + $0x104] sm:$0xf0]  ;;  %v9397_v44 = vld [vmem:[#allocation12 + $0x174] sm:$0xf]  ;;  %v9414_v9 = vld [vmem:[#allocation12 + $0x1f4] sm:$0xf0] }
 0x32f   :  { %5244 = vmatpush.bf16.msra.mxu0 %v8382_v28  ;;  %v8638_v40 = vor.u32 %v9397_v44, %v8635_v58  ;;  %v8698_v47 = vor.u32 %v9414_v9, %v8697_v61  ;;  %v9404_v58 = vld [vmem:[#allocation12 + $0x1a4] sm:$0xf0]  ;;  %v9403_v9 = vld [vmem:[#allocation12 + $0x1a4] sm:$0xf] }
 0x330   :  { %5723 = vmatpush.bf16.msrb.mxu1 %v8550_v35 }
 0x332   :  { %5711 = vmatpush.bf16.msra.mxu3 %v8478_v59  ;;  %v4977_v59 = vadd.f32 %v9999_v27, %v9987_v20  ;;  %5683 = vmatpush.bf16.msra.mxu2 %v8618_v38 }
 0x333   :  { %5245 = vmatpush.bf16.msra.mxu0 %v8366_v34  ;;  %v8577_v34 = vld [vmem:[#allocation12 + $0x100] sm:$0xf] }
 0x334   :  { %5724 = vmatpush.bf16.msrb.mxu1 %v8542_v54  ;;  %v4990_v0 = vadd.f32 %v4989_v29, %v4977_v59  ;;  %v10019_v11 = vpop.f32.mrf.mxu2  ;;  %v8578_v19 = vor.u32 %v9384_v39, %v8577_v34  ;;  %v8614_v29 = vor.u32 %v9391_v55, %v8611_v7  ;;  %v9406_v34 = vld [vmem:[#allocation12 + $0x1b4] sm:$0xf0]  ;;  %v8657_v39 = vld [vmem:[#allocation12 + $0x1a0] sm:$0xf]  ;;  %v9411_v55 = vld [vmem:[#allocation12 + $0x1e4] sm:$0xf] }
 0x335   :  { %v8691_v7 = vld [vmem:[#allocation12 + $0x1e8] sm:$0xf0] }
 0x336   :  { %5712 = vmatpush.bf16.msra.mxu3 %v8470_v45  ;;  %v5003_v6 = vadd.f32 %v9997_v41, %v4990_v0  ;;  %5684 = vmatpush.bf16.msra.mxu2 %v8610_v15  ;;  %v9387_v0 = vld [vmem:[#allocation12 + $0x124] sm:$0xf] }
 0x337   :  { %5246 = vmatpush.bf16.msra.mxu0 %v8350_v56  ;;  %v8622_v56 = vor.u32 %v9393_v31, %v8619_v1  ;;  %v8598_v12 = vor.u32 %v9387_v0, %v8595_v37  ;;  %v8641_v1 = vld [vmem:[#allocation12 + $0x180] sm:$0xf]  ;;  %v9407_v37 = vld [vmem:[#allocation12 + $0x1c4] sm:$0xf] }
 0x338   :  { %5725 = vmatpush.bf16.msrb.mxu1 %v8534_v53  ;;  %v5016_v20 = vadd.f32 %v9995_v4, %v5003_v6 }
 0x33a   :  { %5713 = vmatpush.bf16.msra.mxu3 %v8462_v32  ;;  %v5029_v41 = vadd.f32 %v10008_v36, %v5016_v20  ;;  %5685 = vmatpush.bf16.msra.mxu2 %v8602_v52  ;;  %v9385_v20 = vld [vmem:[#allocation12 + $0x114] sm:$0xf]  ;;  %v9410_v52 = vld [vmem:[#allocation12 + $0x1d4] sm:$0xf0] }
 0x33b   :  { %5247 = vmatpush.bf16.msra.mxu0 %v8334_v57  ;;  %v8590_v38 = vor.u32 %v9385_v20, %v8587_v8  ;;  %v8682_v60 = vor.u32 %v9410_v52, %v8681_v22  ;;  %v8659_v20 = vld [vmem:[#allocation12 + $0x1a8] sm:$0xf0] }
 0x33c   :  { %5726 = vmatpush.bf16.msrb.mxu1 %v8526_v62  ;;  %v5082_v35 = vpop.f32.mrf.mxu2  ;;  %v9389_v62 = vld [vmem:[#allocation12 + $0x134] sm:$0xf] }
 0x33d   :  { %v8606_v3 = vor.u32 %v9389_v62, %v8603_v2  ;;  %v8683_v62 = vld [vmem:[#allocation12 + $0x1d8] sm:$0xf0] }
 0x33e   :  { %5714 = vmatpush.bf16.msra.mxu3 %v8454_v17  ;;  %5248 = vmatmul.bf16.vlgmr.msra.gmra.mxu0 %v9965_v26  ;;  %v5041_v26 = vpop.f32.mrf.mxu0  ;;  %v8627_v17 = vld [vmem:[#allocation12 + $0x168] sm:$0xf0] }
 0x33f   :  { %v5042_v21 = vadd.f32 %v5041_v26, %v5029_v41  ;;  %5686 = vmatpush.bf16.msra.mxu2 %v8594_v63  ;;  %v8630_v54 = vor.u32 %v9395_v30, %v8627_v17  ;;  %5694 = vmatpush.bf16.msrb.mxu0 %v8698_v47  ;;  %v9383_v41 = vld [vmem:[#allocation12 + $0x104] sm:$0xf]  ;;  %v8579_v26 = vld [vmem:[#allocation12 + $0x108] sm:$0xf0] }
 0x340   :  { %5727 = vmatpush.bf16.msrb.mxu1 %v8518_v5  ;;  %v10017_v27 = vpop.f32.mrf.mxu1  ;;  %v8582_v14 = vor.u32 %v9383_v41, %v8579_v26  ;;  %v9401_v41 = vld [vmem:[#allocation12 + $0x194] sm:$0xf]  ;;  %v8651_v26 = vld [vmem:[#allocation12 + $0x198] sm:$0xf0] }
 0x341   :  { %5715 = vmatmul.bf16.vlgmr.msra.gmra.mxu3 %v5261_v13  ;;  %v5254_v16 = vmul.f32 0.2, %v5042_v21 }
 0x343   :  { %v5258_v4 = vmax.f32 %v5042_v21, %v5254_v16  ;;  %5687 = vmatpush.bf16.msra.mxu2 %v8586_v10  ;;  %v5081_v21 = vadd.f32 %v10019_v11, %v10010_v24  ;;  %v8689_v16 = vld [vmem:[#allocation12 + $0x1e0] sm:$0xf]  ;;  %v8665_v10 = vld [vmem:[#allocation12 + $0x1b0] sm:$0xf] }
 0x344   :  { %v10022_v45 = vpop.f32.mrf.mxu3  ;;  %v8666_v44 = vor.u32 %v9406_v34, %v8665_v10 }
 0x345   :  { %v5262_v32 = vpack.c.bf16 %v5258_v4, %v5258_v4  ;;  %v9412_v4 = vld [vmem:[#allocation12 + $0x1e4] sm:$0xf0] }
 0x346   :  { %v5043_v13 = vpop.f32.mrf.mxu0 }
 0x347   :  { %5676 = vmatmul.bf16.vlgmr.msra.gmra.mxu1 %v5262_v32  ;;  %5688 = vmatpush.bf16.msra.mxu2 %v8578_v19  ;;  %v9408_v13 = vld [vmem:[#allocation12 + $0x1c4] sm:$0xf0] }
 0x348   :  { %v5121_v28 = vpop.f32.mrf.mxu1 }
 0x349   :  { %v8690_v28 = vor.u32 %v9412_v4, %v8689_v16  ;;  %v8643_v16 = vld [vmem:[#allocation12 + $0x188] sm:$0xf0] }
 0x34b   :  { %5733 = vmatpush.bf16.msrb.mxu2 %v8638_v40  ;;  %5695 = vmatpush.bf16.msrb.mxu0 %v8690_v28 }
 0x34c   :  { %v5108_v36 = vpop.f32.mrf.mxu3 }
 0x34d   :  { %v8673_v36 = vld [vmem:[#allocation12 + $0x1c0] sm:$0xf] }
 0x34e   :  { %v8674_v63 = vor.u32 %v9408_v13, %v8673_v36 }
 0x34f   :  { %5734 = vmatpush.bf16.msrb.mxu2 %v8630_v54  ;;  %5696 = vmatpush.bf16.msrb.mxu0 %v8682_v60  ;;  %v8658_v54 = vor.u32 %v9404_v58, %v8657_v39 }
 0x353   :  { %5735 = vmatpush.bf16.msrb.mxu2 %v8622_v56  ;;  %5697 = vmatpush.bf16.msrb.mxu0 %v8674_v63  ;;  %v9400_v56 = vld [vmem:[#allocation12 + $0x184] sm:$0xf0]  ;;  %v5329_v63 = vld [vmem:[#allocation14] sm:$0x3] }
 0x354   :  { %v5132_v18 = vpop.f32.mrf.mxu2  ;;  %v5332_v39 = vperm.slane %v5329_v63, 1 }
 0x355   :  { %v5093_v51 = vpop.f32.mrf.mxu0 }
 0x356   :  { %v5094_v48 = vadd.f32 %v5093_v51, %v5081_v21  ;;  %v8699_v51 = vld [vmem:[#allocation12 + $0x1f8] sm:$0xf0] }
 0x357   :  { %5728 = vmatmul.bf16.vlgmr.msrb.gmra.mxu1 %v5262_v32  ;;  %5736 = vmatpush.bf16.msrb.mxu2 %v8614_v29  ;;  %v8694_v29 = vor.u32 %v9411_v55, %v8691_v7 }
 0x358   :  { %v5107_v15 = vadd.f32 %v10022_v45, %v5094_v48  ;;  %5698 = vmatpush.bf16.msrb.mxu0 %v8666_v44  ;;  %v8654_v48 = vor.u32 %v9401_v41, %v8651_v26 }
 0x35a   :  { %v5120_v50 = vadd.f32 %v10017_v27, %v5107_v15  ;;  %v9399_v15 = vld [vmem:[#allocation12 + $0x184] sm:$0xf] }
 0x35b   :  { %5737 = vmatpush.bf16.msrb.mxu2 %v8606_v3  ;;  %v8646_v4 = vor.u32 %v9399_v15, %v8643_v16 }
 0x35c   :  { %v5134_v5 = vpop.f32.mrf.mxu2  ;;  %v5133_v24 = vadd.f32 %v5132_v18, %v5120_v50  ;;  %5699 = vmatpush.bf16.msrb.mxu0 %v8658_v54  ;;  %v8642_v18 = vor.u32 %v9400_v56, %v8641_v1  ;;  %v5766_v1 = vld [vmem:[#allocation2] sm:$0x1] }
 0x35d   :  { %v5095_v25 = vpop.f32.mrf.mxu0  ;;  %v8675_v5 = vld [vmem:[#allocation12 + $0x1c8] sm:$0xf0] }
 0x35e   :  { %v9405_v25 = vld [vmem:[#allocation12 + $0x1b4] sm:$0xf] }
 0x35f   :  { %5738 = vmatpush.bf16.msrb.mxu2 %v8598_v12  ;;  %v8667_v12 = vld [vmem:[#allocation12 + $0x1b8] sm:$0xf0] }
 0x360   :  { %v5171_v42 = vpop.f32.mrf.mxu1  ;;  %v8670_v61 = vor.u32 %v9405_v25, %v8667_v12 }
 0x363   :  { %5739 = vmatpush.bf16.msrb.mxu2 %v8590_v38  ;;  %v8662_v38 = vor.u32 %v9403_v9, %v8659_v20 }
 0x364   :  { %v5158_v49 = vpop.f32.mrf.mxu3 }
 0x365   :  { %v5159_v53 = vadd.f32 %v5158_v49, %v3552_v43  ;;  %v9402_v43 = vld [vmem:[#allocation12 + $0x194] sm:$0xf0]  ;;  %v9413_v49 = vld [vmem:[#allocation12 + $0x1f4] sm:$0xf] }
 0x367   :  { %v10025_v57 = vadd.f32 %v5171_v42, %v5159_v53  ;;  %5740 = vmatpush.bf16.msrb.mxu2 %v8582_v14  ;;  %v8649_v42 = vld [vmem:[#allocation12 + $0x190] sm:$0xf]  ;;  %v8702_v53 = vor.u32 %v9413_v49, %v8699_v51 }
 0x368   :  { %v5173_v59 = vpop.f32.mrf.mxu1  ;;  %v8650_v31 = vor.u32 %v9402_v43, %v8649_v42  ;;  %v5763_v42 = vld [vmem:[#allocation15] sm:$0x3] }
 0x369   :  { %v9409_v59 = vld [vmem:[#allocation12 + $0x1d4] sm:$0xf]  ;;  %5774 = vst [vmem:[#allocation1] ss:$9 sm:$0xff] %v5763_v42 }
 0x36a   :  { %5700 = vmatpush.bf16.msrb.mxu0 %v8650_v31  ;;  %v8686_v2 = vor.u32 %v9409_v59, %v8683_v62 }
 0x36c   :  { %v5160_v6 = vpop.f32.mrf.mxu3 }
 0x36d   :  { %v8678_v6 = vor.u32 %v9407_v37, %v8675_v5 }
 0x36e   :  { %5701 = vmatpush.bf16.msrb.mxu0 %v8642_v18  ;;  %v9681_v18 = vmov 0  }
 0x36f   :  { %9431 = vset.pattern.permute.xlu0 %v9681_v18 }
 0x370   :  { %5769 = vperm.xlu0 %9431, %v5766_v1   ;;  %v5775_v7 = vld [vmem:[#allocation1] sm:$0xff]  ;;  %v5776_v5 = vld [vmem:[#allocation1 + $0x9] sm:$0xff] }
 0x372   :  { %5746 = vmatpush.bf16.msra.mxu0 %v8702_v53 }
 0x374   :  { %v10033_v32 = vpop.f32.mrf.mxu2 }
 0x375   :  { %v5185_v21 = vadd.f32 %v10033_v32, %v10025_v57 }
 0x376   :  { %5747 = vmatpush.bf16.msra.mxu0 %v8694_v29 }
 0x37a   :  { %5748 = vmatpush.bf16.msra.mxu0 %v8686_v2 }
 0x37b   :  { %v5145_v35 = vpop.f32.mrf.mxu0 }
 0x37c   :  { %v5146_v45 = vadd.f32 %v5145_v35, %v5133_v24  ;;  %v5186_v40 = vpop.f32.mrf.mxu2 }
 0x37e   :  { %v5255_v46 = vmul.f32 0.2, %v5146_v45  ;;  %5749 = vmatpush.bf16.msra.mxu0 %v8678_v6 }
 0x380   :  { %v10031_v23 = vpop.f32.mrf.mxu1  ;;  %v5259_v27 = vmax.f32 %v5146_v45, %v5255_v46  ;;  %v5331_v46 = vperm.slane %v5329_v63, 0 }
 0x382   :  { %v5263_v19 = vpack.c.bf16 %v5259_v27, %v5259_v27  ;;  %5750 = vmatpush.bf16.msra.mxu0 %v8670_v61 }
 0x383   :  { %v5147_v17 = vpop.f32.mrf.mxu0 }
 0x384   :  { %v10035_v11 = vpop.f32.mrf.mxu3  ;;  %5689 = vmatmul.bf16.vlgmr.msra.gmra.mxu2 %v5263_v19 }
 0x386   :  { %5751 = vmatpush.bf16.msra.mxu0 %v8662_v38 }
 0x388   :  { %v5225_v33 = vpop.f32.mrf.mxu1 }
 0x38a   :  { %5752 = vmatpush.bf16.msra.mxu0 %v8654_v48 }
 0x38c   :  { %v5212_v30 = vpop.f32.mrf.mxu3 }
 0x38e   :  { %5753 = vmatpush.bf16.msra.mxu0 %v8646_v4 }
 0x394   :  { %5741 = vmatmul.bf16.vlgmr.msrb.gmra.mxu2 %v5263_v19 }
 0x39a   :  { %v5236_v3 = vpop.f32.mrf.mxu2 }
 0x39b   :  { %v5197_v0 = vpop.f32.mrf.mxu0 }
 0x39c   :  { %v5198_v14 = vadd.f32 %v5197_v0, %v5185_v21 }
 0x39e   :  { %v5211_v28 = vadd.f32 %v10035_v11, %v5198_v14 }
 0x3a0   :  { %v5224_v22 = vadd.f32 %v10031_v23, %v5211_v28 }
 0x3a2   :  { %v5238_v8 = vpop.f32.mrf.mxu2  ;;  %v5237_v52 = vadd.f32 %v5236_v3, %v5224_v22 }
 0x3a3   :  { %v5199_v47 = vpop.f32.mrf.mxu0 }
 0x3a4   :  { %v5664_v50 = vpop.f32.mrf.mxu3 }
 0x3a5   :  { %v5665_v33 = vadd.f32 %v5664_v50, %v5331_v46 }
 0x3ac   :  { %v5666_v24 = vpop.f32.mrf.mxu3 }
 0x3bb   :  { %v5249_v60 = vpop.f32.mrf.mxu0 }
 0x3bc   :  { %v5250_v35 = vadd.f32 %v5249_v60, %v5237_v52 }
 0x3be   :  { %v5256_v45 = vmul.f32 0.2, %v5250_v35 }
 0x3c0   :  { %v5260_v36 = vmax.f32 %v5250_v35, %v5256_v45 }
 0x3c2   :  { %v5264_v13 = vpack.c.bf16 %v5260_v36, %v5260_v36 }
 0x3c3   :  { %v5251_v57 = vpop.f32.mrf.mxu0 }
 0x3c4   :  { %v5716_v32 = vpop.f32.mrf.mxu3  ;;  %5702 = vmatmul.bf16.vlgmr.msrb.gmra.mxu0 %v5264_v13  ;;  %v5677_v10 = vpop.f32.mrf.mxu1 }
 0x3c5   :  { %v5678_v11 = vadd.f32 %v5677_v10, %v5665_v33  ;;  %v5717_v23 = vadd.f32 %v5716_v32, %v5332_v39 }
 0x3cc   :  { %v5718_v27 = vpop.f32.mrf.mxu3  ;;  %v5679_v34 = vpop.f32.mrf.mxu1 }
 0x3d4   :  { %5754 = vmatmul.bf16.vlgmr.msra.gmra.mxu0 %v5264_v13  ;;  %v5729_v44 = vpop.f32.mrf.mxu1 }
 0x3d5   :  { %v5730_v58 = vadd.f32 %v5729_v44, %v5717_v23 }
 0x3dc   :  { %v5731_v19 = vpop.f32.mrf.mxu1 }
 0x3e2   :  { %v5770_v6 = vpop.permute.xlu0 %5769 }
 0x3e3   :  { %v5772_v12 = vperm.slane %v5770_v6, 0 }
 0x407   :  { %v5690_v40 = vpop.f32.mrf.mxu2 }
 0x408   :  { %v5691_v43 = vadd.f32 %v5690_v40, %v5678_v11 }
 0x40f   :  { %v5692_v30 = vpop.f32.mrf.mxu2 }
 0x417   :  { %v5742_v17 = vpop.f32.mrf.mxu2 }
 0x418   :  { %v5743_v29 = vadd.f32 %v5742_v17, %v5730_v58 }
 0x41f   :  { %v5744_v54 = vpop.f32.mrf.mxu2 }
 0x441   :  { %v5703_v31 = vpop.f32.mrf.mxu0 }
 0x442   :  { %v5704_v56 = vadd.f32 %v5703_v31, %v5691_v43 }
 0x444   :  { %v5759_v49 = vmul.f32 0.2, %v5704_v56 }
 0x446   :  { %v5761_v51 = vmax.f32 %v5704_v56, %v5759_v49 }
 0x448   :  { %v5764_v53 = vpack.c.bf16 %v5761_v51, %v5761_v51 }
 0x449   :  { %v5705_v55 = vpop.f32.mrf.mxu0 }
 0x44a   :  { %5786 = vmatpush.bf16.xpose.msrb.mxu3 %v5764_v53 }
 0x451   :  { %v5755_v59 = vpop.f32.mrf.mxu0  ;;  %5787 = vmatmul.bf16.vlgmr.msrb.gmra.mxu3 %v5775_v7 }
 0x452   :  { %v5756_v62 = vadd.f32 %v5755_v59, %v5743_v29 }
 0x454   :  { %v5760_v2 = vmul.f32 0.2, %v5756_v62 }
 0x456   :  { %v5762_v3 = vmax.f32 %v5756_v62, %v5760_v2 }
 0x458   :  { %v5765_v0 = vpack.c.bf16 %v5762_v3, %v5762_v3 }
 0x459   :  { %v5757_v37 = vpop.f32.mrf.mxu0 }
 0x45a   :  { %5799 = vmatpush.bf16.xpose.msra.mxu1 %v5765_v0 }
 0x461   :  { %5800 = vmatmul.bf16.vlgmr.msra.gmra.mxu1 %v5776_v5 }
 0x4d4   :  { %v5788_v25 = vpop.f32.mrf.mxu3 }
 0x4d5   :  { %v5789_v61 = vadd.f32 %v5788_v25, %v5772_v12 }
 0x4dc   :  { %v5790_v9 = vpop.f32.mrf.mxu3 }
 0x4de   :  { %v5801_v20 = vpop.f32.mrf.mxu1 }
 0x4df   :  { %v5802_v8 = vadd.f32 %v5801_v20, %v5789_v61 }
 0x4e1   :  { %v5805_v47 = vsub.f32 0.0, %v5802_v8 }
 0x4e3   :  { %v5806_v38 = vmul.f32 1.442695, %v5805_v47 }
 0x4e5   :  { %9432 = vpow2.f32 %v5806_v38 }
 0x4e6   :  { %v5803_v41 = vpop.f32.mrf.mxu1 }
 0x4eb   :  { %v9433_v26 = vpop.eup %9432 }
 0x4ec   :  { %v5808_v21 = vadd.f32 1.0, %v9433_v26 }
 0x4ee   :  { %9434 = vrcp.f32 %v5808_v21  ;;  %v5820_v16 = vand.u32 2147483648, %v5808_v21  ;;  %v5818_v28 = vand.u32 2147483647, %v5808_v21  ;;  %vm5814_vm2 = vweird.f32 %v5808_v21 }
 0x4f0   :  { %v5821_v22 = vor.u32 1.1754944e-38, %v5820_v16  ;;  %vm5819_vm5 = vcmp.eq.f32.partialorder %v5818_v28, 8.507059e+37 }
 0x4f4   :  { %v9435_v48 = vpop.eup %9434 }
 0x4f5   :  { %v5810_v14 = vmul.f32 %v9435_v48, %v5808_v21  ;;  %vm5815_vm1 = vweird.f32 %v9435_v48 }
 0x4f6   :  { %vm5816_vm3 = vmor %vm5814_vm2, %vm5815_vm1 }
 0x4f7   :  { %v5811_v15 = vsub.f32 1.0, %v5810_v14 }
 0x4f9   :  { %v5812_v4 = vmul.f32 %v9435_v48, %v5811_v15 }
 0x4fb   :  { %v5813_v50 = vadd.f32 %v9435_v48, %v5812_v4 }
 0x4fd   :  { %v5817_v52 = vsel %vm5816_vm3, %v9435_v48, %v5813_v50 }
 0x4fe   :  { %v5822_v60 = vsel %vm5819_vm5, %v5821_v22, %v5817_v52 }
 0x4ff   :  { %5825 = vst.msk [vmem:[#allocation17] sm:$0x1] %vm5824_vm4, %v5822_v60 }
 0x500   :  { %5836 = dma.vmem_to_hbm [thread:$0]  %s5832_s7, 16, %s5834_s3, [#allocation5]  }
 0x501   :  { %9665 = dma.done.wait [#allocation5], 16  }
 0x502   :  { %9666 = vsyncadd [#allocation5], 4294967280 }
 0x503   :  { %5841 = vsyncpa [#allocation4], 1 }
 0x504   :  { %5842 = vsyncpa [#allocation7], 1 }
 0x505   :  { %5843 = vsyncpa [#allocation10], 1 }
 0x506   :  { %5844 = vsyncpa [#allocation13], 1 }
 0x507   :  { %5845 = vsyncpa [#allocation16], 1 }
 0x508   :  { %5846 = vsyncpa [#allocation5], 1 }

// kernel: tpu_custom_call.1
= control target key start
LH: loop header
LB: loop body
LE: loop exit
PB: predicated region body
PF: predicated region fallthrough
CT: control target
= control target key end

     0   :  { %s10044_s0 = inlined_call_operand.hbm [shape: f32[8,784], index: 0, kind: input, shape index: {}]   ;;  %s10045_s1 = inlined_call_operand.hbm [shape: bf16[784,1024], index: 1, kind: input, shape index: {}]   ;;  %s10046_s2 = inlined_call_operand.hbm [shape: f32[1,1024], index: 2, kind: input, shape index: {}]   ;;  %s10047_s3 = inlined_call_operand.hbm [shape: bf16[1024,512], index: 3, kind: input, shape index: {}]   ;;  %s10048_s4 = inlined_call_operand.hbm [shape: f32[1,512], index: 4, kind: input, shape index: {}]   ;;  %s10049_s5 = inlined_call_operand.hbm [shape: bf16[512,256], index: 5, kind: input, shape index: {}]   ;;  %s10050_s6 = inlined_call_operand.hbm [shape: f32[1,256], index: 6, kind: input, shape index: {}]   ;;  %s10051_s7 = inlined_call_operand.hbm [shape: bf16[1,256], index: 7, kind: input, shape index: {}]   ;;  %s10052_s8 = inlined_call_operand.<no memory space> [shape: f32[1,1], index: 8, kind: input, shape index: {}]   ;;  %s10053_s9 = inlined_call_operand.hbm [shape: f32[1,1,8], index: 9, kind: output, shape index: {}]  }
   0x1   :  { %v14_v0 = vstv %s10052_s8 }
   0x2   :  { %15 = vst [vmem:[#allocation2] sm:$0x1] %v14_v0 }
   0x3   :  { %16 = vsyncpa [#allocation4], 0 }
   0x4   :  { %17 = vsyncpa [#allocation7], 0 }
   0x5   :  { %18 = vsyncpa [#allocation10], 0 }
   0x6   :  { %19 = vsyncpa [#allocation13], 0 }
   0x7   :  { %20 = vsyncpa [#allocation16], 0  ;;  %s37_s13 = sshll.u32 %s10045_s1, 4  ;;  %s38_s13 = int_to_ptr.hbm [resolvable:$true] %s37_s13 }
   0x8   :  { %21 = vsyncpa [#allocation5], 0  ;;  %s9667_s14 = smov [#allocation6]   ;;  %s61_s18 = sshll.u32 %s10047_s3, 4  ;;  %s62_s18 = int_to_ptr.hbm [resolvable:$true] %s61_s18 }
   0x9   :  { %s39_s15 = sshll.u32 %s9667_s14, 4  ;;  %s9668_s8 = smov 512   ;;  %s40_s15 = int_to_ptr.vmem [resolvable:$true] %s39_s15 }
   0xa   :  { %s9669_s19 = smov 32   ;;  %s9670_s20 = smov [#allocation9]  }
   0xb   :  { %45 = dma.hbm_to_vmem [thread:$0]  %s38_s13, 50176, %s40_s15, [#allocation7], %s9668_s8, %s9668_s8, %s9669_s19  }
   0xc   :  { %s63_s21 = sshll.u32 %s9670_s20, 4  ;;  %s9671_s22 = smov 256   ;;  %s64_s21 = int_to_ptr.vmem [resolvable:$true] %s63_s21 }
   0xd   :  { %s9672_s23 = smov 16   ;;  %s85_s25 = sshll.u32 %s10049_s5, 4  ;;  %s86_s25 = int_to_ptr.hbm [resolvable:$true] %s85_s25 }
   0xe   :  { %69 = dma.hbm_to_vmem [thread:$0]  %s62_s18, 32768, %s64_s21, [#allocation10], %s9671_s22, %s9671_s22, %s9672_s23  }
   0xf   :  { %s9673_s26 = smov [#allocation12]   ;;  %s27_s29 = sshll.u32 %s10044_s0, 4  ;;  %s28_s29 = int_to_ptr.hbm [resolvable:$true] %s27_s29 }
  0x10   :  { %s87_s27 = sshll.u32 %s9673_s26, 4  ;;  %s9674_s30 = smov 128   ;;  %s88_s27 = int_to_ptr.vmem [resolvable:$true] %s87_s27 }
  0x11   :  { %s9675_s10 = smov 8   ;;  %s9676_s11 = smov [#allocation3]  }
  0x12   :  { %93 = dma.hbm_to_vmem [thread:$0]  %s86_s25, 8192, %s88_s27, [#allocation13], %s9674_s30, %s9674_s30, %s9675_s10  }
  0x13   :  { %s29_s12 = sshll.u32 %s9676_s11, 4  ;;  %s51_s15 = sshll.u32 %s10046_s2, 4  ;;  %s30_s12 = int_to_ptr.vmem [resolvable:$true] %s29_s12  ;;  %s52_s15 = int_to_ptr.hbm [resolvable:$true] %s51_s15 }
  0x14   :  { %32 = dma.hbm_to_vmem [thread:$0]  %s28_s29, 896, %s30_s12, [#allocation4]  }
  0x15   :  { %s75_s17 = sshll.u32 %s10048_s4, 4  ;;  %s9677_s18 = smov [#allocation8]   ;;  %s76_s17 = int_to_ptr.hbm [resolvable:$true] %s75_s17 }
  0x16   :  { %s53_s8 = sshll.u32 %s9677_s18, 4  ;;  %s9678_s0 = smov [#allocation11]   ;;  %s54_s8 = int_to_ptr.vmem [resolvable:$true] %s53_s8 }
  0x17   :  { %56 = dma.hbm_to_vmem [thread:$0]  %s52_s15, 128, %s54_s8, [#allocation7]  }
  0x18   :  { %s77_s19 = sshll.u32 %s9678_s0, 4  ;;  %s99_s22 = sshll.u32 %s10050_s6, 4  ;;  %s78_s19 = int_to_ptr.vmem [resolvable:$true] %s77_s19  ;;  %s100_s22 = int_to_ptr.hbm [resolvable:$true] %s99_s22 }
  0x19   :  { %80 = dma.hbm_to_vmem [thread:$0]  %s76_s17, 64, %s78_s19, [#allocation10]  }
  0x1a   :  { %s110_s1 = sshll.u32 %s10051_s7, 4  ;;  %s9679_s24 = smov [#allocation14]   ;;  %s111_s1 = int_to_ptr.hbm [resolvable:$true] %s110_s1 }
  0x1b   :  { %s101_s4 = sshll.u32 %s9679_s24, 4  ;;  %s9680_s25 = smov [#allocation15]   ;;  %s102_s4 = int_to_ptr.vmem [resolvable:$true] %s101_s4 }
  0x1c   :  { %104 = dma.hbm_to_vmem [thread:$0]  %s100_s22, 32, %s102_s4, [#allocation13]  }
  0x1d   :  { %s112_s26 = sshll.u32 %s9680_s25, 4  ;;  %s113_s26 = int_to_ptr.vmem [resolvable:$true] %s112_s26 }
  0x1e   :  { %115 = dma.hbm_to_vmem [thread:$0]  %s111_s1, 32, %s113_s26, [#allocation16]  }
  0x1f   :  { %9655 = dma.done.wait [#allocation4], 896  }
  0x20   :  { %9656 = vsyncadd [#allocation4], 4294966400 }
  0x21   :  { %9657 = dma.done.wait [#allocation7], 50304  }
  0x22   :  { %9658 = vsyncadd [#allocation7], 4294916992 }
  0x23   :  { %9659 = dma.done.wait [#allocation10], 32832  }
  0x24   :  { %9660 = vsyncadd [#allocation10], 4294934464 }
  0x25   :  { %9661 = dma.done.wait [#allocation13], 8224  }
  0x26   :  { %9662 = vsyncadd [#allocation13], 4294959072 }
  0x27   :  { %9663 = dma.done.wait [#allocation16], 32  }
  0x28   :  { %9664 = vsyncadd [#allocation16], 4294967264  ;;  %v6073_v1 = vld [vmem:[#allocation6 + $0x1c0] sm:$0xf]  ;;  %vm2535_vm0 = vcmask 130048   ;;  %s9682_s6 = smov [#allocation17]  }
  0x29   :  { %v8763_v2 = vld [vmem:[#allocation6 + $0x1dc] sm:$0xf0]  ;;  %s5831_s7 = sshll.u32 %s9682_s6, 4  ;;  %s5833_s3 = sshll.u32 %s10053_s9, 4  ;;  %vm5824_vm4 = vcmask 57344   ;;  %s5832_s7 = int_to_ptr.vmem [resolvable:$true] %s5831_s7  ;;  %s5834_s3 = int_to_ptr.hbm [resolvable:$true] %s5833_s3 }
  0x2a   :  { %v6329_v3 = vld [vmem:[#allocation6 + $0x3c0] sm:$0xf]  ;;  %v6074_v4 = vor.u32 %v8763_v2, %v6073_v1 }
  0x2b   :  { %v8827_v5 = vld [vmem:[#allocation6 + $0x3dc] sm:$0xf0] }
  0x2c   :  { %v6585_v6 = vld [vmem:[#allocation6 + $0x5c0] sm:$0xf]  ;;  %v6330_v8 = vor.u32 %v8827_v5, %v6329_v3  ;;  %2539 = vmatpush.bf16.msra.mxu0 %v6074_v4 }
  0x2d   :  { %v8891_v7 = vld [vmem:[#allocation6 + $0x5dc] sm:$0xf0] }
  0x2e   :  { %v6586_v9 = vor.u32 %v8891_v7, %v6585_v6  ;;  %v6841_v10 = vld [vmem:[#allocation6 + $0x7c0] sm:$0xf]  ;;  %2552 = vmatpush.bf16.msra.mxu1 %v6330_v8 }
  0x2f   :  { %v8955_v11 = vld [vmem:[#allocation6 + $0x7dc] sm:$0xf0] }
  0x30   :  { %v6041_v12 = vld [vmem:[#allocation6 + $0x180] sm:$0xf]  ;;  %v6842_v13 = vor.u32 %v8955_v11, %v6841_v10  ;;  %2565 = vmatpush.bf16.msra.mxu2 %v6586_v9 }
  0x31   :  { %v8755_v14 = vld [vmem:[#allocation6 + $0x19c] sm:$0xf0] }
  0x32   :  { %v6297_v15 = vld [vmem:[#allocation6 + $0x380] sm:$0xf]  ;;  %v6042_v17 = vor.u32 %v8755_v14, %v6041_v12  ;;  %2578 = vmatpush.bf16.msra.mxu3 %v6842_v13 }
  0x33   :  { %v8819_v16 = vld [vmem:[#allocation6 + $0x39c] sm:$0xf0] }
  0x34   :  { %v6298_v18 = vor.u32 %v8819_v16, %v6297_v15  ;;  %v6553_v19 = vld [vmem:[#allocation6 + $0x580] sm:$0xf]  ;;  %2540 = vmatpush.bf16.msra.mxu0 %v6042_v17 }
  0x35   :  { %v8883_v20 = vld [vmem:[#allocation6 + $0x59c] sm:$0xf0] }
  0x36   :  { %v6809_v21 = vld [vmem:[#allocation6 + $0x780] sm:$0xf]  ;;  %v6554_v22 = vor.u32 %v8883_v20, %v6553_v19  ;;  %2553 = vmatpush.bf16.msra.mxu1 %v6298_v18 }
  0x37   :  { %v8947_v23 = vld [vmem:[#allocation6 + $0x79c] sm:$0xf0] }
  0x38   :  { %v6009_v24 = vld [vmem:[#allocation6 + $0x140] sm:$0xf]  ;;  %v6810_v26 = vor.u32 %v8947_v23, %v6809_v21  ;;  %2566 = vmatpush.bf16.msra.mxu2 %v6554_v22 }
  0x39   :  { %v8747_v25 = vld [vmem:[#allocation6 + $0x15c] sm:$0xf0] }
  0x3a   :  { %v6265_v27 = vld [vmem:[#allocation6 + $0x340] sm:$0xf]  ;;  %v6010_v30 = vor.u32 %v8747_v25, %v6009_v24  ;;  %2579 = vmatpush.bf16.msra.mxu3 %v6810_v26 }
  0x3b   :  { %v8811_v28 = vld [vmem:[#allocation6 + $0x35c] sm:$0xf0] }
  0x3c   :  { %v6521_v29 = vld [vmem:[#allocation6 + $0x540] sm:$0xf]  ;;  %v6266_v34 = vor.u32 %v8811_v28, %v6265_v27  ;;  %2541 = vmatpush.bf16.msra.mxu0 %v6010_v30 }
  0x3d   :  { %v8875_v31 = vld [vmem:[#allocation6 + $0x55c] sm:$0xf0] }
  0x3e   :  { %v6777_v32 = vld [vmem:[#allocation6 + $0x740] sm:$0xf]  ;;  %v6522_v35 = vor.u32 %v8875_v31, %v6521_v29  ;;  %2554 = vmatpush.bf16.msra.mxu1 %v6266_v34  ;;  %v8759_v34 = vld [vmem:[#allocation6 + $0x1c4] sm:$0xf] }
  0x3f   :  { %v8939_v33 = vld [vmem:[#allocation6 + $0x75c] sm:$0xf0] }
  0x40   :  { %v5977_v36 = vld [vmem:[#allocation6 + $0x100] sm:$0xf]  ;;  %v6778_v39 = vor.u32 %v8939_v33, %v6777_v32  ;;  %2567 = vmatpush.bf16.msra.mxu2 %v6522_v35  ;;  %v6075_v35 = vld [vmem:[#allocation6 + $0x1e0] sm:$0xf0] }
  0x41   :  { %v8739_v37 = vld [vmem:[#allocation6 + $0x11c] sm:$0xf0] }
  0x42   :  { %v6233_v38 = vld [vmem:[#allocation6 + $0x300] sm:$0xf]  ;;  %v5978_v45 = vor.u32 %v8739_v37, %v5977_v36  ;;  %2580 = vmatpush.bf16.msra.mxu3 %v6778_v39  ;;  %v153_v36 = vld [vmem:[#allocation3 + $0x10] sm:$0xff] }
  0x43   :  { %v8803_v40 = vld [vmem:[#allocation6 + $0x31c] sm:$0xf0] }
  0x44   :  { %v6489_v41 = vld [vmem:[#allocation6 + $0x500] sm:$0xf]  ;;  %v6234_v46 = vor.u32 %v8803_v40, %v6233_v38  ;;  %2542 = vmatpush.bf16.msra.mxu0 %v5978_v45  ;;  %v6331_v45 = vld [vmem:[#allocation6 + $0x3e0] sm:$0xf0] }
  0x45   :  { %v8867_v42 = vld [vmem:[#allocation6 + $0x51c] sm:$0xf0] }
  0x46   :  { %v6745_v43 = vld [vmem:[#allocation6 + $0x700] sm:$0xf]  ;;  %v6490_v47 = vor.u32 %v8867_v42, %v6489_v41  ;;  %2555 = vmatpush.bf16.msra.mxu1 %v6234_v46  ;;  %v151_v41 = vld [vmem:[#allocation3] sm:$0xff] }
  0x47   :  { %v8931_v44 = vld [vmem:[#allocation6 + $0x71c] sm:$0xf0] }
  0x48   :  { %v5945_v48 = vld [vmem:[#allocation6 + $0xc0] sm:$0xf]  ;;  %v6746_v51 = vor.u32 %v8931_v44, %v6745_v43  ;;  %2568 = vmatpush.bf16.msra.mxu2 %v6490_v47  ;;  %v8823_v44 = vld [vmem:[#allocation6 + $0x3c4] sm:$0xf] }
  0x49   :  { %v8731_v49 = vld [vmem:[#allocation6 + $0xdc] sm:$0xf0] }
  0x4a   :  { %v6201_v50 = vld [vmem:[#allocation6 + $0x2c0] sm:$0xf]  ;;  %v5946_v57 = vor.u32 %v8731_v49, %v5945_v48  ;;  %2581 = vmatpush.bf16.msra.mxu3 %v6746_v51  ;;  %v6078_v48 = vor.u32 %v8759_v34, %v6075_v35 }
  0x4b   :  { %v8795_v52 = vld [vmem:[#allocation6 + $0x2dc] sm:$0xf0] }
  0x4c   :  { %v6457_v53 = vld [vmem:[#allocation6 + $0x4c0] sm:$0xf]  ;;  %v6202_v58 = vor.u32 %v8795_v52, %v6201_v50  ;;  %2543 = vmatpush.bf16.msra.mxu0 %v5946_v57  ;;  %v9760_v52 = vpack.c.bf16 %v153_v36, %v153_v36  ;;  %v8791_v36 = vld [vmem:[#allocation6 + $0x2c4] sm:$0xf] }
  0x4d   :  { %v8859_v54 = vld [vmem:[#allocation6 + $0x4dc] sm:$0xf0] }
  0x4e   :  { %v6713_v55 = vld [vmem:[#allocation6 + $0x6c0] sm:$0xf]  ;;  %v6458_v59 = vor.u32 %v8859_v54, %v6457_v53  ;;  %2556 = vmatpush.bf16.msra.mxu1 %v6202_v58  ;;  %v8751_v54 = vld [vmem:[#allocation6 + $0x184] sm:$0xf] }
  0x4f   :  { %v8923_v56 = vld [vmem:[#allocation6 + $0x6dc] sm:$0xf0] }
  0x50   :  { %v5913_v60 = vld [vmem:[#allocation6 + $0x80] sm:$0xf]  ;;  %v6714_v63 = vor.u32 %v8923_v56, %v6713_v55  ;;  %2569 = vmatpush.bf16.msra.mxu2 %v6458_v59  ;;  %v6043_v55 = vld [vmem:[#allocation6 + $0x1a0] sm:$0xf0]  ;;  %v9762_v56 = vpack.c.bf16 %v151_v41, %v151_v41  ;;  %v152_v59 = vld [vmem:[#allocation3 + $0x8] sm:$0xff] }
  0x51   :  { %v8723_v61 = vld [vmem:[#allocation6 + $0x9c] sm:$0xf0] }
  0x52   :  { %v6169_v62 = vld [vmem:[#allocation6 + $0x280] sm:$0xf]  ;;  %v5914_v5 = vor.u32 %v8723_v61, %v5913_v60  ;;  %2582 = vmatpush.bf16.msra.mxu3 %v6714_v63  ;;  %v6334_v60 = vor.u32 %v8823_v44, %v6331_v45  ;;  %v6299_v63 = vld [vmem:[#allocation6 + $0x3a0] sm:$0xf0] }
  0x53   :  { %v8787_v0 = vld [vmem:[#allocation6 + $0x29c] sm:$0xf0]  ;;  %v8719_v44 = vld [vmem:[#allocation6 + $0x84] sm:$0xf] }
  0x54   :  { %v6425_v1 = vld [vmem:[#allocation6 + $0x480] sm:$0xf]  ;;  %v6170_v6 = vor.u32 %v8787_v0, %v6169_v62  ;;  %2544 = vmatpush.bf16.msra.mxu0 %v5914_v5  ;;  %v8815_v62 = vld [vmem:[#allocation6 + $0x384] sm:$0xf] }
  0x55   :  { %v8851_v2 = vld [vmem:[#allocation6 + $0x49c] sm:$0xf0]  ;;  %v5915_v45 = vld [vmem:[#allocation6 + $0xa0] sm:$0xf0] }
  0x56   :  { %v6681_v3 = vld [vmem:[#allocation6 + $0x680] sm:$0xf]  ;;  %v6426_v7 = vor.u32 %v8851_v2, %v6425_v1  ;;  %2557 = vmatpush.bf16.msra.mxu1 %v6170_v6  ;;  %v6046_v1 = vor.u32 %v8751_v54, %v6043_v55  ;;  %v8743_v6 = vld [vmem:[#allocation6 + $0x144] sm:$0xf] }
  0x57   :  { %v8915_v4 = vld [vmem:[#allocation6 + $0x69c] sm:$0xf0] }
  0x58   :  { %v5881_v8 = vld [vmem:[#allocation6 + $0x40] sm:$0xf]  ;;  %v6682_v11 = vor.u32 %v8915_v4, %v6681_v3  ;;  %2570 = vmatpush.bf16.msra.mxu2 %v6426_v7  ;;  %v6011_v7 = vld [vmem:[#allocation6 + $0x160] sm:$0xf0] }
  0x59   :  { %v8715_v9 = vld [vmem:[#allocation6 + $0x5c] sm:$0xf0] }
  0x5a   :  { %v6137_v10 = vld [vmem:[#allocation6 + $0x240] sm:$0xf]  ;;  %v5882_v17 = vor.u32 %v8715_v9, %v5881_v8  ;;  %2583 = vmatpush.bf16.msra.mxu3 %v6682_v11  ;;  %v9768_v8 = vpack.c.bf16 %v152_v59, %v152_v59  ;;  %v6302_v9 = vor.u32 %v8815_v62, %v6299_v63  ;;  %v8807_v11 = vld [vmem:[#allocation6 + $0x344] sm:$0xf] }
  0x5b   :  { %v8779_v12 = vld [vmem:[#allocation6 + $0x25c] sm:$0xf0] }
  0x5c   :  { %v6393_v13 = vld [vmem:[#allocation6 + $0x440] sm:$0xf]  ;;  %v6138_v21 = vor.u32 %v8779_v12, %v6137_v10  ;;  %2545 = vmatpush.bf16.msra.mxu0 %v5882_v17  ;;  %v6267_v12 = vld [vmem:[#allocation6 + $0x360] sm:$0xf0] }
  0x5d   :  { %v8843_v14 = vld [vmem:[#allocation6 + $0x45c] sm:$0xf0] }
  0x5e   :  { %v6649_v15 = vld [vmem:[#allocation6 + $0x640] sm:$0xf]  ;;  %v6394_v22 = vor.u32 %v8843_v14, %v6393_v13  ;;  %2558 = vmatpush.bf16.msra.mxu1 %v6138_v21  ;;  %v6014_v14 = vor.u32 %v8743_v6, %v6011_v7  ;;  %v6270_v21 = vor.u32 %v8807_v11, %v6267_v12  ;;  %v8887_v11 = vld [vmem:[#allocation6 + $0x5c4] sm:$0xf] }
  0x5f   :  { %v8907_v16 = vld [vmem:[#allocation6 + $0x65c] sm:$0xf0]  ;;  %v6587_v12 = vld [vmem:[#allocation6 + $0x5e0] sm:$0xf0] }
  0x60   :  { %v5849_v18 = vld [vmem:[#allocation6] sm:$0xf]  ;;  %v6650_v26 = vor.u32 %v8907_v16, %v6649_v15  ;;  %2571 = vmatpush.bf16.msra.mxu2 %v6394_v22 }
  0x61   :  { %v8707_v19 = vld [vmem:[#allocation6 + $0x1c] sm:$0xf0] }
  0x62   :  { %v6105_v20 = vld [vmem:[#allocation6 + $0x200] sm:$0xf]  ;;  %v5850_v33 = vor.u32 %v8707_v19, %v5849_v18  ;;  %2584 = vmatpush.bf16.msra.mxu3 %v6650_v26  ;;  %v8735_v19 = vld [vmem:[#allocation6 + $0x104] sm:$0xf] }
  0x63   :  { %v8771_v23 = vld [vmem:[#allocation6 + $0x21c] sm:$0xf0] }
  0x64   :  { %v6361_v24 = vld [vmem:[#allocation6 + $0x400] sm:$0xf]  ;;  %v6106_v37 = vor.u32 %v8771_v23, %v6105_v20  ;;  %2546 = vmatpush.bf16.msra.mxu0 %v5850_v33  ;;  %v5979_v20 = vld [vmem:[#allocation6 + $0x120] sm:$0xf0]  ;;  %v157_v33 = vld [vmem:[#allocation3 + $0x30] sm:$0xff] }
  0x65   :  { %v8835_v25 = vld [vmem:[#allocation6 + $0x41c] sm:$0xf0]  ;;  %v8799_v23 = vld [vmem:[#allocation6 + $0x304] sm:$0xf]  ;;  %v5982_v26 = vor.u32 %v8735_v19, %v5979_v20  ;;  %v155_v19 = vld [vmem:[#allocation3 + $0x20] sm:$0xff] }
  0x66   :  { %v6617_v27 = vld [vmem:[#allocation6 + $0x600] sm:$0xf]  ;;  %v6362_v38 = vor.u32 %v8835_v25, %v6361_v24  ;;  %2559 = vmatpush.bf16.msra.mxu1 %v6106_v37  ;;  %v6235_v24 = vld [vmem:[#allocation6 + $0x320] sm:$0xf0] }
  0x67   :  { %v8899_v28 = vld [vmem:[#allocation6 + $0x61c] sm:$0xf0]  ;;  %2547 = vmatmul.bf16.vlgmr.msra.gmra.mxu0 %v9762_v56  ;;  %v6238_v34 = vor.u32 %v8799_v23, %v6235_v24  ;;  %v6203_v37 = vld [vmem:[#allocation6 + $0x2e0] sm:$0xf0]  ;;  %v156_v24 = vld [vmem:[#allocation3 + $0x28] sm:$0xff] }
  0x68   :  { %v7097_v29 = vld [vmem:[#allocation6 + $0x9c0] sm:$0xf]  ;;  %v6618_v42 = vor.u32 %v8899_v28, %v6617_v27  ;;  %2572 = vmatpush.bf16.msra.mxu2 %v6362_v38  ;;  %v6107_v23 = vld [vmem:[#allocation6 + $0x220] sm:$0xf0] }
  0x69   :  { %v9019_v30 = vld [vmem:[#allocation6 + $0x9dc] sm:$0xf0]  ;;  %2560 = vmatmul.bf16.vlgmr.msra.gmra.mxu1 %v9768_v8 }
  0x6a   :  { %v7353_v31 = vld [vmem:[#allocation6 + $0xbc0] sm:$0xf]  ;;  %v7098_v43 = vor.u32 %v9019_v30, %v7097_v29  ;;  %2585 = vmatpush.bf16.msra.mxu3 %v6618_v42 }
  0x6b   :  { %v9083_v32 = vld [vmem:[#allocation6 + $0xbdc] sm:$0xf0]  ;;  %2573 = vmatmul.bf16.vlgmr.msra.gmra.mxu2 %v9760_v52 }
  0x6c   :  { %v7385_v39 = vld [vmem:[#allocation6 + $0xc00] sm:$0xf]  ;;  %v7354_v47 = vor.u32 %v9083_v32, %v7353_v31  ;;  %2591 = vmatpush.bf16.msrb.mxu0 %v7098_v43  ;;  %v8727_v31 = vld [vmem:[#allocation6 + $0xc4] sm:$0xf] }
  0x6d   :  { %v9091_v40 = vld [vmem:[#allocation6 + $0xc1c] sm:$0xf0]  ;;  %v5947_v32 = vld [vmem:[#allocation6 + $0xe0] sm:$0xf0] }
  0x6e   :  { %v154_v46 = vld [vmem:[#allocation3 + $0x18] sm:$0xff]  ;;  %v7386_v57 = vor.u32 %v9091_v40, %v7385_v39  ;;  %2604 = vmatpush.bf16.msrb.mxu1 %v7354_v47  ;;  %2630 = vmatpush.bf16.msrb.mxu3 %v6078_v48  ;;  %v5950_v39 = vor.u32 %v8727_v31, %v5947_v32  ;;  %v6206_v47 = vor.u32 %v8791_v36, %v6203_v37 }
  0x6f   :  { %v7065_v49 = vld [vmem:[#allocation6 + $0x980] sm:$0xf]  ;;  %v9764_v58 = vpack.c.bf16 %v154_v46, %v154_v46  ;;  %v9772_v46 = vpack.c.bf16 %v157_v33, %v157_v33  ;;  %v9776_v31 = vpack.c.bf16 %v155_v19, %v155_v19  ;;  %v6555_v32 = vld [vmem:[#allocation6 + $0x5a0] sm:$0xf0]  ;;  %v9778_v36 = vpack.c.bf16 %v156_v24, %v156_v24 }
  0x70   :  { %v9011_v50 = vld [vmem:[#allocation6 + $0x99c] sm:$0xf0]  ;;  %2624 = vmatpush.bf16.msrb.mxu2 %v7386_v57  ;;  %v8943_v33 = vld [vmem:[#allocation6 + $0x784] sm:$0xf] }
  0x71   :  { %v7321_v51 = vld [vmem:[#allocation6 + $0xb80] sm:$0xf]  ;;  %v7066_v61 = vor.u32 %v9011_v50, %v7065_v49  ;;  %2586 = vmatmul.bf16.vlgmr.msra.gmra.mxu3 %v9764_v58  ;;  %v8783_v49 = vld [vmem:[#allocation6 + $0x284] sm:$0xf] }
  0x72   :  { %v9075_v53 = vld [vmem:[#allocation6 + $0xb9c] sm:$0xf0]  ;;  %2631 = vmatpush.bf16.msrb.mxu3 %v6046_v1  ;;  %v6171_v50 = vld [vmem:[#allocation6 + $0x2a0] sm:$0xf0] }
  0x73   :  { %v7322_v0 = vor.u32 %v9075_v53, %v7321_v51  ;;  %v7033_v2 = vld [vmem:[#allocation6 + $0x940] sm:$0xf]  ;;  %2592 = vmatpush.bf16.msrb.mxu0 %v7066_v61  ;;  %v5918_v53 = vor.u32 %v8719_v44, %v5915_v45  ;;  %v5883_v61 = vld [vmem:[#allocation6 + $0x60] sm:$0xf0]  ;;  %v6174_v62 = vor.u32 %v8783_v49, %v6171_v50 }
  0x74   :  { %v9003_v3 = vld [vmem:[#allocation6 + $0x95c] sm:$0xf0]  ;;  %2643 = vmatpush.bf16.msra.mxu2 %v6334_v60  ;;  %v8711_v60 = vld [vmem:[#allocation6 + $0x44] sm:$0xf] }
  0x75   :  { %v7289_v4 = vld [vmem:[#allocation6 + $0xb40] sm:$0xf]  ;;  %v7034_v10 = vor.u32 %v9003_v3, %v7033_v2  ;;  %2605 = vmatpush.bf16.msrb.mxu1 %v7322_v0  ;;  %v8775_v0 = vld [vmem:[#allocation6 + $0x244] sm:$0xf] }
  0x76   :  { %v9067_v5 = vld [vmem:[#allocation6 + $0xb5c] sm:$0xf0]  ;;  %2632 = vmatpush.bf16.msrb.mxu3 %v6014_v14  ;;  %v6139_v1 = vld [vmem:[#allocation6 + $0x260] sm:$0xf0] }
  0x77   :  { %v7290_v13 = vor.u32 %v9067_v5, %v7289_v4  ;;  %v7001_v15 = vld [vmem:[#allocation6 + $0x900] sm:$0xf]  ;;  %2593 = vmatpush.bf16.msrb.mxu0 %v7034_v10  ;;  %v5886_v4 = vor.u32 %v8711_v60, %v5883_v61  ;;  %v5851_v10 = vld [vmem:[#allocation6 + $0x20] sm:$0xf0] }
  0x78   :  { %v8995_v16 = vld [vmem:[#allocation6 + $0x91c] sm:$0xf0]  ;;  %2644 = vmatpush.bf16.msra.mxu2 %v6302_v9  ;;  %v8703_v9 = vld [vmem:[#allocation6 + $0x4] sm:$0xf] }
  0x79   :  { %v7257_v17 = vld [vmem:[#allocation6 + $0xb00] sm:$0xf]  ;;  %v7002_v22 = vor.u32 %v8995_v16, %v7001_v15  ;;  %2606 = vmatpush.bf16.msrb.mxu1 %v7290_v13  ;;  %v8951_v13 = vld [vmem:[#allocation6 + $0x7c4] sm:$0xf]  ;;  %v6142_v15 = vor.u32 %v8775_v0, %v6139_v1 }
  0x7a   :  { %v9059_v18 = vld [vmem:[#allocation6 + $0xb1c] sm:$0xf0]  ;;  %2633 = vmatpush.bf16.msrb.mxu3 %v5982_v26  ;;  %v6843_v14 = vld [vmem:[#allocation6 + $0x7e0] sm:$0xf0] }
  0x7b   :  { %v7258_v25 = vor.u32 %v9059_v18, %v7257_v17  ;;  %v6969_v27 = vld [vmem:[#allocation6 + $0x8c0] sm:$0xf]  ;;  %2594 = vmatpush.bf16.msrb.mxu0 %v7002_v22  ;;  %7415 = vmatmul.msk.bf16.vlgmr.msrb.gmra.mxu2 %vm2535_vm0, %v9772_v46  ;;  %v9015_v17 = vld [vmem:[#allocation6 + $0x9c4] sm:$0xf]  ;;  %v6846_v26 = vor.u32 %v8951_v13, %v6843_v14 }
  0x7c   :  { %v8987_v28 = vld [vmem:[#allocation6 + $0x8dc] sm:$0xf0]  ;;  %2645 = vmatpush.bf16.msra.mxu2 %v6270_v21  ;;  %v7099_v18 = vld [vmem:[#allocation6 + $0x9e0] sm:$0xf0]  ;;  %v5854_v21 = vor.u32 %v8703_v9, %v5851_v10 }
  0x7d   :  { %v7225_v29 = vld [vmem:[#allocation6 + $0xac0] sm:$0xf]  ;;  %v6970_v35 = vor.u32 %v8987_v28, %v6969_v27  ;;  %2607 = vmatpush.bf16.msrb.mxu1 %v7258_v25  ;;  %v8767_v22 = vld [vmem:[#allocation6 + $0x204] sm:$0xf]  ;;  %v6590_v25 = vor.u32 %v8887_v11, %v6587_v12 }
  0x7e   :  { %v9051_v30 = vld [vmem:[#allocation6 + $0xadc] sm:$0xf0]  ;;  %2634 = vmatpush.bf16.msrb.mxu3 %v5950_v39  ;;  %v9079_v27 = vld [vmem:[#allocation6 + $0xbc4] sm:$0xf] }
  0x7f   :  { %v7226_v38 = vor.u32 %v9051_v30, %v7225_v29  ;;  %v6937_v40 = vld [vmem:[#allocation6 + $0x880] sm:$0xf]  ;;  %2595 = vmatpush.bf16.msrb.mxu0 %v6970_v35  ;;  %v7355_v28 = vld [vmem:[#allocation6 + $0xbe0] sm:$0xf0]  ;;  %v7102_v30 = vor.u32 %v9015_v17, %v7099_v18  ;;  %v6110_v35 = vor.u32 %v8767_v22, %v6107_v23 }
  0x80   :  { %v8979_v41 = vld [vmem:[#allocation6 + $0x89c] sm:$0xf0]  ;;  %2646 = vmatpush.bf16.msra.mxu2 %v6238_v34  ;;  %v8879_v29 = vld [vmem:[#allocation6 + $0x584] sm:$0xf]  ;;  %v7358_v39 = vor.u32 %v9079_v27, %v7355_v28 }
  0x81   :  { %v7193_v42 = vld [vmem:[#allocation6 + $0xa80] sm:$0xf]  ;;  %v6938_v48 = vor.u32 %v8979_v41, %v6937_v40  ;;  %2608 = vmatpush.bf16.msrb.mxu1 %v7226_v38  ;;  %v6811_v34 = vld [vmem:[#allocation6 + $0x7a0] sm:$0xf0]  ;;  %v6558_v40 = vor.u32 %v8879_v29, %v6555_v32 }
  0x82   :  { %v9043_v43 = vld [vmem:[#allocation6 + $0xa9c] sm:$0xf0]  ;;  %2635 = vmatpush.bf16.msrb.mxu3 %v5918_v53  ;;  %v9007_v37 = vld [vmem:[#allocation6 + $0x984] sm:$0xf]  ;;  %v6814_v41 = vor.u32 %v8943_v33, %v6811_v34 }
  0x83   :  { %v7194_v51 = vor.u32 %v9043_v43, %v7193_v42  ;;  %v6905_v54 = vld [vmem:[#allocation6 + $0x840] sm:$0xf]  ;;  %2596 = vmatpush.bf16.msrb.mxu0 %v6938_v48  ;;  %v7067_v38 = vld [vmem:[#allocation6 + $0x9a0] sm:$0xf0] }
  0x84   :  { %v8971_v55 = vld [vmem:[#allocation6 + $0x85c] sm:$0xf0]  ;;  %2647 = vmatpush.bf16.msra.mxu2 %v6206_v47  ;;  %v9071_v42 = vld [vmem:[#allocation6 + $0xb84] sm:$0xf]  ;;  %v7070_v45 = vor.u32 %v9007_v37, %v7067_v38 }
  0x85   :  { %v7161_v57 = vld [vmem:[#allocation6 + $0xa40] sm:$0xf]  ;;  %v6906_v63 = vor.u32 %v8971_v55, %v6905_v54  ;;  %2609 = vmatpush.bf16.msrb.mxu1 %v7194_v51  ;;  %v7323_v43 = vld [vmem:[#allocation6 + $0xba0] sm:$0xf0] }
  0x86   :  { %v9035_v59 = vld [vmem:[#allocation6 + $0xa5c] sm:$0xf0]  ;;  %2636 = vmatpush.bf16.msrb.mxu3 %v5886_v4  ;;  %v8871_v44 = vld [vmem:[#allocation6 + $0x544] sm:$0xf]  ;;  %v7326_v53 = vor.u32 %v9071_v42, %v7323_v43 }
  0x87   :  { %v6873_v2 = vld [vmem:[#allocation6 + $0x800] sm:$0xf]  ;;  %v7162_v3 = vor.u32 %v9035_v59, %v7161_v57  ;;  %2597 = vmatpush.bf16.msrb.mxu0 %v6906_v63  ;;  %v6523_v47 = vld [vmem:[#allocation6 + $0x560] sm:$0xf0] }
  0x88   :  { %v8963_v5 = vld [vmem:[#allocation6 + $0x81c] sm:$0xf0]  ;;  %2648 = vmatpush.bf16.msra.mxu2 %v6174_v62  ;;  %v8935_v48 = vld [vmem:[#allocation6 + $0x744] sm:$0xf]  ;;  %v6526_v54 = vor.u32 %v8871_v44, %v6523_v47 }
  0x89   :  { %v7129_v6 = vld [vmem:[#allocation6 + $0xa00] sm:$0xf]  ;;  %v6874_v16 = vor.u32 %v8963_v5, %v6873_v2  ;;  %2610 = vmatpush.bf16.msrb.mxu1 %v7162_v3  ;;  %v6779_v49 = vld [vmem:[#allocation6 + $0x760] sm:$0xf0] }
  0x8a   :  { %v9027_v7 = vld [vmem:[#allocation6 + $0xa1c] sm:$0xf0]  ;;  %2637 = vmatpush.bf16.msrb.mxu3 %v5854_v21  ;;  %v8999_v50 = vld [vmem:[#allocation6 + $0x944] sm:$0xf]  ;;  %v6782_v55 = vor.u32 %v8935_v48, %v6779_v49 }
  0x8b   :  { %v7130_v20 = vor.u32 %v9027_v7, %v7129_v6  ;;  %2598 = vmatpush.bf16.msrb.mxu0 %v6874_v16  ;;  %v7035_v51 = vld [vmem:[#allocation6 + $0x960] sm:$0xf0] }
  0x8c   :  { %2649 = vmatpush.bf16.msra.mxu2 %v6142_v15  ;;  %v9063_v57 = vld [vmem:[#allocation6 + $0xb44] sm:$0xf]  ;;  %v7038_v61 = vor.u32 %v8999_v50, %v7035_v51 }
  0x8d   :  { %2611 = vmatpush.bf16.msrb.mxu1 %v7130_v20  ;;  %2638 = vmatmul.bf16.vlgmr.msrb.gmra.mxu3 %v9762_v56  ;;  %v7291_v59 = vld [vmem:[#allocation6 + $0xb60] sm:$0xf0] }
  0x8e   :  { %2682 = vmatpush.bf16.msra.mxu3 %v7102_v30  ;;  %2599 = vmatmul.bf16.vlgmr.msrb.gmra.mxu0 %v9776_v31  ;;  %v8863_v60 = vld [vmem:[#allocation6 + $0x504] sm:$0xf]  ;;  %v7294_v3 = vor.u32 %v9063_v57, %v7291_v59  ;;  %v6081_v57 = vld [vmem:[#allocation6 + $0x1c8] sm:$0xf] }
  0x8f   :  { %2656 = vmatpush.bf16.msra.mxu0 %v6590_v25  ;;  %v6491_v62 = vld [vmem:[#allocation6 + $0x520] sm:$0xf0]  ;;  %v8764_v59 = vld [vmem:[#allocation6 + $0x1e4] sm:$0xf0] }
  0x90   :  { %2650 = vmatpush.bf16.msra.mxu2 %v6110_v35  ;;  %2612 = vmatmul.bf16.vlgmr.msrb.gmra.mxu1 %v9778_v36  ;;  %v8927_v63 = vld [vmem:[#allocation6 + $0x704] sm:$0xf]  ;;  %v6494_v4 = vor.u32 %v8863_v60, %v6491_v62  ;;  %v6337_v60 = vld [vmem:[#allocation6 + $0x3c8] sm:$0xf] }
  0x91   :  { %2669 = vmatpush.bf16.msra.mxu1 %v6846_v26  ;;  %v6747_v0 = vld [vmem:[#allocation6 + $0x720] sm:$0xf0]  ;;  %v8828_v62 = vld [vmem:[#allocation6 + $0x3e4] sm:$0xf0] }
  0x92   :  { %2683 = vmatpush.bf16.msra.mxu3 %v7070_v45  ;;  %v8991_v1 = vld [vmem:[#allocation6 + $0x904] sm:$0xf]  ;;  %v6750_v5 = vor.u32 %v8927_v63, %v6747_v0 }
  0x93   :  { %2657 = vmatpush.bf16.msra.mxu0 %v6558_v40  ;;  %2651 = vmatmul.bf16.vlgmr.msra.gmra.mxu2 %v9768_v8  ;;  %v7003_v2 = vld [vmem:[#allocation6 + $0x920] sm:$0xf0] }
  0x94   :  { %2695 = vmatpush.bf16.msrb.mxu2 %v7358_v39  ;;  %v9055_v6 = vld [vmem:[#allocation6 + $0xb04] sm:$0xf]  ;;  %v7006_v10 = vor.u32 %v8991_v1, %v7003_v2 }
  0x95   :  { %2670 = vmatpush.bf16.msra.mxu1 %v6814_v41  ;;  %v7259_v7 = vld [vmem:[#allocation6 + $0xb20] sm:$0xf0] }
  0x96   :  { %v8855_v9 = vld [vmem:[#allocation6 + $0x4c4] sm:$0xf]  ;;  %2684 = vmatpush.bf16.msra.mxu3 %v7038_v61  ;;  %v7262_v16 = vor.u32 %v9055_v6, %v7259_v7  ;;  %v6082_v7 = vor.u32 %v8764_v59, %v6081_v57  ;;  %v8732_v57 = vld [vmem:[#allocation6 + $0xe4] sm:$0xf0] }
  0x97   :  { %2658 = vmatpush.bf16.msra.mxu0 %v6526_v54  ;;  %v6459_v11 = vld [vmem:[#allocation6 + $0x4e0] sm:$0xf0]  ;;  %v6209_v59 = vld [vmem:[#allocation6 + $0x2c8] sm:$0xf] }
  0x98   :  { %2696 = vmatpush.bf16.msrb.mxu2 %v7326_v53  ;;  %v8919_v12 = vld [vmem:[#allocation6 + $0x6c4] sm:$0xf]  ;;  %v6462_v17 = vor.u32 %v8855_v9, %v6459_v11  ;;  %v8892_v9 = vld [vmem:[#allocation6 + $0x5e4] sm:$0xf0] }
  0x99   :  { %2671 = vmatpush.bf16.msra.mxu1 %v6782_v55  ;;  %v6715_v13 = vld [vmem:[#allocation6 + $0x6e0] sm:$0xf0]  ;;  %v8956_v11 = vld [vmem:[#allocation6 + $0x7e4] sm:$0xf0] }
  0x9a   :  { %v8983_v14 = vld [vmem:[#allocation6 + $0x8c4] sm:$0xf]  ;;  %v6718_v18 = vor.u32 %v8919_v12, %v6715_v13  ;;  %2685 = vmatpush.bf16.msra.mxu3 %v7006_v10  ;;  %v6849_v10 = vld [vmem:[#allocation6 + $0x7c8] sm:$0xf]  ;;  %v6338_v12 = vor.u32 %v8828_v62, %v6337_v60 }
  0x9b   :  { %v6971_v15 = vld [vmem:[#allocation6 + $0x8e0] sm:$0xf0]  ;;  %2659 = vmatpush.bf16.msra.mxu0 %v6494_v4  ;;  %v8796_v60 = vld [vmem:[#allocation6 + $0x2e4] sm:$0xf0] }
  0x9c   :  { %2697 = vmatpush.bf16.msrb.mxu2 %v7294_v3  ;;  %v9047_v19 = vld [vmem:[#allocation6 + $0xac4] sm:$0xf]  ;;  %v6974_v22 = vor.u32 %v8983_v14, %v6971_v15  ;;  %v6049_v14 = vld [vmem:[#allocation6 + $0x188] sm:$0xf] }
  0x9d   :  { %2672 = vmatpush.bf16.msra.mxu1 %v6750_v5  ;;  %v7227_v20 = vld [vmem:[#allocation6 + $0xae0] sm:$0xf0]  ;;  %v6593_v5 = vld [vmem:[#allocation6 + $0x5c8] sm:$0xf] }
  0x9e   :  { %v8847_v21 = vld [vmem:[#allocation6 + $0x484] sm:$0xf]  ;;  %v7230_v28 = vor.u32 %v9047_v19, %v7227_v20  ;;  %2686 = vmatpush.bf16.msra.mxu3 %v6974_v22  ;;  %v8756_v15 = vld [vmem:[#allocation6 + $0x1a4] sm:$0xf0]  ;;  %v6594_v19 = vor.u32 %v8892_v9, %v6593_v5  ;;  %v6850_v20 = vor.u32 %v8956_v11, %v6849_v10 }
  0x9f   :  { %v6427_v23 = vld [vmem:[#allocation6 + $0x4a0] sm:$0xf0]  ;;  %2660 = vmatpush.bf16.msra.mxu0 %v6462_v17  ;;  %v6305_v17 = vld [vmem:[#allocation6 + $0x388] sm:$0xf]  ;;  %v6050_v22 = vor.u32 %v8756_v15, %v6049_v14 }
  0xa0   :  { %v8911_v24 = vld [vmem:[#allocation6 + $0x684] sm:$0xf]  ;;  %2698 = vmatpush.bf16.msrb.mxu2 %v7262_v16  ;;  %v6430_v29 = vor.u32 %v8847_v21, %v6427_v23  ;;  %v6561_v21 = vld [vmem:[#allocation6 + $0x588] sm:$0xf] }
  0xa1   :  { %v6683_v25 = vld [vmem:[#allocation6 + $0x6a0] sm:$0xf0]  ;;  %2673 = vmatpush.bf16.msra.mxu1 %v6718_v18  ;;  %v8820_v18 = vld [vmem:[#allocation6 + $0x3a4] sm:$0xf0] }
  0xa2   :  { %v8975_v26 = vld [vmem:[#allocation6 + $0x884] sm:$0xf]  ;;  %v6686_v30 = vor.u32 %v8911_v24, %v6683_v25  ;;  %v8884_v23 = vld [vmem:[#allocation6 + $0x5a4] sm:$0xf0] }
  0xa3   :  { %v6939_v27 = vld [vmem:[#allocation6 + $0x8a0] sm:$0xf0]  ;;  %2661 = vmatpush.bf16.msra.mxu0 %v6430_v29  ;;  %v6817_v24 = vld [vmem:[#allocation6 + $0x788] sm:$0xf] }
  0xa4   :  { %v9039_v32 = vld [vmem:[#allocation6 + $0xa84] sm:$0xf]  ;;  %v6942_v35 = vor.u32 %v8975_v26, %v6939_v27  ;;  %2699 = vmatpush.bf16.msrb.mxu2 %v7230_v28  ;;  %v8948_v25 = vld [vmem:[#allocation6 + $0x7a4] sm:$0xf0]  ;;  %v6306_v26 = vor.u32 %v8820_v18, %v6305_v17 }
  0xa5   :  { %v7195_v33 = vld [vmem:[#allocation6 + $0xaa0] sm:$0xf0]  ;;  %2674 = vmatpush.bf16.msra.mxu1 %v6686_v30  ;;  %v6017_v27 = vld [vmem:[#allocation6 + $0x148] sm:$0xf] }
  0xa6   :  { %v8839_v34 = vld [vmem:[#allocation6 + $0x444] sm:$0xf]  ;;  %v7198_v42 = vor.u32 %v9039_v32, %v7195_v33  ;;  %2687 = vmatpush.bf16.msra.mxu3 %v6942_v35  ;;  %v8748_v28 = vld [vmem:[#allocation6 + $0x164] sm:$0xf0]  ;;  %v6562_v32 = vor.u32 %v8884_v23, %v6561_v21  ;;  %v6818_v33 = vor.u32 %v8948_v25, %v6817_v24 }
  0xa7   :  { %v6395_v37 = vld [vmem:[#allocation6 + $0x460] sm:$0xf0]  ;;  %v6273_v29 = vld [vmem:[#allocation6 + $0x348] sm:$0xf]  ;;  %v6018_v35 = vor.u32 %v8748_v28, %v6017_v27 }
  0xa8   :  { %v8903_v38 = vld [vmem:[#allocation6 + $0x644] sm:$0xf]  ;;  %v6398_v45 = vor.u32 %v8839_v34, %v6395_v37  ;;  %2700 = vmatpush.bf16.msrb.mxu2 %v7198_v42  ;;  %v8812_v30 = vld [vmem:[#allocation6 + $0x364] sm:$0xf0] }
  0xa9   :  { %v6651_v39 = vld [vmem:[#allocation6 + $0x660] sm:$0xf0]  ;;  %v6529_v34 = vld [vmem:[#allocation6 + $0x548] sm:$0xf] }
  0xaa   :  { %v8967_v40 = vld [vmem:[#allocation6 + $0x844] sm:$0xf]  ;;  %v6654_v47 = vor.u32 %v8903_v38, %v6651_v39  ;;  %2662 = vmatpush.bf16.msra.mxu0 %v6398_v45  ;;  %v8876_v37 = vld [vmem:[#allocation6 + $0x564] sm:$0xf0] }
  0xab   :  { %v6907_v41 = vld [vmem:[#allocation6 + $0x860] sm:$0xf0]  ;;  %v6785_v38 = vld [vmem:[#allocation6 + $0x748] sm:$0xf]  ;;  %v6530_v45 = vor.u32 %v8876_v37, %v6529_v34 }
  0xac   :  { %v9031_v43 = vld [vmem:[#allocation6 + $0xa44] sm:$0xf]  ;;  %v6910_v51 = vor.u32 %v8967_v40, %v6907_v41  ;;  %2675 = vmatpush.bf16.msra.mxu1 %v6654_v47  ;;  %v8940_v39 = vld [vmem:[#allocation6 + $0x764] sm:$0xf0]  ;;  %v6274_v40 = vor.u32 %v8812_v30, %v6273_v29 }
  0xad   :  { %v7163_v44 = vld [vmem:[#allocation6 + $0xa60] sm:$0xf0]  ;;  %v5985_v41 = vld [vmem:[#allocation6 + $0x108] sm:$0xf]  ;;  %v6786_v47 = vor.u32 %v8940_v39, %v6785_v38 }
  0xae   :  { %v8831_v48 = vld [vmem:[#allocation6 + $0x404] sm:$0xf]  ;;  %v7166_v61 = vor.u32 %v9031_v43, %v7163_v44  ;;  %2688 = vmatpush.bf16.msra.mxu3 %v6910_v51  ;;  %v8740_v42 = vld [vmem:[#allocation6 + $0x124] sm:$0xf0] }
  0xaf   :  { %v6363_v49 = vld [vmem:[#allocation6 + $0x420] sm:$0xf0]  ;;  %v6241_v43 = vld [vmem:[#allocation6 + $0x308] sm:$0xf] }
  0xb0   :  { %v8895_v50 = vld [vmem:[#allocation6 + $0x604] sm:$0xf]  ;;  %v6366_v1 = vor.u32 %v8831_v48, %v6363_v49  ;;  %2701 = vmatpush.bf16.msrb.mxu2 %v7166_v61  ;;  %v8804_v44 = vld [vmem:[#allocation6 + $0x324] sm:$0xf0]  ;;  %v5986_v49 = vor.u32 %v8740_v42, %v5985_v41 }
  0xb1   :  { %v6619_v53 = vld [vmem:[#allocation6 + $0x620] sm:$0xf0]  ;;  %v6497_v48 = vld [vmem:[#allocation6 + $0x508] sm:$0xf] }
  0xb2   :  { %v8959_v54 = vld [vmem:[#allocation6 + $0x804] sm:$0xf]  ;;  %v6622_v2 = vor.u32 %v8895_v50, %v6619_v53  ;;  %2663 = vmatpush.bf16.msra.mxu0 %v6366_v1  ;;  %v8868_v50 = vld [vmem:[#allocation6 + $0x524] sm:$0xf0] }
  0xb3   :  { %v6875_v55 = vld [vmem:[#allocation6 + $0x820] sm:$0xf0]  ;;  %v6753_v51 = vld [vmem:[#allocation6 + $0x708] sm:$0xf]  ;;  %v6498_v61 = vor.u32 %v8868_v50, %v6497_v48  ;;  %v8760_v48 = vld [vmem:[#allocation6 + $0x1cc] sm:$0xf] }
  0xb4   :  { %v9087_v63 = vld [vmem:[#allocation6 + $0xc04] sm:$0xf]  ;;  %v6878_v6 = vor.u32 %v8959_v54, %v6875_v55  ;;  %2676 = vmatpush.bf16.msra.mxu1 %v6622_v2  ;;  %v8932_v53 = vld [vmem:[#allocation6 + $0x724] sm:$0xf0]  ;;  %v6242_v54 = vor.u32 %v8804_v44, %v6241_v43 }
  0xb5   :  { %v7387_v0 = vld [vmem:[#allocation6 + $0xc20] sm:$0xf0]  ;;  %2664 = vmatmul.bf16.vlgmr.msra.gmra.mxu0 %v9760_v52  ;;  %v5953_v55 = vld [vmem:[#allocation6 + $0xc8] sm:$0xf]  ;;  %v6754_v62 = vor.u32 %v8932_v53, %v6753_v51  ;;  %v6083_v51 = vld [vmem:[#allocation6 + $0x1e8] sm:$0xf0] }
  0xb6   :  { %v9023_v3 = vld [vmem:[#allocation6 + $0xa04] sm:$0xf]  ;;  %v7390_v13 = vor.u32 %v9087_v63, %v7387_v0  ;;  %2689 = vmatpush.bf16.msra.mxu3 %v6878_v6  ;;  %v6465_v63 = vld [vmem:[#allocation6 + $0x4c8] sm:$0xf]  ;;  %v5954_v0 = vor.u32 %v8732_v57, %v5953_v55 }
  0xb7   :  { %v7131_v4 = vld [vmem:[#allocation6 + $0xa20] sm:$0xf0]  ;;  %2677 = vmatmul.bf16.vlgmr.msra.gmra.mxu1 %v9764_v58  ;;  %v8860_v1 = vld [vmem:[#allocation6 + $0x4e4] sm:$0xf0] }
  0xb8   :  { %v7134_v16 = vor.u32 %v9023_v3, %v7131_v4  ;;  %2721 = vmatpush.bf16.msrb.mxu1 %v6082_v7  ;;  %2715 = vmatpush.bf16.msrb.mxu0 %v7390_v13  ;;  %v6721_v2 = vld [vmem:[#allocation6 + $0x6c8] sm:$0xf]  ;;  %v6210_v4 = vor.u32 %v8796_v60, %v6209_v59  ;;  %v6466_v10 = vor.u32 %v8860_v1, %v6465_v63 }
  0xb9   :  { %2690 = vmatmul.bf16.vlgmr.msra.gmra.mxu3 %v9776_v31  ;;  %v8924_v3 = vld [vmem:[#allocation6 + $0x6e4] sm:$0xf0] }
  0xba   :  { %2734 = vmatpush.bf16.msrb.mxu3 %v6338_v12  ;;  %2702 = vmatpush.bf16.msrb.mxu2 %v7134_v16  ;;  %v5921_v5 = vld [vmem:[#allocation6 + $0x88] sm:$0xf]  ;;  %v6722_v11 = vor.u32 %v8924_v3, %v6721_v2  ;;  %v8824_v2 = vld [vmem:[#allocation6 + $0x3cc] sm:$0xf] }
  0xbb   :  { %v8724_v6 = vld [vmem:[#allocation6 + $0xa4] sm:$0xf0]  ;;  %v6339_v3 = vld [vmem:[#allocation6 + $0x3e8] sm:$0xf0] }
  0xbc   :  { %2747 = vmatpush.bf16.msra.mxu0 %v6594_v19  ;;  %2722 = vmatpush.bf16.msrb.mxu1 %v6050_v22  ;;  %v6177_v7 = vld [vmem:[#allocation6 + $0x288] sm:$0xf]  ;;  %v5922_v13 = vor.u32 %v8724_v6, %v5921_v5  ;;  %v8752_v5 = vld [vmem:[#allocation6 + $0x18c] sm:$0xf] }
  0xbd   :  { %2703 = vmatmul.bf16.vlgmr.msrb.gmra.mxu2 %v9778_v36  ;;  %v8788_v9 = vld [vmem:[#allocation6 + $0x2a4] sm:$0xf0]  ;;  %v6051_v6 = vld [vmem:[#allocation6 + $0x1a8] sm:$0xf0] }
  0xbe   :  { %2760 = vmatpush.bf16.msra.mxu2 %v6850_v20  ;;  %2735 = vmatpush.bf16.msrb.mxu3 %v6306_v26  ;;  %v6433_v12 = vld [vmem:[#allocation6 + $0x488] sm:$0xf]  ;;  %v6178_v17 = vor.u32 %v8788_v9, %v6177_v7 }
  0xbf   :  { %v8852_v14 = vld [vmem:[#allocation6 + $0x4a4] sm:$0xf0] }
  0xc0   :  { %2748 = vmatpush.bf16.msra.mxu0 %v6562_v32  ;;  %2723 = vmatpush.bf16.msrb.mxu1 %v6018_v35  ;;  %v6689_v15 = vld [vmem:[#allocation6 + $0x688] sm:$0xf]  ;;  %v6434_v22 = vor.u32 %v8852_v14, %v6433_v12  ;;  %v6054_v14 = vor.u32 %v8752_v5, %v6051_v6  ;;  %v8784_v5 = vld [vmem:[#allocation6 + $0x28c] sm:$0xf] }
  0xc1   :  { %v8916_v16 = vld [vmem:[#allocation6 + $0x6a4] sm:$0xf0]  ;;  %v6179_v6 = vld [vmem:[#allocation6 + $0x2a8] sm:$0xf0] }
  0xc2   :  { %2761 = vmatpush.bf16.msra.mxu2 %v6818_v33  ;;  %2736 = vmatpush.bf16.msrb.mxu3 %v6274_v40  ;;  %v5889_v18 = vld [vmem:[#allocation6 + $0x48] sm:$0xf]  ;;  %v6690_v23 = vor.u32 %v8916_v16, %v6689_v15  ;;  %v8816_v15 = vld [vmem:[#allocation6 + $0x38c] sm:$0xf] }
  0xc3   :  { %v8716_v19 = vld [vmem:[#allocation6 + $0x64] sm:$0xf0]  ;;  %v6307_v16 = vld [vmem:[#allocation6 + $0x3a8] sm:$0xf0] }
  0xc4   :  { %2749 = vmatpush.bf16.msra.mxu0 %v6530_v45  ;;  %2724 = vmatpush.bf16.msrb.mxu1 %v5986_v49  ;;  %v6145_v20 = vld [vmem:[#allocation6 + $0x248] sm:$0xf]  ;;  %v5890_v26 = vor.u32 %v8716_v19, %v5889_v18  ;;  %v8744_v18 = vld [vmem:[#allocation6 + $0x14c] sm:$0xf] }
  0xc5   :  { %7416 = vmatmul.msk.bf16.vlgmr.msrb.gmra.mxu0 %vm2535_vm0, %v9772_v46  ;;  %v8780_v21 = vld [vmem:[#allocation6 + $0x264] sm:$0xf0]  ;;  %v6019_v19 = vld [vmem:[#allocation6 + $0x168] sm:$0xf0] }
  0xc6   :  { %2762 = vmatpush.bf16.msra.mxu2 %v6786_v47  ;;  %2737 = vmatpush.bf16.msrb.mxu3 %v6242_v54  ;;  %v6401_v24 = vld [vmem:[#allocation6 + $0x448] sm:$0xf]  ;;  %v6146_v30 = vor.u32 %v8780_v21, %v6145_v20 }
  0xc7   :  { %v8844_v25 = vld [vmem:[#allocation6 + $0x464] sm:$0xf0] }
  0xc8   :  { %2750 = vmatpush.bf16.msra.mxu0 %v6498_v61  ;;  %2725 = vmatpush.bf16.msrb.mxu1 %v5954_v0  ;;  %v6657_v27 = vld [vmem:[#allocation6 + $0x648] sm:$0xf]  ;;  %v6402_v39 = vor.u32 %v8844_v25, %v6401_v24  ;;  %v6086_v0 = vor.u32 %v8760_v48, %v6083_v51 }
  0xc9   :  { %v8908_v28 = vld [vmem:[#allocation6 + $0x664] sm:$0xf0] }
  0xca   :  { %2763 = vmatpush.bf16.msra.mxu2 %v6754_v62  ;;  %2738 = vmatpush.bf16.msrb.mxu3 %v6210_v4  ;;  %v5857_v29 = vld [vmem:[#allocation6 + $0x8] sm:$0xf]  ;;  %v6658_v40 = vor.u32 %v8908_v28, %v6657_v27  ;;  %v8808_v27 = vld [vmem:[#allocation6 + $0x34c] sm:$0xf] }
  0xcb   :  { %v8708_v32 = vld [vmem:[#allocation6 + $0x24] sm:$0xf0]  ;;  %v6275_v28 = vld [vmem:[#allocation6 + $0x368] sm:$0xf0] }
  0xcc   :  { %2751 = vmatpush.bf16.msra.mxu0 %v6466_v10  ;;  %2726 = vmatpush.bf16.msrb.mxu1 %v5922_v13  ;;  %v6113_v33 = vld [vmem:[#allocation6 + $0x208] sm:$0xf]  ;;  %v5858_v44 = vor.u32 %v8708_v32, %v5857_v29  ;;  %v5987_v32 = vld [vmem:[#allocation6 + $0x128] sm:$0xf0] }
  0xcd   :  { %v8772_v34 = vld [vmem:[#allocation6 + $0x224] sm:$0xf0] }
  0xce   :  { %2764 = vmatpush.bf16.msra.mxu2 %v6722_v11  ;;  %2739 = vmatpush.bf16.msrb.mxu3 %v6178_v17  ;;  %v7105_v35 = vld [vmem:[#allocation6 + $0x9c8] sm:$0xf]  ;;  %v6114_v49 = vor.u32 %v8772_v34, %v6113_v33  ;;  %v6342_v11 = vor.u32 %v8824_v2, %v6339_v3 }
  0xcf   :  { %v9020_v37 = vld [vmem:[#allocation6 + $0x9e4] sm:$0xf0] }
  0xd0   :  { %v7361_v38 = vld [vmem:[#allocation6 + $0xbc8] sm:$0xf]  ;;  %2752 = vmatpush.bf16.msra.mxu0 %v6434_v22  ;;  %2727 = vmatpush.bf16.msrb.mxu1 %v5890_v26  ;;  %v7106_v50 = vor.u32 %v9020_v37, %v7105_v35  ;;  %v6022_v26 = vor.u32 %v8744_v18, %v6019_v19  ;;  %v6278_v37 = vor.u32 %v8808_v27, %v6275_v28  ;;  %v6595_v18 = vld [vmem:[#allocation6 + $0x5e8] sm:$0xf0] }
  0xd1   :  { %v9084_v41 = vld [vmem:[#allocation6 + $0xbe4] sm:$0xf0]  ;;  %v8952_v19 = vld [vmem:[#allocation6 + $0x7cc] sm:$0xf] }
  0xd2   :  { %2765 = vmatpush.bf16.msra.mxu2 %v6690_v23  ;;  %v6369_v42 = vld [vmem:[#allocation6 + $0x408] sm:$0xf]  ;;  %2740 = vmatpush.bf16.msrb.mxu3 %v6146_v30  ;;  %v7362_v55 = vor.u32 %v9084_v41, %v7361_v38  ;;  %v6310_v23 = vor.u32 %v8816_v15, %v6307_v16  ;;  %v8736_v30 = vld [vmem:[#allocation6 + $0x10c] sm:$0xf]  ;;  %v6182_v16 = vor.u32 %v8784_v5, %v6179_v6 }
  0xd3   :  { %v8836_v43 = vld [vmem:[#allocation6 + $0x424] sm:$0xf0]  ;;  %v8800_v41 = vld [vmem:[#allocation6 + $0x30c] sm:$0xf] }
  0xd4   :  { %v6625_v45 = vld [vmem:[#allocation6 + $0x608] sm:$0xf]  ;;  %2753 = vmatpush.bf16.msra.mxu0 %v6402_v39  ;;  %v6370_v60 = vor.u32 %v8836_v43, %v6369_v42  ;;  %2728 = vmatpush.bf16.msrb.mxu1 %v5858_v44  ;;  %v6243_v42 = vld [vmem:[#allocation6 + $0x328] sm:$0xf0] }
  0xd5   :  { %v8900_v47 = vld [vmem:[#allocation6 + $0x624] sm:$0xf0]  ;;  %v8728_v44 = vld [vmem:[#allocation6 + $0xcc] sm:$0xf] }
  0xd6   :  { %v7393_v53 = vld [vmem:[#allocation6 + $0xc08] sm:$0xf]  ;;  %2766 = vmatpush.bf16.msra.mxu2 %v6658_v40  ;;  %v6626_v61 = vor.u32 %v8900_v47, %v6625_v45  ;;  %2741 = vmatpush.bf16.msrb.mxu3 %v6114_v49  ;;  %v5990_v40 = vor.u32 %v8736_v30, %v5987_v32  ;;  %v5955_v45 = vld [vmem:[#allocation6 + $0xe8] sm:$0xf0] }
  0xd7   :  { %v9092_v54 = vld [vmem:[#allocation6 + $0xc24] sm:$0xf0]  ;;  %2729 = vmatmul.bf16.vlgmr.msrb.gmra.mxu1 %v9762_v56  ;;  %v7107_v30 = vld [vmem:[#allocation6 + $0x9e8] sm:$0xf0] }
  0xd8   :  { %v7073_v57 = vld [vmem:[#allocation6 + $0x988] sm:$0xf]  ;;  %v7394_v1 = vor.u32 %v9092_v54, %v7393_v53  ;;  %2773 = vmatpush.bf16.msra.mxu1 %v7106_v50  ;;  %2754 = vmatpush.bf16.msra.mxu0 %v6370_v60  ;;  %v6246_v50 = vor.u32 %v8800_v41, %v6243_v42  ;;  %v5958_v54 = vor.u32 %v8728_v44, %v5955_v45  ;;  %v8720_v60 = vld [vmem:[#allocation6 + $0x8c] sm:$0xf] }
  0xd9   :  { %v9012_v59 = vld [vmem:[#allocation6 + $0x9a4] sm:$0xf0]  ;;  %2742 = vmatmul.bf16.vlgmr.msrb.gmra.mxu3 %v9768_v8  ;;  %v6115_v41 = vld [vmem:[#allocation6 + $0x228] sm:$0xf0] }
  0xda   :  { %v7329_v62 = vld [vmem:[#allocation6 + $0xb88] sm:$0xf]  ;;  %v7074_v4 = vor.u32 %v9012_v59, %v7073_v57  ;;  %2786 = vmatpush.bf16.msra.mxu3 %v7362_v55  ;;  %2767 = vmatpush.bf16.msra.mxu2 %v6626_v61  ;;  %v8792_v55 = vld [vmem:[#allocation6 + $0x2cc] sm:$0xf] }
  0xdb   :  { %v9076_v63 = vld [vmem:[#allocation6 + $0xba4] sm:$0xf0]  ;;  %2755 = vmatmul.bf16.vlgmr.msra.gmra.mxu0 %v9760_v52  ;;  %v6211_v57 = vld [vmem:[#allocation6 + $0x2e8] sm:$0xf0] }
  0xdc   :  { %v7330_v7 = vor.u32 %v9076_v63, %v7329_v62  ;;  %v7041_v9 = vld [vmem:[#allocation6 + $0x948] sm:$0xf]  ;;  %2806 = vmatpush.bf16.msrb.mxu0 %v7394_v1  ;;  %2774 = vmatpush.bf16.msra.mxu1 %v7074_v4  ;;  %v5923_v61 = vld [vmem:[#allocation6 + $0xa8] sm:$0xf0]  ;;  %v6214_v1 = vor.u32 %v8792_v55, %v6211_v57 }
  0xdd   :  { %v9004_v10 = vld [vmem:[#allocation6 + $0x964] sm:$0xf0]  ;;  %2768 = vmatmul.bf16.vlgmr.msra.gmra.mxu2 %v9764_v58  ;;  %v5926_v4 = vor.u32 %v8720_v60, %v5923_v61  ;;  %v7363_v44 = vld [vmem:[#allocation6 + $0xbe8] sm:$0xf0] }
  0xde   :  { %v7297_v12 = vld [vmem:[#allocation6 + $0xb48] sm:$0xf]  ;;  %2812 = vmatpush.bf16.msrb.mxu2 %v6086_v0  ;;  %v7042_v17 = vor.u32 %v9004_v10, %v7041_v9  ;;  %2787 = vmatpush.bf16.msra.mxu3 %v7330_v7  ;;  %v8712_v9 = vld [vmem:[#allocation6 + $0x4c] sm:$0xf] }
  0xdf   :  { %v9068_v13 = vld [vmem:[#allocation6 + $0xb64] sm:$0xf0]  ;;  %v5891_v10 = vld [vmem:[#allocation6 + $0x68] sm:$0xf0] }
  0xe0   :  { %v7298_v20 = vor.u32 %v9068_v13, %v7297_v12  ;;  %v7009_v21 = vld [vmem:[#allocation6 + $0x908] sm:$0xf]  ;;  %2825 = vmatpush.bf16.msra.mxu0 %v6342_v11  ;;  %2775 = vmatpush.bf16.msra.mxu1 %v7042_v17  ;;  %v8888_v17 = vld [vmem:[#allocation6 + $0x5cc] sm:$0xf] }
  0xe1   :  { %v8996_v22 = vld [vmem:[#allocation6 + $0x924] sm:$0xf0]  ;;  %v6598_v28 = vor.u32 %v8888_v17, %v6595_v18  ;;  %v8936_v55 = vld [vmem:[#allocation6 + $0x74c] sm:$0xf] }
  0xe2   :  { %v7265_v24 = vld [vmem:[#allocation6 + $0xb08] sm:$0xf]  ;;  %2813 = vmatpush.bf16.msrb.mxu2 %v6054_v14  ;;  %v7010_v29 = vor.u32 %v8996_v22, %v7009_v21  ;;  %2788 = vmatpush.bf16.msra.mxu3 %v7298_v20  ;;  %v5894_v20 = vor.u32 %v8712_v9, %v5891_v10  ;;  %v6851_v21 = vld [vmem:[#allocation6 + $0x7e8] sm:$0xf0] }
  0xe3   :  { %v9060_v25 = vld [vmem:[#allocation6 + $0xb24] sm:$0xf0]  ;;  %v8776_v22 = vld [vmem:[#allocation6 + $0x24c] sm:$0xf]  ;;  %v6854_v32 = vor.u32 %v8952_v19, %v6851_v21 }
  0xe4   :  { %v7266_v33 = vor.u32 %v9060_v25, %v7265_v24  ;;  %v6977_v34 = vld [vmem:[#allocation6 + $0x8c8] sm:$0xf]  ;;  %2826 = vmatpush.bf16.msra.mxu0 %v6310_v23  ;;  %2776 = vmatpush.bf16.msra.mxu1 %v7010_v29  ;;  %v6147_v23 = vld [vmem:[#allocation6 + $0x268] sm:$0xf0] }
  0xe5   :  { %v8988_v35 = vld [vmem:[#allocation6 + $0x8e4] sm:$0xf0]  ;;  %v8704_v25 = vld [vmem:[#allocation6 + $0xc] sm:$0xf] }
  0xe6   :  { %v7233_v38 = vld [vmem:[#allocation6 + $0xac8] sm:$0xf]  ;;  %2814 = vmatpush.bf16.msrb.mxu2 %v6022_v26  ;;  %v6978_v43 = vor.u32 %v8988_v35, %v6977_v34  ;;  %2789 = vmatpush.bf16.msra.mxu3 %v7266_v33  ;;  %v5859_v26 = vld [vmem:[#allocation6 + $0x28] sm:$0xf0]  ;;  %v6150_v33 = vor.u32 %v8776_v22, %v6147_v23  ;;  %v2548_v22 = vpop.f32.mrf.mxu0 }
  0xe7   :  { %v9052_v39 = vld [vmem:[#allocation6 + $0xae4] sm:$0xf0]  ;;  %v9016_v29 = vld [vmem:[#allocation6 + $0x9cc] sm:$0xf] }
  0xe8   :  { %v7234_v47 = vor.u32 %v9052_v39, %v7233_v38  ;;  %v6945_v48 = vld [vmem:[#allocation6 + $0x888] sm:$0xf]  ;;  %2827 = vmatpush.bf16.msra.mxu0 %v6278_v37  ;;  %2777 = vmatpush.bf16.msra.mxu1 %v6978_v43  ;;  %v8880_v34 = vld [vmem:[#allocation6 + $0x58c] sm:$0xf]  ;;  %v5862_v38 = vor.u32 %v8704_v25, %v5859_v26  ;;  %v7110_v42 = vor.u32 %v9016_v29, %v7107_v30 }
  0xe9   :  { %v8980_v49 = vld [vmem:[#allocation6 + $0x8a4] sm:$0xf0]  ;;  %v6563_v35 = vld [vmem:[#allocation6 + $0x5a8] sm:$0xf0] }
  0xea   :  { %v7201_v51 = vld [vmem:[#allocation6 + $0xa88] sm:$0xf]  ;;  %2815 = vmatpush.bf16.msrb.mxu2 %v5990_v40  ;;  %v6946_v59 = vor.u32 %v8980_v49, %v6945_v48  ;;  %2790 = vmatpush.bf16.msra.mxu3 %v7234_v47  ;;  %v8944_v37 = vld [vmem:[#allocation6 + $0x78c] sm:$0xf]  ;;  %v6566_v45 = vor.u32 %v8880_v34, %v6563_v35  ;;  %v2561_v35 = vpop.f32.mrf.mxu1 }
  0xeb   :  { %v9044_v53 = vld [vmem:[#allocation6 + $0xaa4] sm:$0xf0]  ;;  %7417 = vmatmul.msk.bf16.vlgmr.msrb.gmra.mxu0 %vm2535_vm0, %v9772_v46  ;;  %v6819_v39 = vld [vmem:[#allocation6 + $0x7a8] sm:$0xf0] }
  0xec   :  { %v7202_v62 = vor.u32 %v9044_v53, %v7201_v51  ;;  %v6913_v63 = vld [vmem:[#allocation6 + $0x848] sm:$0xf]  ;;  %2828 = vmatpush.bf16.msra.mxu0 %v6246_v50  ;;  %2778 = vmatpush.bf16.msra.mxu1 %v6946_v59  ;;  %v8768_v40 = vld [vmem:[#allocation6 + $0x20c] sm:$0xf]  ;;  %v6822_v49 = vor.u32 %v8944_v37, %v6819_v39 }
  0xed   :  { %v8972_v0 = vld [vmem:[#allocation6 + $0x864] sm:$0xf0]  ;;  %v9080_v43 = vld [vmem:[#allocation6 + $0xbcc] sm:$0xf]  ;;  %v6118_v50 = vor.u32 %v8768_v40, %v6115_v41 }
  0xee   :  { %v7169_v2 = vld [vmem:[#allocation6 + $0xa48] sm:$0xf]  ;;  %2816 = vmatpush.bf16.msrb.mxu2 %v5958_v54  ;;  %v6914_v7 = vor.u32 %v8972_v0, %v6913_v63  ;;  %2791 = vmatpush.bf16.msra.mxu3 %v7202_v62  ;;  %v9008_v47 = vld [vmem:[#allocation6 + $0x98c] sm:$0xf]  ;;  %v7366_v54 = vor.u32 %v9080_v43, %v7363_v44  ;;  %v2574_v43 = vpop.f32.mrf.mxu2 }
  0xef   :  { %v9036_v3 = vld [vmem:[#allocation6 + $0xa64] sm:$0xf0]  ;;  %v7075_v48 = vld [vmem:[#allocation6 + $0x9a8] sm:$0xf0] }
  0xf0   :  { %v6881_v11 = vld [vmem:[#allocation6 + $0x808] sm:$0xf]  ;;  %v7170_v12 = vor.u32 %v9036_v3, %v7169_v2  ;;  %2829 = vmatpush.bf16.msra.mxu0 %v6214_v1  ;;  %2779 = vmatpush.bf16.msra.mxu1 %v6914_v7  ;;  %v8872_v51 = vld [vmem:[#allocation6 + $0x54c] sm:$0xf]  ;;  %v7078_v59 = vor.u32 %v9008_v47, %v7075_v48  ;;  %v9798_v1 = vld [vmem:[#allocation8] sm:$0xff] }
  0xf1   :  { %v8964_v13 = vld [vmem:[#allocation6 + $0x824] sm:$0xf0]  ;;  %v6531_v53 = vld [vmem:[#allocation6 + $0x568] sm:$0xf0] }
  0xf2   :  { %v7137_v14 = vld [vmem:[#allocation6 + $0xa08] sm:$0xf]  ;;  %2817 = vmatpush.bf16.msrb.mxu2 %v5926_v4  ;;  %v6882_v24 = vor.u32 %v8964_v13, %v6881_v11  ;;  %2792 = vmatpush.bf16.msra.mxu3 %v7170_v12  ;;  %v6787_v57 = vld [vmem:[#allocation6 + $0x768] sm:$0xf0]  ;;  %v6534_v62 = vor.u32 %v8872_v51, %v6531_v53  ;;  %v559_v12 = vperm.slane %v9798_v1, 0 }
  0xf3   :  { %v9028_v15 = vld [vmem:[#allocation6 + $0xa24] sm:$0xf0]  ;;  %v9072_v60 = vld [vmem:[#allocation6 + $0xb8c] sm:$0xf]  ;;  %v6790_v2 = vor.u32 %v8936_v55, %v6787_v57 }
  0xf4   :  { %v7138_v27 = vor.u32 %v9028_v15, %v7137_v14  ;;  %2830 = vmatpush.bf16.msra.mxu0 %v6182_v16  ;;  %2780 = vmatpush.bf16.msra.mxu1 %v6882_v24  ;;  %v7331_v61 = vld [vmem:[#allocation6 + $0xba8] sm:$0xf0]  ;;  %v2549_v24 = vadd.f32 %v2548_v22, %v559_v12 }
  0xf5   :  { %v9000_v63 = vld [vmem:[#allocation6 + $0x94c] sm:$0xf]  ;;  %v7334_v5 = vor.u32 %v9072_v60, %v7331_v61 }
  0xf6   :  { %2818 = vmatpush.bf16.msrb.mxu2 %v5894_v20  ;;  %2793 = vmatpush.bf16.msra.mxu3 %v7138_v27  ;;  %v7043_v0 = vld [vmem:[#allocation6 + $0x968] sm:$0xf0]  ;;  %v2562_v39 = vadd.f32 %v2561_v35, %v2549_v24  ;;  %v8757_v35 = vld [vmem:[#allocation6 + $0x1ac] sm:$0xf0] }
  0xf7   :  { %2781 = vmatmul.bf16.vlgmr.msra.gmra.mxu1 %v9776_v31  ;;  %v8864_v3 = vld [vmem:[#allocation6 + $0x50c] sm:$0xf]  ;;  %v7046_v9 = vor.u32 %v9000_v63, %v7043_v0 }
  0xf8   :  { %2838 = vmatpush.bf16.msrb.mxu1 %v6598_v28  ;;  %2831 = vmatpush.bf16.msra.mxu0 %v6150_v33  ;;  %v6499_v4 = vld [vmem:[#allocation6 + $0x528] sm:$0xf0] }
  0xf9   :  { %2794 = vmatmul.bf16.vlgmr.msra.gmra.mxu3 %v9778_v36  ;;  %v8928_v6 = vld [vmem:[#allocation6 + $0x70c] sm:$0xf]  ;;  %v6502_v13 = vor.u32 %v8864_v3, %v6499_v4 }
  0xfa   :  { %2851 = vmatpush.bf16.msrb.mxu3 %v6854_v32  ;;  %2819 = vmatpush.bf16.msrb.mxu2 %v5862_v38  ;;  %v6755_v7 = vld [vmem:[#allocation6 + $0x728] sm:$0xf0] }
  0xfb   :  { %v9064_v10 = vld [vmem:[#allocation6 + $0xb4c] sm:$0xf]  ;;  %v6758_v16 = vor.u32 %v8928_v6, %v6755_v7 }
  0xfc   :  { %2839 = vmatpush.bf16.msrb.mxu1 %v6566_v45  ;;  %2832 = vmatpush.bf16.msra.mxu0 %v6118_v50  ;;  %v7299_v11 = vld [vmem:[#allocation6 + $0xb68] sm:$0xf0]  ;;  %v2587_v50 = vpop.f32.mrf.mxu3 }
  0xfd   :  { %2820 = vmatmul.bf16.vlgmr.msrb.gmra.mxu2 %v9762_v56  ;;  %v8992_v14 = vld [vmem:[#allocation6 + $0x90c] sm:$0xf]  ;;  %v7302_v19 = vor.u32 %v9064_v10, %v7299_v11  ;;  %v6089_v11 = vld [vmem:[#allocation6 + $0x1d0] sm:$0xf] }
  0xfe   :  { %2864 = vmatpush.bf16.msra.mxu2 %v7110_v42  ;;  %2852 = vmatpush.bf16.msrb.mxu3 %v6822_v49  ;;  %v7011_v15 = vld [vmem:[#allocation6 + $0x928] sm:$0xf0]  ;;  %v2575_v49 = vadd.f32 %v2574_v43, %v2562_v39  ;;  %v6313_v43 = vld [vmem:[#allocation6 + $0x390] sm:$0xf] }
  0xff   :  { %2833 = vmatmul.bf16.vlgmr.msra.gmra.mxu0 %v9768_v8  ;;  %v8856_v17 = vld [vmem:[#allocation6 + $0x4cc] sm:$0xf]  ;;  %v7014_v23 = vor.u32 %v8992_v14, %v7011_v15  ;;  %v2563_v14 = vpop.f32.mrf.mxu1 }
 0x100   :  { %2877 = vmatpush.bf16.msrb.mxu0 %v7366_v54  ;;  %2840 = vmatpush.bf16.msrb.mxu1 %v6534_v62  ;;  %v6467_v18 = vld [vmem:[#allocation6 + $0x4e8] sm:$0xf0]  ;;  %v9803_v60 = vadd.f32 %v2587_v50, %v2575_v49  ;;  %v6025_v50 = vld [vmem:[#allocation6 + $0x150] sm:$0xf] }
 0x101   :  { %v8920_v20 = vld [vmem:[#allocation6 + $0x6cc] sm:$0xf]  ;;  %v6470_v27 = vor.u32 %v8856_v17, %v6467_v18 }
 0x102   :  { %2865 = vmatpush.bf16.msra.mxu2 %v7078_v59  ;;  %2853 = vmatpush.bf16.msrb.mxu3 %v6790_v2  ;;  %v6723_v21 = vld [vmem:[#allocation6 + $0x6e8] sm:$0xf0]  ;;  %v2550_v59 = vpop.f32.mrf.mxu0 }
 0x103   :  { %v9056_v25 = vld [vmem:[#allocation6 + $0xb0c] sm:$0xf]  ;;  %v6726_v30 = vor.u32 %v8920_v20, %v6723_v21 }
 0x104   :  { %2878 = vmatpush.bf16.msrb.mxu0 %v7334_v5  ;;  %v7267_v26 = vld [vmem:[#allocation6 + $0xb28] sm:$0xf0]  ;;  %2841 = vmatpush.bf16.msrb.mxu1 %v6502_v13 }
 0x105   :  { %v8984_v28 = vld [vmem:[#allocation6 + $0x8cc] sm:$0xf]  ;;  %v7270_v34 = vor.u32 %v9056_v25, %v7267_v26  ;;  %v6345_v25 = vld [vmem:[#allocation6 + $0x3d0] sm:$0xf] }
 0x106   :  { %2866 = vmatpush.bf16.msra.mxu2 %v7046_v9  ;;  %v6979_v29 = vld [vmem:[#allocation6 + $0x8e8] sm:$0xf0]  ;;  %2854 = vmatpush.bf16.msrb.mxu3 %v6758_v16  ;;  %v8765_v16 = vld [vmem:[#allocation6 + $0x1ec] sm:$0xf0] }
 0x107   :  { %v8848_v32 = vld [vmem:[#allocation6 + $0x48c] sm:$0xf]  ;;  %v6982_v40 = vor.u32 %v8984_v28, %v6979_v29  ;;  %v8829_v26 = vld [vmem:[#allocation6 + $0x3ec] sm:$0xf0]  ;;  %v6090_v28 = vor.u32 %v8765_v16, %v6089_v11 }
 0x108   :  { %v6435_v33 = vld [vmem:[#allocation6 + $0x4a8] sm:$0xf0]  ;;  %2879 = vmatpush.bf16.msrb.mxu0 %v7302_v19  ;;  %2842 = vmatpush.bf16.msrb.mxu1 %v6470_v27  ;;  %v2576_v19 = vpop.f32.mrf.mxu2  ;;  %v2589_v27 = vpop.f32.mrf.mxu3  ;;  %v8941_v11 = vld [vmem:[#allocation6 + $0x76c] sm:$0xf0] }
 0x109   :  { %v8912_v37 = vld [vmem:[#allocation6 + $0x68c] sm:$0xf]  ;;  %v6438_v44 = vor.u32 %v8848_v32, %v6435_v33  ;;  %v8893_v32 = vld [vmem:[#allocation6 + $0x5ec] sm:$0xf0] }
 0x10a   :  { %v6691_v38 = vld [vmem:[#allocation6 + $0x6a8] sm:$0xf0]  ;;  %2867 = vmatpush.bf16.msra.mxu2 %v7014_v23  ;;  %2855 = vmatpush.bf16.msrb.mxu3 %v6726_v30  ;;  %v6601_v30 = vld [vmem:[#allocation6 + $0x5d0] sm:$0xf] }
 0x10b   :  { %v9048_v41 = vld [vmem:[#allocation6 + $0xacc] sm:$0xf]  ;;  %v6694_v48 = vor.u32 %v8912_v37, %v6691_v38  ;;  %v6346_v37 = vor.u32 %v8829_v26, %v6345_v25  ;;  %v8869_v16 = vld [vmem:[#allocation6 + $0x52c] sm:$0xf0] }
 0x10c   :  { %v7235_v42 = vld [vmem:[#allocation6 + $0xae8] sm:$0xf0]  ;;  %2880 = vmatpush.bf16.msrb.mxu0 %v7270_v34  ;;  %2843 = vmatpush.bf16.msrb.mxu1 %v6438_v44  ;;  %v6057_v34 = vld [vmem:[#allocation6 + $0x190] sm:$0xf] }
 0x10d   :  { %v8976_v45 = vld [vmem:[#allocation6 + $0x88c] sm:$0xf]  ;;  %v7238_v54 = vor.u32 %v9048_v41, %v7235_v42  ;;  %v6602_v41 = vor.u32 %v8893_v32, %v6601_v30  ;;  %v8957_v42 = vld [vmem:[#allocation6 + $0x7ec] sm:$0xf0] }
 0x10e   :  { %v6947_v47 = vld [vmem:[#allocation6 + $0x8a8] sm:$0xf0]  ;;  %2868 = vmatpush.bf16.msra.mxu2 %v6982_v40  ;;  %2856 = vmatpush.bf16.msrb.mxu3 %v6694_v48  ;;  %v6857_v40 = vld [vmem:[#allocation6 + $0x7d0] sm:$0xf] }
 0x10f   :  { %v8840_v51 = vld [vmem:[#allocation6 + $0x44c] sm:$0xf]  ;;  %v6950_v61 = vor.u32 %v8976_v45, %v6947_v47  ;;  %v8821_v44 = vld [vmem:[#allocation6 + $0x3ac] sm:$0xf0]  ;;  %v6058_v45 = vor.u32 %v8757_v35, %v6057_v34 }
 0x110   :  { %v6403_v53 = vld [vmem:[#allocation6 + $0x468] sm:$0xf0]  ;;  %2881 = vmatpush.bf16.msrb.mxu0 %v7238_v54  ;;  %v6569_v47 = vld [vmem:[#allocation6 + $0x590] sm:$0xf]  ;;  %v6314_v54 = vor.u32 %v8821_v44, %v6313_v43 }
 0x111   :  { %v8904_v55 = vld [vmem:[#allocation6 + $0x64c] sm:$0xf]  ;;  %v6406_v0 = vor.u32 %v8840_v51, %v6403_v53  ;;  %v8885_v48 = vld [vmem:[#allocation6 + $0x5ac] sm:$0xf0]  ;;  %v6858_v53 = vor.u32 %v8957_v42, %v6857_v40 }
 0x112   :  { %v6659_v57 = vld [vmem:[#allocation6 + $0x668] sm:$0xf0]  ;;  %2869 = vmatpush.bf16.msra.mxu2 %v6950_v61  ;;  %v8749_v51 = vld [vmem:[#allocation6 + $0x16c] sm:$0xf0]  ;;  %v6570_v59 = vor.u32 %v8885_v48, %v6569_v47 }
 0x113   :  { %v9040_v62 = vld [vmem:[#allocation6 + $0xa8c] sm:$0xf]  ;;  %v6662_v5 = vor.u32 %v8904_v55, %v6659_v57  ;;  %2844 = vmatpush.bf16.msrb.mxu1 %v6406_v0  ;;  %v6825_v55 = vld [vmem:[#allocation6 + $0x790] sm:$0xf]  ;;  %v2626_v57 = vpop.f32.mrf.mxu2  ;;  %v6026_v0 = vor.u32 %v8749_v51, %v6025_v50 }
 0x114   :  { %v7203_v63 = vld [vmem:[#allocation6 + $0xaa8] sm:$0xf0]  ;;  %v8949_v61 = vld [vmem:[#allocation6 + $0x7ac] sm:$0xf0] }
 0x115   :  { %v8968_v2 = vld [vmem:[#allocation6 + $0x84c] sm:$0xf]  ;;  %v7206_v10 = vor.u32 %v9040_v62, %v7203_v63  ;;  %2857 = vmatpush.bf16.msrb.mxu3 %v6662_v5  ;;  %v6281_v62 = vld [vmem:[#allocation6 + $0x350] sm:$0xf] }
 0x116   :  { %v6915_v3 = vld [vmem:[#allocation6 + $0x868] sm:$0xf0]  ;;  %v8813_v63 = vld [vmem:[#allocation6 + $0x36c] sm:$0xf0] }
 0x117   :  { %v8832_v4 = vld [vmem:[#allocation6 + $0x40c] sm:$0xf]  ;;  %v6918_v15 = vor.u32 %v8968_v2, %v6915_v3  ;;  %2882 = vmatpush.bf16.msrb.mxu0 %v7206_v10  ;;  %v6537_v2 = vld [vmem:[#allocation6 + $0x550] sm:$0xf] }
 0x118   :  { %v6371_v6 = vld [vmem:[#allocation6 + $0x428] sm:$0xf0]  ;;  %v8877_v3 = vld [vmem:[#allocation6 + $0x56c] sm:$0xf0] }
 0x119   :  { %v8896_v7 = vld [vmem:[#allocation6 + $0x60c] sm:$0xf]  ;;  %v6374_v20 = vor.u32 %v8832_v4, %v6371_v6  ;;  %2870 = vmatpush.bf16.msra.mxu2 %v6918_v15  ;;  %v5993_v4 = vld [vmem:[#allocation6 + $0x110] sm:$0xf]  ;;  %v6826_v6 = vor.u32 %v8949_v61, %v6825_v55  ;;  %v6538_v10 = vor.u32 %v8877_v3, %v6537_v2 }
 0x11a   :  { %v6627_v9 = vld [vmem:[#allocation6 + $0x628] sm:$0xf0]  ;;  %v8741_v5 = vld [vmem:[#allocation6 + $0x12c] sm:$0xf0] }
 0x11b   :  { %v9088_v12 = vld [vmem:[#allocation6 + $0xc0c] sm:$0xf]  ;;  %v6630_v23 = vor.u32 %v8896_v7, %v6627_v9  ;;  %2845 = vmatpush.bf16.msrb.mxu1 %v6374_v20  ;;  %v6282_v7 = vor.u32 %v8813_v63, %v6281_v62  ;;  %v6793_v9 = vld [vmem:[#allocation6 + $0x750] sm:$0xf]  ;;  %v5994_v14 = vor.u32 %v8741_v5, %v5993_v4  ;;  %v2628_v25 = vpop.f32.mrf.mxu2 }
 0x11c   :  { %v7395_v13 = vld [vmem:[#allocation6 + $0xc28] sm:$0xf0]  ;;  %v6505_v15 = vld [vmem:[#allocation6 + $0x510] sm:$0xf] }
 0x11d   :  { %v9032_v17 = vld [vmem:[#allocation6 + $0xa4c] sm:$0xf]  ;;  %v7398_v24 = vor.u32 %v9088_v12, %v7395_v13  ;;  %2858 = vmatpush.bf16.msrb.mxu3 %v6630_v23  ;;  %v6249_v12 = vld [vmem:[#allocation6 + $0x310] sm:$0xf]  ;;  %v6506_v26 = vor.u32 %v8869_v16, %v6505_v15 }
 0x11e   :  { %v7171_v18 = vld [vmem:[#allocation6 + $0xa68] sm:$0xf0]  ;;  %2846 = vmatmul.bf16.vlgmr.msrb.gmra.mxu1 %v9760_v52  ;;  %v8805_v13 = vld [vmem:[#allocation6 + $0x32c] sm:$0xf0] }
 0x11f   :  { %v8960_v21 = vld [vmem:[#allocation6 + $0x80c] sm:$0xf]  ;;  %v7174_v29 = vor.u32 %v9032_v17, %v7171_v18  ;;  %2897 = vmatpush.bf16.msra.mxu1 %v7398_v24  ;;  %v2600_v17 = vpop.f32.mrf.mxu0  ;;  %v5961_v18 = vld [vmem:[#allocation6 + $0xd0] sm:$0xf]  ;;  %v6250_v23 = vor.u32 %v8805_v13, %v6249_v12 }
 0x120   :  { %v6883_v22 = vld [vmem:[#allocation6 + $0x828] sm:$0xf0]  ;;  %2859 = vmatmul.bf16.vlgmr.msrb.gmra.mxu3 %v9764_v58  ;;  %v8733_v19 = vld [vmem:[#allocation6 + $0xec] sm:$0xf0]  ;;  %v2601_v20 = vadd.f32 %v2600_v17, %v9803_v60 }
 0x121   :  { %v6886_v33 = vor.u32 %v8960_v21, %v6883_v22  ;;  %v9024_v38 = vld [vmem:[#allocation6 + $0xa0c] sm:$0xf]  ;;  %2903 = vmatpush.bf16.msra.mxu3 %v6090_v28  ;;  %2883 = vmatpush.bf16.msrb.mxu0 %v7174_v29  ;;  %v2613_v21 = vpop.f32.mrf.mxu1  ;;  %v6794_v22 = vor.u32 %v8941_v11, %v6793_v9  ;;  %v6761_v24 = vld [vmem:[#allocation6 + $0x710] sm:$0xf]  ;;  %v5962_v32 = vor.u32 %v8733_v19, %v5961_v18 }
 0x122   :  { %v7139_v39 = vld [vmem:[#allocation6 + $0xa28] sm:$0xf0]  ;;  %v8933_v27 = vld [vmem:[#allocation6 + $0x72c] sm:$0xf0]  ;;  %v2614_v30 = vadd.f32 %v2613_v21, %v2601_v20 }
 0x123   :  { %2871 = vmatpush.bf16.msra.mxu2 %v6886_v33  ;;  %v7142_v49 = vor.u32 %v9024_v38, %v7139_v39  ;;  %2916 = vmatpush.bf16.msrb.mxu1 %v6346_v37  ;;  %v6217_v28 = vld [vmem:[#allocation6 + $0x2d0] sm:$0xf]  ;;  %v6762_v60 = vor.u32 %v8933_v27, %v6761_v24  ;;  %v2652_v4 = vpop.f32.mrf.mxu2 }
 0x124   :  { %v8797_v29 = vld [vmem:[#allocation6 + $0x2ec] sm:$0xf0]  ;;  %v9810_v38 = vadd.f32 %v2626_v57, %v2614_v30 }
 0x125   :  { %2904 = vmatpush.bf16.msra.mxu3 %v6058_v45  ;;  %2884 = vmatpush.bf16.msrb.mxu0 %v7142_v49  ;;  %v6473_v33 = vld [vmem:[#allocation6 + $0x4d0] sm:$0xf]  ;;  %v6218_v39 = vor.u32 %v8797_v29, %v6217_v28 }
 0x126   :  { %2872 = vmatmul.bf16.vlgmr.msra.gmra.mxu2 %v9776_v31  ;;  %v8861_v34 = vld [vmem:[#allocation6 + $0x4ec] sm:$0xf0] }
 0x127   :  { %2929 = vmatpush.bf16.msrb.mxu2 %v6602_v41  ;;  %2917 = vmatpush.bf16.msrb.mxu1 %v6314_v54  ;;  %v5929_v35 = vld [vmem:[#allocation6 + $0x90] sm:$0xf]  ;;  %v560_v41 = vperm.slane %v9798_v1, 1  ;;  %v6474_v42 = vor.u32 %v8861_v34, %v6473_v33  ;;  %v2639_v54 = vpop.f32.mrf.mxu3 }
 0x128   :  { %2885 = vmatmul.bf16.vlgmr.msrb.gmra.mxu0 %v9778_v36  ;;  %v8725_v37 = vld [vmem:[#allocation6 + $0xac] sm:$0xf0] }
 0x129   :  { %2942 = vmatpush.bf16.msra.mxu0 %v6858_v53  ;;  %2905 = vmatpush.bf16.msra.mxu3 %v6026_v0  ;;  %v6729_v40 = vld [vmem:[#allocation6 + $0x6d0] sm:$0xf]  ;;  %v5930_v47 = vor.u32 %v8725_v37, %v5929_v35  ;;  %v2602_v53 = vpop.f32.mrf.mxu0  ;;  %v2640_v61 = vadd.f32 %v2639_v54, %v560_v41  ;;  %v2615_v62 = vpop.f32.mrf.mxu1 }
 0x12a   :  { %v8925_v43 = vld [vmem:[#allocation6 + $0x6ec] sm:$0xf0]  ;;  %v8817_v62 = vld [vmem:[#allocation6 + $0x394] sm:$0xf] }
 0x12b   :  { %2930 = vmatpush.bf16.msrb.mxu2 %v6570_v59  ;;  %2918 = vmatpush.bf16.msrb.mxu1 %v6282_v7  ;;  %v6185_v44 = vld [vmem:[#allocation6 + $0x290] sm:$0xf]  ;;  %v6730_v55 = vor.u32 %v8925_v43, %v6729_v40  ;;  %v9815_v9 = vadd.f32 %v2652_v4, %v2640_v61  ;;  %v8761_v40 = vld [vmem:[#allocation6 + $0x1d4] sm:$0xf]  ;;  %v2654_v41 = vpop.f32.mrf.mxu2 }
 0x12c   :  { %v8789_v45 = vld [vmem:[#allocation6 + $0x2ac] sm:$0xf0]  ;;  %v6091_v43 = vld [vmem:[#allocation6 + $0x1f0] sm:$0xf0] }
 0x12d   :  { %2943 = vmatpush.bf16.msra.mxu0 %v6826_v6  ;;  %2906 = vmatpush.bf16.msra.mxu3 %v5994_v14  ;;  %v6441_v48 = vld [vmem:[#allocation6 + $0x490] sm:$0xf]  ;;  %v6186_v57 = vor.u32 %v8789_v45, %v6185_v44  ;;  %v8825_v44 = vld [vmem:[#allocation6 + $0x3d4] sm:$0xf]  ;;  %v6094_v54 = vor.u32 %v8761_v40, %v6091_v43 }
 0x12e   :  { %v8853_v49 = vld [vmem:[#allocation6 + $0x4ac] sm:$0xf0]  ;;  %7418 = vmatmul.msk.bf16.vlgmr.msra.gmra.mxu1 %vm2535_vm0, %v9772_v46  ;;  %v6347_v45 = vld [vmem:[#allocation6 + $0x3f0] sm:$0xf0] }
 0x12f   :  { %2931 = vmatpush.bf16.msrb.mxu2 %v6538_v10  ;;  %2919 = vmatpush.bf16.msrb.mxu1 %v6250_v23  ;;  %v5897_v50 = vld [vmem:[#allocation6 + $0x50] sm:$0xf]  ;;  %v6442_v63 = vor.u32 %v8853_v49, %v6441_v48  ;;  %v2641_v29 = vpop.f32.mrf.mxu3  ;;  %v6059_v61 = vld [vmem:[#allocation6 + $0x1b0] sm:$0xf0] }
 0x130   :  { %v8717_v51 = vld [vmem:[#allocation6 + $0x6c] sm:$0xf0]  ;;  %v5963_v41 = vld [vmem:[#allocation6 + $0xf0] sm:$0xf0] }
 0x131   :  { %2944 = vmatpush.bf16.msra.mxu0 %v6794_v22  ;;  %2907 = vmatpush.bf16.msra.mxu3 %v5962_v32  ;;  %v6697_v59 = vld [vmem:[#allocation6 + $0x690] sm:$0xf]  ;;  %v5898_v5 = vor.u32 %v8717_v51, %v5897_v50  ;;  %v6219_v43 = vld [vmem:[#allocation6 + $0x2f0] sm:$0xf0] }
 0x132   :  { %v8917_v0 = vld [vmem:[#allocation6 + $0x6ac] sm:$0xf0] }
 0x133   :  { %2932 = vmatpush.bf16.msrb.mxu2 %v6506_v26  ;;  %2920 = vmatpush.bf16.msrb.mxu1 %v6218_v39  ;;  %v6153_v2 = vld [vmem:[#allocation6 + $0x250] sm:$0xf]  ;;  %v6698_v13 = vor.u32 %v8917_v0, %v6697_v59 }
 0x134   :  { %v8781_v3 = vld [vmem:[#allocation6 + $0x26c] sm:$0xf0] }
 0x135   :  { %2945 = vmatpush.bf16.msra.mxu0 %v6762_v60  ;;  %2908 = vmatpush.bf16.msra.mxu3 %v5930_v47  ;;  %v6409_v6 = vld [vmem:[#allocation6 + $0x450] sm:$0xf]  ;;  %v6154_v14 = vor.u32 %v8781_v3, %v6153_v2 }
 0x136   :  { %v8845_v7 = vld [vmem:[#allocation6 + $0x46c] sm:$0xf0] }
 0x137   :  { %2933 = vmatpush.bf16.msrb.mxu2 %v6474_v42  ;;  %v5865_v10 = vld [vmem:[#allocation6 + $0x10] sm:$0xf]  ;;  %2921 = vmatpush.bf16.msrb.mxu1 %v6186_v57  ;;  %v6410_v18 = vor.u32 %v8845_v7, %v6409_v6  ;;  %v8753_v57 = vld [vmem:[#allocation6 + $0x194] sm:$0xf] }
 0x138   :  { %v8709_v11 = vld [vmem:[#allocation6 + $0x2c] sm:$0xf0]  ;;  %v6062_v6 = vor.u32 %v8753_v57, %v6059_v61 }
 0x139   :  { %v7113_v12 = vld [vmem:[#allocation6 + $0x9d0] sm:$0xf]  ;;  %2946 = vmatpush.bf16.msra.mxu0 %v6730_v55  ;;  %2909 = vmatpush.bf16.msra.mxu3 %v5898_v5  ;;  %v5866_v22 = vor.u32 %v8709_v11, %v5865_v10  ;;  %v6350_v55 = vor.u32 %v8825_v44, %v6347_v45  ;;  %v8745_v10 = vld [vmem:[#allocation6 + $0x154] sm:$0xf] }
 0x13a   :  { %v9021_v15 = vld [vmem:[#allocation6 + $0x9ec] sm:$0xf0] }
 0x13b   :  { %v6665_v16 = vld [vmem:[#allocation6 + $0x650] sm:$0xf]  ;;  %2934 = vmatpush.bf16.msrb.mxu2 %v6442_v63  ;;  %v7114_v26 = vor.u32 %v9021_v15, %v7113_v12  ;;  %2922 = vmatpush.bf16.msrb.mxu1 %v6154_v14  ;;  %v6315_v63 = vld [vmem:[#allocation6 + $0x3b0] sm:$0xf0] }
 0x13c   :  { %v8909_v17 = vld [vmem:[#allocation6 + $0x66c] sm:$0xf0]  ;;  %v6318_v7 = vor.u32 %v8817_v62, %v6315_v63  ;;  %v6027_v12 = vld [vmem:[#allocation6 + $0x170] sm:$0xf0] }
 0x13d   :  { %v6121_v19 = vld [vmem:[#allocation6 + $0x210] sm:$0xf]  ;;  %2947 = vmatpush.bf16.msra.mxu0 %v6698_v13  ;;  %v6666_v30 = vor.u32 %v8909_v17, %v6665_v16  ;;  %2910 = vmatpush.bf16.msra.mxu3 %v5866_v22  ;;  %v8809_v13 = vld [vmem:[#allocation6 + $0x354] sm:$0xf] }
 0x13e   :  { %v8773_v20 = vld [vmem:[#allocation6 + $0x22c] sm:$0xf0]  ;;  %v6283_v14 = vld [vmem:[#allocation6 + $0x370] sm:$0xf0] }
 0x13f   :  { %v6377_v21 = vld [vmem:[#allocation6 + $0x410] sm:$0xf]  ;;  %v6122_v32 = vor.u32 %v8773_v20, %v6121_v19  ;;  %2935 = vmatpush.bf16.msrb.mxu2 %v6410_v18  ;;  %v2665_v20 = vpop.f32.mrf.mxu0  ;;  %v6286_v22 = vor.u32 %v8809_v13, %v6283_v14  ;;  %v5931_v62 = vld [vmem:[#allocation6 + $0xb0] sm:$0xf0] }
 0x140   :  { %v8837_v23 = vld [vmem:[#allocation6 + $0x42c] sm:$0xf0]  ;;  %2911 = vmatmul.bf16.vlgmr.msra.gmra.mxu3 %v9762_v56  ;;  %v2704_v61 = vpop.f32.mrf.mxu2  ;;  %v8785_v63 = vld [vmem:[#allocation6 + $0x294] sm:$0xf] }
 0x141   :  { %v7369_v24 = vld [vmem:[#allocation6 + $0xbd0] sm:$0xf]  ;;  %v6378_v35 = vor.u32 %v8837_v23, %v6377_v21  ;;  %2955 = vmatpush.bf16.msrb.mxu3 %v7114_v26  ;;  %2948 = vmatpush.bf16.msra.mxu0 %v6666_v30  ;;  %v6030_v21 = vor.u32 %v8745_v10, %v6027_v12  ;;  %v8737_v23 = vld [vmem:[#allocation6 + $0x114] sm:$0xf] }
 0x142   :  { %v9085_v25 = vld [vmem:[#allocation6 + $0xbec] sm:$0xf0]  ;;  %2923 = vmatpush.bf16.msrb.mxu1 %v6122_v32  ;;  %v5995_v26 = vld [vmem:[#allocation6 + $0x130] sm:$0xf0] }
 0x143   :  { %v7401_v27 = vld [vmem:[#allocation6 + $0xc10] sm:$0xf]  ;;  %v7370_v37 = vor.u32 %v9085_v25, %v7369_v24  ;;  %2936 = vmatpush.bf16.msrb.mxu2 %v6378_v35  ;;  %v2666_v24 = vadd.f32 %v2665_v20, %v9815_v9  ;;  %v5998_v35 = vor.u32 %v8737_v23, %v5995_v26  ;;  %v8889_v12 = vld [vmem:[#allocation6 + $0x5d4] sm:$0xf] }
 0x144   :  { %v9093_v28 = vld [vmem:[#allocation6 + $0xc2c] sm:$0xf0]  ;;  %v6603_v13 = vld [vmem:[#allocation6 + $0x5f0] sm:$0xf0] }
 0x145   :  { %v7081_v33 = vld [vmem:[#allocation6 + $0x990] sm:$0xf]  ;;  %v7402_v42 = vor.u32 %v9093_v28, %v7401_v27  ;;  %2924 = vmatmul.bf16.vlgmr.msrb.gmra.mxu1 %v9768_v8  ;;  %v8801_v27 = vld [vmem:[#allocation6 + $0x314] sm:$0xf]  ;;  %v6606_v23 = vor.u32 %v8889_v12, %v6603_v13 }
 0x146   :  { %v9013_v34 = vld [vmem:[#allocation6 + $0x9ac] sm:$0xf0]  ;;  %2968 = vmatpush.bf16.msra.mxu1 %v7370_v37  ;;  %2937 = vmatmul.bf16.vlgmr.msrb.gmra.mxu2 %v9760_v52  ;;  %v6251_v28 = vld [vmem:[#allocation6 + $0x330] sm:$0xf0] }
 0x147   :  { %v6633_v60 = vld [vmem:[#allocation6 + $0x610] sm:$0xf]  ;;  %v7082_v47 = vor.u32 %v9013_v34, %v7081_v33  ;;  %2988 = vmatpush.bf16.msra.mxu2 %v7402_v42  ;;  %v6254_v37 = vor.u32 %v8801_v27, %v6251_v28  ;;  %v8793_v42 = vld [vmem:[#allocation6 + $0x2d4] sm:$0xf] }
 0x148   :  { %v8901_v39 = vld [vmem:[#allocation6 + $0x62c] sm:$0xf0]  ;;  %v8713_v14 = vld [vmem:[#allocation6 + $0x54] sm:$0xf] }
 0x149   :  { %v7337_v48 = vld [vmem:[#allocation6 + $0xb90] sm:$0xf]  ;;  %v6634_v50 = vor.u32 %v8901_v39, %v6633_v60  ;;  %2956 = vmatpush.bf16.msrb.mxu3 %v7082_v47  ;;  %v2678_v60 = vpop.f32.mrf.mxu1  ;;  %v8729_v39 = vld [vmem:[#allocation6 + $0xd4] sm:$0xf] }
 0x14a   :  { %v9077_v49 = vld [vmem:[#allocation6 + $0xbac] sm:$0xf0]  ;;  %v2679_v9 = vadd.f32 %v2678_v60, %v2666_v24  ;;  %v8953_v24 = vld [vmem:[#allocation6 + $0x7d4] sm:$0xf] }
 0x14b   :  { %v7049_v51 = vld [vmem:[#allocation6 + $0x950] sm:$0xf]  ;;  %v7338_v59 = vor.u32 %v9077_v49, %v7337_v48  ;;  %2949 = vmatpush.bf16.msra.mxu0 %v6634_v50  ;;  %3007 = vmatpush.bf16.msrb.mxu2 %v6350_v55  ;;  %v2667_v50 = vpop.f32.mrf.mxu0  ;;  %v8721_v55 = vld [vmem:[#allocation6 + $0x94] sm:$0xf] }
 0x14c   :  { %v9005_v53 = vld [vmem:[#allocation6 + $0x96c] sm:$0xf0]  ;;  %v5934_v10 = vor.u32 %v8721_v55, %v5931_v62  ;;  %v8881_v26 = vld [vmem:[#allocation6 + $0x594] sm:$0xf] }
 0x14d   :  { %v7050_v0 = vor.u32 %v9005_v53, %v7049_v51  ;;  %v7305_v2 = vld [vmem:[#allocation6 + $0xb50] sm:$0xf]  ;;  %2969 = vmatpush.bf16.msra.mxu1 %v7338_v59  ;;  %v5966_v51 = vor.u32 %v8729_v39, %v5963_v41  ;;  %v6222_v53 = vor.u32 %v8793_v42, %v6219_v43  ;;  %v8769_v60 = vld [vmem:[#allocation6 + $0x214] sm:$0xf] }
 0x14e   :  { %v9069_v3 = vld [vmem:[#allocation6 + $0xb6c] sm:$0xf0]  ;;  %2950 = vmatmul.bf16.vlgmr.msra.gmra.mxu0 %v9764_v58  ;;  %v6123_v39 = vld [vmem:[#allocation6 + $0x230] sm:$0xf0] }
 0x14f   :  { %v7017_v4 = vld [vmem:[#allocation6 + $0x910] sm:$0xf]  ;;  %2994 = vmatpush.bf16.msrb.mxu0 %v6094_v54  ;;  %v7306_v11 = vor.u32 %v9069_v3, %v7305_v2  ;;  %2957 = vmatpush.bf16.msrb.mxu3 %v7050_v0  ;;  %v2691_v54 = vpop.f32.mrf.mxu3  ;;  %v6187_v0 = vld [vmem:[#allocation6 + $0x2b0] sm:$0xf0]  ;;  %v6126_v50 = vor.u32 %v8769_v60, %v6123_v39 }
 0x150   :  { %v8997_v5 = vld [vmem:[#allocation6 + $0x92c] sm:$0xf0]  ;;  %3008 = vmatpush.bf16.msrb.mxu2 %v6318_v7  ;;  %v2692_v57 = vadd.f32 %v2691_v54, %v2679_v9  ;;  %v2706_v9 = vpop.f32.mrf.mxu2  ;;  %v7115_v42 = vld [vmem:[#allocation6 + $0x9f0] sm:$0xf0] }
 0x151   :  { %v7018_v15 = vor.u32 %v8997_v5, %v7017_v4  ;;  %v7273_v16 = vld [vmem:[#allocation6 + $0xb10] sm:$0xf]  ;;  %2970 = vmatpush.bf16.msra.mxu1 %v7306_v11  ;;  %v6190_v11 = vor.u32 %v8785_v63, %v6187_v0  ;;  %v9081_v43 = vld [vmem:[#allocation6 + $0xbd4] sm:$0xf] }
 0x152   :  { %v9061_v17 = vld [vmem:[#allocation6 + $0xb2c] sm:$0xf0]  ;;  %v2705_v5 = vadd.f32 %v2704_v61, %v2692_v57  ;;  %v9009_v57 = vld [vmem:[#allocation6 + $0x994] sm:$0xf] }
 0x153   :  { %v6985_v18 = vld [vmem:[#allocation6 + $0x8d0] sm:$0xf]  ;;  %2995 = vmatpush.bf16.msrb.mxu0 %v6062_v6  ;;  %v7274_v25 = vor.u32 %v9061_v17, %v7273_v16  ;;  %2958 = vmatpush.bf16.msrb.mxu3 %v7018_v15  ;;  %v2680_v15 = vpop.f32.mrf.mxu1  ;;  %v5899_v17 = vld [vmem:[#allocation6 + $0x70] sm:$0xf0]  ;;  %v2717_v27 = vpop.f32.mrf.mxu0 }
 0x154   :  { %v8989_v19 = vld [vmem:[#allocation6 + $0x8ec] sm:$0xf0]  ;;  %3009 = vmatpush.bf16.msrb.mxu2 %v6286_v22  ;;  %v5902_v28 = vor.u32 %v8713_v14, %v5899_v17  ;;  %v7083_v61 = vld [vmem:[#allocation6 + $0x9b0] sm:$0xf0] }
 0x155   :  { %v6986_v29 = vor.u32 %v8989_v19, %v6985_v18  ;;  %v7241_v30 = vld [vmem:[#allocation6 + $0xad0] sm:$0xf]  ;;  %2971 = vmatpush.bf16.msra.mxu1 %v7274_v25  ;;  %v8777_v18 = vld [vmem:[#allocation6 + $0x254] sm:$0xf] }
 0x156   :  { %v9053_v32 = vld [vmem:[#allocation6 + $0xaec] sm:$0xf0]  ;;  %7419 = vmatmul.msk.bf16.vlgmr.msra.gmra.mxu2 %vm2535_vm0, %v9772_v46  ;;  %v6155_v19 = vld [vmem:[#allocation6 + $0x270] sm:$0xf0] }
 0x157   :  { %v6953_v33 = vld [vmem:[#allocation6 + $0x890] sm:$0xf]  ;;  %2996 = vmatpush.bf16.msrb.mxu0 %v6030_v21  ;;  %v7242_v40 = vor.u32 %v9053_v32, %v7241_v30  ;;  %2959 = vmatpush.bf16.msrb.mxu3 %v6986_v29  ;;  %v6859_v25 = vld [vmem:[#allocation6 + $0x7f0] sm:$0xf0]  ;;  %v6158_v29 = vor.u32 %v8777_v18, %v6155_v19 }
 0x158   :  { %v8981_v34 = vld [vmem:[#allocation6 + $0x8ac] sm:$0xf0]  ;;  %3010 = vmatpush.bf16.msrb.mxu2 %v6254_v37  ;;  %v6571_v30 = vld [vmem:[#allocation6 + $0x5b0] sm:$0xf0]  ;;  %v6862_v41 = vor.u32 %v8953_v24, %v6859_v25 }
 0x159   :  { %v6954_v44 = vor.u32 %v8981_v34, %v6953_v33  ;;  %v7209_v45 = vld [vmem:[#allocation6 + $0xa90] sm:$0xf]  ;;  %2972 = vmatpush.bf16.msra.mxu1 %v7242_v40  ;;  %v8705_v32 = vld [vmem:[#allocation6 + $0x14] sm:$0xf]  ;;  %v2693_v34 = vpop.f32.mrf.mxu3 }
 0x15a   :  { %v9045_v47 = vld [vmem:[#allocation6 + $0xaac] sm:$0xf0]  ;;  %v5867_v33 = vld [vmem:[#allocation6 + $0x30] sm:$0xf0] }
 0x15b   :  { %v6921_v48 = vld [vmem:[#allocation6 + $0x850] sm:$0xf]  ;;  %2997 = vmatpush.bf16.msrb.mxu0 %v5998_v35  ;;  %v7210_v59 = vor.u32 %v9045_v47, %v7209_v45  ;;  %2960 = vmatpush.bf16.msrb.mxu3 %v6954_v44  ;;  %v9824_v35 = vadd.f32 %v2717_v27, %v2705_v5  ;;  %v9017_v40 = vld [vmem:[#allocation6 + $0x9d4] sm:$0xf]  ;;  %v6574_v45 = vor.u32 %v8881_v26, %v6571_v30 }
 0x15c   :  { %v8973_v49 = vld [vmem:[#allocation6 + $0x86c] sm:$0xf0]  ;;  %3011 = vmatpush.bf16.msrb.mxu2 %v6222_v53  ;;  %v7371_v44 = vld [vmem:[#allocation6 + $0xbf0] sm:$0xf0]  ;;  %v7118_v54 = vor.u32 %v9017_v40, %v7115_v42  ;;  %v2730_v40 = vpop.f32.mrf.mxu1 }
 0x15d   :  { %v6922_v2 = vor.u32 %v8973_v49, %v6921_v48  ;;  %v7177_v3 = vld [vmem:[#allocation6 + $0xa50] sm:$0xf]  ;;  %2973 = vmatpush.bf16.msra.mxu1 %v7210_v59  ;;  %v8945_v47 = vld [vmem:[#allocation6 + $0x794] sm:$0xf]  ;;  %v5870_v49 = vor.u32 %v8705_v32, %v5867_v33  ;;  %v7374_v55 = vor.u32 %v9081_v43, %v7371_v44 }
 0x15e   :  { %v9037_v4 = vld [vmem:[#allocation6 + $0xa6c] sm:$0xf0]  ;;  %v6827_v48 = vld [vmem:[#allocation6 + $0x7b0] sm:$0xf0] }
 0x15f   :  { %v6889_v6 = vld [vmem:[#allocation6 + $0x810] sm:$0xf]  ;;  %2998 = vmatpush.bf16.msrb.mxu0 %v5966_v51  ;;  %v7178_v16 = vor.u32 %v9037_v4, %v7177_v3  ;;  %2961 = vmatpush.bf16.msrb.mxu3 %v6922_v2  ;;  %v8873_v51 = vld [vmem:[#allocation6 + $0x554] sm:$0xf]  ;;  %v6830_v59 = vor.u32 %v8945_v47, %v6827_v48  ;;  %v2719_v4 = vpop.f32.mrf.mxu0 }
 0x160   :  { %v8965_v7 = vld [vmem:[#allocation6 + $0x82c] sm:$0xf0]  ;;  %3012 = vmatpush.bf16.msrb.mxu2 %v6190_v11  ;;  %v6539_v53 = vld [vmem:[#allocation6 + $0x570] sm:$0xf0] }
 0x161   :  { %v6890_v20 = vor.u32 %v8965_v7, %v6889_v6  ;;  %v7145_v21 = vld [vmem:[#allocation6 + $0xa10] sm:$0xf]  ;;  %2974 = vmatpush.bf16.msra.mxu1 %v7178_v16  ;;  %v9073_v62 = vld [vmem:[#allocation6 + $0xb94] sm:$0xf]  ;;  %v6542_v0 = vor.u32 %v8873_v51, %v6539_v53  ;;  %v7086_v7 = vor.u32 %v9009_v57, %v7083_v61  ;;  %v2743_v51 = vpop.f32.mrf.mxu3 }
 0x162   :  { %v9029_v22 = vld [vmem:[#allocation6 + $0xa2c] sm:$0xf0]  ;;  %v7339_v63 = vld [vmem:[#allocation6 + $0xbb0] sm:$0xf0] }
 0x163   :  { %2999 = vmatpush.bf16.msrb.mxu0 %v5934_v10  ;;  %v7146_v37 = vor.u32 %v9029_v22, %v7145_v21  ;;  %2962 = vmatpush.bf16.msrb.mxu3 %v6890_v20  ;;  %v8937_v2 = vld [vmem:[#allocation6 + $0x754] sm:$0xf]  ;;  %v7342_v10 = vor.u32 %v9073_v62, %v7339_v63 }
 0x164   :  { %3013 = vmatpush.bf16.msrb.mxu2 %v6158_v29  ;;  %v6795_v3 = vld [vmem:[#allocation6 + $0x770] sm:$0xf0] }
 0x165   :  { %2975 = vmatpush.bf16.msra.mxu1 %v7146_v37  ;;  %v8865_v5 = vld [vmem:[#allocation6 + $0x514] sm:$0xf]  ;;  %v6798_v12 = vor.u32 %v8937_v2, %v6795_v3 }
 0x166   :  { %2963 = vmatmul.bf16.vlgmr.msrb.gmra.mxu3 %v9776_v31  ;;  %v6507_v6 = vld [vmem:[#allocation6 + $0x530] sm:$0xf0] }
 0x167   :  { %3020 = vmatpush.bf16.msra.mxu3 %v6606_v23  ;;  %3000 = vmatpush.bf16.msrb.mxu0 %v5902_v28  ;;  %v9001_v11 = vld [vmem:[#allocation6 + $0x954] sm:$0xf]  ;;  %v6510_v16 = vor.u32 %v8865_v5, %v6507_v6  ;;  %v561_v28 = vperm.slane %v9798_v1, 2  ;;  %v2756_v33 = vpop.f32.mrf.mxu0 }
 0x168   :  { %3014 = vmatpush.bf16.msrb.mxu2 %v6126_v50  ;;  %v7051_v13 = vld [vmem:[#allocation6 + $0x970] sm:$0xf0]  ;;  %2976 = vmatmul.bf16.vlgmr.msra.gmra.mxu1 %v9778_v36 }
 0x169   :  { %3033 = vmatpush.bf16.msrb.mxu1 %v6862_v41  ;;  %v9065_v14 = vld [vmem:[#allocation6 + $0xb54] sm:$0xf]  ;;  %v7054_v21 = vor.u32 %v9001_v11, %v7051_v13  ;;  %v2731_v41 = vadd.f32 %v2730_v40, %v561_v28  ;;  %v6353_v28 = vld [vmem:[#allocation6 + $0x3d8] sm:$0xf] }
 0x16a   :  { %v7307_v15 = vld [vmem:[#allocation6 + $0xb70] sm:$0xf0] }
 0x16b   :  { %3021 = vmatpush.bf16.msra.mxu3 %v6574_v45  ;;  %3001 = vmatpush.bf16.msrb.mxu0 %v5870_v49  ;;  %v8929_v17 = vld [vmem:[#allocation6 + $0x714] sm:$0xf]  ;;  %v7310_v22 = vor.u32 %v9065_v14, %v7307_v15  ;;  %v2744_v57 = vadd.f32 %v2743_v51, %v2731_v41  ;;  %v8894_v41 = vld [vmem:[#allocation6 + $0x5f4] sm:$0xf0] }
 0x16c   :  { %3059 = vmatpush.bf16.msra.mxu2 %v7374_v55  ;;  %v6763_v18 = vld [vmem:[#allocation6 + $0x730] sm:$0xf0] }
 0x16d   :  { %3034 = vmatpush.bf16.msrb.mxu1 %v6830_v59  ;;  %v8857_v19 = vld [vmem:[#allocation6 + $0x4d4] sm:$0xf]  ;;  %3015 = vmatmul.bf16.vlgmr.msrb.gmra.mxu2 %v9768_v8  ;;  %v6766_v25 = vor.u32 %v8929_v17, %v6763_v18  ;;  %v2757_v5 = vadd.f32 %v2756_v33, %v2744_v57 }
 0x16e   :  { %v6475_v20 = vld [vmem:[#allocation6 + $0x4f0] sm:$0xf0]  ;;  %3002 = vmatmul.bf16.vlgmr.msrb.gmra.mxu0 %v9762_v56 }
 0x16f   :  { %3046 = vmatpush.bf16.msra.mxu0 %v7118_v54  ;;  %3022 = vmatpush.bf16.msra.mxu3 %v6542_v0  ;;  %v8993_v23 = vld [vmem:[#allocation6 + $0x914] sm:$0xf]  ;;  %v6478_v29 = vor.u32 %v8857_v19, %v6475_v20  ;;  %v2758_v4 = vpop.f32.mrf.mxu0 }
 0x170   :  { %3060 = vmatpush.bf16.msra.mxu2 %v7342_v10  ;;  %v7019_v24 = vld [vmem:[#allocation6 + $0x930] sm:$0xf0]  ;;  %v2769_v10 = vpop.f32.mrf.mxu2  ;;  %v8750_v4 = vld [vmem:[#allocation6 + $0x174] sm:$0xf0] }
 0x171   :  { %3035 = vmatpush.bf16.msrb.mxu1 %v6798_v12  ;;  %v9057_v26 = vld [vmem:[#allocation6 + $0xb14] sm:$0xf]  ;;  %v7022_v60 = vor.u32 %v8993_v23, %v7019_v24  ;;  %v9831_v17 = vadd.f32 %v2769_v10, %v2757_v5  ;;  %v6289_v5 = vld [vmem:[#allocation6 + $0x358] sm:$0xf] }
 0x172   :  { %v7275_v27 = vld [vmem:[#allocation6 + $0xb30] sm:$0xf0] }
 0x173   :  { %3047 = vmatpush.bf16.msra.mxu0 %v7086_v7  ;;  %3023 = vmatpush.bf16.msra.mxu3 %v6510_v16  ;;  %v8921_v30 = vld [vmem:[#allocation6 + $0x6d4] sm:$0xf]  ;;  %v7278_v39 = vor.u32 %v9057_v26, %v7275_v27  ;;  %v2732_v16 = vpop.f32.mrf.mxu1  ;;  %v8766_v27 = vld [vmem:[#allocation6 + $0x1f4] sm:$0xf0] }
 0x174   :  { %v6731_v32 = vld [vmem:[#allocation6 + $0x6f0] sm:$0xf0]  ;;  %3061 = vmatpush.bf16.msra.mxu2 %v7310_v22  ;;  %v8942_v16 = vld [vmem:[#allocation6 + $0x774] sm:$0xf0] }
 0x175   :  { %v8849_v34 = vld [vmem:[#allocation6 + $0x494] sm:$0xf]  ;;  %3036 = vmatpush.bf16.msrb.mxu1 %v6766_v25  ;;  %v6734_v42 = vor.u32 %v8921_v30, %v6731_v32  ;;  %v6097_v25 = vld [vmem:[#allocation6 + $0x1d8] sm:$0xf] }
 0x176   :  { %v6443_v37 = vld [vmem:[#allocation6 + $0x4b0] sm:$0xf0] }
 0x177   :  { %3048 = vmatpush.bf16.msra.mxu0 %v7054_v21  ;;  %v8985_v9 = vld [vmem:[#allocation6 + $0x8d4] sm:$0xf]  ;;  %3024 = vmatpush.bf16.msra.mxu3 %v6478_v29  ;;  %v6446_v1 = vor.u32 %v8849_v34, %v6443_v37  ;;  %v8830_v29 = vld [vmem:[#allocation6 + $0x3f4] sm:$0xf0] }
 0x178   :  { %v6987_v43 = vld [vmem:[#allocation6 + $0x8f0] sm:$0xf0]  ;;  %3062 = vmatpush.bf16.msra.mxu2 %v7278_v39 }
 0x179   :  { %v9049_v44 = vld [vmem:[#allocation6 + $0xad4] sm:$0xf]  ;;  %v6990_v53 = vor.u32 %v8985_v9, %v6987_v43  ;;  %3037 = vmatpush.bf16.msrb.mxu1 %v6734_v42  ;;  %v6609_v9 = vld [vmem:[#allocation6 + $0x5d8] sm:$0xf]  ;;  %v6098_v42 = vor.u32 %v8766_v27, %v6097_v25  ;;  %v6354_v43 = vor.u32 %v8830_v29, %v6353_v28 }
 0x17a   :  { %v7243_v45 = vld [vmem:[#allocation6 + $0xaf0] sm:$0xf0]  ;;  %v6513_v29 = vld [vmem:[#allocation6 + $0x518] sm:$0xf] }
 0x17b   :  { %v8913_v47 = vld [vmem:[#allocation6 + $0x694] sm:$0xf]  ;;  %3049 = vmatpush.bf16.msra.mxu0 %v7022_v60  ;;  %v7246_v54 = vor.u32 %v9049_v44, %v7243_v45  ;;  %3025 = vmatpush.bf16.msra.mxu3 %v6446_v1  ;;  %v2745_v60 = vpop.f32.mrf.mxu3  ;;  %v6865_v44 = vld [vmem:[#allocation6 + $0x7d8] sm:$0xf] }
 0x17c   :  { %v6699_v48 = vld [vmem:[#allocation6 + $0x6b0] sm:$0xf0]  ;;  %v8958_v45 = vld [vmem:[#allocation6 + $0x7f4] sm:$0xf0] }
 0x17d   :  { %v8841_v49 = vld [vmem:[#allocation6 + $0x454] sm:$0xf]  ;;  %v6702_v59 = vor.u32 %v8913_v47, %v6699_v48  ;;  %3063 = vmatpush.bf16.msra.mxu2 %v7246_v54  ;;  %v6065_v1 = vld [vmem:[#allocation6 + $0x198] sm:$0xf]  ;;  %v2771_v54 = vpop.f32.mrf.mxu2  ;;  %v6866_v57 = vor.u32 %v8958_v45, %v6865_v44 }
 0x17e   :  { %v6411_v50 = vld [vmem:[#allocation6 + $0x470] sm:$0xf0]  ;;  %v8758_v47 = vld [vmem:[#allocation6 + $0x1b4] sm:$0xf0]  ;;  %v9840_v54 = vld [vmem:[#allocation8] sm:$0xff] }
 0x17f   :  { %v8977_v55 = vld [vmem:[#allocation6 + $0x894] sm:$0xf]  ;;  %v6414_v0 = vor.u32 %v8841_v49, %v6411_v50  ;;  %3050 = vmatpush.bf16.msra.mxu0 %v6990_v53  ;;  %3038 = vmatpush.bf16.msrb.mxu1 %v6702_v59  ;;  %v6321_v48 = vld [vmem:[#allocation6 + $0x398] sm:$0xf]  ;;  %v9833_v50 = vpop.f32.mrf.mxu0 }
 0x180   :  { %v6955_v61 = vld [vmem:[#allocation6 + $0x8b0] sm:$0xf0]  ;;  %v8822_v49 = vld [vmem:[#allocation6 + $0x3b4] sm:$0xf0] }
 0x181   :  { %v9041_v62 = vld [vmem:[#allocation6 + $0xa94] sm:$0xf]  ;;  %v6958_v11 = vor.u32 %v8977_v55, %v6955_v61  ;;  %3026 = vmatpush.bf16.msra.mxu3 %v6414_v0  ;;  %v6610_v55 = vor.u32 %v8894_v41, %v6609_v9  ;;  %v6577_v59 = vld [vmem:[#allocation6 + $0x598] sm:$0xf] }
 0x182   :  { %v7211_v63 = vld [vmem:[#allocation6 + $0xab0] sm:$0xf0]  ;;  %v8886_v61 = vld [vmem:[#allocation6 + $0x5b4] sm:$0xf0] }
 0x183   :  { %v8905_v2 = vld [vmem:[#allocation6 + $0x654] sm:$0xf]  ;;  %v7214_v12 = vor.u32 %v9041_v62, %v7211_v63  ;;  %3051 = vmatpush.bf16.msra.mxu0 %v6958_v11  ;;  %v6066_v62 = vor.u32 %v8758_v47, %v6065_v1  ;;  %v6322_v63 = vor.u32 %v8822_v49, %v6321_v48  ;;  %v6833_v0 = vld [vmem:[#allocation6 + $0x798] sm:$0xf]  ;;  %v2795_v49 = vpop.f32.mrf.mxu3 }
 0x184   :  { %v6667_v3 = vld [vmem:[#allocation6 + $0x670] sm:$0xf0]  ;;  %v6545_v11 = vld [vmem:[#allocation6 + $0x558] sm:$0xf] }
 0x185   :  { %v8833_v6 = vld [vmem:[#allocation6 + $0x414] sm:$0xf]  ;;  %v6670_v18 = vor.u32 %v8905_v2, %v6667_v3  ;;  %3064 = vmatpush.bf16.msra.mxu2 %v7214_v12  ;;  %v8950_v2 = vld [vmem:[#allocation6 + $0x7b4] sm:$0xf0] }
 0x186   :  { %v6379_v7 = vld [vmem:[#allocation6 + $0x430] sm:$0xf0]  ;;  %v6033_v3 = vld [vmem:[#allocation6 + $0x158] sm:$0xf]  ;;  %v6834_v10 = vor.u32 %v8950_v2, %v6833_v0 }
 0x187   :  { %v8969_v13 = vld [vmem:[#allocation6 + $0x854] sm:$0xf]  ;;  %v6382_v22 = vor.u32 %v8833_v6, %v6379_v7  ;;  %3039 = vmatpush.bf16.msrb.mxu1 %v6670_v18  ;;  %v8814_v6 = vld [vmem:[#allocation6 + $0x374] sm:$0xf0]  ;;  %v6578_v7 = vor.u32 %v8886_v61, %v6577_v59 }
 0x188   :  { %v9089_v14 = vld [vmem:[#allocation6 + $0xc14] sm:$0xf]  ;;  %v8878_v12 = vld [vmem:[#allocation6 + $0x574] sm:$0xf0] }
 0x189   :  { %v7403_v15 = vld [vmem:[#allocation6 + $0xc30] sm:$0xf0]  ;;  %3027 = vmatpush.bf16.msra.mxu3 %v6382_v22  ;;  %v6001_v18 = vld [vmem:[#allocation6 + $0x118] sm:$0xf]  ;;  %v2810_v22 = vpop.f32.mrf.mxu0 }
 0x18a   :  { %v6923_v19 = vld [vmem:[#allocation6 + $0x870] sm:$0xf0]  ;;  %v7406_v26 = vor.u32 %v9089_v14, %v7403_v15  ;;  %v6290_v14 = vor.u32 %v8814_v6, %v6289_v5  ;;  %v6801_v15 = vld [vmem:[#allocation6 + $0x758] sm:$0xf] }
 0x18b   :  { %v9033_v20 = vld [vmem:[#allocation6 + $0xa54] sm:$0xf]  ;;  %v6926_v30 = vor.u32 %v8969_v13, %v6923_v19  ;;  %v6034_v13 = vor.u32 %v8750_v4, %v6033_v3  ;;  %v8742_v19 = vld [vmem:[#allocation6 + $0x134] sm:$0xf0]  ;;  %v6802_v25 = vor.u32 %v8942_v16, %v6801_v15 }
 0x18c   :  { %v7179_v21 = vld [vmem:[#allocation6 + $0xa70] sm:$0xf0]  ;;  %3028 = vmatmul.bf16.vlgmr.msra.gmra.mxu3 %v9760_v52  ;;  %v6002_v27 = vor.u32 %v8742_v19, %v6001_v18  ;;  %v6225_v60 = vld [vmem:[#allocation6 + $0x2d8] sm:$0xf] }
 0x18d   :  { %v8897_v23 = vld [vmem:[#allocation6 + $0x614] sm:$0xf]  ;;  %v7182_v32 = vor.u32 %v9033_v20, %v7179_v21  ;;  %3079 = vmatpush.bf16.msrb.mxu3 %v7406_v26  ;;  %3052 = vmatpush.bf16.msra.mxu0 %v6926_v30  ;;  %v6257_v20 = vld [vmem:[#allocation6 + $0x318] sm:$0xf] }
 0x18e   :  { %v6635_v24 = vld [vmem:[#allocation6 + $0x630] sm:$0xf0]  ;;  %v8806_v21 = vld [vmem:[#allocation6 + $0x334] sm:$0xf0] }
 0x18f   :  { %v8961_v33 = vld [vmem:[#allocation6 + $0x814] sm:$0xf]  ;;  %v6638_v39 = vor.u32 %v8897_v23, %v6635_v24  ;;  %3065 = vmatpush.bf16.msra.mxu2 %v7182_v32  ;;  %v2782_v23 = vpop.f32.mrf.mxu1  ;;  %v6546_v24 = vor.u32 %v8878_v12, %v6545_v11  ;;  %v6258_v28 = vor.u32 %v8806_v21, %v6257_v20  ;;  %v8870_v30 = vld [vmem:[#allocation6 + $0x534] sm:$0xf0]  ;;  %v2821_v11 = vpop.f32.mrf.mxu2 }
 0x190   :  { %v6891_v34 = vld [vmem:[#allocation6 + $0x830] sm:$0xf0]  ;;  %v2783_v26 = vadd.f32 %v2782_v23, %v9831_v17  ;;  %v6769_v32 = vld [vmem:[#allocation6 + $0x718] sm:$0xf] }
 0x191   :  { %v9025_v37 = vld [vmem:[#allocation6 + $0xa14] sm:$0xf]  ;;  %v6894_v51 = vor.u32 %v8961_v33, %v6891_v34  ;;  %3040 = vmatpush.bf16.msrb.mxu1 %v6638_v39  ;;  %3098 = vmatpush.bf16.msra.mxu3 %v6354_v43  ;;  %v8934_v33 = vld [vmem:[#allocation6 + $0x734] sm:$0xf0]  ;;  %v2834_v48 = vpop.f32.mrf.mxu0 }
 0x192   :  { %v7147_v40 = vld [vmem:[#allocation6 + $0xa30] sm:$0xf0]  ;;  %v5969_v34 = vld [vmem:[#allocation6 + $0xd8] sm:$0xf]  ;;  %v6770_v9 = vor.u32 %v8934_v33, %v6769_v32  ;;  %v2797_v32 = vpop.f32.mrf.mxu3 }
 0x193   :  { %v7150_v53 = vor.u32 %v9025_v37, %v7147_v40  ;;  %3053 = vmatpush.bf16.msra.mxu0 %v6894_v51  ;;  %v8734_v37 = vld [vmem:[#allocation6 + $0xf4] sm:$0xf0]  ;;  %v6514_v40 = vor.u32 %v8870_v30, %v6513_v29 }
 0x194   :  { %3041 = vmatmul.bf16.vlgmr.msrb.gmra.mxu1 %v9764_v58  ;;  %v8798_v39 = vld [vmem:[#allocation6 + $0x2f4] sm:$0xf0]  ;;  %v5970_v41 = vor.u32 %v8734_v37, %v5969_v34 }
 0x195   :  { %3085 = vmatpush.bf16.msra.mxu1 %v6098_v42  ;;  %3066 = vmatpush.bf16.msra.mxu2 %v7150_v53  ;;  %v6481_v17 = vld [vmem:[#allocation6 + $0x4d8] sm:$0xf]  ;;  %v6226_v44 = vor.u32 %v8798_v39, %v6225_v60 }
 0x196   :  { %3099 = vmatpush.bf16.msra.mxu3 %v6322_v63  ;;  %3054 = vmatmul.bf16.vlgmr.msra.gmra.mxu0 %v9776_v31  ;;  %v8862_v42 = vld [vmem:[#allocation6 + $0x4f4] sm:$0xf0] }
 0x197   :  { %3111 = vmatpush.bf16.msrb.mxu0 %v6610_v55  ;;  %v6737_v43 = vld [vmem:[#allocation6 + $0x6d8] sm:$0xf]  ;;  %v562_v55 = vperm.slane %v9840_v54, 3  ;;  %v6482_v59 = vor.u32 %v8862_v42, %v6481_v17  ;;  %v2784_v61 = vpop.f32.mrf.mxu1 }
 0x198   :  { %3067 = vmatmul.bf16.vlgmr.msra.gmra.mxu2 %v9778_v36  ;;  %v8926_v45 = vld [vmem:[#allocation6 + $0x6f4] sm:$0xf0] }
 0x199   :  { %3124 = vmatpush.bf16.msrb.mxu2 %v6866_v57  ;;  %3086 = vmatpush.bf16.msra.mxu1 %v6066_v62  ;;  %v5937_v1 = vld [vmem:[#allocation6 + $0x98] sm:$0xf]  ;;  %v2796_v57 = vadd.f32 %v2795_v49, %v2783_v26  ;;  %v6738_v62 = vor.u32 %v8926_v45, %v6737_v43  ;;  %v6099_v49 = vld [vmem:[#allocation6 + $0x1f8] sm:$0xf0] }
 0x19a   :  { %3100 = vmatpush.bf16.msra.mxu3 %v6290_v14  ;;  %v8726_v47 = vld [vmem:[#allocation6 + $0xb4] sm:$0xf0]  ;;  %v2822_v14 = vadd.f32 %v2821_v11, %v562_v55 }
 0x19b   :  { %3112 = vmatpush.bf16.msrb.mxu0 %v6578_v7  ;;  %v6193_v51 = vld [vmem:[#allocation6 + $0x298] sm:$0xf]  ;;  %v5938_v63 = vor.u32 %v8726_v47, %v5937_v1  ;;  %v9846_v4 = vadd.f32 %v9833_v50, %v2796_v57  ;;  %v2823_v47 = vpop.f32.mrf.mxu2 }
 0x19c   :  { %v8790_v53 = vld [vmem:[#allocation6 + $0x2b4] sm:$0xf0]  ;;  %7420 = vmatmul.msk.bf16.vlgmr.msrb.gmra.mxu3 %vm2535_vm0, %v9772_v46  ;;  %v9848_v22 = vadd.f32 %v2834_v48, %v2822_v14 }
 0x19d   :  { %3125 = vmatpush.bf16.msrb.mxu2 %v6834_v10  ;;  %3087 = vmatpush.bf16.msra.mxu1 %v6034_v13  ;;  %v6449_v0 = vld [vmem:[#allocation6 + $0x498] sm:$0xf]  ;;  %v6194_v5 = vor.u32 %v8790_v53, %v6193_v51 }
 0x19e   :  { %3101 = vmatpush.bf16.msra.mxu3 %v6258_v28  ;;  %v8854_v2 = vld [vmem:[#allocation6 + $0x4b4] sm:$0xf0] }
 0x19f   :  { %3113 = vmatpush.bf16.msrb.mxu0 %v6546_v24  ;;  %v6705_v3 = vld [vmem:[#allocation6 + $0x698] sm:$0xf]  ;;  %v6450_v15 = vor.u32 %v8854_v2, %v6449_v0  ;;  %v6355_v0 = vld [vmem:[#allocation6 + $0x3f8] sm:$0xf0] }
 0x1a0   :  { %v8918_v6 = vld [vmem:[#allocation6 + $0x6b4] sm:$0xf0] }
 0x1a1   :  { %3126 = vmatpush.bf16.msrb.mxu2 %v6802_v25  ;;  %3088 = vmatpush.bf16.msra.mxu1 %v6002_v27  ;;  %v5905_v7 = vld [vmem:[#allocation6 + $0x58] sm:$0xf]  ;;  %v6706_v18 = vor.u32 %v8918_v6, %v6705_v3  ;;  %v2836_v27 = vpop.f32.mrf.mxu0 }
 0x1a2   :  { %3102 = vmatpush.bf16.msra.mxu3 %v6226_v44  ;;  %v8718_v10 = vld [vmem:[#allocation6 + $0x74] sm:$0xf0]  ;;  %v8762_v44 = vld [vmem:[#allocation6 + $0x1dc] sm:$0xf] }
 0x1a3   :  { %3114 = vmatpush.bf16.msrb.mxu0 %v6514_v40  ;;  %v6161_v12 = vld [vmem:[#allocation6 + $0x258] sm:$0xf]  ;;  %v5906_v19 = vor.u32 %v8718_v10, %v5905_v7  ;;  %v6102_v2 = vor.u32 %v8762_v44, %v6099_v49  ;;  %v6067_v7 = vld [vmem:[#allocation6 + $0x1b8] sm:$0xf0] }
 0x1a4   :  { %v8782_v13 = vld [vmem:[#allocation6 + $0x274] sm:$0xf0]  ;;  %v6259_v44 = vld [vmem:[#allocation6 + $0x338] sm:$0xf0] }
 0x1a5   :  { %3127 = vmatpush.bf16.msrb.mxu2 %v6770_v9  ;;  %3089 = vmatpush.bf16.msra.mxu1 %v5970_v41  ;;  %v6417_v16 = vld [vmem:[#allocation6 + $0x458] sm:$0xf]  ;;  %v6162_v23 = vor.u32 %v8782_v13, %v6161_v12 }
 0x1a6   :  { %v8846_v20 = vld [vmem:[#allocation6 + $0x474] sm:$0xf0]  ;;  %3103 = vmatpush.bf16.msra.mxu3 %v6194_v5  ;;  %v8754_v5 = vld [vmem:[#allocation6 + $0x19c] sm:$0xf] }
 0x1a7   :  { %3115 = vmatpush.bf16.msrb.mxu0 %v6482_v59  ;;  %v6673_v21 = vld [vmem:[#allocation6 + $0x658] sm:$0xf]  ;;  %v6418_v33 = vor.u32 %v8846_v20, %v6417_v16  ;;  %v6323_v16 = vld [vmem:[#allocation6 + $0x3b8] sm:$0xf0] }
 0x1a8   :  { %v8910_v50 = vld [vmem:[#allocation6 + $0x674] sm:$0xf0]  ;;  %v8746_v20 = vld [vmem:[#allocation6 + $0x15c] sm:$0xf] }
 0x1a9   :  { %3128 = vmatpush.bf16.msrb.mxu2 %v6738_v62  ;;  %3090 = vmatpush.bf16.msra.mxu1 %v5938_v63  ;;  %v5873_v24 = vld [vmem:[#allocation6 + $0x18] sm:$0xf]  ;;  %v6674_v39 = vor.u32 %v8910_v50, %v6673_v21  ;;  %v8826_v63 = vld [vmem:[#allocation6 + $0x3dc] sm:$0xf] }
 0x1aa   :  { %v8710_v25 = vld [vmem:[#allocation6 + $0x34] sm:$0xf0]  ;;  %3104 = vmatpush.bf16.msra.mxu3 %v6162_v23  ;;  %v6358_v12 = vor.u32 %v8826_v63, %v6355_v0  ;;  %v6035_v50 = vld [vmem:[#allocation6 + $0x178] sm:$0xf0] }
 0x1ab   :  { %v6129_v26 = vld [vmem:[#allocation6 + $0x218] sm:$0xf]  ;;  %3116 = vmatpush.bf16.msrb.mxu0 %v6450_v15  ;;  %v5874_v40 = vor.u32 %v8710_v25, %v5873_v24  ;;  %v8818_v15 = vld [vmem:[#allocation6 + $0x39c] sm:$0xf] }
 0x1ac   :  { %v8774_v28 = vld [vmem:[#allocation6 + $0x234] sm:$0xf0]  ;;  %v6326_v25 = vor.u32 %v8818_v15, %v6323_v16  ;;  %v8794_v0 = vld [vmem:[#allocation6 + $0x2dc] sm:$0xf] }
 0x1ad   :  { %v7121_v29 = vld [vmem:[#allocation6 + $0x9d8] sm:$0xf]  ;;  %3129 = vmatpush.bf16.msrb.mxu2 %v6706_v18  ;;  %3091 = vmatpush.bf16.msra.mxu1 %v5906_v19  ;;  %v6130_v42 = vor.u32 %v8774_v28, %v6129_v26  ;;  %v6070_v18 = vor.u32 %v8754_v5, %v6067_v7  ;;  %v2847_v28 = vpop.f32.mrf.mxu1  ;;  %v8722_v7 = vld [vmem:[#allocation6 + $0x9c] sm:$0xf] }
 0x1ae   :  { %v9022_v30 = vld [vmem:[#allocation6 + $0x9f4] sm:$0xf0]  ;;  %v2848_v32 = vadd.f32 %v2847_v28, %v9848_v22  ;;  %v8730_v22 = vld [vmem:[#allocation6 + $0xdc] sm:$0xf] }
 0x1af   :  { %v7377_v34 = vld [vmem:[#allocation6 + $0xbd8] sm:$0xf]  ;;  %v7122_v43 = vor.u32 %v9022_v30, %v7121_v29  ;;  %3117 = vmatpush.bf16.msrb.mxu0 %v6418_v33  ;;  %3105 = vmatpush.bf16.msra.mxu3 %v6130_v42  ;;  %v8810_v29 = vld [vmem:[#allocation6 + $0x35c] sm:$0xf]  ;;  %v6038_v33 = vor.u32 %v8746_v20, %v6035_v50 }
 0x1b0   :  { %v9086_v37 = vld [vmem:[#allocation6 + $0xbf4] sm:$0xf0]  ;;  %v6291_v30 = vld [vmem:[#allocation6 + $0x378] sm:$0xf0] }
 0x1b1   :  { %v6385_v60 = vld [vmem:[#allocation6 + $0x418] sm:$0xf]  ;;  %v7378_v48 = vor.u32 %v9086_v37, %v7377_v34  ;;  %3130 = vmatpush.bf16.msrb.mxu2 %v6674_v39  ;;  %3092 = vmatpush.bf16.msra.mxu1 %v5874_v40  ;;  %v8738_v37 = vld [vmem:[#allocation6 + $0x11c] sm:$0xf] }
 0x1b2   :  { %v8838_v9 = vld [vmem:[#allocation6 + $0x434] sm:$0xf0]  ;;  %3106 = vmatmul.bf16.vlgmr.msra.gmra.mxu3 %v9768_v8  ;;  %v6003_v39 = vld [vmem:[#allocation6 + $0x138] sm:$0xf0] }
 0x1b3   :  { %v6641_v41 = vld [vmem:[#allocation6 + $0x618] sm:$0xf]  ;;  %v6386_v55 = vor.u32 %v8838_v9, %v6385_v60  ;;  %3150 = vmatpush.bf16.msrb.mxu3 %v7378_v48  ;;  %v5971_v48 = vld [vmem:[#allocation6 + $0xf8] sm:$0xf0] }
 0x1b4   :  { %v8902_v17 = vld [vmem:[#allocation6 + $0x634] sm:$0xf0]  ;;  %3093 = vmatmul.bf16.vlgmr.msra.gmra.mxu1 %v9762_v56  ;;  %v5974_v5 = vor.u32 %v8730_v22, %v5971_v48  ;;  %v8786_v20 = vld [vmem:[#allocation6 + $0x29c] sm:$0xf] }
 0x1b5   :  { %v7409_v45 = vld [vmem:[#allocation6 + $0xc18] sm:$0xf]  ;;  %v6642_v61 = vor.u32 %v8902_v17, %v6641_v41  ;;  %3137 = vmatpush.bf16.msrb.mxu1 %v7122_v43  ;;  %3118 = vmatpush.bf16.msrb.mxu0 %v6386_v55  ;;  %v6294_v41 = vor.u32 %v8810_v29, %v6291_v30  ;;  %v8802_v43 = vld [vmem:[#allocation6 + $0x31c] sm:$0xf]  ;;  %v2849_v63 = vpop.f32.mrf.mxu1 }
 0x1b6   :  { %v9094_v1 = vld [vmem:[#allocation6 + $0xc34] sm:$0xf0]  ;;  %v6262_v55 = vor.u32 %v8802_v43, %v6259_v44  ;;  %v8706_v44 = vld [vmem:[#allocation6 + $0x1c] sm:$0xf] }
 0x1b7   :  { %v7089_v51 = vld [vmem:[#allocation6 + $0x998] sm:$0xf]  ;;  %v7410_v62 = vor.u32 %v9094_v1, %v7409_v45  ;;  %3131 = vmatpush.bf16.msrb.mxu2 %v6642_v61  ;;  %v6006_v45 = vor.u32 %v8738_v37, %v6003_v39  ;;  %v8954_v37 = vld [vmem:[#allocation6 + $0x7dc] sm:$0xf] }
 0x1b8   :  { %v9014_v53 = vld [vmem:[#allocation6 + $0x9b4] sm:$0xf0]  ;;  %3119 = vmatmul.bf16.vlgmr.msrb.gmra.mxu0 %v9760_v52  ;;  %v9018_v48 = vld [vmem:[#allocation6 + $0x9dc] sm:$0xf] }
 0x1b9   :  { %v7345_v57 = vld [vmem:[#allocation6 + $0xb98] sm:$0xf]  ;;  %v7090_v3 = vor.u32 %v9014_v53, %v7089_v51  ;;  %3170 = vmatpush.bf16.msra.mxu0 %v7410_v62  ;;  %v2860_v53 = vpop.f32.mrf.mxu3  ;;  %v6131_v63 = vld [vmem:[#allocation6 + $0x238] sm:$0xf0] }
 0x1ba   :  { %v9078_v59 = vld [vmem:[#allocation6 + $0xbb4] sm:$0xf0]  ;;  %3132 = vmatmul.bf16.vlgmr.msrb.gmra.mxu2 %v9764_v58  ;;  %v2861_v62 = vadd.f32 %v2860_v53, %v2848_v32 }
 0x1bb   :  { %v7346_v6 = vor.u32 %v9078_v59, %v7345_v57  ;;  %v7057_v10 = vld [vmem:[#allocation6 + $0x958] sm:$0xf]  ;;  %3176 = vmatpush.bf16.msra.mxu2 %v6102_v2  ;;  %3138 = vmatpush.bf16.msrb.mxu1 %v7090_v3  ;;  %v2886_v57 = vpop.f32.mrf.mxu0  ;;  %v6227_v2 = vld [vmem:[#allocation6 + $0x2f8] sm:$0xf0]  ;;  %v2873_v3 = vpop.f32.mrf.mxu2 }
 0x1bc   :  { %v9006_v11 = vld [vmem:[#allocation6 + $0x974] sm:$0xf0]  ;;  %v6230_v15 = vor.u32 %v8794_v0, %v6227_v2  ;;  %v9082_v2 = vld [vmem:[#allocation6 + $0xbdc] sm:$0xf] }
 0x1bd   :  { %v7313_v13 = vld [vmem:[#allocation6 + $0xb58] sm:$0xf]  ;;  %v7058_v19 = vor.u32 %v9006_v11, %v7057_v10  ;;  %3151 = vmatpush.bf16.msrb.mxu3 %v7346_v6  ;;  %3189 = vmatpush.bf16.msrb.mxu0 %v6358_v12  ;;  %v2874_v10 = vadd.f32 %v2873_v3, %v2861_v62  ;;  %v5939_v12 = vld [vmem:[#allocation6 + $0xb8] sm:$0xf0] }
 0x1be   :  { %v9070_v14 = vld [vmem:[#allocation6 + $0xb74] sm:$0xf0]  ;;  %v5942_v50 = vor.u32 %v8722_v7, %v5939_v12  ;;  %v8770_v62 = vld [vmem:[#allocation6 + $0x21c] sm:$0xf] }
 0x1bf   :  { %v7314_v21 = vor.u32 %v9070_v14, %v7313_v13  ;;  %v7025_v23 = vld [vmem:[#allocation6 + $0x918] sm:$0xf]  ;;  %3177 = vmatpush.bf16.msra.mxu2 %v6070_v18  ;;  %3139 = vmatpush.bf16.msrb.mxu1 %v7058_v19  ;;  %v9855_v19 = vadd.f32 %v2886_v57, %v2874_v10  ;;  %v6579_v57 = vld [vmem:[#allocation6 + $0x5b8] sm:$0xf0] }
 0x1c0   :  { %v8998_v24 = vld [vmem:[#allocation6 + $0x934] sm:$0xf0]  ;;  %v7379_v3 = vld [vmem:[#allocation6 + $0xbf8] sm:$0xf0] }
 0x1c1   :  { %v7281_v26 = vld [vmem:[#allocation6 + $0xb18] sm:$0xf]  ;;  %v7026_v34 = vor.u32 %v8998_v24, %v7025_v23  ;;  %3152 = vmatpush.bf16.msrb.mxu3 %v7314_v21  ;;  %3190 = vmatpush.bf16.msrb.mxu0 %v6326_v25  ;;  %v6195_v21 = vld [vmem:[#allocation6 + $0x2b8] sm:$0xf0] }
 0x1c2   :  { %v9062_v27 = vld [vmem:[#allocation6 + $0xb34] sm:$0xf0]  ;;  %v8714_v24 = vld [vmem:[#allocation6 + $0x5c] sm:$0xf]  ;;  %v6198_v32 = vor.u32 %v8786_v20, %v6195_v21 }
 0x1c3   :  { %v7282_v60 = vor.u32 %v9062_v27, %v7281_v26  ;;  %v6993_v40 = vld [vmem:[#allocation6 + $0x8d8] sm:$0xf]  ;;  %3178 = vmatpush.bf16.msra.mxu2 %v6038_v33  ;;  %3140 = vmatpush.bf16.msrb.mxu1 %v7026_v34  ;;  %v5907_v25 = vld [vmem:[#allocation6 + $0x78] sm:$0xf0]  ;;  %v2888_v39 = vpop.f32.mrf.mxu0 }
 0x1c4   :  { %v8990_v9 = vld [vmem:[#allocation6 + $0x8f4] sm:$0xf0]  ;;  %v8890_v33 = vld [vmem:[#allocation6 + $0x5dc] sm:$0xf] }
 0x1c5   :  { %v7249_v17 = vld [vmem:[#allocation6 + $0xad8] sm:$0xf]  ;;  %v6994_v1 = vor.u32 %v8990_v9, %v6993_v40  ;;  %3153 = vmatpush.bf16.msrb.mxu3 %v7282_v60  ;;  %3191 = vmatpush.bf16.msrb.mxu0 %v6294_v41  ;;  %v6611_v34 = vld [vmem:[#allocation6 + $0x5f8] sm:$0xf0]  ;;  %v2862_v60 = vpop.f32.mrf.mxu3  ;;  %v9859_v40 = vpop.f32.mrf.mxu1 }
 0x1c6   :  { %v9054_v42 = vld [vmem:[#allocation6 + $0xaf4] sm:$0xf0]  ;;  %v6867_v9 = vld [vmem:[#allocation6 + $0x7f8] sm:$0xf0]  ;;  %v6614_v22 = vor.u32 %v8890_v33, %v6611_v34 }
 0x1c7   :  { %v7250_v47 = vor.u32 %v9054_v42, %v7249_v17  ;;  %v6961_v49 = vld [vmem:[#allocation6 + $0x898] sm:$0xf]  ;;  %3179 = vmatpush.bf16.msra.mxu2 %v6006_v45  ;;  %3141 = vmatpush.bf16.msrb.mxu1 %v6994_v1  ;;  %v8778_v41 = vld [vmem:[#allocation6 + $0x25c] sm:$0xf]  ;;  %v5910_v42 = vor.u32 %v8714_v24, %v5907_v25  ;;  %v2875_v45 = vpop.f32.mrf.mxu2 }
 0x1c8   :  { %v8982_v51 = vld [vmem:[#allocation6 + $0x8b4] sm:$0xf0]  ;;  %7421 = vmatmul.msk.bf16.vlgmr.msra.gmra.mxu0 %vm2535_vm0, %v9772_v46  ;;  %v6163_v17 = vld [vmem:[#allocation6 + $0x278] sm:$0xf0] }
 0x1c9   :  { %v7217_v59 = vld [vmem:[#allocation6 + $0xa98] sm:$0xf]  ;;  %v6962_v6 = vor.u32 %v8982_v51, %v6961_v49  ;;  %3154 = vmatpush.bf16.msrb.mxu3 %v7250_v47  ;;  %3192 = vmatpush.bf16.msrb.mxu0 %v6262_v55  ;;  %v5875_v47 = vld [vmem:[#allocation6 + $0x38] sm:$0xf0]  ;;  %v6870_v51 = vor.u32 %v8954_v37, %v6867_v9  ;;  %v6166_v53 = vor.u32 %v8778_v41, %v6163_v17 }
 0x1ca   :  { %v9046_v61 = vld [vmem:[#allocation6 + $0xab4] sm:$0xf0]  ;;  %v7123_v49 = vld [vmem:[#allocation6 + $0x9f8] sm:$0xf0]  ;;  %v5878_v0 = vor.u32 %v8706_v44, %v5875_v47 }
 0x1cb   :  { %v7218_v11 = vor.u32 %v9046_v61, %v7217_v59  ;;  %v6929_v13 = vld [vmem:[#allocation6 + $0x858] sm:$0xf]  ;;  %3180 = vmatpush.bf16.msra.mxu2 %v5974_v5  ;;  %3142 = vmatpush.bf16.msrb.mxu1 %v6962_v6  ;;  %v8882_v55 = vld [vmem:[#allocation6 + $0x59c] sm:$0xf]  ;;  %v7126_v5 = vor.u32 %v9018_v48, %v7123_v49 }
 0x1cc   :  { %v8974_v14 = vld [vmem:[#allocation6 + $0x874] sm:$0xf0]  ;;  %v8946_v59 = vld [vmem:[#allocation6 + $0x79c] sm:$0xf]  ;;  %v6582_v6 = vor.u32 %v8882_v55, %v6579_v57 }
 0x1cd   :  { %v7185_v16 = vld [vmem:[#allocation6 + $0xa58] sm:$0xf]  ;;  %v6930_v23 = vor.u32 %v8974_v14, %v6929_v13  ;;  %3155 = vmatpush.bf16.msrb.mxu3 %v7218_v11  ;;  %3193 = vmatpush.bf16.msrb.mxu0 %v6230_v15  ;;  %v6835_v61 = vld [vmem:[#allocation6 + $0x7b8] sm:$0xf0]  ;;  %v6134_v11 = vor.u32 %v8770_v62, %v6131_v63  ;;  %v7382_v15 = vor.u32 %v9082_v2, %v7379_v3  ;;  %v2901_v20 = vpop.f32.mrf.mxu1  ;;  %v9867_v63 = vpop.f32.mrf.mxu0 }
 0x1ce   :  { %v9038_v18 = vld [vmem:[#allocation6 + $0xa74] sm:$0xf0]  ;;  %v9010_v7 = vld [vmem:[#allocation6 + $0x99c] sm:$0xf]  ;;  %v6838_v10 = vor.u32 %v8946_v59, %v6835_v61 }
 0x1cf   :  { %v6897_v26 = vld [vmem:[#allocation6 + $0x818] sm:$0xf]  ;;  %v7186_v27 = vor.u32 %v9038_v18, %v7185_v16  ;;  %3181 = vmatpush.bf16.msra.mxu2 %v5942_v50  ;;  %3143 = vmatpush.bf16.msrb.mxu1 %v6930_v23  ;;  %v7091_v12 = vld [vmem:[#allocation6 + $0x9b8] sm:$0xf0] }
 0x1d0   :  { %v8966_v28 = vld [vmem:[#allocation6 + $0x834] sm:$0xf0]  ;;  %v8874_v13 = vld [vmem:[#allocation6 + $0x55c] sm:$0xf]  ;;  %v7094_v23 = vor.u32 %v9010_v7, %v7091_v12 }
 0x1d1   :  { %v7153_v29 = vld [vmem:[#allocation6 + $0xa18] sm:$0xf]  ;;  %v6898_v43 = vor.u32 %v8966_v28, %v6897_v26  ;;  %3156 = vmatpush.bf16.msrb.mxu3 %v7186_v27  ;;  %3194 = vmatpush.bf16.msrb.mxu0 %v6198_v32  ;;  %v6547_v14 = vld [vmem:[#allocation6 + $0x578] sm:$0xf0] }
 0x1d2   :  { %v9030_v30 = vld [vmem:[#allocation6 + $0xa34] sm:$0xf0]  ;;  %v8938_v16 = vld [vmem:[#allocation6 + $0x75c] sm:$0xf]  ;;  %v6550_v24 = vor.u32 %v8874_v13, %v6547_v14 }
 0x1d3   :  { %v7154_v1 = vor.u32 %v9030_v30, %v7153_v29  ;;  %3182 = vmatpush.bf16.msra.mxu2 %v5910_v42  ;;  %3144 = vmatpush.bf16.msrb.mxu1 %v6898_v43  ;;  %v6803_v18 = vld [vmem:[#allocation6 + $0x778] sm:$0xf0] }
 0x1d4   :  { %v9074_v21 = vld [vmem:[#allocation6 + $0xb9c] sm:$0xf]  ;;  %v6806_v26 = vor.u32 %v8938_v16, %v6803_v18 }
 0x1d5   :  { %3157 = vmatpush.bf16.msrb.mxu3 %v7154_v1  ;;  %3195 = vmatpush.bf16.msrb.mxu0 %v6166_v53  ;;  %v7347_v50 = vld [vmem:[#allocation6 + $0xbb8] sm:$0xf0] }
 0x1d6   :  { %3145 = vmatmul.bf16.vlgmr.msrb.gmra.mxu1 %v9776_v31  ;;  %v9002_v25 = vld [vmem:[#allocation6 + $0x95c] sm:$0xf]  ;;  %v7350_v30 = vor.u32 %v9074_v21, %v7347_v50 }
 0x1d7   :  { %3202 = vmatpush.bf16.msra.mxu1 %v6614_v22  ;;  %3183 = vmatpush.bf16.msra.mxu2 %v5878_v0  ;;  %v7059_v27 = vld [vmem:[#allocation6 + $0x978] sm:$0xf0]  ;;  %v9865_v22 = vpop.f32.mrf.mxu1  ;;  %v9869_v0 = vpop.f32.mrf.mxu3 }
 0x1d8   :  { %3158 = vmatmul.bf16.vlgmr.msrb.gmra.mxu3 %v9778_v36  ;;  %v8866_v28 = vld [vmem:[#allocation6 + $0x51c] sm:$0xf]  ;;  %v7062_v60 = vor.u32 %v9002_v25, %v7059_v27 }
 0x1d9   :  { %3215 = vmatpush.bf16.msra.mxu3 %v6870_v51  ;;  %3196 = vmatpush.bf16.msrb.mxu0 %v6134_v11  ;;  %v6515_v29 = vld [vmem:[#allocation6 + $0x538] sm:$0xf0] }
 0x1da   :  { %v8930_v32 = vld [vmem:[#allocation6 + $0x71c] sm:$0xf]  ;;  %3184 = vmatmul.bf16.vlgmr.msra.gmra.mxu2 %v9762_v56  ;;  %v6518_v39 = vor.u32 %v8866_v28, %v6515_v29 }
 0x1db   :  { %3228 = vmatpush.bf16.msrb.mxu2 %v7126_v5  ;;  %3203 = vmatpush.bf16.msra.mxu1 %v6582_v6  ;;  %v6771_v33 = vld [vmem:[#allocation6 + $0x738] sm:$0xf0] }
 0x1dc   :  { %v9066_v34 = vld [vmem:[#allocation6 + $0xb5c] sm:$0xf]  ;;  %v6774_v41 = vor.u32 %v8930_v32, %v6771_v33  ;;  %3197 = vmatmul.bf16.vlgmr.msrb.gmra.mxu0 %v9768_v8 }
 0x1dd   :  { %3216 = vmatpush.bf16.msra.mxu3 %v6838_v10  ;;  %3241 = vmatpush.bf16.msra.mxu0 %v7382_v15  ;;  %v7315_v37 = vld [vmem:[#allocation6 + $0xb78] sm:$0xf0]  ;;  %v9871_v10 = vpop.f32.mrf.mxu2 }
 0x1de   :  { %v8994_v9 = vld [vmem:[#allocation6 + $0x91c] sm:$0xf]  ;;  %v7318_v44 = vor.u32 %v9066_v34, %v7315_v37  ;;  %v7537_v34 = vld [vmem:[#allocation9 + $0xe0] sm:$0xf] }
 0x1df   :  { %3229 = vmatpush.bf16.msrb.mxu2 %v7094_v23  ;;  %3204 = vmatpush.bf16.msra.mxu1 %v6550_v24  ;;  %v7027_v17 = vld [vmem:[#allocation6 + $0x938] sm:$0xf0]  ;;  %v2927_v20 = vpop.f32.mrf.mxu1 }
 0x1e0   :  { %v8858_v42 = vld [vmem:[#allocation6 + $0x4dc] sm:$0xf]  ;;  %v7030_v48 = vor.u32 %v8994_v9, %v7027_v17  ;;  %v9125_v9 = vld [vmem:[#allocation9 + $0xec] sm:$0xf0] }
 0x1e1   :  { %3217 = vmatpush.bf16.msra.mxu3 %v6806_v26  ;;  %v6483_v43 = vld [vmem:[#allocation6 + $0x4f8] sm:$0xf0]  ;;  %3242 = vmatpush.bf16.msra.mxu0 %v7350_v30 }
 0x1e2   :  { %v8922_v45 = vld [vmem:[#allocation6 + $0x6dc] sm:$0xf]  ;;  %v6486_v49 = vor.u32 %v8858_v42, %v6483_v43  ;;  %v2914_v42 = vpop.f32.mrf.mxu3 }
 0x1e3   :  { %v6739_v1 = vld [vmem:[#allocation6 + $0x6f8] sm:$0xf0]  ;;  %3230 = vmatpush.bf16.msrb.mxu2 %v7062_v60  ;;  %3205 = vmatpush.bf16.msra.mxu1 %v6518_v39  ;;  %v2953_v39 = vpop.f32.mrf.mxu0  ;;  %v9145_v42 = vld [vmem:[#allocation9 + $0x18c] sm:$0xf0] }
 0x1e4   :  { %v9058_v56 = vld [vmem:[#allocation6 + $0xb1c] sm:$0xf]  ;;  %v6742_v53 = vor.u32 %v8922_v45, %v6739_v1 }
 0x1e5   :  { %v7283_v47 = vld [vmem:[#allocation6 + $0xb38] sm:$0xf0]  ;;  %3218 = vmatpush.bf16.msra.mxu3 %v6774_v41  ;;  %3243 = vmatpush.bf16.msra.mxu0 %v7318_v44  ;;  %v2940_v1 = vpop.f32.mrf.mxu2 }
 0x1e6   :  { %v8986_v51 = vld [vmem:[#allocation6 + $0x8dc] sm:$0xf]  ;;  %v7286_v8 = vor.u32 %v9058_v56, %v7283_v47  ;;  %v9109_v1 = vld [vmem:[#allocation9 + $0x6c] sm:$0xf0] }
 0x1e7   :  { %v6995_v55 = vld [vmem:[#allocation6 + $0x8f8] sm:$0xf0]  ;;  %3231 = vmatpush.bf16.msrb.mxu2 %v7030_v48  ;;  %3206 = vmatpush.bf16.msra.mxu1 %v6486_v49  ;;  %v7665_v49 = vld [vmem:[#allocation9 + $0x1e0] sm:$0xf] }
 0x1e8   :  { %v8850_v57 = vld [vmem:[#allocation6 + $0x49c] sm:$0xf]  ;;  %v6998_v5 = vor.u32 %v8986_v51, %v6995_v55  ;;  %v9157_v51 = vld [vmem:[#allocation9 + $0x1ec] sm:$0xf0] }
 0x1e9   :  { %v6451_v59 = vld [vmem:[#allocation6 + $0x4b8] sm:$0xf0]  ;;  %3219 = vmatpush.bf16.msra.mxu3 %v6742_v53  ;;  %3244 = vmatpush.bf16.msra.mxu0 %v7286_v8  ;;  %v7538_v53 = vor.u32 %v9125_v9, %v7537_v34  ;;  %v7521_v8 = vld [vmem:[#allocation9 + $0xc0] sm:$0xf]  ;;  %v9113_v34 = vld [vmem:[#allocation9 + $0x8c] sm:$0xf0] }
 0x1ea   :  { %v8914_v61 = vld [vmem:[#allocation6 + $0x69c] sm:$0xf]  ;;  %v6454_v6 = vor.u32 %v8850_v57, %v6451_v59  ;;  %v7793_v57 = vld [vmem:[#allocation9 + $0x2e0] sm:$0xf]  ;;  %v9189_v59 = vld [vmem:[#allocation9 + $0x2ec] sm:$0xf0] }
 0x1eb   :  { %v6707_v62 = vld [vmem:[#allocation6 + $0x6b8] sm:$0xf0]  ;;  %3232 = vmatpush.bf16.msrb.mxu2 %v6998_v5  ;;  %v7921_v5 = vld [vmem:[#allocation9 + $0x3e0] sm:$0xf] }
 0x1ec   :  { %v9050_v2 = vld [vmem:[#allocation6 + $0xadc] sm:$0xf]  ;;  %v6710_v11 = vor.u32 %v8914_v61, %v6707_v62  ;;  %3207 = vmatpush.bf16.msra.mxu1 %v6454_v6  ;;  %v9121_v61 = vld [vmem:[#allocation9 + $0xcc] sm:$0xf0] }
 0x1ed   :  { %v7251_v3 = vld [vmem:[#allocation6 + $0xaf8] sm:$0xf0]  ;;  %v9221_v6 = vld [vmem:[#allocation9 + $0x3ec] sm:$0xf0] }
 0x1ee   :  { %v8978_v7 = vld [vmem:[#allocation6 + $0x89c] sm:$0xf]  ;;  %v7254_v15 = vor.u32 %v9050_v2, %v7251_v3  ;;  %3220 = vmatpush.bf16.msra.mxu3 %v6710_v11  ;;  %v7794_v11 = vor.u32 %v9189_v59, %v7793_v57  ;;  %v7922_v20 = vor.u32 %v9221_v6, %v7921_v5  ;;  %v7729_v57 = vld [vmem:[#allocation9 + $0x260] sm:$0xf]  ;;  %v9173_v59 = vld [vmem:[#allocation9 + $0x26c] sm:$0xf0] }
 0x1ef   :  { %v6963_v12 = vld [vmem:[#allocation6 + $0x8b8] sm:$0xf0]  ;;  %v7857_v5 = vld [vmem:[#allocation9 + $0x360] sm:$0xf]  ;;  %v9205_v6 = vld [vmem:[#allocation9 + $0x36c] sm:$0xf0] }
 0x1f0   :  { %v8842_v13 = vld [vmem:[#allocation6 + $0x45c] sm:$0xf]  ;;  %v6966_v23 = vor.u32 %v8978_v7, %v6963_v12  ;;  %3245 = vmatpush.bf16.msra.mxu0 %v7254_v15  ;;  %v7666_v7 = vor.u32 %v9157_v51, %v7665_v49  ;;  %v7649_v12 = vld [vmem:[#allocation9 + $0x1c0] sm:$0xf]  ;;  %v9153_v15 = vld [vmem:[#allocation9 + $0x1cc] sm:$0xf0] }
 0x1f1   :  { %v6419_v14 = vld [vmem:[#allocation6 + $0x478] sm:$0xf0]  ;;  %v7601_v51 = vld [vmem:[#allocation9 + $0x160] sm:$0xf] }
 0x1f2   :  { %v8906_v16 = vld [vmem:[#allocation6 + $0x65c] sm:$0xf]  ;;  %v6422_v24 = vor.u32 %v8842_v13, %v6419_v14  ;;  %3233 = vmatpush.bf16.msrb.mxu2 %v6966_v23  ;;  %v7522_v13 = vor.u32 %v9121_v61, %v7521_v8  ;;  %v7905_v23 = vld [vmem:[#allocation9 + $0x3c0] sm:$0xf]  ;;  %v9879_v8 = vpop.f32.mrf.mxu3  ;;  %v9881_v61 = vpop.f32.mrf.mxu1 }
 0x1f3   :  { %v6675_v18 = vld [vmem:[#allocation6 + $0x678] sm:$0xf0] }
 0x1f4   :  { %v9042_v21 = vld [vmem:[#allocation6 + $0xa9c] sm:$0xf]  ;;  %v6678_v28 = vor.u32 %v8906_v16, %v6675_v18  ;;  %3208 = vmatpush.bf16.msra.mxu1 %v6422_v24  ;;  %v7777_v16 = vld [vmem:[#allocation9 + $0x2c0] sm:$0xf]  ;;  %v9185_v18 = vld [vmem:[#allocation9 + $0x2cc] sm:$0xf0] }
 0x1f5   :  { %v7219_v50 = vld [vmem:[#allocation6 + $0xab8] sm:$0xf0]  ;;  %v9217_v24 = vld [vmem:[#allocation9 + $0x3cc] sm:$0xf0] }
 0x1f6   :  { %v8970_v25 = vld [vmem:[#allocation6 + $0x85c] sm:$0xf]  ;;  %v7222_v33 = vor.u32 %v9042_v21, %v7219_v50  ;;  %3221 = vmatpush.bf16.msra.mxu3 %v6678_v28  ;;  %v7505_v21 = vld [vmem:[#allocation9 + $0xa0] sm:$0xf]  ;;  %v9117_v50 = vld [vmem:[#allocation9 + $0xac] sm:$0xf0]  ;;  %v9875_v28 = vpop.f32.mrf.mxu2 }
 0x1f7   :  { %v6931_v26 = vld [vmem:[#allocation6 + $0x878] sm:$0xf0] }
 0x1f8   :  { %v8834_v27 = vld [vmem:[#allocation6 + $0x41c] sm:$0xf]  ;;  %v6934_v43 = vor.u32 %v8970_v25, %v6931_v26  ;;  %3246 = vmatpush.bf16.msra.mxu0 %v7222_v33  ;;  %v7650_v25 = vor.u32 %v9153_v15, %v7649_v12  ;;  %v7778_v26 = vor.u32 %v9185_v18, %v7777_v16  ;;  %v7489_v33 = vld [vmem:[#allocation9 + $0x80] sm:$0xf]  ;;  %v9137_v16 = vld [vmem:[#allocation9 + $0x14c] sm:$0xf0] }
 0x1f9   :  { %v6387_v29 = vld [vmem:[#allocation6 + $0x438] sm:$0xf0]  ;;  %v7713_v18 = vld [vmem:[#allocation9 + $0x240] sm:$0xf] }
 0x1fa   :  { %v8898_v30 = vld [vmem:[#allocation6 + $0x61c] sm:$0xf]  ;;  %v6390_v44 = vor.u32 %v8834_v27, %v6387_v29  ;;  %3234 = vmatpush.bf16.msrb.mxu2 %v6934_v43  ;;  %v7633_v27 = vld [vmem:[#allocation9 + $0x1a0] sm:$0xf]  ;;  %v7506_v29 = vor.u32 %v9117_v50, %v7505_v21  ;;  %v3268_v21 = vmul.f32 0.2, %v9824_v35  ;;  %v7858_v50 = vor.u32 %v9205_v6, %v7857_v5 }
 0x1fb   :  { %v6643_v32 = vld [vmem:[#allocation6 + $0x638] sm:$0xf0]  ;;  %v7745_v43 = vld [vmem:[#allocation9 + $0x280] sm:$0xf]  ;;  %v9193_v5 = vld [vmem:[#allocation9 + $0x30c] sm:$0xf0] }
 0x1fc   :  { %v9090_v37 = vld [vmem:[#allocation6 + $0xc1c] sm:$0xf]  ;;  %v6646_v56 = vor.u32 %v8898_v30, %v6643_v32  ;;  %3209 = vmatpush.bf16.msra.mxu1 %v6390_v44  ;;  %v9149_v30 = vld [vmem:[#allocation9 + $0x1ac] sm:$0xf0] }
 0x1fd   :  { %v7411_v60 = vld [vmem:[#allocation6 + $0xc38] sm:$0xf0]  ;;  %v9181_v32 = vld [vmem:[#allocation9 + $0x2ac] sm:$0xf0]  ;;  %v7634_v39 = vor.u32 %v9149_v30, %v7633_v27  ;;  %v563_v30 = vperm.slane %v9840_v54, 4 }
 0x1fe   :  { %v9034_v41 = vld [vmem:[#allocation6 + $0xa5c] sm:$0xf]  ;;  %v7414_v48 = vor.u32 %v9090_v37, %v7411_v60  ;;  %3222 = vmatpush.bf16.msra.mxu3 %v6646_v56  ;;  %v7889_v37 = vld [vmem:[#allocation9 + $0x3a0] sm:$0xf]  ;;  %v9213_v60 = vld [vmem:[#allocation9 + $0x3ac] sm:$0xf0] }
 0x1ff   :  { %v7187_v17 = vld [vmem:[#allocation6 + $0xa78] sm:$0xf0]  ;;  %3210 = vmatmul.bf16.vlgmr.msra.gmra.mxu1 %v9760_v52  ;;  %v7761_v52 = vld [vmem:[#allocation9 + $0x2a0] sm:$0xf]  ;;  %v9177_v44 = vld [vmem:[#allocation9 + $0x28c] sm:$0xf0] }
 0x200   :  { %v8962_v45 = vld [vmem:[#allocation6 + $0x81c] sm:$0xf]  ;;  %v7190_v55 = vor.u32 %v9034_v41, %v7187_v17  ;;  %3261 = vmatpush.bf16.msrb.mxu1 %v7414_v48  ;;  %v7762_v9 = vor.u32 %v9181_v32, %v7761_v52  ;;  %v7617_v41 = vld [vmem:[#allocation9 + $0x180] sm:$0xf]  ;;  %v7490_v17 = vor.u32 %v9113_v34, %v7489_v33  ;;  %v7746_v49 = vor.u32 %v9177_v44, %v7745_v43  ;;  %v9201_v27 = vld [vmem:[#allocation9 + $0x34c] sm:$0xf0] }
 0x201   :  { %v6899_v47 = vld [vmem:[#allocation6 + $0x838] sm:$0xf0]  ;;  %3223 = vmatmul.bf16.vlgmr.msra.gmra.mxu3 %v9764_v58  ;;  %v7906_v58 = vor.u32 %v9217_v24, %v7905_v23  ;;  %v7873_v56 = vld [vmem:[#allocation9 + $0x380] sm:$0xf]  ;;  %v7618_v48 = vor.u32 %v9145_v42, %v7617_v41  ;;  %v9101_v24 = vld [vmem:[#allocation9 + $0x2c] sm:$0xf0] }
 0x202   :  { %v9026_v62 = vld [vmem:[#allocation6 + $0xa1c] sm:$0xf]  ;;  %v6902_v3 = vor.u32 %v8962_v45, %v6899_v47  ;;  %4837 = vmatpush.bf16.msrb.mxu3 %v7538_v53  ;;  %3247 = vmatpush.bf16.msra.mxu0 %v7190_v55  ;;  %v7473_v45 = vld [vmem:[#allocation9 + $0x60] sm:$0xf]  ;;  %v9209_v47 = vld [vmem:[#allocation9 + $0x38c] sm:$0xf0]  ;;  %v2992_v53 = vpop.f32.mrf.mxu2 }
 0x203   :  { %v7155_v2 = vld [vmem:[#allocation6 + $0xa38] sm:$0xf0]  ;;  %v7474_v55 = vor.u32 %v9109_v1, %v7473_v45  ;;  %v7441_v23 = vld [vmem:[#allocation9 + $0x20] sm:$0xf]  ;;  %v9133_v33 = vld [vmem:[#allocation9 + $0x12c] sm:$0xf0]  ;;  %v2913_v45 = vadd.f32 %v9869_v0, %v563_v30 }
 0x204   :  { %v7158_v14 = vor.u32 %v9026_v62, %v7155_v2  ;;  %3235 = vmatpush.bf16.msrb.mxu2 %v6902_v3  ;;  %4850 = vmatpush.bf16.msra.mxu1 %v7666_v7  ;;  %v7874_v62 = vor.u32 %v9209_v47, %v7873_v56  ;;  %v7457_v2 = vld [vmem:[#allocation9 + $0x40] sm:$0xf]  ;;  %v9105_v3 = vld [vmem:[#allocation9 + $0x4c] sm:$0xf0]  ;;  %v9883_v7 = vpop.f32.mrf.mxu0 }
 0x205   :  { %v7458_v15 = vor.u32 %v9105_v3, %v7457_v2  ;;  %v7697_v34 = vld [vmem:[#allocation9 + $0x220] sm:$0xf]  ;;  %v9097_v41 = vld [vmem:[#allocation9 + $0xc] sm:$0xf0]  ;;  %v2926_v6 = vadd.f32 %v9865_v22, %v2913_v45 }
 0x206   :  { %4838 = vmatpush.bf16.msrb.mxu3 %v7522_v13  ;;  %3248 = vmatpush.bf16.msra.mxu0 %v7158_v14  ;;  %v7730_v13 = vor.u32 %v9173_v59, %v7729_v57  ;;  %v7585_v14 = vld [vmem:[#allocation9 + $0x140] sm:$0xf]  ;;  %v9253_v54 = vld [vmem:[#allocation9 + $0x4ec] sm:$0xf0] }
 0x207   :  { %3236 = vmatmul.bf16.vlgmr.msrb.gmra.mxu2 %v9776_v31  ;;  %v7890_v31 = vor.u32 %v9213_v60, %v7889_v37  ;;  %v7586_v52 = vor.u32 %v9137_v16, %v7585_v14  ;;  %v9165_v37 = vld [vmem:[#allocation9 + $0x22c] sm:$0xf0]  ;;  %v7825_v42 = vld [vmem:[#allocation9 + $0x320] sm:$0xf]  ;;  %v3276_v14 = vmax.f32 %v9824_v35, %v3268_v21 }
 0x208   :  { %4863 = vmatpush.bf16.msra.mxu2 %v7794_v11  ;;  %4851 = vmatpush.bf16.msra.mxu1 %v7650_v25  ;;  %v3267_v11 = vmul.f32 0.2, %v9810_v38  ;;  %v3269_v25 = vmul.f32 0.2, %v9846_v4  ;;  %v9197_v43 = vld [vmem:[#allocation9 + $0x32c] sm:$0xf0]  ;;  %v7698_v56 = vor.u32 %v9165_v37, %v7697_v34 }
 0x209   :  { %3249 = vmatmul.bf16.vlgmr.msra.gmra.mxu0 %v9778_v36  ;;  %v9141_v36 = vld [vmem:[#allocation9 + $0x16c] sm:$0xf0]  ;;  %v7553_v47 = vld [vmem:[#allocation9 + $0x100] sm:$0xf]  ;;  %v7826_v57 = vor.u32 %v9197_v43, %v7825_v42 }
 0x20a   :  { %4876 = vmatpush.bf16.msrb.mxu0 %v7922_v20  ;;  %4839 = vmatpush.bf16.msrb.mxu3 %v7506_v29  ;;  %v7602_v12 = vor.u32 %v9141_v36, %v7601_v51  ;;  %v9169_v20 = vld [vmem:[#allocation9 + $0x24c] sm:$0xf0]  ;;  %v9892_v29 = vadd.f32 %v9859_v40, %v9855_v19  ;;  %v9895_v60 = vpop.f32.mrf.mxu2  ;;  %v8049_v19 = vld [vmem:[#allocation9 + $0x4e0] sm:$0xf]  ;;  %v2966_v40 = vpop.f32.mrf.mxu3 }
 0x20b   :  { %v7714_v32 = vor.u32 %v9169_v20, %v7713_v18  ;;  %v9129_v51 = vld [vmem:[#allocation9 + $0x10c] sm:$0xf0]  ;;  %v7681_v53 = vld [vmem:[#allocation9 + $0x200] sm:$0xf]  ;;  %v8050_v36 = vor.u32 %v9253_v54, %v8049_v19  ;;  %v3277_v20 = vmax.f32 %v9846_v4, %v3269_v25 }
 0x20c   :  { %4864 = vmatpush.bf16.msra.mxu2 %v7778_v26  ;;  %4852 = vmatpush.bf16.msra.mxu1 %v7634_v39  ;;  %v7841_v26 = vld [vmem:[#allocation9 + $0x340] sm:$0xf]  ;;  %v3005_v44 = vpop.f32.mrf.mxu0  ;;  %v9249_v3 = vld [vmem:[#allocation9 + $0x4cc] sm:$0xf0] }
 0x20d   :  { %v7842_v39 = vor.u32 %v9201_v27, %v7841_v26  ;;  %v8177_v59 = vld [vmem:[#allocation9 + $0x5e0] sm:$0xf]  ;;  %v9245_v30 = vld [vmem:[#allocation9 + $0x4ac] sm:$0xf0]  ;;  %v9910_v25 = vpack.c.bf16 %v3277_v20, %v3277_v20 }
 0x20e   :  { %4877 = vmatpush.bf16.msrb.mxu0 %v7906_v58  ;;  %4840 = vmatpush.bf16.msrb.mxu3 %v7490_v17  ;;  %v7569_v58 = vld [vmem:[#allocation9 + $0x120] sm:$0xf]  ;;  %v2979_v17 = vpop.f32.mrf.mxu1  ;;  %v9313_v21 = vld [vmem:[#allocation9 + $0x6cc] sm:$0xf0] }
 0x20f   :  { %7422 = vmatmul.msk.bf16.vlgmr.msrb.gmra.mxu1 %vm2535_vm0, %v9772_v46  ;;  %v7442_v46 = vor.u32 %v9101_v24, %v7441_v23  ;;  %v7570_v1 = vor.u32 %v9133_v33, %v7569_v58  ;;  %v8033_v2 = vld [vmem:[#allocation9 + $0x4c0] sm:$0xf]  ;;  %v9281_v24 = vld [vmem:[#allocation9 + $0x5cc] sm:$0xf0]  ;;  %v9908_v58 = vpack.c.bf16 %v3276_v14, %v3276_v14 }
 0x210   :  { %4865 = vmatpush.bf16.msra.mxu2 %v7762_v9  ;;  %4853 = vmatpush.bf16.msra.mxu1 %v7618_v48  ;;  %v7425_v9 = vld [vmem:[#allocation9] sm:$0xf]  ;;  %v3275_v48 = vmax.f32 %v9810_v38, %v3267_v11  ;;  %v9317_v11 = vld [vmem:[#allocation9 + $0x6ec] sm:$0xf0] }
 0x211   :  { %v7809_v0 = vld [vmem:[#allocation9 + $0x300] sm:$0xf]  ;;  %v9277_v34 = vld [vmem:[#allocation9 + $0x5ac] sm:$0xf0] }
 0x212   :  { %4878 = vmatpush.bf16.msrb.mxu0 %v7890_v31  ;;  %4841 = vmatpush.bf16.msrb.mxu3 %v7474_v55  ;;  %v3270_v31 = vmul.f32 0.2, %v9892_v29  ;;  %v9161_v55 = vld [vmem:[#allocation9 + $0x20c] sm:$0xf0]  ;;  %v8305_v38 = vld [vmem:[#allocation9 + $0x6e0] sm:$0xf]  ;;  %v3018_v18 = vpop.f32.mrf.mxu2  ;;  %v7810_v23 = vor.u32 %v9193_v5, %v7809_v0 }
 0x213   :  { %v8161_v22 = vld [vmem:[#allocation9 + $0x5c0] sm:$0xf]  ;;  %v9309_v17 = vld [vmem:[#allocation9 + $0x6ac] sm:$0xf0] }
 0x214   :  { %4866 = vmatpush.bf16.msra.mxu2 %v7746_v49  ;;  %4854 = vmatpush.bf16.msra.mxu1 %v7602_v12  ;;  %v7426_v49 = vor.u32 %v9097_v41, %v7425_v9  ;;  %v7554_v12 = vor.u32 %v9129_v51, %v7553_v47  ;;  %v3278_v26 = vmax.f32 %v9892_v29, %v3270_v31  ;;  %v8017_v27 = vld [vmem:[#allocation9 + $0x4a0] sm:$0xf]  ;;  %v9912_v29 = vld [vmem:[#allocation8] sm:$0xff]  ;;  %v9241_v9 = vld [vmem:[#allocation9 + $0x48c] sm:$0xf0] }
 0x215   :  { %v8289_v35 = vld [vmem:[#allocation9 + $0x6c0] sm:$0xf]  ;;  %v8162_v4 = vor.u32 %v9281_v24, %v8161_v22  ;;  %v8018_v33 = vor.u32 %v9245_v30, %v8017_v27  ;;  %v9273_v45 = vld [vmem:[#allocation9 + $0x58c] sm:$0xf0] }
 0x216   :  { %4879 = vmatpush.bf16.msrb.mxu0 %v7874_v62  ;;  %4842 = vmatpush.bf16.msrb.mxu3 %v7458_v15  ;;  %v9285_v62 = vld [vmem:[#allocation9 + $0x5ec] sm:$0xf0]  ;;  %v7682_v15 = vor.u32 %v9161_v55, %v7681_v53  ;;  %v9915_v37 = vpack.c.bf16 %v3278_v26, %v3278_v26  ;;  %v8290_v41 = vor.u32 %v9313_v21, %v8289_v35  ;;  %v8273_v40 = vld [vmem:[#allocation9 + $0x6a0] sm:$0xf]  ;;  %v9123_v35 = vld [vmem:[#allocation9 + $0xe4] sm:$0xf] }
 0x217   :  { %v8178_v16 = vor.u32 %v9285_v62, %v8177_v59  ;;  %v8129_v31 = vld [vmem:[#allocation9 + $0x580] sm:$0xf]  ;;  %v9233_v59 = vld [vmem:[#allocation9 + $0x44c] sm:$0xf0]  ;;  %v3042_v62 = vpop.f32.mrf.mxu1 }
 0x218   :  { %4867 = vmatpush.bf16.msra.mxu2 %v7730_v13  ;;  %4855 = vmatpush.bf16.msra.mxu1 %v7586_v52  ;;  %v9901_v13 = vpack.c.bf16 %v3275_v48, %v3275_v48  ;;  %v8306_v52 = vor.u32 %v9317_v11, %v8305_v38  ;;  %v8257_v47 = vld [vmem:[#allocation9 + $0x680] sm:$0xf]  ;;  %v9305_v48 = vld [vmem:[#allocation9 + $0x68c] sm:$0xf0] }
 0x219   :  { %v8113_v55 = vld [vmem:[#allocation9 + $0x560] sm:$0xf]  ;;  %v9301_v5 = vld [vmem:[#allocation9 + $0x66c] sm:$0xf0] }
 0x21a   :  { %4880 = vmatpush.bf16.msrb.mxu0 %v7858_v50  ;;  %4843 = vmatpush.bf16.msrb.mxu3 %v7442_v46  ;;  %v8034_v50 = vor.u32 %v9249_v3, %v8033_v2  ;;  %v564_v46 = vperm.slane %v9912_v29, 5  ;;  %v8258_v2 = vor.u32 %v9305_v48, %v8257_v47  ;;  %v3055_v3 = vpop.f32.mrf.mxu0  ;;  %v8241_v0 = vld [vmem:[#allocation9 + $0x660] sm:$0xf]  ;;  %v9265_v11 = vld [vmem:[#allocation9 + $0x54c] sm:$0xf0] }
 0x21b   :  { %v8097_v38 = vld [vmem:[#allocation9 + $0x540] sm:$0xf]  ;;  %v9297_v20 = vld [vmem:[#allocation9 + $0x64c] sm:$0xf0]  ;;  %v9187_v48 = vld [vmem:[#allocation9 + $0x2e4] sm:$0xf] }
 0x21c   :  { %4868 = vmatpush.bf16.msra.mxu2 %v7714_v32  ;;  %4856 = vmatpush.bf16.msra.mxu1 %v7570_v1  ;;  %v2939_v32 = vadd.f32 %v9871_v10, %v2926_v6  ;;  %v8145_v10 = vld [vmem:[#allocation9 + $0x5a0] sm:$0xf]  ;;  %v3004_v43 = vadd.f32 %v9883_v7, %v564_v46  ;;  %v9269_v7 = vld [vmem:[#allocation9 + $0x56c] sm:$0xf0]  ;;  %v7539_v46 = vld [vmem:[#allocation9 + $0xf0] sm:$0xf0] }
 0x21d   :  { %v8146_v54 = vor.u32 %v9277_v34, %v8145_v10  ;;  %v7985_v1 = vld [vmem:[#allocation9 + $0x460] sm:$0xf]  ;;  %v8114_v6 = vor.u32 %v9269_v7, %v8113_v55  ;;  %v9293_v34 = vld [vmem:[#allocation9 + $0x62c] sm:$0xf0] }
 0x21e   :  { %4881 = vmatpush.bf16.msrb.mxu0 %v7842_v39  ;;  %4844 = vmatpush.bf16.msrb.mxu3 %v7426_v49  ;;  %v8001_v39 = vld [vmem:[#allocation9 + $0x480] sm:$0xf]  ;;  %v2952_v19 = vadd.f32 %v9867_v63, %v2939_v32  ;;  %v8274_v63 = vor.u32 %v9309_v17, %v8273_v40  ;;  %v8130_v49 = vor.u32 %v9273_v45, %v8129_v31  ;;  %v9225_v32 = vld [vmem:[#allocation9 + $0x40c] sm:$0xf0]  ;;  %v7523_v45 = vld [vmem:[#allocation9 + $0xd0] sm:$0xf0] }
 0x21f   :  { %v8002_v44 = vor.u32 %v9241_v9, %v8001_v39  ;;  %v3017_v53 = vadd.f32 %v9895_v60, %v3004_v43  ;;  %v7953_v14 = vld [vmem:[#allocation9 + $0x420] sm:$0xf]  ;;  %v3044_v21 = vpop.f32.mrf.mxu1  ;;  %v9257_v40 = vld [vmem:[#allocation9 + $0x50c] sm:$0xf0]  ;;  %v7667_v43 = vld [vmem:[#allocation9 + $0x1f0] sm:$0xf0] }
 0x220   :  { %4869 = vmatpush.bf16.msra.mxu2 %v7698_v56  ;;  %4857 = vmatpush.bf16.msra.mxu1 %v7554_v12  ;;  %v2965_v42 = vadd.f32 %v9879_v8, %v2952_v19  ;;  %v9237_v56 = vld [vmem:[#allocation9 + $0x46c] sm:$0xf0]  ;;  %v8225_v18 = vld [vmem:[#allocation9 + $0x640] sm:$0xf]  ;;  %v9143_v21 = vld [vmem:[#allocation9 + $0x184] sm:$0xf] }
 0x221   :  { %4845 = vmatmul.bf16.vlgmr.msrb.gmra.mxu3 %v9901_v13  ;;  %v7986_v8 = vor.u32 %v9237_v56, %v7985_v1  ;;  %v8081_v27 = vld [vmem:[#allocation9 + $0x520] sm:$0xf]  ;;  %v9289_v56 = vld [vmem:[#allocation9 + $0x60c] sm:$0xf0] }
 0x222   :  { %4889 = vmatpush.bf16.msra.mxu3 %v8050_v36  ;;  %4882 = vmatpush.bf16.msrb.mxu0 %v7826_v57  ;;  %v2978_v51 = vadd.f32 %v9881_v61, %v2965_v42  ;;  %v3029_v36 = vpop.f32.mrf.mxu3  ;;  %v7969_v57 = vld [vmem:[#allocation9 + $0x440] sm:$0xf]  ;;  %v9155_v42 = vld [vmem:[#allocation9 + $0x1e4] sm:$0xf] }
 0x223   :  { %4858 = vmatmul.bf16.vlgmr.msra.gmra.mxu1 %v9908_v58  ;;  %v3030_v61 = vadd.f32 %v3029_v36, %v3017_v53  ;;  %v7970_v60 = vor.u32 %v9233_v59, %v7969_v57  ;;  %v8209_v10 = vld [vmem:[#allocation9 + $0x620] sm:$0xf]  ;;  %v7670_v53 = vor.u32 %v9155_v42, %v7667_v43  ;;  %v9151_v36 = vld [vmem:[#allocation9 + $0x1c4] sm:$0xf]  ;;  %v7651_v57 = vld [vmem:[#allocation9 + $0x1d0] sm:$0xf0] }
 0x224   :  { %4870 = vmatpush.bf16.msra.mxu2 %v7682_v15  ;;  %4902 = vmatpush.bf16.msrb.mxu1 %v8178_v16  ;;  %v2991_v12 = vadd.f32 %v9875_v28, %v2978_v51  ;;  %v9229_v15 = vld [vmem:[#allocation9 + $0x42c] sm:$0xf0]  ;;  %v8242_v16 = vor.u32 %v9301_v5, %v8241_v0  ;;  %v8065_v19 = vld [vmem:[#allocation9 + $0x500] sm:$0xf]  ;;  %v8210_v31 = vor.u32 %v9293_v34, %v8209_v10  ;;  %v9183_v5 = vld [vmem:[#allocation9 + $0x2c4] sm:$0xf] }
 0x225   :  { %v3043_v24 = vadd.f32 %v3042_v62, %v3030_v61  ;;  %v7954_v26 = vor.u32 %v9229_v15, %v7953_v14  ;;  %v9261_v28 = vld [vmem:[#allocation9 + $0x52c] sm:$0xf0]  ;;  %v8193_v1 = vld [vmem:[#allocation9 + $0x600] sm:$0xf]  ;;  %v9147_v15 = vld [vmem:[#allocation9 + $0x1a4] sm:$0xf] }
 0x226   :  { %4890 = vmatpush.bf16.msra.mxu3 %v8034_v50  ;;  %4883 = vmatpush.bf16.msrb.mxu0 %v7810_v23  ;;  %v8098_v50 = vor.u32 %v9265_v11, %v8097_v38  ;;  %v3068_v23 = vpop.f32.mrf.mxu2  ;;  %v3271_v22 = vmul.f32 0.2, %v2991_v12  ;;  %v8082_v39 = vor.u32 %v9261_v28, %v8081_v27  ;;  %v8194_v59 = vor.u32 %v9289_v56, %v8193_v1  ;;  %v9349_v61 = vld [vmem:[#allocation9 + $0x7ec] sm:$0xf0]  ;;  %v8401_v34 = vld [vmem:[#allocation9 + $0x7a0] sm:$0xf] }
 0x227   :  { %4871 = vmatmul.bf16.vlgmr.msra.gmra.mxu2 %v9910_v25  ;;  %v3056_v9 = vadd.f32 %v3055_v3, %v3043_v24  ;;  %v7507_v3 = vld [vmem:[#allocation9 + $0xb0] sm:$0xf0]  ;;  %v7654_v38 = vor.u32 %v9151_v36, %v7651_v57  ;;  %v9345_v27 = vld [vmem:[#allocation9 + $0x7cc] sm:$0xf0]  ;;  %v9139_v42 = vld [vmem:[#allocation9 + $0x164] sm:$0xf] }
 0x228   :  { %4915 = vmatpush.bf16.msrb.mxu2 %v8306_v52  ;;  %4903 = vmatpush.bf16.msrb.mxu1 %v8162_v4  ;;  %v7937_v52 = vld [vmem:[#allocation9 + $0x400] sm:$0xf]  ;;  %v8226_v4 = vor.u32 %v9297_v20, %v8225_v18  ;;  %v3279_v17 = vmax.f32 %v2991_v12, %v3271_v22  ;;  %v9111_v20 = vld [vmem:[#allocation9 + $0x84] sm:$0xf]  ;;  %v7763_v24 = vld [vmem:[#allocation9 + $0x2b0] sm:$0xf0] }
 0x229   :  { %4884 = vmatmul.bf16.vlgmr.msrb.gmra.mxu0 %v9915_v37  ;;  %v3069_v51 = vadd.f32 %v3068_v23, %v3056_v9  ;;  %v8433_v12 = vld [vmem:[#allocation9 + $0x7e0] sm:$0xf]  ;;  %v9179_v22 = vld [vmem:[#allocation9 + $0x2a4] sm:$0xf]  ;;  %v7603_v43 = vld [vmem:[#allocation9 + $0x170] sm:$0xf0] }
 0x22a   :  { %4891 = vmatpush.bf16.msra.mxu3 %v8018_v33  ;;  %v3031_v30 = vpop.f32.mrf.mxu3  ;;  %v3057_v33 = vpop.f32.mrf.mxu0  ;;  %v8434_v11 = vor.u32 %v9349_v61, %v8433_v12  ;;  %v7766_v10 = vor.u32 %v9179_v22, %v7763_v24  ;;  %v9171_v56 = vld [vmem:[#allocation9 + $0x264] sm:$0xf]  ;;  %v7443_v57 = vld [vmem:[#allocation9 + $0x30] sm:$0xf0] }
 0x22b   :  { %v7475_v33 = vld [vmem:[#allocation9 + $0x70] sm:$0xf0]  ;;  %v9099_v36 = vld [vmem:[#allocation9 + $0x24] sm:$0xf] }
 0x22c   :  { %4916 = vmatpush.bf16.msrb.mxu2 %v8290_v41  ;;  %4904 = vmatpush.bf16.msrb.mxu1 %v8146_v54  ;;  %v7938_v41 = vor.u32 %v9225_v32, %v7937_v52  ;;  %v7542_v54 = vor.u32 %v9123_v35, %v7539_v46  ;;  %v9107_v46 = vld [vmem:[#allocation9 + $0x64] sm:$0xf]  ;;  %v7699_v24 = vld [vmem:[#allocation9 + $0x230] sm:$0xf0] }
 0x22d   :  { %4928 = vmatpush.bf16.msra.mxu0 %v8434_v11  ;;  %v9131_v12 = vld [vmem:[#allocation9 + $0x124] sm:$0xf]  ;;  %v7571_v11 = vld [vmem:[#allocation9 + $0x130] sm:$0xf0] }
 0x22e   :  { %4892 = vmatpush.bf16.msra.mxu3 %v8002_v44  ;;  %v9119_v44 = vld [vmem:[#allocation9 + $0xc4] sm:$0xf]  ;;  %v3070_v47 = vpop.f32.mrf.mxu2 }
 0x22f   :  { %v7526_v7 = vor.u32 %v9119_v44, %v7523_v45  ;;  %v7459_v45 = vld [vmem:[#allocation9 + $0x50] sm:$0xf0]  ;;  %v8385_v47 = vld [vmem:[#allocation9 + $0x780] sm:$0xf]  ;;  %v9163_v22 = vld [vmem:[#allocation9 + $0x224] sm:$0xf] }
 0x230   :  { %4917 = vmatpush.bf16.msrb.mxu2 %v8274_v63  ;;  %4905 = vmatpush.bf16.msrb.mxu1 %v8130_v49  ;;  %v8066_v63 = vor.u32 %v9257_v40, %v8065_v19  ;;  %v7795_v49 = vld [vmem:[#allocation9 + $0x2f0] sm:$0xf0] }
 0x231   :  { %v7798_v0 = vor.u32 %v9187_v48, %v7795_v49  ;;  %v9932_v9 = vpop.f32.mrf.mxu1  ;;  %v7747_v19 = vld [vmem:[#allocation9 + $0x290] sm:$0xf0]  ;;  %v9337_v48 = vld [vmem:[#allocation9 + $0x78c] sm:$0xf0]  ;;  %v7606_v49 = vor.u32 %v9139_v42, %v7603_v43 }
 0x232   :  { %4893 = vmatpush.bf16.msra.mxu3 %v7986_v8  ;;  %v9926_v8 = vpack.c.bf16 %v3279_v17, %v3279_v17  ;;  %v3081_v55 = vpop.f32.mrf.mxu3 }
 0x233   :  { %v3082_v62 = vadd.f32 %v3081_v55, %v3069_v51  ;;  %v8386_v51 = vor.u32 %v9337_v48, %v8385_v47  ;;  %v9135_v55 = vld [vmem:[#allocation9 + $0x144] sm:$0xf] }
 0x234   :  { %4918 = vmatpush.bf16.msrb.mxu2 %v8258_v2  ;;  %4906 = vmatpush.bf16.msrb.mxu1 %v8114_v6  ;;  %v9115_v2 = vld [vmem:[#allocation9 + $0xa4] sm:$0xf]  ;;  %v7779_v6 = vld [vmem:[#allocation9 + $0x2d0] sm:$0xf0] }
 0x235   :  { %v7510_v14 = vor.u32 %v9115_v2, %v7507_v3  ;;  %v7782_v23 = vor.u32 %v9183_v5, %v7779_v6  ;;  %v9934_v44 = vpop.f32.mrf.mxu0  ;;  %v7715_v3 = vld [vmem:[#allocation9 + $0x250] sm:$0xf0]  ;;  %v9333_v5 = vld [vmem:[#allocation9 + $0x76c] sm:$0xf0]  ;;  %v9243_v47 = vld [vmem:[#allocation9 + $0x4a4] sm:$0xf] }
 0x236   :  { %4894 = vmatpush.bf16.msra.mxu3 %v7970_v60  ;;  %v3272_v60 = vmul.f32 0.2, %v3082_v62 }
 0x238   :  { %4919 = vmatpush.bf16.msrb.mxu2 %v8242_v16  ;;  %4907 = vmatpush.bf16.msrb.mxu1 %v8098_v50  ;;  %v7635_v16 = vld [vmem:[#allocation9 + $0x1b0] sm:$0xf0]  ;;  %v3280_v18 = vmax.f32 %v3082_v62, %v3272_v60  ;;  %v9167_v62 = vld [vmem:[#allocation9 + $0x244] sm:$0xf] }
 0x239   :  { %v7491_v50 = vld [vmem:[#allocation9 + $0x90] sm:$0xf0]  ;;  %v7638_v30 = vor.u32 %v9147_v15, %v7635_v16  ;;  %v3096_v2 = vpop.f32.mrf.mxu1 }
 0x23a   :  { %4895 = vmatpush.bf16.msra.mxu3 %v7954_v26  ;;  %v8417_v26 = vld [vmem:[#allocation9 + $0x7c0] sm:$0xf]  ;;  %v9929_v28 = vpack.c.bf16 %v3280_v18, %v3280_v18  ;;  %v7494_v32 = vor.u32 %v9111_v20, %v7491_v50  ;;  %v3083_v35 = vpop.f32.mrf.mxu3  ;;  %v7427_v15 = vld [vmem:[#allocation9 + $0x10] sm:$0xf0]  ;;  %v9251_v20 = vld [vmem:[#allocation9 + $0x4e4] sm:$0xf] }
 0x23b   :  { %v8418_v52 = vor.u32 %v9345_v27, %v8417_v26  ;;  %v8051_v50 = vld [vmem:[#allocation9 + $0x4f0] sm:$0xf0]  ;;  %v8353_v26 = vld [vmem:[#allocation9 + $0x740] sm:$0xf]  ;;  %v9329_v27 = vld [vmem:[#allocation9 + $0x74c] sm:$0xf0] }
 0x23c   :  { %4920 = vmatpush.bf16.msrb.mxu2 %v8226_v4  ;;  %4908 = vmatpush.bf16.msrb.mxu1 %v8082_v39  ;;  %v7619_v4 = vld [vmem:[#allocation9 + $0x190] sm:$0xf0]  ;;  %v9341_v39 = vld [vmem:[#allocation9 + $0x7ac] sm:$0xf0] }
 0x23d   :  { %4929 = vmatpush.bf16.msra.mxu0 %v8418_v52  ;;  %v8402_v40 = vor.u32 %v9341_v39, %v8401_v34  ;;  %v7622_v17 = vor.u32 %v9143_v21, %v7619_v4  ;;  %v3122_v16 = vpop.f32.mrf.mxu0  ;;  %v9938_v18 = vpop.f32.mrf.mxu2  ;;  %v9127_v52 = vld [vmem:[#allocation9 + $0x104] sm:$0xf]  ;;  %v7555_v21 = vld [vmem:[#allocation9 + $0x110] sm:$0xf0]  ;;  %v7702_v39 = vor.u32 %v9163_v22, %v7699_v24 }
 0x23e   :  { %4896 = vmatpush.bf16.msra.mxu3 %v7938_v41  ;;  %v9175_v41 = vld [vmem:[#allocation9 + $0x284] sm:$0xf]  ;;  %v8035_v34 = vld [vmem:[#allocation9 + $0x4d0] sm:$0xf0]  ;;  %v7558_v42 = vor.u32 %v9127_v52, %v7555_v21 }
 0x23f   :  { %v7750_v1 = vor.u32 %v9175_v41, %v7747_v19  ;;  %v9283_v4 = vld [vmem:[#allocation9 + $0x5e4] sm:$0xf]  ;;  %v7683_v19 = vld [vmem:[#allocation9 + $0x210] sm:$0xf0] }
 0x240   :  { %4921 = vmatpush.bf16.msrb.mxu2 %v8210_v31  ;;  %4909 = vmatpush.bf16.msrb.mxu1 %v8066_v63  ;;  %v9103_v31 = vld [vmem:[#allocation9 + $0x44] sm:$0xf]  ;;  %v7731_v63 = vld [vmem:[#allocation9 + $0x270] sm:$0xf0] }
 0x241   :  { %4897 = vmatmul.bf16.vlgmr.msra.gmra.mxu3 %v9926_v8  ;;  %4930 = vmatpush.bf16.msra.mxu0 %v8402_v40  ;;  %v9159_v41 = vld [vmem:[#allocation9 + $0x204] sm:$0xf]  ;;  %v8337_v40 = vld [vmem:[#allocation9 + $0x720] sm:$0xf]  ;;  %v7987_v24 = vld [vmem:[#allocation9 + $0x470] sm:$0xf0] }
 0x242   :  { %4941 = vmatpush.bf16.msrb.mxu3 %v7542_v54  ;;  %v7478_v54 = vor.u32 %v9107_v46, %v7475_v33  ;;  %v9936_v60 = vpop.f32.mrf.mxu3  ;;  %v8179_v46 = vld [vmem:[#allocation9 + $0x5f0] sm:$0xf0]  ;;  %v8054_v33 = vor.u32 %v9251_v20, %v8051_v50  ;;  %v9271_v20 = vld [vmem:[#allocation9 + $0x584] sm:$0xf] }
 0x243   :  { %4910 = vmatmul.bf16.vlgmr.msrb.gmra.mxu1 %v9929_v28  ;;  %v8131_v50 = vld [vmem:[#allocation9 + $0x590] sm:$0xf0]  ;;  %v9235_v22 = vld [vmem:[#allocation9 + $0x464] sm:$0xf] }
 0x244   :  { %4954 = vmatpush.bf16.msra.mxu1 %v7670_v53  ;;  %4922 = vmatpush.bf16.msrb.mxu2 %v8194_v59  ;;  %v7462_v53 = vor.u32 %v9103_v31, %v7459_v45  ;;  %v7734_v59 = vor.u32 %v9171_v56, %v7731_v63  ;;  %v8182_v31 = vor.u32 %v9283_v4, %v8179_v46  ;;  %v9279_v56 = vld [vmem:[#allocation9 + $0x5c4] sm:$0xf]  ;;  %v8163_v63 = vld [vmem:[#allocation9 + $0x5d0] sm:$0xf0] }
 0x245   :  { %4931 = vmatpush.bf16.msra.mxu0 %v8386_v51  ;;  %v9941_v48 = vpop.f32.mrf.mxu0  ;;  %v7686_v51 = vor.u32 %v9159_v41, %v7683_v19  ;;  %v8166_v2 = vor.u32 %v9279_v56, %v8163_v63  ;;  %v7891_v52 = vld [vmem:[#allocation9 + $0x3b0] sm:$0xf0]  ;;  %v9267_v21 = vld [vmem:[#allocation9 + $0x564] sm:$0xf] }
 0x246   :  { %4942 = vmatpush.bf16.msrb.mxu3 %v7526_v7  ;;  %v7587_v7 = vld [vmem:[#allocation9 + $0x150] sm:$0xf0]  ;;  %v9231_v46 = vld [vmem:[#allocation9 + $0x444] sm:$0xf] }
 0x247   :  { %v7590_v6 = vor.u32 %v9135_v55, %v7587_v7  ;;  %v8321_v55 = vld [vmem:[#allocation9 + $0x700] sm:$0xf]  ;;  %v9321_v7 = vld [vmem:[#allocation9 + $0x70c] sm:$0xf0]  ;;  %v8115_v4 = vld [vmem:[#allocation9 + $0x570] sm:$0xf0] }
 0x248   :  { %4967 = vmatpush.bf16.msra.mxu2 %v7798_v0  ;;  %4955 = vmatpush.bf16.msra.mxu1 %v7654_v38  ;;  %v8369_v0 = vld [vmem:[#allocation9 + $0x760] sm:$0xf]  ;;  %v7446_v38 = vor.u32 %v9099_v36, %v7443_v57  ;;  %v8322_v57 = vor.u32 %v9321_v7, %v8321_v55  ;;  %v7859_v63 = vld [vmem:[#allocation9 + $0x370] sm:$0xf0] }
 0x249   :  { %v8370_v61 = vor.u32 %v9333_v5, %v8369_v0  ;;  %v9275_v5 = vld [vmem:[#allocation9 + $0x5a4] sm:$0xf] }
 0x24a   :  { %4943 = vmatpush.bf16.msrb.mxu3 %v7510_v14  ;;  %v9095_v14 = vld [vmem:[#allocation9 + $0x4] sm:$0xf]  ;;  %v3109_v45 = vpop.f32.mrf.mxu3 }
 0x24b   :  { %4932 = vmatpush.bf16.msra.mxu0 %v8370_v61  ;;  %v7430_v35 = vor.u32 %v9095_v14, %v7427_v15  ;;  %v8003_v61 = vld [vmem:[#allocation9 + $0x490] sm:$0xf0] }
 0x24c   :  { %4968 = vmatpush.bf16.msra.mxu2 %v7782_v23  ;;  %4956 = vmatpush.bf16.msra.mxu1 %v7638_v30  ;;  %v7718_v23 = vor.u32 %v9167_v62, %v7715_v3  ;;  %v7574_v30 = vor.u32 %v9131_v12, %v7571_v11  ;;  %v7923_v62 = vld [vmem:[#allocation9 + $0x3f0] sm:$0xf0]  ;;  %v9239_v12 = vld [vmem:[#allocation9 + $0x484] sm:$0xf] }
 0x24d   :  { %v7907_v11 = vld [vmem:[#allocation9 + $0x3d0] sm:$0xf0]  ;;  %v8006_v16 = vor.u32 %v9239_v12, %v8003_v61 }
 0x24e   :  { %4944 = vmatpush.bf16.msrb.mxu3 %v7494_v32  ;;  %v8354_v32 = vor.u32 %v9329_v27, %v8353_v26  ;;  %v7843_v12 = vld [vmem:[#allocation9 + $0x350] sm:$0xf0] }
 0x250   :  { %4969 = vmatpush.bf16.msra.mxu2 %v7766_v10  ;;  %4957 = vmatpush.bf16.msra.mxu1 %v7622_v17  ;;  %v9247_v10 = vld [vmem:[#allocation9 + $0x4c4] sm:$0xf]  ;;  %v9325_v17 = vld [vmem:[#allocation9 + $0x72c] sm:$0xf0] }
 0x251   :  { %4933 = vmatpush.bf16.msra.mxu0 %v8354_v32  ;;  %v8338_v43 = vor.u32 %v9325_v17, %v8337_v40  ;;  %v9263_v17 = vld [vmem:[#allocation9 + $0x544] sm:$0xf] }
 0x252   :  { %4945 = vmatpush.bf16.msrb.mxu3 %v7478_v54  ;;  %v565_v54 = vperm.slane %v9912_v29, 6 }
 0x253   :  { %v3146_v27 = vpop.f32.mrf.mxu1 }
 0x254   :  { %4970 = vmatpush.bf16.msra.mxu2 %v7750_v1  ;;  %4958 = vmatpush.bf16.msra.mxu1 %v7606_v49  ;;  %v8038_v1 = vor.u32 %v9247_v10, %v8035_v34  ;;  %v3135_v49 = vpop.f32.mrf.mxu2  ;;  %v3095_v36 = vadd.f32 %v9932_v9, %v565_v54  ;;  %v9207_v34 = vld [vmem:[#allocation9 + $0x384] sm:$0xf]  ;;  %v8099_v54 = vld [vmem:[#allocation9 + $0x550] sm:$0xf0] }
 0x255   :  { %4934 = vmatpush.bf16.msra.mxu0 %v8338_v43  ;;  %v9227_v43 = vld [vmem:[#allocation9 + $0x424] sm:$0xf] }
 0x256   :  { %4946 = vmatpush.bf16.msrb.mxu3 %v7462_v53  ;;  %v8019_v53 = vld [vmem:[#allocation9 + $0x4b0] sm:$0xf0]  ;;  %v3108_v9 = vadd.f32 %v9936_v60, %v3095_v36  ;;  %v8134_v60 = vor.u32 %v9271_v20, %v8131_v50  ;;  %v9259_v49 = vld [vmem:[#allocation9 + $0x524] sm:$0xf] }
 0x257   :  { %v8022_v0 = vor.u32 %v9243_v47, %v8019_v53  ;;  %v8102_v47 = vor.u32 %v9263_v17, %v8099_v54  ;;  %v9191_v17 = vld [vmem:[#allocation9 + $0x304] sm:$0xf]  ;;  %v7811_v54 = vld [vmem:[#allocation9 + $0x310] sm:$0xf0] }
 0x258   :  { %4971 = vmatpush.bf16.msra.mxu2 %v7734_v59  ;;  %4959 = vmatpush.bf16.msra.mxu1 %v7590_v6  ;;  %v9219_v59 = vld [vmem:[#allocation9 + $0x3e4] sm:$0xf]  ;;  %v8147_v6 = vld [vmem:[#allocation9 + $0x5b0] sm:$0xf0]  ;;  %v3121_v26 = vadd.f32 %v9934_v44, %v3108_v9  ;;  %v8118_v44 = vor.u32 %v9267_v21, %v8115_v4 }
 0x259   :  { %v7926_v3 = vor.u32 %v9219_v59, %v7923_v62  ;;  %4935 = vmatpush.bf16.msra.mxu0 %v8322_v57  ;;  %v8150_v14 = vor.u32 %v9275_v5, %v8147_v6  ;;  %v9223_v57 = vld [vmem:[#allocation9 + $0x404] sm:$0xf]  ;;  %v7939_v59 = vld [vmem:[#allocation9 + $0x410] sm:$0xf0] }
 0x25a   :  { %4947 = vmatpush.bf16.msrb.mxu3 %v7446_v38  ;;  %v9215_v38 = vld [vmem:[#allocation9 + $0x3c4] sm:$0xf]  ;;  %v3134_v10 = vadd.f32 %v9938_v18, %v3121_v26 }
 0x25b   :  { %v7910_v15 = vor.u32 %v9215_v38, %v7907_v11  ;;  %v3148_v56 = vpop.f32.mrf.mxu1  ;;  %v9203_v18 = vld [vmem:[#allocation9 + $0x364] sm:$0xf] }
 0x25c   :  { %4972 = vmatpush.bf16.msra.mxu2 %v7718_v23  ;;  %4960 = vmatpush.bf16.msra.mxu1 %v7574_v30  ;;  %v3174_v23 = vpop.f32.mrf.mxu0  ;;  %v9211_v30 = vld [vmem:[#allocation9 + $0x3a4] sm:$0xf]  ;;  %v3147_v19 = vadd.f32 %v3146_v27, %v3134_v10  ;;  %v7862_v53 = vor.u32 %v9203_v18, %v7859_v63  ;;  %v8275_v10 = vld [vmem:[#allocation9 + $0x6b0] sm:$0xf0]  ;;  %v7641_v63 = vld [vmem:[#allocation9 + $0x1a8] sm:$0xf] }
 0x25d   :  { %4980 = vmatpush.bf16.msrb.mxu0 %v7926_v3  ;;  %v7894_v32 = vor.u32 %v9211_v30, %v7891_v52  ;;  %v9952_v36 = vpop.f32.mrf.mxu2  ;;  %v9315_v62 = vld [vmem:[#allocation9 + $0x6e4] sm:$0xf]  ;;  %v7545_v3 = vld [vmem:[#allocation9 + $0xe8] sm:$0xf]  ;;  %v9122_v52 = vld [vmem:[#allocation9 + $0xd4] sm:$0xf0] }
 0x25e   :  { %4948 = vmatpush.bf16.msrb.mxu3 %v7430_v35  ;;  %v7990_v35 = vor.u32 %v9235_v22, %v7987_v24  ;;  %v9199_v6 = vld [vmem:[#allocation9 + $0x344] sm:$0xf]  ;;  %v7673_v23 = vld [vmem:[#allocation9 + $0x1e8] sm:$0xf]  ;;  %v9158_v22 = vld [vmem:[#allocation9 + $0x1f4] sm:$0xf0] }
 0x25f   :  { %v9255_v9 = vld [vmem:[#allocation9 + $0x504] sm:$0xf]  ;;  %v7846_v38 = vor.u32 %v9199_v6, %v7843_v12  ;;  %v7529_v24 = vld [vmem:[#allocation9 + $0xc8] sm:$0xf]  ;;  %v7674_v4 = vor.u32 %v9158_v22, %v7673_v23 }
 0x260   :  { %4973 = vmatpush.bf16.msra.mxu2 %v7702_v39  ;;  %4961 = vmatpush.bf16.msra.mxu1 %v7558_v42  ;;  %v7875_v39 = vld [vmem:[#allocation9 + $0x390] sm:$0xf0]  ;;  %v3159_v42 = vpop.f32.mrf.mxu3  ;;  %v9303_v18 = vld [vmem:[#allocation9 + $0x684] sm:$0xf] }
 0x261   :  { %4949 = vmatmul.bf16.vlgmr.msrb.gmra.mxu3 %v9901_v13  ;;  %4981 = vmatpush.bf16.msrb.mxu0 %v7910_v15  ;;  %v7878_v41 = vor.u32 %v9207_v34, %v7875_v39  ;;  %v9311_v15 = vld [vmem:[#allocation9 + $0x6c4] sm:$0xf]  ;;  %v7530_v39 = vor.u32 %v9122_v52, %v7529_v24  ;;  %v7593_v24 = vld [vmem:[#allocation9 + $0x148] sm:$0xf] }
 0x262   :  { %4993 = vmatpush.bf16.msra.mxu3 %v8054_v33  ;;  %v7971_v33 = vld [vmem:[#allocation9 + $0x450] sm:$0xf0] }
 0x263   :  { %4962 = vmatmul.bf16.vlgmr.msra.gmra.mxu1 %v9908_v58  ;;  %v7974_v40 = vor.u32 %v9231_v46, %v7971_v33  ;;  %v9307_v33 = vld [vmem:[#allocation9 + $0x6a4] sm:$0xf] }
 0x264   :  { %5006 = vmatpush.bf16.msrb.mxu1 %v8182_v31  ;;  %4974 = vmatpush.bf16.msra.mxu2 %v7686_v51  ;;  %v7955_v31 = vld [vmem:[#allocation9 + $0x430] sm:$0xf0]  ;;  %v9949_v45 = vpop.f32.mrf.mxu0 }
 0x265   :  { %4982 = vmatpush.bf16.msrb.mxu0 %v7894_v32  ;;  %v8083_v51 = vld [vmem:[#allocation9 + $0x530] sm:$0xf0]  ;;  %v7958_v7 = vor.u32 %v9227_v43, %v7955_v31  ;;  %v3187_v46 = vpop.f32.mrf.mxu2  ;;  %v566_v43 = vperm.slane %v9912_v29, 7 }
 0x266   :  { %4994 = vmatpush.bf16.msra.mxu3 %v8038_v1  ;;  %v3160_v1 = vadd.f32 %v3159_v42, %v3147_v19  ;;  %v8086_v61 = vor.u32 %v9259_v49, %v8083_v51  ;;  %v7827_v32 = vld [vmem:[#allocation9 + $0x330] sm:$0xf0]  ;;  %v7513_v19 = vld [vmem:[#allocation9 + $0xa8] sm:$0xf]  ;;  %v7814_v42 = vor.u32 %v9191_v17, %v7811_v54  ;;  %v9098_v54 = vld [vmem:[#allocation9 + $0x14] sm:$0xf0] }
 0x267   :  { %v8259_v49 = vld [vmem:[#allocation9 + $0x690] sm:$0xf0]  ;;  %v7497_v51 = vld [vmem:[#allocation9 + $0x88] sm:$0xf] }
 0x268   :  { %5007 = vmatpush.bf16.msrb.mxu1 %v8166_v2  ;;  %v3173_v55 = vadd.f32 %v9941_v48, %v3160_v1  ;;  %v8307_v2 = vld [vmem:[#allocation9 + $0x6f0] sm:$0xf0]  ;;  %v7942_v48 = vor.u32 %v9223_v57, %v7939_v59  ;;  %v3161_v26 = vpop.f32.mrf.mxu3  ;;  %v8278_v1 = vor.u32 %v9307_v33, %v8275_v10  ;;  %v8262_v29 = vor.u32 %v9303_v18, %v8259_v49  ;;  %v9299_v59 = vld [vmem:[#allocation9 + $0x664] sm:$0xf]  ;;  %v7433_v17 = vld [vmem:[#allocation9 + $0x8] sm:$0xf] }
 0x269   :  { %4983 = vmatpush.bf16.msrb.mxu0 %v7878_v41  ;;  %v8310_v20 = vor.u32 %v9315_v62, %v8307_v2  ;;  %v9154_v41 = vld [vmem:[#allocation9 + $0x1d4] sm:$0xf0]  ;;  %v7625_v62 = vld [vmem:[#allocation9 + $0x188] sm:$0xf]  ;;  %v9287_v33 = vld [vmem:[#allocation9 + $0x604] sm:$0xf] }
 0x26a   :  { %4995 = vmatpush.bf16.msra.mxu3 %v8022_v0  ;;  %v9126_v0 = vld [vmem:[#allocation9 + $0xf4] sm:$0xf0]  ;;  %v3273_v5 = vmul.f32 0.2, %v3173_v55 }
 0x26b   :  { %v7546_v50 = vor.u32 %v9126_v0, %v7545_v3  ;;  %v9146_v2 = vld [vmem:[#allocation9 + $0x194] sm:$0xf0]  ;;  %v8243_v3 = vld [vmem:[#allocation9 + $0x670] sm:$0xf0]  ;;  %v7481_v0 = vld [vmem:[#allocation9 + $0x68] sm:$0xf] }
 0x26c   :  { %5008 = vmatpush.bf16.msrb.mxu1 %v8150_v14  ;;  %v3281_v11 = vmax.f32 %v3173_v55, %v3273_v5  ;;  %v8067_v14 = vld [vmem:[#allocation9 + $0x510] sm:$0xf0]  ;;  %v3200_v27 = vpop.f32.mrf.mxu0  ;;  %v9110_v5 = vld [vmem:[#allocation9 + $0x74] sm:$0xf0]  ;;  %v7626_v12 = vor.u32 %v9146_v2, %v7625_v62  ;;  %v8185_v2 = vld [vmem:[#allocation9 + $0x5e8] sm:$0xf] }
 0x26d   :  { %4984 = vmatpush.bf16.msrb.mxu0 %v7862_v53  ;;  %v9114_v53 = vld [vmem:[#allocation9 + $0x94] sm:$0xf0] }
 0x26e   :  { %4996 = vmatpush.bf16.msra.mxu3 %v8006_v16  ;;  %v8291_v16 = vld [vmem:[#allocation9 + $0x6d0] sm:$0xf0]  ;;  %v9954_v30 = vpack.c.bf16 %v3281_v11, %v3281_v11  ;;  %v7498_v57 = vor.u32 %v9114_v53, %v7497_v51  ;;  %v7609_v11 = vld [vmem:[#allocation9 + $0x168] sm:$0xf]  ;;  %v9138_v26 = vld [vmem:[#allocation9 + $0x154] sm:$0xf0] }
 0x26f   :  { %v8294_v34 = vor.u32 %v9311_v15, %v8291_v16  ;;  %v7465_v15 = vld [vmem:[#allocation9 + $0x48] sm:$0xf]  ;;  %v9106_v16 = vld [vmem:[#allocation9 + $0x54] sm:$0xf0]  ;;  %v7594_v46 = vor.u32 %v9138_v26, %v7593_v24 }
 0x270   :  { %5009 = vmatpush.bf16.msrb.mxu1 %v8134_v60  ;;  %v9195_v60 = vld [vmem:[#allocation9 + $0x324] sm:$0xf]  ;;  %4923 = vmatmul.bf16.vlgmr.msrb.gmra.mxu2 %v9954_v30  ;;  %v7466_v22 = vor.u32 %v9106_v16, %v7465_v15  ;;  %v9186_v62 = vld [vmem:[#allocation9 + $0x2d4] sm:$0xf0] }
 0x271   :  { %4985 = vmatpush.bf16.msrb.mxu0 %v7846_v38  ;;  %v7830_v21 = vor.u32 %v9195_v60, %v7827_v32  ;;  %5019 = vmatpush.bf16.msrb.mxu2 %v8310_v20  ;;  %v7482_v38 = vor.u32 %v9110_v5, %v7481_v0  ;;  %v8211_v60 = vld [vmem:[#allocation9 + $0x630] sm:$0xf0]  ;;  %v7449_v32 = vld [vmem:[#allocation9 + $0x28] sm:$0xf]  ;;  %v9182_v16 = vld [vmem:[#allocation9 + $0x2b4] sm:$0xf0] }
 0x272   :  { %4997 = vmatpush.bf16.msra.mxu3 %v7990_v35  ;;  %v8070_v35 = vor.u32 %v9255_v9, %v8067_v14  ;;  %v8246_v9 = vor.u32 %v9299_v59, %v8243_v3  ;;  %v8227_v14 = vld [vmem:[#allocation9 + $0x650] sm:$0xf0]  ;;  %v9286_v3 = vld [vmem:[#allocation9 + $0x5f4] sm:$0xf0]  ;;  %v8041_v5 = vld [vmem:[#allocation9 + $0x4c8] sm:$0xf] }
 0x274   :  { %5010 = vmatpush.bf16.msrb.mxu1 %v8118_v44  ;;  %v7657_v44 = vld [vmem:[#allocation9 + $0x1c8] sm:$0xf] }
 0x275   :  { %4986 = vmatpush.bf16.msrb.mxu0 %v7830_v21  ;;  %v7658_v31 = vor.u32 %v9154_v41, %v7657_v44  ;;  %5020 = vmatpush.bf16.msrb.mxu2 %v8294_v34  ;;  %v8195_v44 = vld [vmem:[#allocation9 + $0x610] sm:$0xf0]  ;;  %v7577_v41 = vld [vmem:[#allocation9 + $0x128] sm:$0xf] }
 0x276   :  { %4998 = vmatpush.bf16.msra.mxu3 %v7974_v40  ;;  %v9118_v40 = vld [vmem:[#allocation9 + $0xb4] sm:$0xf0]  ;;  %v8198_v18 = vor.u32 %v9287_v33, %v8195_v44  ;;  %v8153_v33 = vld [vmem:[#allocation9 + $0x5a8] sm:$0xf] }
 0x277   :  { %v7514_v56 = vor.u32 %v9118_v40, %v7513_v19  ;;  %v9134_v19 = vld [vmem:[#allocation9 + $0x134] sm:$0xf0] }
 0x278   :  { %5011 = vmatpush.bf16.msrb.mxu1 %v8102_v47  ;;  %v9150_v47 = vld [vmem:[#allocation9 + $0x1b4] sm:$0xf0] }
 0x279   :  { %4987 = vmatpush.bf16.msrb.mxu0 %v7814_v42  ;;  %v7642_v55 = vor.u32 %v9150_v47, %v7641_v63  ;;  %5021 = vmatpush.bf16.msrb.mxu2 %v8278_v1  ;;  %v7801_v42 = vld [vmem:[#allocation9 + $0x2e8] sm:$0xf]  ;;  %v9254_v1 = vld [vmem:[#allocation9 + $0x4f4] sm:$0xf0]  ;;  %v7434_v63 = vor.u32 %v9098_v54, %v7433_v17  ;;  %v8403_v17 = vld [vmem:[#allocation9 + $0x7b0] sm:$0xf0] }
 0x27a   :  { %4999 = vmatpush.bf16.msra.mxu3 %v7958_v7  ;;  %v3186_v7 = vadd.f32 %v9952_v36, %v566_v43  ;;  %v9295_v36 = vld [vmem:[#allocation9 + $0x644] sm:$0xf]  ;;  %v9190_v43 = vld [vmem:[#allocation9 + $0x2f4] sm:$0xf0]  ;;  %v7737_v54 = vld [vmem:[#allocation9 + $0x268] sm:$0xf] }
 0x27b   :  { %v8230_v23 = vor.u32 %v9295_v36, %v8227_v14  ;;  %v7802_v53 = vor.u32 %v9190_v43, %v7801_v42  ;;  %v7769_v14 = vld [vmem:[#allocation9 + $0x2a8] sm:$0xf]  ;;  %v9174_v43 = vld [vmem:[#allocation9 + $0x274] sm:$0xf0] }
 0x27c   :  { %5012 = vmatpush.bf16.msrb.mxu1 %v8086_v61  ;;  %v3211_v6 = vpop.f32.mrf.mxu1  ;;  %v3199_v61 = vadd.f32 %v9949_v45, %v3186_v7  ;;  %v9291_v45 = vld [vmem:[#allocation9 + $0x624] sm:$0xf]  ;;  %v7561_v7 = vld [vmem:[#allocation9 + $0x108] sm:$0xf] }
 0x27d   :  { %5022 = vmatpush.bf16.msrb.mxu2 %v8262_v29  ;;  %v8214_v34 = vor.u32 %v9291_v45, %v8211_v60  ;;  %v9130_v29 = vld [vmem:[#allocation9 + $0x114] sm:$0xf0]  ;;  %v9343_v60 = vld [vmem:[#allocation9 + $0x7c4] sm:$0xf] }
 0x27e   :  { %5000 = vmatpush.bf16.msra.mxu3 %v7942_v48  ;;  %v9142_v48 = vld [vmem:[#allocation9 + $0x174] sm:$0xf0] }
 0x27f   :  { %v7610_v20 = vor.u32 %v9142_v48, %v7609_v11  ;;  %v8186_v11 = vor.u32 %v9286_v3, %v8185_v2  ;;  %v8435_v48 = vld [vmem:[#allocation9 + $0x7f0] sm:$0xf0]  ;;  %v9246_v45 = vld [vmem:[#allocation9 + $0x4b4] sm:$0xf0] }
 0x280   :  { %5013 = vmatpush.bf16.msrb.mxu1 %v8070_v35  ;;  %4975 = vmatmul.bf16.vlgmr.msra.gmra.mxu2 %v9910_v25  ;;  %v9102_v35 = vld [vmem:[#allocation9 + $0x34] sm:$0xf0] }
 0x281   :  { %5001 = vmatmul.bf16.vlgmr.msra.gmra.mxu3 %v9926_v8  ;;  %5023 = vmatpush.bf16.msrb.mxu2 %v8246_v9  ;;  %v9347_v9 = vld [vmem:[#allocation9 + $0x7e4] sm:$0xf] }
 0x282   :  { %5045 = vmatpush.bf16.msrb.mxu3 %v7546_v50  ;;  %v3212_v50 = vadd.f32 %v3211_v6, %v3199_v61  ;;  %v9250_v6 = vld [vmem:[#allocation9 + $0x4d4] sm:$0xf0]  ;;  %v7562_v61 = vor.u32 %v9130_v29, %v7561_v7  ;;  %v8438_v24 = vor.u32 %v9347_v9, %v8435_v48  ;;  %v7721_v7 = vld [vmem:[#allocation9 + $0x248] sm:$0xf] }
 0x283   :  { %5014 = vmatmul.bf16.vlgmr.msrb.gmra.mxu1 %v9929_v28  ;;  %v8042_v15 = vor.u32 %v9250_v6, %v8041_v5  ;;  %v9234_v5 = vld [vmem:[#allocation9 + $0x454] sm:$0xf0] }
 0x284   :  { %5058 = vmatpush.bf16.msra.mxu1 %v7674_v4  ;;  %v3224_v27 = vpop.f32.mrf.mxu3  ;;  %v3213_v4 = vpop.f32.mrf.mxu1 }
 0x285   :  { %v3225_v21 = vadd.f32 %v3224_v27, %v3212_v50  ;;  %5024 = vmatpush.bf16.msrb.mxu2 %v8230_v23  ;;  %v9282_v50 = vld [vmem:[#allocation9 + $0x5d4] sm:$0xf0]  ;;  %v7770_v27 = vor.u32 %v9182_v16, %v7769_v14  ;;  %v8105_v16 = vld [vmem:[#allocation9 + $0x548] sm:$0xf] }
 0x286   :  { %5046 = vmatpush.bf16.msrb.mxu3 %v7530_v39  ;;  %v3250_v52 = vpop.f32.mrf.mxu0  ;;  %v7450_v39 = vor.u32 %v9102_v35, %v7449_v32  ;;  %v8419_v32 = vld [vmem:[#allocation9 + $0x7d0] sm:$0xf0]  ;;  %v7753_v35 = vld [vmem:[#allocation9 + $0x288] sm:$0xf] }
 0x287   :  { %v8422_v44 = vor.u32 %v9343_v60, %v8419_v32  ;;  %v8355_v32 = vld [vmem:[#allocation9 + $0x750] sm:$0xf0] }
 0x288   :  { %5059 = vmatpush.bf16.msra.mxu1 %v7658_v31  ;;  %v8057_v31 = vld [vmem:[#allocation9 + $0x4e8] sm:$0xf] }
 0x289   :  { %5025 = vmatpush.bf16.msrb.mxu2 %v8214_v34  ;;  %v8009_v34 = vld [vmem:[#allocation9 + $0x488] sm:$0xf] }
 0x28a   :  { %5047 = vmatpush.bf16.msrb.mxu3 %v7514_v56  ;;  %v3237_v10 = vpop.f32.mrf.mxu2  ;;  %v7578_v56 = vor.u32 %v9134_v19, %v7577_v41 }
 0x28b   :  { %v3238_v40 = vadd.f32 %v3237_v10, %v3225_v21  ;;  %v9278_v10 = vld [vmem:[#allocation9 + $0x5b4] sm:$0xf0] }
 0x28c   :  { %5060 = vmatpush.bf16.msra.mxu1 %v7642_v55  ;;  %v3226_v47 = vpop.f32.mrf.mxu3  ;;  %v8058_v55 = vor.u32 %v9254_v1, %v8057_v31  ;;  %v3263_v59 = vpop.f32.mrf.mxu1  ;;  %v8154_v19 = vor.u32 %v9278_v10, %v8153_v33  ;;  %v8137_v31 = vld [vmem:[#allocation9 + $0x588] sm:$0xf]  ;;  %v9274_v1 = vld [vmem:[#allocation9 + $0x594] sm:$0xf0] }
 0x28d   :  { %v3251_v51 = vadd.f32 %v3250_v52, %v3238_v40  ;;  %5026 = vmatpush.bf16.msrb.mxu2 %v8198_v18  ;;  %v9339_v40 = vld [vmem:[#allocation9 + $0x7a4] sm:$0xf]  ;;  %v9238_v18 = vld [vmem:[#allocation9 + $0x474] sm:$0xf0]  ;;  %v9969_v47 = vld [vmem:[#allocation11] sm:$0xf] }
 0x28e   :  { %5048 = vmatpush.bf16.msrb.mxu3 %v7498_v57  ;;  %v3252_v49 = vpop.f32.mrf.mxu0  ;;  %v7785_v57 = vld [vmem:[#allocation9 + $0x2c8] sm:$0xf]  ;;  %v3549_v3 = vperm.slane %v9969_v47, 0  ;;  %v9262_v10 = vld [vmem:[#allocation9 + $0x534] sm:$0xf0] }
 0x28f   :  { %v3264_v0 = vadd.f32 %v3263_v59, %v3251_v51  ;;  %v7786_v36 = vor.u32 %v9186_v62, %v7785_v57  ;;  %v7738_v49 = vor.u32 %v9174_v43, %v7737_v54  ;;  %v8138_v51 = vor.u32 %v9274_v1, %v8137_v31  ;;  %v9170_v57 = vld [vmem:[#allocation9 + $0x254] sm:$0xf0]  ;;  %v8121_v59 = vld [vmem:[#allocation9 + $0x568] sm:$0xf]  ;;  %v9124_v54 = vld [vmem:[#allocation9 + $0xec] sm:$0xf] }
 0x290   :  { %5061 = vmatpush.bf16.msra.mxu1 %v7626_v12  ;;  %5027 = vmatmul.bf16.vlgmr.msrb.gmra.mxu2 %v9954_v30  ;;  %v9270_v62 = vld [vmem:[#allocation9 + $0x574] sm:$0xf0]  ;;  %v8089_v33 = vld [vmem:[#allocation9 + $0x528] sm:$0xf] }
 0x291   :  { %5071 = vmatpush.bf16.msra.mxu2 %v7802_v53  ;;  %v9335_v53 = vld [vmem:[#allocation9 + $0x784] sm:$0xf]  ;;  %v8122_v9 = vor.u32 %v9270_v62, %v8121_v59  ;;  %v8090_v1 = vor.u32 %v9262_v10, %v8089_v33  ;;  %v9314_v59 = vld [vmem:[#allocation9 + $0x6d4] sm:$0xf0]  ;;  %v9156_v62 = vld [vmem:[#allocation9 + $0x1ec] sm:$0xf] }
 0x292   :  { %5049 = vmatpush.bf16.msrb.mxu3 %v7482_v38  ;;  %v3239_v12 = vpop.f32.mrf.mxu2  ;;  %v3274_v38 = vmul.f32 0.2, %v3264_v0  ;;  %v7643_v33 = vld [vmem:[#allocation9 + $0x1b8] sm:$0xf0]  ;;  %v9112_v10 = vld [vmem:[#allocation9 + $0x8c] sm:$0xf] }
 0x294   :  { %5062 = vmatpush.bf16.msra.mxu1 %v7610_v20  ;;  %v8169_v20 = vld [vmem:[#allocation9 + $0x5c8] sm:$0xf]  ;;  %v3282_v23 = vmax.f32 %v3264_v0, %v3274_v38  ;;  %v3265_v21 = vpop.f32.mrf.mxu1  ;;  %v9331_v38 = vld [vmem:[#allocation9 + $0x764] sm:$0xf] }
 0x295   :  { %5072 = vmatpush.bf16.msra.mxu2 %v7786_v36  ;;  %v8170_v52 = vor.u32 %v9282_v50, %v8169_v20  ;;  %v7977_v0 = vld [vmem:[#allocation9 + $0x448] sm:$0xf]  ;;  %v8371_v36 = vld [vmem:[#allocation9 + $0x770] sm:$0xf0]  ;;  %v9266_v20 = vld [vmem:[#allocation9 + $0x554] sm:$0xf0] }
 0x296   :  { %5050 = vmatpush.bf16.msrb.mxu3 %v7466_v22  ;;  %v8025_v22 = vld [vmem:[#allocation9 + $0x4a8] sm:$0xf]  ;;  %v9965_v26 = vpack.c.bf16 %v3282_v23, %v3282_v23  ;;  %v7978_v14 = vor.u32 %v9234_v5, %v7977_v0  ;;  %v8106_v60 = vor.u32 %v9266_v20, %v8105_v16  ;;  %v9162_v21 = vld [vmem:[#allocation9 + $0x214] sm:$0xf0]  ;;  %v9120_v0 = vld [vmem:[#allocation9 + $0xcc] sm:$0xf] }
 0x297   :  { %v8026_v4 = vor.u32 %v9246_v45, %v8025_v22  ;;  %v7961_v23 = vld [vmem:[#allocation9 + $0x428] sm:$0xf]  ;;  %v9230_v22 = vld [vmem:[#allocation9 + $0x434] sm:$0xf0]  ;;  %v8374_v45 = vor.u32 %v9331_v38, %v8371_v36  ;;  %v7531_v5 = vld [vmem:[#allocation9 + $0xd8] sm:$0xf0] }
 0x298   :  { %5063 = vmatpush.bf16.msra.mxu1 %v7594_v46  ;;  %v9178_v46 = vld [vmem:[#allocation9 + $0x294] sm:$0xf0]  ;;  %4936 = vmatmul.bf16.vlgmr.msra.gmra.mxu0 %v9965_v26  ;;  %v9152_v20 = vld [vmem:[#allocation9 + $0x1cc] sm:$0xf] }
 0x299   :  { %5032 = vmatpush.bf16.msra.mxu0 %v8438_v24  ;;  %5073 = vmatpush.bf16.msra.mxu2 %v7770_v27  ;;  %v7754_v41 = vor.u32 %v9178_v46, %v7753_v35  ;;  %v9327_v24 = vld [vmem:[#allocation9 + $0x744] sm:$0xf]  ;;  %v7689_v35 = vld [vmem:[#allocation9 + $0x208] sm:$0xf]  ;;  %v7962_v46 = vor.u32 %v9230_v22, %v7961_v23  ;;  %v9310_v16 = vld [vmem:[#allocation9 + $0x6b4] sm:$0xf0] }
 0x29a   :  { %5051 = vmatpush.bf16.msrb.mxu3 %v7450_v39  ;;  %v9242_v39 = vld [vmem:[#allocation9 + $0x494] sm:$0xf0]  ;;  %v7690_v31 = vor.u32 %v9162_v21, %v7689_v35  ;;  %v9116_v22 = vld [vmem:[#allocation9 + $0xac] sm:$0xf]  ;;  %v8265_v35 = vld [vmem:[#allocation9 + $0x688] sm:$0xf] }
 0x29b   :  { %v8010_v42 = vor.u32 %v9242_v39, %v8009_v34  ;;  %v7945_v34 = vld [vmem:[#allocation9 + $0x408] sm:$0xf] }
 0x29c   :  { %5064 = vmatpush.bf16.msra.mxu1 %v7578_v56  ;;  %v7993_v56 = vld [vmem:[#allocation9 + $0x468] sm:$0xf] }
 0x29d   :  { %5033 = vmatpush.bf16.msra.mxu0 %v8422_v44  ;;  %5074 = vmatpush.bf16.msra.mxu2 %v7754_v41  ;;  %v7994_v29 = vor.u32 %v9238_v18, %v7993_v56  ;;  %v9226_v41 = vld [vmem:[#allocation9 + $0x414] sm:$0xf0]  ;;  %v9323_v56 = vld [vmem:[#allocation9 + $0x724] sm:$0xf]  ;;  %v8339_v18 = vld [vmem:[#allocation9 + $0x730] sm:$0xf0] }
 0x29e   :  { %5052 = vmatpush.bf16.msrb.mxu3 %v7434_v63  ;;  %v8406_v63 = vor.u32 %v9339_v40, %v8403_v17  ;;  %v9318_v40 = vld [vmem:[#allocation9 + $0x6f4] sm:$0xf0]  ;;  %v8358_v17 = vor.u32 %v9327_v24, %v8355_v32 }
 0x29f   :  { %v9218_v32 = vld [vmem:[#allocation9 + $0x3d4] sm:$0xf0] }
 0x2a0   :  { %5065 = vmatpush.bf16.msra.mxu1 %v7562_v61  ;;  %v4859_v2 = vpop.f32.mrf.mxu1  ;;  %v7722_v61 = vor.u32 %v9170_v57, %v7721_v7  ;;  %v9258_v7 = vld [vmem:[#allocation9 + $0x514] sm:$0xf0] }
 0x2a1   :  { %5053 = vmatmul.bf16.vlgmr.msrb.gmra.mxu3 %v9901_v13  ;;  %5034 = vmatpush.bf16.msra.mxu0 %v8406_v63 }
 0x2a2   :  { %5097 = vmatpush.bf16.msra.mxu3 %v8058_v55  ;;  %v8387_v55 = vld [vmem:[#allocation9 + $0x790] sm:$0xf0]  ;;  %5075 = vmatpush.bf16.msra.mxu2 %v7738_v49 }
 0x2a3   :  { %5066 = vmatmul.bf16.vlgmr.msra.gmra.mxu1 %v9908_v58  ;;  %v8390_v6 = vor.u32 %v9335_v53, %v8387_v55  ;;  %v8073_v55 = vld [vmem:[#allocation9 + $0x508] sm:$0xf] }
 0x2a4   :  { %5110 = vmatpush.bf16.msrb.mxu1 %v8186_v11  ;;  %v7705_v11 = vld [vmem:[#allocation9 + $0x228] sm:$0xf]  ;;  %v4846_v48 = vpop.f32.mrf.mxu3 }
 0x2a5   :  { %v4847_v50 = vadd.f32 %v4846_v48, %v3549_v3  ;;  %5035 = vmatpush.bf16.msra.mxu0 %v8390_v6  ;;  %v8342_v3 = vor.u32 %v9323_v56, %v8339_v18  ;;  %v8074_v6 = vor.u32 %v9258_v7, %v8073_v55  ;;  %v9222_v48 = vld [vmem:[#allocation9 + $0x3f4] sm:$0xf0]  ;;  %v7483_v56 = vld [vmem:[#allocation9 + $0x78] sm:$0xf0]  ;;  %v8233_v7 = vld [vmem:[#allocation9 + $0x648] sm:$0xf] }
 0x2a6   :  { %5098 = vmatpush.bf16.msra.mxu3 %v8042_v15  ;;  %v4885_v12 = vpop.f32.mrf.mxu0  ;;  %v9166_v15 = vld [vmem:[#allocation9 + $0x234] sm:$0xf0]  ;;  %5076 = vmatpush.bf16.msra.mxu2 %v7722_v61  ;;  %v8323_v61 = vld [vmem:[#allocation9 + $0x710] sm:$0xf0] }
 0x2a7   :  { %v4860_v27 = vadd.f32 %v4859_v2, %v4847_v50  ;;  %v7675_v2 = vld [vmem:[#allocation9 + $0x1f8] sm:$0xf0]  ;;  %v9210_v55 = vld [vmem:[#allocation9 + $0x394] sm:$0xf0] }
 0x2a8   :  { %5111 = vmatpush.bf16.msrb.mxu1 %v8170_v52  ;;  %v7706_v52 = vor.u32 %v9166_v15, %v7705_v11  ;;  %v4861_v44 = vpop.f32.mrf.mxu1  ;;  %4988 = vmatmul.bf16.vlgmr.msrb.gmra.mxu0 %v9915_v37  ;;  %v7678_v36 = vor.u32 %v9156_v62, %v7675_v2  ;;  %v7929_v11 = vld [vmem:[#allocation9 + $0x3e8] sm:$0xf]  ;;  %v7534_v15 = vor.u32 %v9120_v0, %v7531_v5  ;;  %v7659_v50 = vld [vmem:[#allocation9 + $0x1d8] sm:$0xf0]  ;;  %v9104_v2 = vld [vmem:[#allocation9 + $0x4c] sm:$0xf] }
 0x2a9   :  { %5036 = vmatpush.bf16.msra.mxu0 %v8374_v45  ;;  %v7515_v45 = vld [vmem:[#allocation9 + $0xb8] sm:$0xf0]  ;;  %v7930_v24 = vor.u32 %v9222_v48, %v7929_v11  ;;  %v9294_v11 = vld [vmem:[#allocation9 + $0x634] sm:$0xf0]  ;;  %v9136_v48 = vld [vmem:[#allocation9 + $0x14c] sm:$0xf] }
 0x2aa   :  { %5099 = vmatpush.bf16.msra.mxu3 %v8026_v4  ;;  %v4872_v4 = vpop.f32.mrf.mxu2  ;;  %5077 = vmatpush.bf16.msra.mxu2 %v7706_v52  ;;  %v7662_v52 = vor.u32 %v9152_v20, %v7659_v50  ;;  %v7518_v21 = vor.u32 %v9116_v22, %v7515_v45  ;;  %v7611_v62 = vld [vmem:[#allocation9 + $0x178] sm:$0xf0]  ;;  %v9100_v20 = vld [vmem:[#allocation9 + $0x2c] sm:$0xf]  ;;  %v7849_v22 = vld [vmem:[#allocation9 + $0x348] sm:$0xf] }
 0x2ab   :  { %v4873_v39 = vadd.f32 %v4872_v4, %v4860_v27  ;;  %v9306_v4 = vld [vmem:[#allocation9 + $0x694] sm:$0xf0]  ;;  %v7451_v50 = vld [vmem:[#allocation9 + $0x38] sm:$0xf0] }
 0x2ac   :  { %5112 = vmatpush.bf16.msrb.mxu1 %v8154_v19  ;;  %v8313_v19 = vld [vmem:[#allocation9 + $0x6e8] sm:$0xf]  ;;  %v4848_v49 = vpop.f32.mrf.mxu3  ;;  %v8266_v44 = vor.u32 %v9306_v4, %v8265_v35  ;;  %v7454_v35 = vor.u32 %v9100_v20, %v7451_v50  ;;  %v7579_v4 = vld [vmem:[#allocation9 + $0x138] sm:$0xf0] }
 0x2ad   :  { %v9973_v63 = vadd.f32 %v4885_v12, %v4873_v39  ;;  %v8314_v53 = vor.u32 %v9318_v40, %v8313_v19  ;;  %5037 = vmatpush.bf16.msra.mxu0 %v8358_v17  ;;  %v9319_v12 = vld [vmem:[#allocation9 + $0x704] sm:$0xf]  ;;  %v7897_v19 = vld [vmem:[#allocation9 + $0x3a8] sm:$0xf]  ;;  %v9214_v40 = vld [vmem:[#allocation9 + $0x3b4] sm:$0xf0] }
 0x2ae   :  { %5100 = vmatpush.bf16.msra.mxu3 %v8010_v42  ;;  %v7547_v42 = vld [vmem:[#allocation9 + $0xf8] sm:$0xf0]  ;;  %v4887_v43 = vpop.f32.mrf.mxu0  ;;  %5078 = vmatpush.bf16.msra.mxu2 %v7690_v31  ;;  %v8326_v23 = vor.u32 %v9319_v12, %v8323_v61  ;;  %v8249_v17 = vld [vmem:[#allocation9 + $0x668] sm:$0xf]  ;;  %v7898_v18 = vor.u32 %v9214_v40, %v7897_v19  ;;  %v9206_v61 = vld [vmem:[#allocation9 + $0x374] sm:$0xf0] }
 0x2af   :  { %v7550_v57 = vor.u32 %v9124_v54, %v7547_v42  ;;  %v9302_v42 = vld [vmem:[#allocation9 + $0x674] sm:$0xf0]  ;;  %v9144_v43 = vld [vmem:[#allocation9 + $0x18c] sm:$0xf]  ;;  %v7627_v31 = vld [vmem:[#allocation9 + $0x198] sm:$0xf0] }
 0x2b0   :  { %5113 = vmatpush.bf16.msrb.mxu1 %v8138_v51  ;;  %v7946_v51 = vor.u32 %v9226_v41, %v7945_v34  ;;  %v7499_v34 = vld [vmem:[#allocation9 + $0x98] sm:$0xf0]  ;;  %v8250_v49 = vor.u32 %v9302_v42, %v8249_v17  ;;  %v7865_v12 = vld [vmem:[#allocation9 + $0x368] sm:$0xf]  ;;  %v9198_v17 = vld [vmem:[#allocation9 + $0x334] sm:$0xf0] }
 0x2b1   :  { %5079 = vmatmul.bf16.vlgmr.msra.gmra.mxu2 %v9910_v25  ;;  %5038 = vmatpush.bf16.msra.mxu0 %v8342_v3  ;;  %v7502_v54 = vor.u32 %v9112_v10, %v7499_v34  ;;  %v7467_v3 = vld [vmem:[#allocation9 + $0x58] sm:$0xf0]  ;;  %v7833_v40 = vld [vmem:[#allocation9 + $0x328] sm:$0xf] }
 0x2b2   :  { %5101 = vmatpush.bf16.msra.mxu3 %v7994_v29  ;;  %v8297_v29 = vld [vmem:[#allocation9 + $0x6c8] sm:$0xf]  ;;  %5123 = vmatpush.bf16.msrb.mxu2 %v8314_v53  ;;  %v7803_v10 = vld [vmem:[#allocation9 + $0x2f8] sm:$0xf0] }
 0x2b3   :  { %v8298_v38 = vor.u32 %v9314_v59, %v8297_v29  ;;  %v7881_v53 = vld [vmem:[#allocation9 + $0x388] sm:$0xf]  ;;  %v9140_v59 = vld [vmem:[#allocation9 + $0x16c] sm:$0xf] }
 0x2b4   :  { %5114 = vmatpush.bf16.msrb.mxu1 %v8122_v9  ;;  %v4874_v9 = vpop.f32.mrf.mxu2  ;;  %v7882_v0 = vor.u32 %v9210_v55, %v7881_v53  ;;  %v9284_v53 = vld [vmem:[#allocation9 + $0x5ec] sm:$0xf]  ;;  %v8187_v55 = vld [vmem:[#allocation9 + $0x5f8] sm:$0xf0]  ;;  %v8425_v50 = vld [vmem:[#allocation9 + $0x7c8] sm:$0xf] }
 0x2b5   :  { %5039 = vmatpush.bf16.msra.mxu0 %v8326_v23  ;;  %v8217_v9 = vld [vmem:[#allocation9 + $0x628] sm:$0xf]  ;;  %v7866_v23 = vor.u32 %v9206_v61, %v7865_v12  ;;  %v9180_v12 = vld [vmem:[#allocation9 + $0x2ac] sm:$0xf] }
 0x2b6   :  { %5102 = vmatpush.bf16.msra.mxu3 %v7978_v14  ;;  %v8281_v14 = vld [vmem:[#allocation9 + $0x6a8] sm:$0xf]  ;;  %5124 = vmatpush.bf16.msrb.mxu2 %v8298_v38 }
 0x2b7   :  { %v8282_v27 = vor.u32 %v9310_v16, %v8281_v14  ;;  %v7595_v14 = vld [vmem:[#allocation9 + $0x158] sm:$0xf0] }
 0x2b8   :  { %5115 = vmatpush.bf16.msrb.mxu1 %v8106_v60  ;;  %v7913_v60 = vld [vmem:[#allocation9 + $0x3c8] sm:$0xf]  ;;  %5040 = vmatmul.bf16.vlgmr.msra.gmra.mxu0 %v9965_v26 }
 0x2b9   :  { %5084 = vmatpush.bf16.msrb.mxu0 %v7930_v24  ;;  %v7914_v39 = vor.u32 %v9218_v32, %v7913_v60  ;;  %v8218_v24 = vor.u32 %v9294_v11, %v8217_v9  ;;  %v8201_v60 = vld [vmem:[#allocation9 + $0x608] sm:$0xf]  ;;  %v9290_v32 = vld [vmem:[#allocation9 + $0x614] sm:$0xf0]  ;;  %v7771_v9 = vld [vmem:[#allocation9 + $0x2b8] sm:$0xf0] }
 0x2ba   :  { %5103 = vmatpush.bf16.msra.mxu3 %v7962_v46  ;;  %v9148_v46 = vld [vmem:[#allocation9 + $0x1ac] sm:$0xf]  ;;  %5125 = vmatpush.bf16.msrb.mxu2 %v8282_v27  ;;  %v7598_v27 = vor.u32 %v9136_v48, %v7595_v14  ;;  %v8027_v14 = vld [vmem:[#allocation9 + $0x4b8] sm:$0xf0] }
 0x2bb   :  { %v7646_v41 = vor.u32 %v9148_v46, %v7643_v33  ;;  %v7435_v46 = vld [vmem:[#allocation9 + $0x18] sm:$0xf0]  ;;  %v9188_v33 = vld [vmem:[#allocation9 + $0x2ec] sm:$0xf] }
 0x2bc   :  { %5116 = vmatpush.bf16.msrb.mxu1 %v8090_v1  ;;  %v9108_v1 = vld [vmem:[#allocation9 + $0x6c] sm:$0xf] }
 0x2bd   :  { %5085 = vmatpush.bf16.msrb.mxu0 %v7914_v39  ;;  %v7486_v29 = vor.u32 %v9108_v1, %v7483_v56  ;;  %v9252_v39 = vld [vmem:[#allocation9 + $0x4ec] sm:$0xf]  ;;  %v7563_v1 = vld [vmem:[#allocation9 + $0x118] sm:$0xf0] }
 0x2be   :  { %5104 = vmatpush.bf16.msra.mxu3 %v7946_v51  ;;  %5126 = vmatpush.bf16.msrb.mxu2 %v8266_v44  ;;  %v7630_v51 = vor.u32 %v9144_v43, %v7627_v31  ;;  %v8059_v44 = vld [vmem:[#allocation9 + $0x4f8] sm:$0xf0]  ;;  %v7806_v43 = vor.u32 %v9188_v33, %v7803_v10  ;;  %v9128_v31 = vld [vmem:[#allocation9 + $0x10c] sm:$0xf] }
 0x2bf   :  { %v9184_v56 = vld [vmem:[#allocation9 + $0x2cc] sm:$0xf] }
 0x2c0   :  { %5117 = vmatpush.bf16.msrb.mxu1 %v8074_v6  ;;  %v7614_v6 = vor.u32 %v9140_v59, %v7611_v62  ;;  %v4911_v16 = vpop.f32.mrf.mxu1  ;;  %v7566_v59 = vor.u32 %v9128_v31, %v7563_v1  ;;  %v7817_v62 = vld [vmem:[#allocation9 + $0x308] sm:$0xf]  ;;  %v9244_v48 = vld [vmem:[#allocation9 + $0x4ac] sm:$0xf]  ;;  %v7723_v1 = vld [vmem:[#allocation9 + $0x258] sm:$0xf0] }
 0x2c1   :  { %5105 = vmatmul.bf16.vlgmr.msra.gmra.mxu3 %v9926_v8  ;;  %5086 = vmatpush.bf16.msrb.mxu0 %v7898_v18  ;;  %v9172_v33 = vld [vmem:[#allocation9 + $0x26c] sm:$0xf] }
 0x2c2   :  { %5149 = vmatpush.bf16.msrb.mxu3 %v7550_v57  ;;  %v9298_v57 = vld [vmem:[#allocation9 + $0x654] sm:$0xf0]  ;;  %5127 = vmatpush.bf16.msrb.mxu2 %v8250_v49  ;;  %v8062_v49 = vor.u32 %v9252_v39, %v8059_v44  ;;  %v9272_v39 = vld [vmem:[#allocation9 + $0x58c] sm:$0xf]  ;;  %v8139_v44 = vld [vmem:[#allocation9 + $0x598] sm:$0xf0] }
 0x2c3   :  { %5118 = vmatmul.bf16.vlgmr.msrb.gmra.mxu1 %v9929_v28  ;;  %v8234_v5 = vor.u32 %v9298_v57, %v8233_v7  ;;  %v7834_v7 = vor.u32 %v9198_v17, %v7833_v40  ;;  %v8043_v57 = vld [vmem:[#allocation9 + $0x4d8] sm:$0xf0]  ;;  %v8142_v17 = vor.u32 %v9272_v39, %v8139_v44  ;;  %v9256_v44 = vld [vmem:[#allocation9 + $0x50c] sm:$0xf] }
 0x2c4   :  { %5162 = vmatpush.bf16.msra.mxu1 %v7678_v36  ;;  %v4898_v38 = vpop.f32.mrf.mxu3  ;;  %v7470_v36 = vor.u32 %v9104_v2, %v7467_v3  ;;  %v9194_v2 = vld [vmem:[#allocation9 + $0x314] sm:$0xf0] }
 0x2c5   :  { %5087 = vmatpush.bf16.msrb.mxu0 %v7882_v0  ;;  %v8190_v0 = vor.u32 %v9284_v53, %v8187_v55  ;;  %v7818_v11 = vor.u32 %v9194_v2, %v7817_v62  ;;  %v9232_v53 = vld [vmem:[#allocation9 + $0x44c] sm:$0xf]  ;;  %v7979_v55 = vld [vmem:[#allocation9 + $0x458] sm:$0xf0]  ;;  %v9334_v62 = vld [vmem:[#allocation9 + $0x774] sm:$0xf0] }
 0x2c6   :  { %5150 = vmatpush.bf16.msrb.mxu3 %v7534_v15  ;;  %v4899_v15 = vadd.f32 %v4898_v38, %v9973_v63  ;;  %5128 = vmatpush.bf16.msrb.mxu2 %v8234_v5  ;;  %v9096_v63 = vld [vmem:[#allocation9 + $0xc] sm:$0xf]  ;;  %v8441_v5 = vld [vmem:[#allocation9 + $0x7e8] sm:$0xf] }
 0x2c7   :  { %v7438_v42 = vor.u32 %v9096_v63, %v7435_v46  ;;  %v9280_v38 = vld [vmem:[#allocation9 + $0x5cc] sm:$0xf]  ;;  %v8409_v63 = vld [vmem:[#allocation9 + $0x7a8] sm:$0xf]  ;;  %v9342_v46 = vld [vmem:[#allocation9 + $0x7b4] sm:$0xf0] }
 0x2c8   :  { %5163 = vmatpush.bf16.msra.mxu1 %v7662_v52  ;;  %v9980_v45 = vadd.f32 %v4911_v16, %v4899_v15  ;;  %v9202_v52 = vld [vmem:[#allocation9 + $0x354] sm:$0xf0]  ;;  %v4913_v18 = vpop.f32.mrf.mxu1  ;;  %v7774_v16 = vor.u32 %v9180_v12, %v7771_v9  ;;  %v9164_v2 = vld [vmem:[#allocation9 + $0x22c] sm:$0xf]  ;;  %v8107_v12 = vld [vmem:[#allocation9 + $0x558] sm:$0xf0] }
 0x2c9   :  { %5088 = vmatpush.bf16.msrb.mxu0 %v7866_v23  ;;  %v7850_v34 = vor.u32 %v9202_v52, %v7849_v22  ;;  %v9346_v23 = vld [vmem:[#allocation9 + $0x7d4] sm:$0xf0]  ;;  %v9176_v22 = vld [vmem:[#allocation9 + $0x28c] sm:$0xf]  ;;  %v8123_v18 = vld [vmem:[#allocation9 + $0x578] sm:$0xf0] }
 0x2ca   :  { %5151 = vmatpush.bf16.msrb.mxu3 %v7518_v21  ;;  %v9132_v21 = vld [vmem:[#allocation9 + $0x12c] sm:$0xf]  ;;  %5129 = vmatpush.bf16.msrb.mxu2 %v8218_v24  ;;  %v8030_v24 = vor.u32 %v9244_v48, %v8027_v14  ;;  %v9330_v14 = vld [vmem:[#allocation9 + $0x754] sm:$0xf0] }
 0x2cb   :  { %v7582_v19 = vor.u32 %v9132_v21, %v7579_v4  ;;  %v9276_v52 = vld [vmem:[#allocation9 + $0x5ac] sm:$0xf] }
 0x2cc   :  { %5164 = vmatpush.bf16.msra.mxu1 %v7646_v41  ;;  %v8202_v41 = vor.u32 %v9290_v32, %v8201_v60  ;;  %v8155_v60 = vld [vmem:[#allocation9 + $0x5b8] sm:$0xf0]  ;;  %v9240_v32 = vld [vmem:[#allocation9 + $0x48c] sm:$0xf] }
 0x2cd   :  { %5089 = vmatpush.bf16.msrb.mxu0 %v7850_v34  ;;  %v8158_v4 = vor.u32 %v9276_v52, %v8155_v60  ;;  %v7739_v34 = vld [vmem:[#allocation9 + $0x278] sm:$0xf0]  ;;  %v9228_v9 = vld [vmem:[#allocation9 + $0x42c] sm:$0xf] }
 0x2ce   :  { %5152 = vmatpush.bf16.msrb.mxu3 %v7502_v54  ;;  %v4900_v54 = vpop.f32.mrf.mxu3  ;;  %5130 = vmatpush.bf16.msrb.mxu2 %v8202_v41  ;;  %v7995_v41 = vld [vmem:[#allocation9 + $0x478] sm:$0xf0]  ;;  %v7742_v40 = vor.u32 %v9172_v33, %v7739_v34  ;;  %v9316_v60 = vld [vmem:[#allocation9 + $0x6ec] sm:$0xf]  ;;  %v9326_v33 = vld [vmem:[#allocation9 + $0x734] sm:$0xf0] }
 0x2cf   :  { %v8393_v54 = vld [vmem:[#allocation9 + $0x788] sm:$0xf]  ;;  %v7947_v52 = vld [vmem:[#allocation9 + $0x418] sm:$0xf0] }
 0x2d0   :  { %5165 = vmatpush.bf16.msra.mxu1 %v7630_v51  ;;  %v7787_v51 = vld [vmem:[#allocation9 + $0x2d8] sm:$0xf0] }
 0x2d1   :  { %v7790_v3 = vor.u32 %v9184_v56, %v7787_v51  ;;  %5131 = vmatmul.bf16.vlgmr.msrb.gmra.mxu2 %v9954_v30  ;;  %5090 = vmatpush.bf16.msrb.mxu0 %v7834_v7  ;;  %v9268_v56 = vld [vmem:[#allocation9 + $0x56c] sm:$0xf]  ;;  %v3550_v51 = vperm.slane %v9969_v47, 1  ;;  %v7963_v47 = vld [vmem:[#allocation9 + $0x438] sm:$0xf0] }
 0x2d2   :  { %5153 = vmatpush.bf16.msrb.mxu3 %v7486_v29  ;;  %v9248_v29 = vld [vmem:[#allocation9 + $0x4cc] sm:$0xf]  ;;  %5175 = vmatpush.bf16.msra.mxu2 %v7806_v43 }
 0x2d3   :  { %v8046_v61 = vor.u32 %v9248_v29, %v8043_v57  ;;  %v9168_v43 = vld [vmem:[#allocation9 + $0x24c] sm:$0xf]  ;;  %v8126_v57 = vor.u32 %v9268_v56, %v8123_v18 }
 0x2d4   :  { %5166 = vmatpush.bf16.msra.mxu1 %v7614_v6  ;;  %v9350_v6 = vld [vmem:[#allocation9 + $0x7f4] sm:$0xf0]  ;;  %v7726_v29 = vor.u32 %v9168_v43, %v7723_v1  ;;  %v9220_v18 = vld [vmem:[#allocation9 + $0x3ec] sm:$0xf] }
 0x2d5   :  { %v8442_v15 = vor.u32 %v9350_v6, %v8441_v5  ;;  %5091 = vmatpush.bf16.msrb.mxu0 %v7818_v11  ;;  %v7707_v5 = vld [vmem:[#allocation9 + $0x238] sm:$0xf0]  ;;  %v9264_v6 = vld [vmem:[#allocation9 + $0x54c] sm:$0xf]  ;;  %v9322_v1 = vld [vmem:[#allocation9 + $0x714] sm:$0xf0] }
 0x2d6   :  { %5154 = vmatpush.bf16.msrb.mxu3 %v7470_v36  ;;  %v8171_v36 = vld [vmem:[#allocation9 + $0x5d8] sm:$0xf0]  ;;  %5176 = vmatpush.bf16.msra.mxu2 %v7790_v3  ;;  %v7710_v11 = vor.u32 %v9164_v2, %v7707_v5  ;;  %v8110_v48 = vor.u32 %v9264_v6, %v8107_v12  ;;  %v9216_v2 = vld [vmem:[#allocation9 + $0x3cc] sm:$0xf] }
 0x2d7   :  { %v8174_v20 = vor.u32 %v9280_v38, %v8171_v36  ;;  %v8361_v36 = vld [vmem:[#allocation9 + $0x748] sm:$0xf]  ;;  %v8267_v5 = vld [vmem:[#allocation9 + $0x698] sm:$0xf0]  ;;  %v9360_v12 = vld [vmem:[#allocation12 + $0x44] sm:$0xf0] }
 0x2d8   :  { %5167 = vmatpush.bf16.msra.mxu1 %v7598_v27  ;;  %v7755_v27 = vld [vmem:[#allocation9 + $0x298] sm:$0xf0]  ;;  %5092 = vmatmul.bf16.vlgmr.msrb.gmra.mxu0 %v9915_v37 }
 0x2d9   :  { %5136 = vmatpush.bf16.msra.mxu0 %v8442_v15  ;;  %v7758_v21 = vor.u32 %v9176_v22, %v7755_v27  ;;  %v9160_v15 = vld [vmem:[#allocation9 + $0x20c] sm:$0xf]  ;;  %v8091_v22 = vld [vmem:[#allocation9 + $0x538] sm:$0xf0] }
 0x2da   :  { %5155 = vmatpush.bf16.msrb.mxu3 %v7454_v35  ;;  %v8011_v35 = vld [vmem:[#allocation9 + $0x498] sm:$0xf0]  ;;  %5177 = vmatpush.bf16.msra.mxu2 %v7774_v16 }
 0x2db   :  { %v8014_v10 = vor.u32 %v9240_v32, %v8011_v35  ;;  %v7691_v16 = vld [vmem:[#allocation9 + $0x218] sm:$0xf0]  ;;  %v8362_v35 = vor.u32 %v9330_v14, %v8361_v36 }
 0x2dc   :  { %5168 = vmatpush.bf16.msra.mxu1 %v7582_v19  ;;  %v8410_v19 = vor.u32 %v9342_v46, %v8409_v63  ;;  %v8315_v32 = vld [vmem:[#allocation9 + $0x6f8] sm:$0xf0]  ;;  %v8345_v46 = vld [vmem:[#allocation9 + $0x728] sm:$0xf] }
 0x2dd   :  { %v8318_v39 = vor.u32 %v9316_v60, %v8315_v32  ;;  %v9382_v36 = vld [vmem:[#allocation12 + $0xf4] sm:$0xf0]  ;;  %v9296_v60 = vld [vmem:[#allocation9 + $0x64c] sm:$0xf] }
 0x2de   :  { %5156 = vmatpush.bf16.msrb.mxu3 %v7438_v42  ;;  %5178 = vmatpush.bf16.msra.mxu2 %v7758_v21  ;;  %v9338_v42 = vld [vmem:[#allocation9 + $0x794] sm:$0xf0]  ;;  %v9366_v21 = vld [vmem:[#allocation12 + $0x74] sm:$0xf0] }
 0x2df   :  { %v8394_v7 = vor.u32 %v9338_v42, %v8393_v54  ;;  %v8497_v54 = vld [vmem:[#allocation12 + $0x60] sm:$0xf]  ;;  %v9364_v42 = vld [vmem:[#allocation12 + $0x64] sm:$0xf0]  ;;  %v8235_v32 = vld [vmem:[#allocation9 + $0x658] sm:$0xf0] }
 0x2e0   :  { %5169 = vmatpush.bf16.msra.mxu1 %v7566_v59  ;;  %v8377_v59 = vld [vmem:[#allocation9 + $0x768] sm:$0xf] }
 0x2e1   :  { %5157 = vmatmul.bf16.vlgmr.msrb.gmra.mxu3 %v9901_v13  ;;  %v8426_v13 = vor.u32 %v9346_v23, %v8425_v50  ;;  %v8378_v38 = vor.u32 %v9334_v62, %v8377_v59  ;;  %v7966_v50 = vor.u32 %v9228_v9, %v7963_v47  ;;  %v9260_v23 = vld [vmem:[#allocation9 + $0x52c] sm:$0xf]  ;;  %v7899_v47 = vld [vmem:[#allocation9 + $0x3b8] sm:$0xf0] }
 0x2e2   :  { %5201 = vmatpush.bf16.msra.mxu3 %v8062_v49  ;;  %v4963_v49 = vpop.f32.mrf.mxu1  ;;  %5179 = vmatpush.bf16.msra.mxu2 %v7742_v40  ;;  %v8094_v63 = vor.u32 %v9260_v23, %v8091_v22  ;;  %v9212_v9 = vld [vmem:[#allocation9 + $0x3ac] sm:$0xf] }
 0x2e3   :  { %5170 = vmatmul.bf16.vlgmr.msra.gmra.mxu1 %v9908_v58  ;;  %v9236_v58 = vld [vmem:[#allocation9 + $0x46c] sm:$0xf]  ;;  %5137 = vmatpush.bf16.msra.mxu0 %v8426_v13  ;;  %v8505_v13 = vld [vmem:[#allocation12 + $0x70] sm:$0xf] }
 0x2e4   :  { %5214 = vmatpush.bf16.msrb.mxu1 %v8190_v0  ;;  %v7998_v31 = vor.u32 %v9236_v58, %v7995_v41  ;;  %v4950_v3 = vpop.f32.mrf.mxu3  ;;  %v7982_v0 = vor.u32 %v9232_v53, %v7979_v55  ;;  %v8075_v58 = vld [vmem:[#allocation9 + $0x518] sm:$0xf0]  ;;  %v9312_v41 = vld [vmem:[#allocation9 + $0x6cc] sm:$0xf]  ;;  %v8506_v40 = vor.u32 %v9366_v21, %v8505_v13  ;;  %v8498_v55 = vor.u32 %v9364_v42, %v8497_v54  ;;  %v8457_v42 = vld [vmem:[#allocation12 + $0x10] sm:$0xf] }
 0x2e5   :  { %v8078_v43 = vor.u32 %v9256_v44, %v8075_v58  ;;  %v8283_v53 = vld [vmem:[#allocation9 + $0x6b8] sm:$0xf0]  ;;  %v9208_v23 = vld [vmem:[#allocation9 + $0x38c] sm:$0xf]  ;;  %v8553_v44 = vld [vmem:[#allocation12 + $0xd0] sm:$0xf] }
 0x2e6   :  { %5202 = vmatpush.bf16.msra.mxu3 %v8046_v61  ;;  %v4951_v61 = vadd.f32 %v4950_v3, %v3550_v51  ;;  %5180 = vmatpush.bf16.msra.mxu2 %v7726_v29  ;;  %v9308_v51 = vld [vmem:[#allocation9 + $0x6ac] sm:$0xf]  ;;  %v8489_v29 = vld [vmem:[#allocation12 + $0x50] sm:$0xf]  ;;  %v7915_v3 = vld [vmem:[#allocation9 + $0x3d8] sm:$0xf0] }
 0x2e7   :  { %5138 = vmatpush.bf16.msra.mxu0 %v8410_v19  ;;  %v8299_v19 = vld [vmem:[#allocation9 + $0x6d8] sm:$0xf0]  ;;  %v8286_v62 = vor.u32 %v9308_v51, %v8283_v53  ;;  %v9376_v51 = vld [vmem:[#allocation12 + $0xc4] sm:$0xf0] }
 0x2e8   :  { %5215 = vmatpush.bf16.msrb.mxu1 %v8174_v20  ;;  %v9987_v20 = vadd.f32 %v4963_v49, %v4951_v61  ;;  %v8302_v56 = vor.u32 %v9312_v41, %v8299_v19  ;;  %v7931_v49 = vld [vmem:[#allocation9 + $0x3f8] sm:$0xf0]  ;;  %v7918_v61 = vor.u32 %v9216_v2, %v7915_v3  ;;  %v9292_v19 = vld [vmem:[#allocation9 + $0x62c] sm:$0xf] }
 0x2e9   :  { %v7934_v59 = vor.u32 %v9220_v18, %v7931_v49  ;;  %v9378_v58 = vld [vmem:[#allocation12 + $0xd4] sm:$0xf0]  ;;  %v8545_v49 = vld [vmem:[#allocation12 + $0xc0] sm:$0xf]  ;;  %v9288_v53 = vld [vmem:[#allocation9 + $0x60c] sm:$0xf] }
 0x2ea   :  { %5203 = vmatpush.bf16.msra.mxu3 %v8030_v24  ;;  %v9224_v24 = vld [vmem:[#allocation9 + $0x40c] sm:$0xf]  ;;  %v4965_v27 = vpop.f32.mrf.mxu1  ;;  %5181 = vmatpush.bf16.msra.mxu2 %v7710_v11  ;;  %v8554_v54 = vor.u32 %v9378_v58, %v8553_v44  ;;  %v7851_v18 = vld [vmem:[#allocation9 + $0x358] sm:$0xf0]  ;;  %v9359_v44 = vld [vmem:[#allocation12 + $0x44] sm:$0xf] }
 0x2eb   :  { %5139 = vmatpush.bf16.msra.mxu0 %v8394_v7  ;;  %v7950_v34 = vor.u32 %v9224_v24, %v7947_v52  ;;  %v9300_v11 = vld [vmem:[#allocation9 + $0x66c] sm:$0xf]  ;;  %v7883_v24 = vld [vmem:[#allocation9 + $0x398] sm:$0xf0]  ;;  %v8561_v27 = vld [vmem:[#allocation12 + $0xe0] sm:$0xf] }
 0x2ec   :  { %5216 = vmatpush.bf16.msrb.mxu1 %v8158_v4  ;;  %v7694_v4 = vor.u32 %v9160_v15, %v7691_v16  ;;  %v8473_v16 = vld [vmem:[#allocation12 + $0x30] sm:$0xf]  ;;  %v9380_v52 = vld [vmem:[#allocation12 + $0xe4] sm:$0xf0]  ;;  %v8483_v58 = vld [vmem:[#allocation12 + $0x48] sm:$0xf0] }
 0x2ed   :  { %v8562_v13 = vor.u32 %v9380_v52, %v8561_v27  ;;  %v9352_v2 = vld [vmem:[#allocation12 + $0x4] sm:$0xf0] }
 0x2ee   :  { %5204 = vmatpush.bf16.msra.mxu3 %v8014_v10  ;;  %v4952_v10 = vpop.f32.mrf.mxu3  ;;  %5182 = vmatpush.bf16.msra.mxu2 %v7694_v4 }
 0x2ef   :  { %5140 = vmatpush.bf16.msra.mxu0 %v8378_v38  ;;  %v8569_v38 = vld [vmem:[#allocation12 + $0xf0] sm:$0xf]  ;;  %v9204_v10 = vld [vmem:[#allocation9 + $0x36c] sm:$0xf] }
 0x2f0   :  { %5217 = vmatpush.bf16.msrb.mxu1 %v8142_v17  ;;  %v8346_v17 = vor.u32 %v9326_v33, %v8345_v46  ;;  %v8570_v15 = vor.u32 %v9382_v36, %v8569_v38  ;;  %v9356_v46 = vld [vmem:[#allocation12 + $0x24] sm:$0xf0]  ;;  %v7886_v33 = vor.u32 %v9208_v23, %v7883_v24 }
 0x2f1   :  { %5183 = vmatmul.bf16.vlgmr.msra.gmra.mxu2 %v9910_v25  ;;  %v8481_v25 = vld [vmem:[#allocation12 + $0x40] sm:$0xf]  ;;  %v9348_v23 = vld [vmem:[#allocation9 + $0x7ec] sm:$0xf] }
 0x2f2   :  { %5205 = vmatpush.bf16.msra.mxu3 %v7998_v31  ;;  %v8329_v31 = vld [vmem:[#allocation9 + $0x708] sm:$0xf]  ;;  %5227 = vmatpush.bf16.msrb.mxu2 %v8318_v39  ;;  %v8482_v14 = vor.u32 %v9360_v12, %v8481_v25  ;;  %v7867_v39 = vld [vmem:[#allocation9 + $0x378] sm:$0xf0] }
 0x2f3   :  { %5141 = vmatpush.bf16.msra.mxu0 %v8362_v35  ;;  %v8330_v7 = vor.u32 %v9322_v1, %v8329_v31  ;;  %v9993_v21 = vpop.f32.mrf.mxu2  ;;  %v7870_v31 = vor.u32 %v9204_v10, %v7867_v39  ;;  %v9200_v1 = vld [vmem:[#allocation9 + $0x34c] sm:$0xf]  ;;  %v7835_v12 = vld [vmem:[#allocation9 + $0x338] sm:$0xf0] }
 0x2f4   :  { %5218 = vmatpush.bf16.msrb.mxu1 %v8126_v57  ;;  %v9362_v57 = vld [vmem:[#allocation12 + $0x54] sm:$0xf0]  ;;  %v7854_v3 = vor.u32 %v9200_v1, %v7851_v18 }
 0x2f5   :  { %v8490_v6 = vor.u32 %v9362_v57, %v8489_v29  ;;  %v8546_v29 = vor.u32 %v9376_v51, %v8545_v49  ;;  %v8427_v10 = vld [vmem:[#allocation9 + $0x7d8] sm:$0xf0]  ;;  %v9357_v49 = vld [vmem:[#allocation12 + $0x34] sm:$0xf]  ;;  %v8475_v51 = vld [vmem:[#allocation12 + $0x38] sm:$0xf0] }
 0x2f6   :  { %5206 = vmatpush.bf16.msra.mxu3 %v7982_v0  ;;  %5228 = vmatpush.bf16.msrb.mxu2 %v8302_v56  ;;  %v9304_v0 = vld [vmem:[#allocation9 + $0x68c] sm:$0xf] }
 0x2f7   :  { %5142 = vmatpush.bf16.msra.mxu0 %v8346_v17 }
 0x2f8   :  { %5219 = vmatpush.bf16.msrb.mxu1 %v8110_v48  ;;  %v8251_v48 = vld [vmem:[#allocation9 + $0x678] sm:$0xf0] }
 0x2f9   :  { %v8254_v22 = vor.u32 %v9300_v11, %v8251_v48  ;;  %v9192_v48 = vld [vmem:[#allocation9 + $0x30c] sm:$0xf] }
 0x2fa   :  { %5207 = vmatpush.bf16.msra.mxu3 %v7966_v50  ;;  %5229 = vmatpush.bf16.msrb.mxu2 %v8286_v62  ;;  %v7902_v50 = vor.u32 %v9212_v9, %v7899_v47  ;;  %v8449_v62 = vld [vmem:[#allocation12] sm:$0xf]  ;;  %v9374_v9 = vld [vmem:[#allocation12 + $0xb4] sm:$0xf0] }
 0x2fb   :  { %5143 = vmatpush.bf16.msra.mxu0 %v8330_v7  ;;  %v4926_v57 = vpop.f32.mrf.mxu2  ;;  %v8450_v47 = vor.u32 %v9352_v2, %v8449_v62  ;;  %v4925_v2 = vadd.f32 %v9993_v21, %v9980_v45 }
 0x2fc   :  { %5220 = vmatpush.bf16.msrb.mxu1 %v8094_v63  ;;  %v8465_v63 = vld [vmem:[#allocation12 + $0x20] sm:$0xf]  ;;  %v8563_v57 = vld [vmem:[#allocation12 + $0xe8] sm:$0xf0] }
 0x2fd   :  { %v8466_v17 = vor.u32 %v9356_v46, %v8465_v63  ;;  %v8521_v63 = vld [vmem:[#allocation12 + $0x90] sm:$0xf]  ;;  %v9370_v46 = vld [vmem:[#allocation12 + $0x94] sm:$0xf0] }
 0x2fe   :  { %5208 = vmatpush.bf16.msra.mxu3 %v7950_v34  ;;  %5144 = vmatmul.bf16.vlgmr.msra.gmra.mxu0 %v9965_v26  ;;  %v8238_v34 = vor.u32 %v9296_v60, %v8235_v32  ;;  %v9361_v32 = vld [vmem:[#allocation12 + $0x54] sm:$0xf] }
 0x2ff   :  { %5188 = vmatpush.bf16.msrb.mxu0 %v7934_v59 }
 0x300   :  { %5221 = vmatpush.bf16.msrb.mxu1 %v8078_v43  ;;  %v9995_v4 = vpop.f32.mrf.mxu1  ;;  %v9354_v43 = vld [vmem:[#allocation12 + $0x14] sm:$0xf0] }
 0x301   :  { %5209 = vmatmul.bf16.vlgmr.msra.gmra.mxu3 %v9926_v8  ;;  %v8270_v8 = vor.u32 %v9304_v0, %v8267_v5  ;;  %v8458_v7 = vor.u32 %v9354_v43, %v8457_v42  ;;  %v9196_v0 = vld [vmem:[#allocation9 + $0x32c] sm:$0xf]  ;;  %v9365_v5 = vld [vmem:[#allocation12 + $0x74] sm:$0xf] }
 0x302   :  { %5655 = vmatpush.bf16.msrb.mxu3 %v8506_v40  ;;  %v8219_v40 = vld [vmem:[#allocation9 + $0x638] sm:$0xf0]  ;;  %v7838_v11 = vor.u32 %v9196_v0, %v7835_v12  ;;  %v9381_v43 = vld [vmem:[#allocation12 + $0xf4] sm:$0xf]  ;;  %v9355_v0 = vld [vmem:[#allocation12 + $0x24] sm:$0xf] }
 0x303   :  { %5222 = vmatmul.bf16.vlgmr.msrb.gmra.mxu1 %v9929_v28  ;;  %v9358_v28 = vld [vmem:[#allocation12 + $0x34] sm:$0xf0]  ;;  %5189 = vmatpush.bf16.msrb.mxu0 %v7918_v61  ;;  %v8222_v56 = vor.u32 %v9292_v19, %v8219_v40  ;;  %v8537_v61 = vld [vmem:[#allocation12 + $0xb0] sm:$0xf]  ;;  %v9999_v27 = vpop.f32.mrf.mxu2  ;;  %v9340_v40 = vld [vmem:[#allocation9 + $0x7ac] sm:$0xf] }
 0x304   :  { %5668 = vmatpush.bf16.msra.mxu1 %v8570_v15  ;;  %5230 = vmatpush.bf16.msrb.mxu2 %v8270_v8  ;;  %v8474_v35 = vor.u32 %v9358_v28, %v8473_v16  ;;  %v9997_v41 = vpop.f32.mrf.mxu3  ;;  %v8538_v38 = vor.u32 %v9374_v9, %v8537_v61  ;;  %v8499_v15 = vld [vmem:[#allocation12 + $0x68] sm:$0xf0]  ;;  %v7819_v16 = vld [vmem:[#allocation9 + $0x318] sm:$0xf0]  ;;  %v8529_v28 = vld [vmem:[#allocation12 + $0xa0] sm:$0xf] }
 0x305   :  { %v7822_v60 = vor.u32 %v9192_v48, %v7819_v16  ;;  %v9332_v61 = vld [vmem:[#allocation9 + $0x76c] sm:$0xf]  ;;  %v8459_v16 = vld [vmem:[#allocation12 + $0x18] sm:$0xf0] }
 0x306   :  { %5656 = vmatpush.bf16.msrb.mxu3 %v8498_v55  ;;  %v8203_v55 = vld [vmem:[#allocation9 + $0x618] sm:$0xf0] }
 0x307   :  { %5190 = vmatpush.bf16.msrb.mxu0 %v7902_v50  ;;  %v8206_v25 = vor.u32 %v9288_v53, %v8203_v55  ;;  %v9372_v50 = vld [vmem:[#allocation12 + $0xa4] sm:$0xf0] }
 0x308   :  { %5669 = vmatpush.bf16.msra.mxu1 %v8562_v13  ;;  %5231 = vmatpush.bf16.msrb.mxu2 %v8254_v22  ;;  %v5017_v59 = vpop.f32.mrf.mxu1  ;;  %v8443_v22 = vld [vmem:[#allocation9 + $0x7f8] sm:$0xf0]  ;;  %v8530_v24 = vor.u32 %v9372_v50, %v8529_v28  ;;  %v9336_v55 = vld [vmem:[#allocation9 + $0x78c] sm:$0xf] }
 0x309   :  { %v8446_v13 = vor.u32 %v9348_v23, %v8443_v22  ;;  %v8478_v59 = vor.u32 %v9357_v49, %v8475_v51  ;;  %v9328_v50 = vld [vmem:[#allocation9 + $0x74c] sm:$0xf]  ;;  %v8363_v22 = vld [vmem:[#allocation9 + $0x758] sm:$0xf0] }
 0x30a   :  { %5657 = vmatpush.bf16.msrb.mxu3 %v8490_v6  ;;  %v8507_v6 = vld [vmem:[#allocation12 + $0x78] sm:$0xf0]  ;;  %v9320_v49 = vld [vmem:[#allocation9 + $0x70c] sm:$0xf]  ;;  %v8331_v51 = vld [vmem:[#allocation9 + $0x718] sm:$0xf0] }
 0x30b   :  { %5191 = vmatpush.bf16.msrb.mxu0 %v7886_v33  ;;  %v8510_v36 = vor.u32 %v9365_v5, %v8507_v6  ;;  %v9344_v33 = vld [vmem:[#allocation9 + $0x7cc] sm:$0xf]  ;;  %v4978_v1 = vpop.f32.mrf.mxu2  ;;  %v8467_v5 = vld [vmem:[#allocation12 + $0x28] sm:$0xf0] }
 0x30c   :  { %5670 = vmatpush.bf16.msra.mxu1 %v8554_v54  ;;  %5232 = vmatpush.bf16.msrb.mxu2 %v8238_v34  ;;  %v5004_v8 = vpop.f32.mrf.mxu3  ;;  %v8522_v34 = vor.u32 %v9370_v46, %v8521_v63  ;;  %v8430_v19 = vor.u32 %v9344_v33, %v8427_v10  ;;  %v8411_v54 = vld [vmem:[#allocation9 + $0x7b8] sm:$0xf0]  ;;  %v8470_v45 = vor.u32 %v9355_v0, %v8467_v5  ;;  %v9351_v63 = vld [vmem:[#allocation12 + $0x4] sm:$0xf]  ;;  %v8451_v46 = vld [vmem:[#allocation12 + $0x8] sm:$0xf0] }
 0x30d   :  { %v8414_v53 = vor.u32 %v9340_v40, %v8411_v54  ;;  %v8379_v8 = vld [vmem:[#allocation9 + $0x778] sm:$0xf0] }
 0x30e   :  { %5658 = vmatpush.bf16.msrb.mxu3 %v8482_v14  ;;  %v9363_v14 = vld [vmem:[#allocation12 + $0x64] sm:$0xf]  ;;  %v8382_v28 = vor.u32 %v9332_v61, %v8379_v8  ;;  %v9398_v1 = vld [vmem:[#allocation12 + $0x174] sm:$0xf0]  ;;  %v9396_v61 = vld [vmem:[#allocation12 + $0x164] sm:$0xf0] }
 0x30f   :  { %5192 = vmatpush.bf16.msrb.mxu0 %v7870_v31  ;;  %v8502_v52 = vor.u32 %v9363_v14, %v8499_v15  ;;  %v8571_v31 = vld [vmem:[#allocation12 + $0xf8] sm:$0xf0]  ;;  %v9353_v15 = vld [vmem:[#allocation12 + $0x14] sm:$0xf]  ;;  %v8617_v8 = vld [vmem:[#allocation12 + $0x150] sm:$0xf] }
 0x310   :  { %5671 = vmatpush.bf16.msra.mxu1 %v8546_v29  ;;  %5233 = vmatpush.bf16.msrb.mxu2 %v8222_v56  ;;  %v8486_v56 = vor.u32 %v9359_v44, %v8483_v58  ;;  %v8574_v18 = vor.u32 %v9381_v43, %v8571_v31  ;;  %v9379_v29 = vld [vmem:[#allocation12 + $0xe4] sm:$0xf]  ;;  %v8347_v44 = vld [vmem:[#allocation9 + $0x738] sm:$0xf0]  ;;  %v9373_v58 = vld [vmem:[#allocation12 + $0xb4] sm:$0xf] }
 0x311   :  { %v8566_v62 = vor.u32 %v9379_v29, %v8563_v57  ;;  %v8531_v43 = vld [vmem:[#allocation12 + $0xa8] sm:$0xf0]  ;;  %v8633_v31 = vld [vmem:[#allocation12 + $0x170] sm:$0xf]  ;;  %v8334_v57 = vor.u32 %v9320_v49, %v8331_v51 }
 0x312   :  { %5659 = vmatpush.bf16.msrb.mxu3 %v8474_v35  ;;  %v8491_v35 = vld [vmem:[#allocation12 + $0x58] sm:$0xf0] }
 0x313   :  { %5193 = vmatpush.bf16.msrb.mxu0 %v7854_v3  ;;  %v8494_v39 = vor.u32 %v9361_v32, %v8491_v35  ;;  %v8462_v32 = vor.u32 %v9353_v15, %v8459_v16 }
 0x314   :  { %5672 = vmatpush.bf16.msra.mxu1 %v8538_v38  ;;  %5234 = vmatpush.bf16.msrb.mxu2 %v8206_v25  ;;  %v8555_v38 = vld [vmem:[#allocation12 + $0xd8] sm:$0xf0] }
 0x315   :  { %v4937_v25 = vpop.f32.mrf.mxu0 }
 0x316   :  { %5660 = vmatpush.bf16.msrb.mxu3 %v8466_v17  ;;  %v9368_v17 = vld [vmem:[#allocation12 + $0x84] sm:$0xf0]  ;;  %v4938_v9 = vadd.f32 %v4937_v25, %v4925_v2  ;;  %v9367_v2 = vld [vmem:[#allocation12 + $0x84] sm:$0xf] }
 0x317   :  { %5235 = vmatmul.bf16.vlgmr.msrb.gmra.mxu2 %v9954_v30  ;;  %5194 = vmatpush.bf16.msrb.mxu0 %v7838_v11  ;;  %v8513_v30 = vld [vmem:[#allocation12 + $0x80] sm:$0xf] }
 0x318   :  { %5673 = vmatpush.bf16.msra.mxu1 %v8530_v24  ;;  %v8514_v42 = vor.u32 %v9368_v17, %v8513_v30  ;;  %v5253_v48 = vmul.f32 0.2, %v4938_v9  ;;  %v8454_v17 = vor.u32 %v9351_v63, %v8451_v46  ;;  %v8585_v46 = vld [vmem:[#allocation12 + $0x110] sm:$0xf] }
 0x31a   :  { %5661 = vmatpush.bf16.msrb.mxu3 %v8458_v7  ;;  %v8395_v7 = vld [vmem:[#allocation9 + $0x798] sm:$0xf0]  ;;  %v5257_v23 = vmax.f32 %v4938_v9, %v5253_v48  ;;  %v8609_v48 = vld [vmem:[#allocation12 + $0x140] sm:$0xf] }
 0x31b   :  { %5195 = vmatpush.bf16.msrb.mxu0 %v7822_v60  ;;  %v8398_v12 = vor.u32 %v9336_v55, %v8395_v7  ;;  %v8547_v60 = vld [vmem:[#allocation12 + $0xc8] sm:$0xf0]  ;;  %v9369_v55 = vld [vmem:[#allocation12 + $0x94] sm:$0xf]  ;;  %v8523_v7 = vld [vmem:[#allocation12 + $0x98] sm:$0xf0] }
 0x31c   :  { %5674 = vmatpush.bf16.msra.mxu1 %v8522_v34  ;;  %v8366_v34 = vor.u32 %v9328_v50, %v8363_v22  ;;  %v8601_v50 = vld [vmem:[#allocation12 + $0x130] sm:$0xf]  ;;  %v8593_v22 = vld [vmem:[#allocation12 + $0x120] sm:$0xf] }
 0x31d   :  { %v4939_v10 = vpop.f32.mrf.mxu0 }
 0x31e   :  { %5662 = vmatpush.bf16.msrb.mxu3 %v8450_v47  ;;  %5196 = vmatmul.bf16.vlgmr.msrb.gmra.mxu0 %v9915_v37  ;;  %v10005_v37 = vld [vmem:[#allocation11] sm:$0xf]  ;;  %v9377_v47 = vld [vmem:[#allocation12 + $0xd4] sm:$0xf] }
 0x31f   :  { %5240 = vmatpush.bf16.msra.mxu0 %v8446_v13  ;;  %v3551_v3 = vperm.slane %v10005_v37, 2  ;;  %v8558_v21 = vor.u32 %v9377_v47, %v8555_v38  ;;  %v5261_v13 = vpack.c.bf16 %v5257_v23, %v5257_v23  ;;  %v9394_v47 = vld [vmem:[#allocation12 + $0x154] sm:$0xf0] }
 0x320   :  { %5675 = vmatpush.bf16.msra.mxu1 %v8514_v42  ;;  %v5067_v6 = vpop.f32.mrf.mxu1  ;;  %v9371_v42 = vld [vmem:[#allocation12 + $0xa4] sm:$0xf]  ;;  %v8618_v38 = vor.u32 %v9394_v47, %v8617_v8  ;;  %v9390_v23 = vld [vmem:[#allocation12 + $0x134] sm:$0xf0]  ;;  %v8587_v8 = vld [vmem:[#allocation12 + $0x118] sm:$0xf0] }
 0x321   :  { %5663 = vmatmul.bf16.vlgmr.msrb.gmra.mxu3 %v5261_v13 }
 0x322   :  { %5707 = vmatpush.bf16.msra.mxu3 %v8510_v36  ;;  %v10008_v36 = vpop.f32.mrf.mxu2 }
 0x323   :  { %5241 = vmatpush.bf16.msra.mxu0 %v8430_v19  ;;  %v8539_v19 = vld [vmem:[#allocation12 + $0xb8] sm:$0xf0] }
 0x324   :  { %5720 = vmatpush.bf16.msrb.mxu1 %v8574_v18  ;;  %v5054_v11 = vpop.f32.mrf.mxu3  ;;  %v8542_v54 = vor.u32 %v9373_v58, %v8539_v19  ;;  %v8634_v18 = vor.u32 %v9398_v1, %v8633_v31  ;;  %v8635_v58 = vld [vmem:[#allocation12 + $0x178] sm:$0xf0]  ;;  %v9393_v31 = vld [vmem:[#allocation12 + $0x154] sm:$0xf] }
 0x325   :  { %v5055_v14 = vadd.f32 %v5054_v11, %v3551_v3  ;;  %v4989_v29 = vpop.f32.mrf.mxu0  ;;  %v8515_v3 = vld [vmem:[#allocation12 + $0x88] sm:$0xf0]  ;;  %v8619_v1 = vld [vmem:[#allocation12 + $0x158] sm:$0xf0] }
 0x326   :  { %5708 = vmatpush.bf16.msra.mxu3 %v8502_v52  ;;  %v9375_v52 = vld [vmem:[#allocation12 + $0xc4] sm:$0xf]  ;;  %5681 = vmatpush.bf16.msra.mxu2 %v8634_v18  ;;  %v8518_v5 = vor.u32 %v9367_v2, %v8515_v3  ;;  %v8603_v2 = vld [vmem:[#allocation12 + $0x138] sm:$0xf0] }
 0x327   :  { %5242 = vmatpush.bf16.msra.mxu0 %v8414_v53  ;;  %v10010_v24 = vadd.f32 %v5067_v6, %v5055_v14  ;;  %v8550_v35 = vor.u32 %v9375_v52, %v8547_v60  ;;  %v8534_v53 = vor.u32 %v9371_v42, %v8531_v43  ;;  %v9392_v14 = vld [vmem:[#allocation12 + $0x144] sm:$0xf0]  ;;  %v8602_v52 = vor.u32 %v9390_v23, %v8601_v50 }
 0x328   :  { %5721 = vmatpush.bf16.msrb.mxu1 %v8566_v62  ;;  %v5069_v33 = vpop.f32.mrf.mxu1  ;;  %v8526_v62 = vor.u32 %v9369_v55, %v8523_v7  ;;  %v8610_v15 = vor.u32 %v9392_v14, %v8609_v48  ;;  %v9388_v60 = vld [vmem:[#allocation12 + $0x124] sm:$0xf0]  ;;  %v3552_v43 = vperm.slane %v10005_v37, 3  ;;  %v9391_v55 = vld [vmem:[#allocation12 + $0x144] sm:$0xf] }
 0x329   :  { %v8594_v63 = vor.u32 %v9388_v60, %v8593_v22  ;;  %v9386_v33 = vld [vmem:[#allocation12 + $0x114] sm:$0xf0]  ;;  %v8611_v7 = vld [vmem:[#allocation12 + $0x148] sm:$0xf0]  ;;  %v8681_v22 = vld [vmem:[#allocation12 + $0x1d0] sm:$0xf] }
 0x32a   :  { %5709 = vmatpush.bf16.msra.mxu3 %v8494_v39  ;;  %v9324_v39 = vld [vmem:[#allocation9 + $0x72c] sm:$0xf]  ;;  %v5030_v40 = vpop.f32.mrf.mxu2  ;;  %v8586_v10 = vor.u32 %v9386_v33, %v8585_v46  ;;  %v8595_v37 = vld [vmem:[#allocation12 + $0x128] sm:$0xf0] }
 0x32b   :  { %5243 = vmatpush.bf16.msra.mxu0 %v8398_v12  ;;  %v8625_v12 = vld [vmem:[#allocation12 + $0x160] sm:$0xf] }
 0x32c   :  { %5722 = vmatpush.bf16.msrb.mxu1 %v8558_v21  ;;  %v5056_v30 = vpop.f32.mrf.mxu3  ;;  %v8626_v9 = vor.u32 %v9396_v61, %v8625_v12  ;;  %v8697_v61 = vld [vmem:[#allocation12 + $0x1f0] sm:$0xf] }
 0x32d   :  { %v4991_v25 = vpop.f32.mrf.mxu0  ;;  %v9395_v30 = vld [vmem:[#allocation12 + $0x164] sm:$0xf] }
 0x32e   :  { %5710 = vmatpush.bf16.msra.mxu3 %v8486_v56  ;;  %v8350_v56 = vor.u32 %v9324_v39, %v8347_v44  ;;  %5682 = vmatpush.bf16.msra.mxu2 %v8626_v9  ;;  %v9384_v39 = vld [vmem:[#allocation12 + $0x104] sm:$0xf0]  ;;  %v9397_v44 = vld [vmem:[#allocation12 + $0x174] sm:$0xf]  ;;  %v9414_v9 = vld [vmem:[#allocation12 + $0x1f4] sm:$0xf0] }
 0x32f   :  { %5244 = vmatpush.bf16.msra.mxu0 %v8382_v28  ;;  %v8638_v40 = vor.u32 %v9397_v44, %v8635_v58  ;;  %v8698_v47 = vor.u32 %v9414_v9, %v8697_v61  ;;  %v9404_v58 = vld [vmem:[#allocation12 + $0x1a4] sm:$0xf0]  ;;  %v9403_v9 = vld [vmem:[#allocation12 + $0x1a4] sm:$0xf] }
 0x330   :  { %5723 = vmatpush.bf16.msrb.mxu1 %v8550_v35 }
 0x332   :  { %5711 = vmatpush.bf16.msra.mxu3 %v8478_v59  ;;  %v4977_v59 = vadd.f32 %v9999_v27, %v9987_v20  ;;  %5683 = vmatpush.bf16.msra.mxu2 %v8618_v38 }
 0x333   :  { %5245 = vmatpush.bf16.msra.mxu0 %v8366_v34  ;;  %v8577_v34 = vld [vmem:[#allocation12 + $0x100] sm:$0xf] }
 0x334   :  { %5724 = vmatpush.bf16.msrb.mxu1 %v8542_v54  ;;  %v4990_v0 = vadd.f32 %v4989_v29, %v4977_v59  ;;  %v10019_v11 = vpop.f32.mrf.mxu2  ;;  %v8578_v19 = vor.u32 %v9384_v39, %v8577_v34  ;;  %v8614_v29 = vor.u32 %v9391_v55, %v8611_v7  ;;  %v9406_v34 = vld [vmem:[#allocation12 + $0x1b4] sm:$0xf0]  ;;  %v8657_v39 = vld [vmem:[#allocation12 + $0x1a0] sm:$0xf]  ;;  %v9411_v55 = vld [vmem:[#allocation12 + $0x1e4] sm:$0xf] }
 0x335   :  { %v8691_v7 = vld [vmem:[#allocation12 + $0x1e8] sm:$0xf0] }
 0x336   :  { %5712 = vmatpush.bf16.msra.mxu3 %v8470_v45  ;;  %v5003_v6 = vadd.f32 %v9997_v41, %v4990_v0  ;;  %5684 = vmatpush.bf16.msra.mxu2 %v8610_v15  ;;  %v9387_v0 = vld [vmem:[#allocation12 + $0x124] sm:$0xf] }
 0x337   :  { %5246 = vmatpush.bf16.msra.mxu0 %v8350_v56  ;;  %v8622_v56 = vor.u32 %v9393_v31, %v8619_v1  ;;  %v8598_v12 = vor.u32 %v9387_v0, %v8595_v37  ;;  %v8641_v1 = vld [vmem:[#allocation12 + $0x180] sm:$0xf]  ;;  %v9407_v37 = vld [vmem:[#allocation12 + $0x1c4] sm:$0xf] }
 0x338   :  { %5725 = vmatpush.bf16.msrb.mxu1 %v8534_v53  ;;  %v5016_v20 = vadd.f32 %v9995_v4, %v5003_v6 }
 0x33a   :  { %5713 = vmatpush.bf16.msra.mxu3 %v8462_v32  ;;  %v5029_v41 = vadd.f32 %v10008_v36, %v5016_v20  ;;  %5685 = vmatpush.bf16.msra.mxu2 %v8602_v52  ;;  %v9385_v20 = vld [vmem:[#allocation12 + $0x114] sm:$0xf]  ;;  %v9410_v52 = vld [vmem:[#allocation12 + $0x1d4] sm:$0xf0] }
 0x33b   :  { %5247 = vmatpush.bf16.msra.mxu0 %v8334_v57  ;;  %v8590_v38 = vor.u32 %v9385_v20, %v8587_v8  ;;  %v8682_v60 = vor.u32 %v9410_v52, %v8681_v22  ;;  %v8659_v20 = vld [vmem:[#allocation12 + $0x1a8] sm:$0xf0] }
 0x33c   :  { %5726 = vmatpush.bf16.msrb.mxu1 %v8526_v62  ;;  %v5082_v35 = vpop.f32.mrf.mxu2  ;;  %v9389_v62 = vld [vmem:[#allocation12 + $0x134] sm:$0xf] }
 0x33d   :  { %v8606_v3 = vor.u32 %v9389_v62, %v8603_v2  ;;  %v8683_v62 = vld [vmem:[#allocation12 + $0x1d8] sm:$0xf0] }
 0x33e   :  { %5714 = vmatpush.bf16.msra.mxu3 %v8454_v17  ;;  %5248 = vmatmul.bf16.vlgmr.msra.gmra.mxu0 %v9965_v26  ;;  %v5041_v26 = vpop.f32.mrf.mxu0  ;;  %v8627_v17 = vld [vmem:[#allocation12 + $0x168] sm:$0xf0] }
 0x33f   :  { %v5042_v21 = vadd.f32 %v5041_v26, %v5029_v41  ;;  %5686 = vmatpush.bf16.msra.mxu2 %v8594_v63  ;;  %v8630_v54 = vor.u32 %v9395_v30, %v8627_v17  ;;  %5694 = vmatpush.bf16.msrb.mxu0 %v8698_v47  ;;  %v9383_v41 = vld [vmem:[#allocation12 + $0x104] sm:$0xf]  ;;  %v8579_v26 = vld [vmem:[#allocation12 + $0x108] sm:$0xf0] }
 0x340   :  { %5727 = vmatpush.bf16.msrb.mxu1 %v8518_v5  ;;  %v10017_v27 = vpop.f32.mrf.mxu1  ;;  %v8582_v14 = vor.u32 %v9383_v41, %v8579_v26  ;;  %v9401_v41 = vld [vmem:[#allocation12 + $0x194] sm:$0xf]  ;;  %v8651_v26 = vld [vmem:[#allocation12 + $0x198] sm:$0xf0] }
 0x341   :  { %5715 = vmatmul.bf16.vlgmr.msra.gmra.mxu3 %v5261_v13  ;;  %v5254_v16 = vmul.f32 0.2, %v5042_v21 }
 0x343   :  { %v5258_v4 = vmax.f32 %v5042_v21, %v5254_v16  ;;  %5687 = vmatpush.bf16.msra.mxu2 %v8586_v10  ;;  %v5081_v21 = vadd.f32 %v10019_v11, %v10010_v24  ;;  %v8689_v16 = vld [vmem:[#allocation12 + $0x1e0] sm:$0xf]  ;;  %v8665_v10 = vld [vmem:[#allocation12 + $0x1b0] sm:$0xf] }
 0x344   :  { %v10022_v45 = vpop.f32.mrf.mxu3  ;;  %v8666_v44 = vor.u32 %v9406_v34, %v8665_v10 }
 0x345   :  { %v5262_v32 = vpack.c.bf16 %v5258_v4, %v5258_v4  ;;  %v9412_v4 = vld [vmem:[#allocation12 + $0x1e4] sm:$0xf0] }
 0x346   :  { %v5043_v13 = vpop.f32.mrf.mxu0 }
 0x347   :  { %5676 = vmatmul.bf16.vlgmr.msra.gmra.mxu1 %v5262_v32  ;;  %5688 = vmatpush.bf16.msra.mxu2 %v8578_v19  ;;  %v9408_v13 = vld [vmem:[#allocation12 + $0x1c4] sm:$0xf0] }
 0x348   :  { %v5121_v28 = vpop.f32.mrf.mxu1 }
 0x349   :  { %v8690_v28 = vor.u32 %v9412_v4, %v8689_v16  ;;  %v8643_v16 = vld [vmem:[#allocation12 + $0x188] sm:$0xf0] }
 0x34b   :  { %5733 = vmatpush.bf16.msrb.mxu2 %v8638_v40  ;;  %5695 = vmatpush.bf16.msrb.mxu0 %v8690_v28 }
 0x34c   :  { %v5108_v36 = vpop.f32.mrf.mxu3 }
 0x34d   :  { %v8673_v36 = vld [vmem:[#allocation12 + $0x1c0] sm:$0xf] }
 0x34e   :  { %v8674_v63 = vor.u32 %v9408_v13, %v8673_v36 }
 0x34f   :  { %5734 = vmatpush.bf16.msrb.mxu2 %v8630_v54  ;;  %5696 = vmatpush.bf16.msrb.mxu0 %v8682_v60  ;;  %v8658_v54 = vor.u32 %v9404_v58, %v8657_v39 }
 0x353   :  { %5735 = vmatpush.bf16.msrb.mxu2 %v8622_v56  ;;  %5697 = vmatpush.bf16.msrb.mxu0 %v8674_v63  ;;  %v9400_v56 = vld [vmem:[#allocation12 + $0x184] sm:$0xf0]  ;;  %v5329_v63 = vld [vmem:[#allocation14] sm:$0x3] }
 0x354   :  { %v5132_v18 = vpop.f32.mrf.mxu2  ;;  %v5332_v39 = vperm.slane %v5329_v63, 1 }
 0x355   :  { %v5093_v51 = vpop.f32.mrf.mxu0 }
 0x356   :  { %v5094_v48 = vadd.f32 %v5093_v51, %v5081_v21  ;;  %v8699_v51 = vld [vmem:[#allocation12 + $0x1f8] sm:$0xf0] }
 0x357   :  { %5728 = vmatmul.bf16.vlgmr.msrb.gmra.mxu1 %v5262_v32  ;;  %5736 = vmatpush.bf16.msrb.mxu2 %v8614_v29  ;;  %v8694_v29 = vor.u32 %v9411_v55, %v8691_v7 }
 0x358   :  { %v5107_v15 = vadd.f32 %v10022_v45, %v5094_v48  ;;  %5698 = vmatpush.bf16.msrb.mxu0 %v8666_v44  ;;  %v8654_v48 = vor.u32 %v9401_v41, %v8651_v26 }
 0x35a   :  { %v5120_v50 = vadd.f32 %v10017_v27, %v5107_v15  ;;  %v9399_v15 = vld [vmem:[#allocation12 + $0x184] sm:$0xf] }
 0x35b   :  { %5737 = vmatpush.bf16.msrb.mxu2 %v8606_v3  ;;  %v8646_v4 = vor.u32 %v9399_v15, %v8643_v16 }
 0x35c   :  { %v5134_v5 = vpop.f32.mrf.mxu2  ;;  %v5133_v24 = vadd.f32 %v5132_v18, %v5120_v50  ;;  %5699 = vmatpush.bf16.msrb.mxu0 %v8658_v54  ;;  %v8642_v18 = vor.u32 %v9400_v56, %v8641_v1  ;;  %v5766_v1 = vld [vmem:[#allocation2] sm:$0x1] }
 0x35d   :  { %v5095_v25 = vpop.f32.mrf.mxu0  ;;  %v8675_v5 = vld [vmem:[#allocation12 + $0x1c8] sm:$0xf0] }
 0x35e   :  { %v9405_v25 = vld [vmem:[#allocation12 + $0x1b4] sm:$0xf] }
 0x35f   :  { %5738 = vmatpush.bf16.msrb.mxu2 %v8598_v12  ;;  %v8667_v12 = vld [vmem:[#allocation12 + $0x1b8] sm:$0xf0] }
 0x360   :  { %v5171_v42 = vpop.f32.mrf.mxu1  ;;  %v8670_v61 = vor.u32 %v9405_v25, %v8667_v12 }
 0x363   :  { %5739 = vmatpush.bf16.msrb.mxu2 %v8590_v38  ;;  %v8662_v38 = vor.u32 %v9403_v9, %v8659_v20 }
 0x364   :  { %v5158_v49 = vpop.f32.mrf.mxu3 }
 0x365   :  { %v5159_v53 = vadd.f32 %v5158_v49, %v3552_v43  ;;  %v9402_v43 = vld [vmem:[#allocation12 + $0x194] sm:$0xf0]  ;;  %v9413_v49 = vld [vmem:[#allocation12 + $0x1f4] sm:$0xf] }
 0x367   :  { %v10025_v57 = vadd.f32 %v5171_v42, %v5159_v53  ;;  %5740 = vmatpush.bf16.msrb.mxu2 %v8582_v14  ;;  %v8649_v42 = vld [vmem:[#allocation12 + $0x190] sm:$0xf]  ;;  %v8702_v53 = vor.u32 %v9413_v49, %v8699_v51 }
 0x368   :  { %v5173_v59 = vpop.f32.mrf.mxu1  ;;  %v8650_v31 = vor.u32 %v9402_v43, %v8649_v42  ;;  %v5763_v42 = vld [vmem:[#allocation15] sm:$0x3] }
 0x369   :  { %v9409_v59 = vld [vmem:[#allocation12 + $0x1d4] sm:$0xf]  ;;  %5774 = vst [vmem:[#allocation1] ss:$9 sm:$0xff] %v5763_v42 }
 0x36a   :  { %5700 = vmatpush.bf16.msrb.mxu0 %v8650_v31  ;;  %v8686_v2 = vor.u32 %v9409_v59, %v8683_v62 }
 0x36c   :  { %v5160_v6 = vpop.f32.mrf.mxu3 }
 0x36d   :  { %v8678_v6 = vor.u32 %v9407_v37, %v8675_v5 }
 0x36e   :  { %5701 = vmatpush.bf16.msrb.mxu0 %v8642_v18  ;;  %v9681_v18 = vmov 0  }
 0x36f   :  { %9431 = vset.pattern.permute.xlu0 %v9681_v18 }
 0x370   :  { %5769 = vperm.xlu0 %9431, %v5766_v1   ;;  %v5775_v7 = vld [vmem:[#allocation1] sm:$0xff]  ;;  %v5776_v5 = vld [vmem:[#allocation1 + $0x9] sm:$0xff] }
 0x372   :  { %5746 = vmatpush.bf16.msra.mxu0 %v8702_v53 }
 0x374   :  { %v10033_v32 = vpop.f32.mrf.mxu2 }
 0x375   :  { %v5185_v21 = vadd.f32 %v10033_v32, %v10025_v57 }
 0x376   :  { %5747 = vmatpush.bf16.msra.mxu0 %v8694_v29 }
 0x37a   :  { %5748 = vmatpush.bf16.msra.mxu0 %v8686_v2 }
 0x37b   :  { %v5145_v35 = vpop.f32.mrf.mxu0 }
 0x37c   :  { %v5146_v45 = vadd.f32 %v5145_v35, %v5133_v24  ;;  %v5186_v40 = vpop.f32.mrf.mxu2 }
 0x37e   :  { %v5255_v46 = vmul.f32 0.2, %v5146_v45  ;;  %5749 = vmatpush.bf16.msra.mxu0 %v8678_v6 }
 0x380   :  { %v10031_v23 = vpop.f32.mrf.mxu1  ;;  %v5259_v27 = vmax.f32 %v5146_v45, %v5255_v46  ;;  %v5331_v46 = vperm.slane %v5329_v63, 0 }
 0x382   :  { %v5263_v19 = vpack.c.bf16 %v5259_v27, %v5259_v27  ;;  %5750 = vmatpush.bf16.msra.mxu0 %v8670_v61 }
 0x383   :  { %v5147_v17 = vpop.f32.mrf.mxu0 }
 0x384   :  { %v10035_v11 = vpop.f32.mrf.mxu3  ;;  %5689 = vmatmul.bf16.vlgmr.msra.gmra.mxu2 %v5263_v19 }
 0x386   :  { %5751 = vmatpush.bf16.msra.mxu0 %v8662_v38 }
 0x388   :  { %v5225_v33 = vpop.f32.mrf.mxu1 }
 0x38a   :  { %5752 = vmatpush.bf16.msra.mxu0 %v8654_v48 }
 0x38c   :  { %v5212_v30 = vpop.f32.mrf.mxu3 }
 0x38e   :  { %5753 = vmatpush.bf16.msra.mxu0 %v8646_v4 }
 0x394   :  { %5741 = vmatmul.bf16.vlgmr.msrb.gmra.mxu2 %v5263_v19 }
 0x39a   :  { %v5236_v3 = vpop.f32.mrf.mxu2 }
 0x39b   :  { %v5197_v0 = vpop.f32.mrf.mxu0 }
 0x39c   :  { %v5198_v14 = vadd.f32 %v5197_v0, %v5185_v21 }
 0x39e   :  { %v5211_v28 = vadd.f32 %v10035_v11, %v5198_v14 }
 0x3a0   :  { %v5224_v22 = vadd.f32 %v10031_v23, %v5211_v28 }
 0x3a2   :  { %v5238_v8 = vpop.f32.mrf.mxu2  ;;  %v5237_v52 = vadd.f32 %v5236_v3, %v5224_v22 }
 0x3a3   :  { %v5199_v47 = vpop.f32.mrf.mxu0 }
 0x3a4   :  { %v5664_v50 = vpop.f32.mrf.mxu3 }
 0x3a5   :  { %v5665_v33 = vadd.f32 %v5664_v50, %v5331_v46 }
 0x3ac   :  { %v5666_v24 = vpop.f32.mrf.mxu3 }
 0x3bb   :  { %v5249_v60 = vpop.f32.mrf.mxu0 }
 0x3bc   :  { %v5250_v35 = vadd.f32 %v5249_v60, %v5237_v52 }
 0x3be   :  { %v5256_v45 = vmul.f32 0.2, %v5250_v35 }
 0x3c0   :  { %v5260_v36 = vmax.f32 %v5250_v35, %v5256_v45 }
 0x3c2   :  { %v5264_v13 = vpack.c.bf16 %v5260_v36, %v5260_v36 }
 0x3c3   :  { %v5251_v57 = vpop.f32.mrf.mxu0 }
 0x3c4   :  { %v5716_v32 = vpop.f32.mrf.mxu3  ;;  %5702 = vmatmul.bf16.vlgmr.msrb.gmra.mxu0 %v5264_v13  ;;  %v5677_v10 = vpop.f32.mrf.mxu1 }
 0x3c5   :  { %v5678_v11 = vadd.f32 %v5677_v10, %v5665_v33  ;;  %v5717_v23 = vadd.f32 %v5716_v32, %v5332_v39 }
 0x3cc   :  { %v5718_v27 = vpop.f32.mrf.mxu3  ;;  %v5679_v34 = vpop.f32.mrf.mxu1 }
 0x3d4   :  { %5754 = vmatmul.bf16.vlgmr.msra.gmra.mxu0 %v5264_v13  ;;  %v5729_v44 = vpop.f32.mrf.mxu1 }
 0x3d5   :  { %v5730_v58 = vadd.f32 %v5729_v44, %v5717_v23 }
 0x3dc   :  { %v5731_v19 = vpop.f32.mrf.mxu1 }
 0x3e2   :  { %v5770_v6 = vpop.permute.xlu0 %5769 }
 0x3e3   :  { %v5772_v12 = vperm.slane %v5770_v6, 0 }
 0x407   :  { %v5690_v40 = vpop.f32.mrf.mxu2 }
 0x408   :  { %v5691_v43 = vadd.f32 %v5690_v40, %v5678_v11 }
 0x40f   :  { %v5692_v30 = vpop.f32.mrf.mxu2 }
 0x417   :  { %v5742_v17 = vpop.f32.mrf.mxu2 }
 0x418   :  { %v5743_v29 = vadd.f32 %v5742_v17, %v5730_v58 }
 0x41f   :  { %v5744_v54 = vpop.f32.mrf.mxu2 }
 0x441   :  { %v5703_v31 = vpop.f32.mrf.mxu0 }
 0x442   :  { %v5704_v56 = vadd.f32 %v5703_v31, %v5691_v43 }
 0x444   :  { %v5759_v49 = vmul.f32 0.2, %v5704_v56 }
 0x446   :  { %v5761_v51 = vmax.f32 %v5704_v56, %v5759_v49 }
 0x448   :  { %v5764_v53 = vpack.c.bf16 %v5761_v51, %v5761_v51 }
 0x449   :  { %v5705_v55 = vpop.f32.mrf.mxu0 }
 0x44a   :  { %5786 = vmatpush.bf16.xpose.msrb.mxu3 %v5764_v53 }
 0x451   :  { %v5755_v59 = vpop.f32.mrf.mxu0  ;;  %5787 = vmatmul.bf16.vlgmr.msrb.gmra.mxu3 %v5775_v7 }
 0x452   :  { %v5756_v62 = vadd.f32 %v5755_v59, %v5743_v29 }
 0x454   :  { %v5760_v2 = vmul.f32 0.2, %v5756_v62 }
 0x456   :  { %v5762_v3 = vmax.f32 %v5756_v62, %v5760_v2 }
 0x458   :  { %v5765_v0 = vpack.c.bf16 %v5762_v3, %v5762_v3 }
 0x459   :  { %v5757_v37 = vpop.f32.mrf.mxu0 }
 0x45a   :  { %5799 = vmatpush.bf16.xpose.msra.mxu1 %v5765_v0 }
 0x461   :  { %5800 = vmatmul.bf16.vlgmr.msra.gmra.mxu1 %v5776_v5 }
 0x4d4   :  { %v5788_v25 = vpop.f32.mrf.mxu3 }
 0x4d5   :  { %v5789_v61 = vadd.f32 %v5788_v25, %v5772_v12 }
 0x4dc   :  { %v5790_v9 = vpop.f32.mrf.mxu3 }
 0x4de   :  { %v5801_v20 = vpop.f32.mrf.mxu1 }
 0x4df   :  { %v5802_v8 = vadd.f32 %v5801_v20, %v5789_v61 }
 0x4e1   :  { %v5805_v47 = vsub.f32 0.0, %v5802_v8 }
 0x4e3   :  { %v5806_v38 = vmul.f32 1.442695, %v5805_v47 }
 0x4e5   :  { %9432 = vpow2.f32 %v5806_v38 }
 0x4e6   :  { %v5803_v41 = vpop.f32.mrf.mxu1 }
 0x4eb   :  { %v9433_v26 = vpop.eup %9432 }
 0x4ec   :  { %v5808_v21 = vadd.f32 1.0, %v9433_v26 }
 0x4ee   :  { %9434 = vrcp.f32 %v5808_v21  ;;  %v5820_v16 = vand.u32 2147483648, %v5808_v21  ;;  %v5818_v28 = vand.u32 2147483647, %v5808_v21  ;;  %vm5814_vm2 = vweird.f32 %v5808_v21 }
 0x4f0   :  { %v5821_v22 = vor.u32 1.1754944e-38, %v5820_v16  ;;  %vm5819_vm5 = vcmp.eq.f32.partialorder %v5818_v28, 8.507059e+37 }
 0x4f4   :  { %v9435_v48 = vpop.eup %9434 }
 0x4f5   :  { %v5810_v14 = vmul.f32 %v9435_v48, %v5808_v21  ;;  %vm5815_vm1 = vweird.f32 %v9435_v48 }
 0x4f6   :  { %vm5816_vm3 = vmor %vm5814_vm2, %vm5815_vm1 }
 0x4f7   :  { %v5811_v15 = vsub.f32 1.0, %v5810_v14 }
 0x4f9   :  { %v5812_v4 = vmul.f32 %v9435_v48, %v5811_v15 }
 0x4fb   :  { %v5813_v50 = vadd.f32 %v9435_v48, %v5812_v4 }
 0x4fd   :  { %v5817_v52 = vsel %vm5816_vm3, %v9435_v48, %v5813_v50 }
 0x4fe   :  { %v5822_v60 = vsel %vm5819_vm5, %v5821_v22, %v5817_v52 }
 0x4ff   :  { %5825 = vst.msk [vmem:[#allocation17] sm:$0x1] %vm5824_vm4, %v5822_v60 }
 0x500   :  { %5836 = dma.vmem_to_hbm [thread:$0]  %s5832_s7, 16, %s5834_s3, [#allocation5]  }
 0x501   :  { %9665 = dma.done.wait [#allocation5], 16  }
 0x502   :  { %9666 = vsyncadd [#allocation5], 4294967280 }
 0x503   :  { %5841 = vsyncpa [#allocation4], 1 }
 0x504   :  { %5842 = vsyncpa [#allocation7], 1 }
 0x505   :  { %5843 = vsyncpa [#allocation10], 1 }
 0x506   :  { %5844 = vsyncpa [#allocation13], 1 }
 0x507   :  { %5845 = vsyncpa [#allocation16], 1 }
 0x508   :  { %5846 = vsyncpa [#allocation5], 1 }

</bundles_post_ra>
